<compile_context>
chip_gen: v7x
topology: tpu7x:2x2x1
jax: 0.10.0
libtpu: 0.0.40
codegen_flags: <defaults>
</compile_context>

<pallas_src>
import jax
import jax.numpy as jnp
from jax.experimental import pallas as pl
from jax.experimental.pallas import tpu as pltpu

NSAMPLE_LSE = 16        # LocalSpatialEncodingModule(nsample=16)
NSAMPLE_SA = 8          # neighbours per SA grouping (small synthetic shapes)
DESIRED_ROWS = 8192     # target rows (S*tp) fed to the MXU per grid step
DESIRED_TP_PW = 2048    # target row tile for point-wise MLP kernels


def _round_up(x, m):
    return ((x + m - 1) // m) * m


def _cdiv(a, b):
    return -(-a // b)


def _pick_tiling(p, desired):
    """Returns (row_tile, padded_rows, grid_steps).

    Single grid step when the whole (8-padded) extent fits the desired tile
    (extra steps only add per-step overhead on 1-TC chips); otherwise an EVEN
    number of steps so the parallel axis splits cleanly across v7x's 2 TCs.
    """
    p8 = _round_up(max(p, 1), 8)
    desired = max(8, (desired // 8) * 8)
    if p8 <= desired:
        return p8, p8, 1
    steps = _round_up(_cdiv(p8, desired), 2)
    tp = _round_up(_cdiv(p8, steps), 8)
    return tp, tp * steps, steps


def _vmem_limit(in_block_bytes, out_block_bytes, weight_bytes, scratch_bytes):
    """Scoped-VMEM request derived from real block sizes (double-buffered I/O
    + in-kernel intermediates + slack), clamped to stay inside v7x's VMEM."""
    working = 2 * (in_block_bytes + out_block_bytes + weight_bytes) + scratch_bytes
    return int(min(max(2 * working + (4 << 20), 16 << 20), 48 << 20))


# ----------------------------------------------------------------------------
# Pallas kernels
# ----------------------------------------------------------------------------
def _grouped_kernel(x_ref, w1_ref, b1_ref, w2_ref, b2_ref, o_ref):
    """2-layer shared MLP over a neighbour-major grouped block + max-pool.

    x_ref: (S, tp, Cin) bf16; o_ref: (tp, C2) bf16/f32.
    """
    s, tp, cin = x_ref.shape
    x = x_ref[...].reshape(s * tp, cin)                       # tile-aligned merge
    h = jnp.dot(x, w1_ref[...], preferred_element_type=jnp.float32) + b1_ref[...]
    h = jnp.maximum(h, 0.0)
    h = jnp.dot(h.astype(w2_ref.dtype), w2_ref[...],
                preferred_element_type=jnp.float32) + b2_ref[...]
    h = jnp.maximum(h, 0.0)
    c2 = h.shape[-1]
    # Neighbour-major pool: S-1 elementwise vmax over (tp, C2) slabs (VPU).
    o_ref[...] = jnp.max(h.reshape(s, tp, c2), axis=0).astype(o_ref.dtype)


def _make_pointwise_kernel(n_inputs, n_extra):
    """Fused point-wise MLP: relu(sum_i x_i @ w1_i + b1) then n_extra more
    relu(matmul+bias) layers, all in one kernel (no HBM intermediates)."""
    def kernel(*refs):
        ins = refs[:n_inputs]
        w1s = refs[n_inputs:2 * n_inputs]
        b1 = refs[2 * n_inputs]
        pos = 2 * n_inputs + 1
        h = b1[...]
        for x, w in zip(ins, w1s):                            # split-concat dots
            h = h + jnp.dot(x[...], w[...], preferred_element_type=jnp.float32)
        h = jnp.maximum(h, 0.0)
        for _ in range(n_extra):
            w, b = refs[pos], refs[pos + 1]
            pos += 2
            h = jnp.dot(h.astype(w.dtype), w[...],
                        preferred_element_type=jnp.float32) + b[...]
            h = jnp.maximum(h, 0.0)
        o_ref = refs[pos]
        o_ref[...] = h.astype(o_ref.dtype)
    return kernel


# ----------------------------------------------------------------------------
# Pallas wrappers
# ----------------------------------------------------------------------------
def grouped_mlp_max(x, w1, b1, w2, b2, out_dtype=jnp.bfloat16):
    """x: (B, S, P, Cin) bf16 neighbour-major grouped tensor -> (B, P, C2)."""
    B, S, P, Cin = x.shape
    C1, C2 = w1.shape[1], w2.shape[1]
    tp, Pp, steps = _pick_tiling(P, max(8, (DESIRED_ROWS // S) // 8 * 8))
    if Pp != P:
        x = jnp.pad(x, ((0, 0), (0, 0), (0, Pp - P), (0, 0)))

    out_bytes = jnp.dtype(out_dtype).itemsize
    in_block = S * tp * Cin * 2
    out_block = tp * C2 * out_bytes
    weight_bytes = (w1.size + w2.size) * 2 + (b1.size + b2.size) * 4
    scratch = S * tp * (C1 * 6 + C2 * 4) + tp * C2 * 4
    flops = 2 * B * S * Pp * (Cin * C1 + C1 * C2)
    bytes_accessed = B * (steps * (in_block + weight_bytes) + Pp * C2 * out_bytes)

    out = pl.pallas_call(
        _grouped_kernel,
        out_shape=jax.ShapeDtypeStruct((B, Pp, C2), out_dtype),
        grid=(B, steps),
        in_specs=[
            pl.BlockSpec((None, S, tp, Cin), lambda b, i: (b, 0, i, 0)),
            pl.BlockSpec(w1.shape, lambda b, i: (0, 0)),
            pl.BlockSpec(b1.shape, lambda b, i: (0, 0)),
            pl.BlockSpec(w2.shape, lambda b, i: (0, 0)),
            pl.BlockSpec(b2.shape, lambda b, i: (0, 0)),
        ],
        out_specs=pl.BlockSpec((None, tp, C2), lambda b, i: (b, i, 0)),
        compiler_params=pltpu.CompilerParams(
            dimension_semantics=("parallel", "parallel"),
            vmem_limit_bytes=_vmem_limit(in_block, out_block,
                                         weight_bytes, scratch)),
        cost_estimate=pl.CostEstimate(flops=int(flops), transcendentals=0,
                                      bytes_accessed=int(bytes_accessed)),
    )(x, w1, b1, w2, b2)
    return out[:, :P]


def pointwise_mlp(inputs, w1s, b1, extra, out_dtype=jnp.bfloat16):
    """inputs: list of (P, Ci) bf16 -> (P, Cout); `extra` = [(w, b), ...]."""
    P = inputs[0].shape[0]
    tp, Pp, steps = _pick_tiling(P, DESIRED_TP_PW)

    flat = []
    for x in inputs:
        if Pp != P:
            x = jnp.pad(x, ((0, Pp - P), (0, 0)))
        flat.append(x)

    n_in = len(flat)
    C1 = w1s[0].shape[1]
    Cout = extra[-1][0].shape[1] if extra else C1
    kernel = _make_pointwise_kernel(n_in, len(extra))

    args = [*flat, *w1s, b1]
    for (w, b) in extra:
        args += [w, b]

    in_specs = ([pl.BlockSpec((tp, f.shape[-1]), lambda i: (i, 0)) for f in flat]
                + [pl.BlockSpec(a.shape, lambda i: (0, 0))
                   for a in args[n_in:]])

    out_bytes = jnp.dtype(out_dtype).itemsize
    in_block = sum(tp * f.shape[-1] * 2 for f in flat)
    out_block = tp * Cout * out_bytes
    weight_bytes = ((sum(w.size for w in w1s)
                     + sum(w.size for w, _ in extra)) * 2
                    + (b1.size + sum(b.size for _, b in extra)) * 4)
    scratch = tp * (C1 * 6 + sum(w.shape[1] * 4 for w, _ in extra))
    flops = (2 * Pp * sum(w.shape[0] * w.shape[1] for w in w1s)
             + 2 * Pp * sum(w.shape[0] * w.shape[1] for w, _ in extra))
    bytes_accessed = steps * (in_block + weight_bytes) + Pp * Cout * out_bytes

    out = pl.pallas_call(
        kernel,
        out_shape=jax.ShapeDtypeStruct((Pp, Cout), out_dtype),
        grid=(steps,),
        in_specs=in_specs,
        out_specs=pl.BlockSpec((tp, Cout), lambda i: (i, 0)),
        compiler_params=pltpu.CompilerParams(
            dimension_semantics=("parallel",),
            vmem_limit_bytes=_vmem_limit(in_block, out_block,
                                         weight_bytes, scratch)),
        cost_estimate=pl.CostEstimate(flops=int(flops), transcendentals=0,
                                      bytes_accessed=int(bytes_accessed)),
    )(*args)
    return out[:P]


# ----------------------------------------------------------------------------
# Plain-JAX glue: sampling / grouping / interpolation (data-dependent gathers)
# ----------------------------------------------------------------------------
def pairwise_sqdist(a, b):
    # a: (B, N, 3), b: (B, M, 3) -> (B, N, M)
    return jnp.sum((a[:, :, None, :] - b[:, None, :, :]) ** 2, axis=-1)


def index_points(points, idx):
    # points: (B, Np, C), idx: (B, ...) int -> (B, ..., C)
    return jax.vmap(lambda p, i: p[i])(points, idx)


def farthest_point_sample_from_dist(d_all, npoint):
    """FPS using a precomputed (B, N, N) distance matrix (shared with kNN)."""
    B, N, _ = d_all.shape

    def body(i, state):
        idxs, dist, farthest = state
        idxs = idxs.at[:, i].set(farthest)
        d = jnp.take_along_axis(d_all, farthest[:, None, None], axis=1)[:, 0, :]
        dist = jnp.minimum(dist, d)
        farthest = jnp.argmax(dist, axis=-1).astype(jnp.int32)
        return idxs, dist, farthest

    init = (jnp.zeros((B, npoint), jnp.int32),
            jnp.full((B, N), 1e10, jnp.float32),
            jnp.zeros((B,), jnp.int32))
    idxs, _, _ = jax.lax.fori_loop(0, npoint, body, init)
    return idxs


# ----------------------------------------------------------------------------
# Module forwards
# ----------------------------------------------------------------------------
def lse_forward(xyz, p):
    """LocalSpatialEncodingModule: geometric encoding -> MLP[16,16] -> maxpool,
    concatenated with the z coordinate -> 17 feature channels (bf16)."""
    B, N, _ = xyz.shape
    d = pairwise_sqdist(xyz, xyz)
    _, idx = jax.lax.top_k(-d, NSAMPLE_LSE)                   # (B, N, K)
    idx_t = jnp.transpose(idx, (0, 2, 1))                     # neighbour-major
    nbr = index_points(xyz, idx_t)                            # (B, K, N, 3)
    center = xyz[:, None, :, :]                               # (B, 1, N, 3)
    rel = nbr - center
    dist = jnp.sqrt(jnp.sum(rel * rel, axis=-1, keepdims=True) + 1e-8)
    enc = jnp.concatenate(
        [jnp.broadcast_to(center, nbr.shape), nbr, rel, dist],
        axis=-1).astype(jnp.bfloat16)                         # (B, K, N, 10)
    pooled = grouped_mlp_max(enc, p["w1"], p["b1"], p["w2"], p["b2"],
                             out_dtype=jnp.bfloat16)          # (B, N, 16)
    return jnp.concatenate(
        [pooled, xyz[..., 2:3].astype(jnp.bfloat16)], axis=-1)  # (B, N, 17)


def sa_forward(xyz, feat, npoint, nsample, p):
    """MSNetSAModule: FPS sample -> kNN group -> shared MLP -> max-pool."""
    B, N, _ = xyz.shape
    d_all = pairwise_sqdist(xyz, xyz)                         # shared FPS + kNN
    fps_idx = farthest_point_sample_from_dist(d_all, npoint)  # (B, npoint)
    new_xyz = index_points(xyz, fps_idx)                      # (B, npoint, 3)
    d_q = index_points(d_all, fps_idx)                        # (B, npoint, N)
    _, idx = jax.lax.top_k(-d_q, nsample)                     # (B, npoint, K)
    idx_t = jnp.transpose(idx, (0, 2, 1))                     # (B, K, npoint)
    grouped_xyz = (index_points(xyz, idx_t)
                   - new_xyz[:, None, :, :]).astype(jnp.bfloat16)
    grouped_feat = index_points(feat, idx_t)                  # bf16 pre-gather
    grouped = jnp.concatenate([grouped_xyz, grouped_feat], axis=-1)
    new_feat = grouped_mlp_max(grouped, p["w1"], p["b1"], p["w2"], p["b2"],
                               out_dtype=jnp.bfloat16)        # (B, npoint, C2)
    return new_xyz, new_feat


def fp_forward(xyz1, xyz2, feat1, feat2, p, out_dtype=jnp.bfloat16):
    """MSNetFPModule: 3-NN inverse-distance interpolation + fused pointwise MLP."""
    B, N, _ = xyz1.shape
    d = pairwise_sqdist(xyz1, xyz2)                           # (B, N, M)
    negd, idx = jax.lax.top_k(-d, 3)
    d3 = jnp.maximum(-negd, 1e-10)
    w = 1.0 / d3
    w = w / jnp.sum(w, axis=-1, keepdims=True)
    nbr_feat = index_points(feat2, idx)                       # (B, N, 3, C2) bf16
    interp = jnp.sum(nbr_feat.astype(jnp.float32) * w[..., None],
                     axis=2).astype(jnp.bfloat16)             # (B, N, C2)
    out = pointwise_mlp(
        [interp.reshape(B * N, -1), feat1.reshape(B * N, -1)],
        p["w1s"], p["b1"], p["extra"], out_dtype=out_dtype)
    return out.reshape(B, N, -1)


def backbone_msnet_forward(xyz, params):
    B, N, _ = xyz.shape
    feat = lse_forward(xyz, params["lse"])                                       # 17
    l1_xyz, l1_f = sa_forward(xyz, feat, N // 2, NSAMPLE_SA, params["sa1"])      # 32
    l2_xyz, l2_f = sa_forward(l1_xyz, l1_f, N // 4, NSAMPLE_SA, params["sa2"])   # 64
    l3_xyz, l3_f = sa_forward(l2_xyz, l2_f, N // 8, NSAMPLE_SA, params["sa3"])   # 128
    l4_xyz, l4_f = sa_forward(l3_xyz, l3_f, N // 16, NSAMPLE_SA, params["sa4"])  # 256
    l3_f = fp_forward(l3_xyz, l4_xyz, l3_f, l4_f, params["fp4"])  # 256+128=384 -> 256
    l2_f = fp_forward(l2_xyz, l3_xyz, l2_f, l3_f, params["fp3"])  # 256+64 =320 -> 256
    l1_f = fp_forward(l1_xyz, l2_xyz, l1_f, l2_f, params["fp2"])  # 256+32 =288 -> 256
    l0_f = fp_forward(xyz, l1_xyz, feat, l1_f, params["fp1"],
                      out_dtype=jnp.float32)                      # 273 -> 256 -> 256
    return jnp.transpose(l0_f, (0, 2, 1))                         # (B, 256, N)


# ----------------------------------------------------------------------------
# Deterministic parameter init (weights bf16 for the MXU, biases f32)
# ----------------------------------------------------------------------------
def init_params(key):
    keys = iter(jax.random.split(key, 32))

    def w(cin, cout):
        return (0.1 * jax.random.normal(next(keys), (cin, cout),
                                        jnp.float32)).astype(jnp.bfloat16)

    def b(c):
        return jnp.zeros((1, c), jnp.float32)

    return {
        # merged layer-1 weights: rows = [xyz-relative(3) | features(Cin)]
        "lse": {"w1": w(10, 16), "b1": b(16), "w2": w(16, 16), "b2": b(16)},
        "sa1": {"w1": w(3 + 17, 32), "b1": b(32), "w2": w(32, 32), "b2": b(32)},
        "sa2": {"w1": w(3 + 32, 32), "b1": b(32), "w2": w(32, 64), "b2": b(64)},
        "sa3": {"w1": w(3 + 64, 64), "b1": b(64), "w2": w(64, 128), "b2": b(128)},
        "sa4": {"w1": w(3 + 128, 128), "b1": b(128),
                "w2": w(128, 256), "b2": b(256)},
        "fp4": {"w1s": [w(256, 256), w(128, 256)], "b1": b(256), "extra": []},
        "fp3": {"w1s": [w(256, 256), w(64, 256)], "b1": b(256), "extra": []},
        "fp2": {"w1s": [w(256, 256), w(32, 256)], "b1": b(256), "extra": []},
        "fp1": {"w1s": [w(256, 256), w(17, 256)], "b1": b(256),
                "extra": [(w(256, 256), b(256))]},
    }


if __name__ == "__main__":
    key = jax.random.PRNGKey(0)
    kx, kp = jax.random.split(key)
    B, N = 2, 64
    xyz = jax.random.uniform(kx, (B, N, 3), jnp.float32, minval=0.0, maxval=2.0)
    params = init_params(kp)

    out = jax.jit(backbone_msnet_forward)(xyz, params)
    out = jax.block_until_ready(out)

    assert out.shape == (B, 256, N), out.shape
    assert out.dtype == jnp.float32
    assert bool(jnp.all(jnp.isfinite(out)))
    print("KERNEL_OK")
</pallas_src>

<mosaic_0001>
module attributes {stable_mosaic.version = 11 : i64} {
  func.func @_grouped_kernel(%arg0: i32, %arg1: i32, %arg2: memref<1x16x64x10xbf16, #tpu.memory_space<vmem>>, %arg3: memref<10x16xbf16, #tpu.memory_space<vmem>>, %arg4: memref<1x16xf32, #tpu.memory_space<vmem>>, %arg5: memref<16x16xbf16, #tpu.memory_space<vmem>>, %arg6: memref<1x16xf32, #tpu.memory_space<vmem>>, %arg7: memref<1x64x16xbf16, #tpu.memory_space<vmem>>) attributes {dimension_semantics = [#tpu.dimension_semantics<parallel>, #tpu.dimension_semantics<parallel>], iteration_bounds = array<i64: 2, 1>, scalar_prefetch = 0 : i64, scratch_operands = 0 : i64, tpu.core_type = #tpu.core_type<tc>, window_params = [{transform_indices = @transform_0, window_bounds = array<i64: 1, 16, 64, 10>}, {pipeline_mode = #tpu.pipeline_mode<synchronous>, transform_indices = @transform_1, window_bounds = array<i64: 10, 16>}, {pipeline_mode = #tpu.pipeline_mode<synchronous>, transform_indices = @transform_2, window_bounds = array<i64: 1, 16>}, {pipeline_mode = #tpu.pipeline_mode<synchronous>, transform_indices = @transform_3, window_bounds = array<i64: 16, 16>}, {pipeline_mode = #tpu.pipeline_mode<synchronous>, transform_indices = @transform_4, window_bounds = array<i64: 1, 16>}, {transform_indices = @transform_5, window_bounds = array<i64: 1, 64, 16>}]} {
    %c0 = arith.constant 0 : index
    %c0_0 = arith.constant 0 : index
    %c0_1 = arith.constant 0 : index
    %c0_2 = arith.constant 0 : index
    %0 = vector.load %arg2[%c0, %c0_0, %c0_1, %c0_2] : memref<1x16x64x10xbf16, #tpu.memory_space<vmem>>, vector<1x16x64x10xbf16>
    %1 = vector.shape_cast %0 : vector<1x16x64x10xbf16> to vector<16x64x10xbf16>
    %2 = vector.shape_cast %1 : vector<16x64x10xbf16> to vector<1024x10xbf16>
    %c0_3 = arith.constant 0 : index
    %c0_4 = arith.constant 0 : index
    %3 = vector.load %arg3[%c0_3, %c0_4] : memref<10x16xbf16, #tpu.memory_space<vmem>>, vector<10x16xbf16>
    %cst = arith.constant dense<0.000000e+00> : vector<1024x16xf32>
    %4 = tpu.matmul %2, %3, %cst {dimension_numbers = #tpu.dot_dimension_numbers<[1], [0], [0], [1], [0, 0, 1, 1], [], []>} : vector<1024x10xbf16>, vector<10x16xbf16>, vector<1024x16xf32> -> vector<1024x16xf32>
    %c0_5 = arith.constant 0 : index
    %c0_6 = arith.constant 0 : index
    %5 = vector.load %arg4[%c0_5, %c0_6] : memref<1x16xf32, #tpu.memory_space<vmem>>, vector<1x16xf32>
    %6 = vector.broadcast %5 : vector<1x16xf32> to vector<1024x16xf32>
    %7 = arith.addf %4, %6 : vector<1024x16xf32>
    %cst_7 = arith.constant 0.000000e+00 : f32
    %8 = vector.broadcast %cst_7 : f32 to vector<1024x16xf32>
    %9 = arith.maximumf %7, %8 : vector<1024x16xf32>
    %10 = arith.truncf %9 : vector<1024x16xf32> to vector<1024x16xbf16>
    %c0_8 = arith.constant 0 : index
    %c0_9 = arith.constant 0 : index
    %11 = vector.load %arg5[%c0_8, %c0_9] : memref<16x16xbf16, #tpu.memory_space<vmem>>, vector<16x16xbf16>
    %cst_10 = arith.constant dense<0.000000e+00> : vector<1024x16xf32>
    %12 = tpu.matmul %10, %11, %cst_10 {dimension_numbers = #tpu.dot_dimension_numbers<[1], [0], [0], [1], [0, 0, 1, 1], [], []>} : vector<1024x16xbf16>, vector<16x16xbf16>, vector<1024x16xf32> -> vector<1024x16xf32>
    %c0_11 = arith.constant 0 : index
    %c0_12 = arith.constant 0 : index
    %13 = vector.load %arg6[%c0_11, %c0_12] : memref<1x16xf32, #tpu.memory_space<vmem>>, vector<1x16xf32>
    %14 = vector.broadcast %13 : vector<1x16xf32> to vector<1024x16xf32>
    %15 = arith.addf %12, %14 : vector<1024x16xf32>
    %cst_13 = arith.constant 0.000000e+00 : f32
    %16 = vector.broadcast %cst_13 : f32 to vector<1024x16xf32>
    %17 = arith.maximumf %15, %16 : vector<1024x16xf32>
    %18 = vector.shape_cast %17 : vector<1024x16xf32> to vector<16x64x16xf32>
    %cst_14 = arith.constant dense<0xFF800000> : vector<64x16xf32>
    %19 = vector.multi_reduction <maximumf>, %18, %cst_14 [0] : vector<16x64x16xf32> to vector<64x16xf32>
    %20 = arith.truncf %19 : vector<64x16xf32> to vector<64x16xbf16>
    %c0_15 = arith.constant 0 : index
    %c0_16 = arith.constant 0 : index
    %c0_17 = arith.constant 0 : index
    %21 = vector.load %arg7[%c0_15, %c0_16, %c0_17] : memref<1x64x16xbf16, #tpu.memory_space<vmem>>, vector<1x64x16xbf16>
    %22 = vector.shape_cast %21 : vector<1x64x16xbf16> to vector<64x16xbf16>
    %23 = vector.shape_cast %20 : vector<64x16xbf16> to vector<1x64x16xbf16>
    tpu.vector_store %arg7[%c0_15, %c0_16, %c0_17], %23 {strides = array<i32>} : memref<1x64x16xbf16, #tpu.memory_space<vmem>>, vector<1x64x16xbf16>,
    return
  }
  func.func @transform_0(%arg0: i32, %arg1: i32) -> (i32, i32, i32, i32) {
    %c0_i32 = arith.constant 0 : i32
    %c0_i32_0 = arith.constant 0 : i32
    %c0_i32_1 = arith.constant 0 : i32
    return %arg0, %c0_i32, %arg1, %c0_i32_0 : i32, i32, i32, i32
  }
  func.func @transform_1(%arg0: i32, %arg1: i32) -> (i32, i32) {
    %c0_i32 = arith.constant 0 : i32
    %c0_i32_0 = arith.constant 0 : i32
    %c0_i32_1 = arith.constant 0 : i32
    return %c0_i32, %c0_i32_0 : i32, i32
  }
  func.func @transform_2(%arg0: i32, %arg1: i32) -> (i32, i32) {
    %c0_i32 = arith.constant 0 : i32
    %c0_i32_0 = arith.constant 0 : i32
    %c0_i32_1 = arith.constant 0 : i32
    return %c0_i32, %c0_i32_0 : i32, i32
  }
  func.func @transform_3(%arg0: i32, %arg1: i32) -> (i32, i32) {
    %c0_i32 = arith.constant 0 : i32
    %c0_i32_0 = arith.constant 0 : i32
    %c0_i32_1 = arith.constant 0 : i32
    return %c0_i32, %c0_i32_0 : i32, i32
  }
  func.func @transform_4(%arg0: i32, %arg1: i32) -> (i32, i32) {
    %c0_i32 = arith.constant 0 : i32
    %c0_i32_0 = arith.constant 0 : i32
    %c0_i32_1 = arith.constant 0 : i32
    return %c0_i32, %c0_i32_0 : i32, i32
  }
  func.func @transform_5(%arg0: i32, %arg1: i32) -> (i32, i32, i32) {
    %c0_i32 = arith.constant 0 : i32
    %c0_i32_0 = arith.constant 0 : i32
    return %arg0, %arg1, %c0_i32 : i32, i32, i32
  }
}

module attributes {stable_mosaic.version = 11 : i64} {
  func.func @_grouped_kernel(%arg0: i32, %arg1: i32, %arg2: memref<1x8x32x20xbf16, #tpu.memory_space<vmem>>, %arg3: memref<20x32xbf16, #tpu.memory_space<vmem>>, %arg4: memref<1x32xf32, #tpu.memory_space<vmem>>, %arg5: memref<32x32xbf16, #tpu.memory_space<vmem>>, %arg6: memref<1x32xf32, #tpu.memory_space<vmem>>, %arg7: memref<1x32x32xbf16, #tpu.memory_space<vmem>>) attributes {dimension_semantics = [#tpu.dimension_semantics<parallel>, #tpu.dimension_semantics<parallel>], iteration_bounds = array<i64: 2, 1>, scalar_prefetch = 0 : i64, scratch_operands = 0 : i64, tpu.core_type = #tpu.core_type<tc>, window_params = [{transform_indices = @transform_0, window_bounds = array<i64: 1, 8, 32, 20>}, {pipeline_mode = #tpu.pipeline_mode<synchronous>, transform_indices = @transform_1, window_bounds = array<i64: 20, 32>}, {pipeline_mode = #tpu.pipeline_mode<synchronous>, transform_indices = @transform_2, window_bounds = array<i64: 1, 32>}, {pipeline_mode = #tpu.pipeline_mode<synchronous>, transform_indices = @transform_3, window_bounds = array<i64: 32, 32>}, {pipeline_mode = #tpu.pipeline_mode<synchronous>, transform_indices = @transform_4, window_bounds = array<i64: 1, 32>}, {transform_indices = @transform_5, window_bounds = array<i64: 1, 32, 32>}]} {
    %c0 = arith.constant 0 : index
    %c0_0 = arith.constant 0 : index
    %c0_1 = arith.constant 0 : index
    %c0_2 = arith.constant 0 : index
    %0 = vector.load %arg2[%c0, %c0_0, %c0_1, %c0_2] : memref<1x8x32x20xbf16, #tpu.memory_space<vmem>>, vector<1x8x32x20xbf16>
    %1 = vector.shape_cast %0 : vector<1x8x32x20xbf16> to vector<8x32x20xbf16>
    %2 = vector.shape_cast %1 : vector<8x32x20xbf16> to vector<256x20xbf16>
    %c0_3 = arith.constant 0 : index
    %c0_4 = arith.constant 0 : index
    %3 = vector.load %arg3[%c0_3, %c0_4] : memref<20x32xbf16, #tpu.memory_space<vmem>>, vector<20x32xbf16>
    %cst = arith.constant dense<0.000000e+00> : vector<256x32xf32>
    %4 = tpu.matmul %2, %3, %cst {dimension_numbers = #tpu.dot_dimension_numbers<[1], [0], [0], [1], [0, 0, 1, 1], [], []>} : vector<256x20xbf16>, vector<20x32xbf16>, vector<256x32xf32> -> vector<256x32xf32>
    %c0_5 = arith.constant 0 : index
    %c0_6 = arith.constant 0 : index
    %5 = vector.load %arg4[%c0_5, %c0_6] : memref<1x32xf32, #tpu.memory_space<vmem>>, vector<1x32xf32>
    %6 = vector.broadcast %5 : vector<1x32xf32> to vector<256x32xf32>
    %7 = arith.addf %4, %6 : vector<256x32xf32>
    %cst_7 = arith.constant 0.000000e+00 : f32
    %8 = vector.broadcast %cst_7 : f32 to vector<256x32xf32>
    %9 = arith.maximumf %7, %8 : vector<256x32xf32>
    %10 = arith.truncf %9 : vector<256x32xf32> to vector<256x32xbf16>
    %c0_8 = arith.constant 0 : index
    %c0_9 = arith.constant 0 : index
    %11 = vector.load %arg5[%c0_8, %c0_9] : memref<32x32xbf16, #tpu.memory_space<vmem>>, vector<32x32xbf16>
    %cst_10 = arith.constant dense<0.000000e+00> : vector<256x32xf32>
    %12 = tpu.matmul %10, %11, %cst_10 {dimension_numbers = #tpu.dot_dimension_numbers<[1], [0], [0], [1], [0, 0, 1, 1], [], []>} : vector<256x32xbf16>, vector<32x32xbf16>, vector<256x32xf32> -> vector<256x32xf32>
    %c0_11 = arith.constant 0 : index
    %c0_12 = arith.constant 0 : index
    %13 = vector.load %arg6[%c0_11, %c0_12] : memref<1x32xf32, #tpu.memory_space<vmem>>, vector<1x32xf32>
    %14 = vector.broadcast %13 : vector<1x32xf32> to vector<256x32xf32>
    %15 = arith.addf %12, %14 : vector<256x32xf32>
    %cst_13 = arith.constant 0.000000e+00 : f32
    %16 = vector.broadcast %cst_13 : f32 to vector<256x32xf32>
    %17 = arith.maximumf %15, %16 : vector<256x32xf32>
    %18 = vector.shape_cast %17 : vector<256x32xf32> to vector<8x32x32xf32>
    %cst_14 = arith.constant dense<0xFF800000> : vector<32x32xf32>
    %19 = vector.multi_reduction <maximumf>, %18, %cst_14 [0] : vector<8x32x32xf32> to vector<32x32xf32>
    %20 = arith.truncf %19 : vector<32x32xf32> to vector<32x32xbf16>
    %c0_15 = arith.constant 0 : index
    %c0_16 = arith.constant 0 : index
    %c0_17 = arith.constant 0 : index
    %21 = vector.load %arg7[%c0_15, %c0_16, %c0_17] : memref<1x32x32xbf16, #tpu.memory_space<vmem>>, vector<1x32x32xbf16>
    %22 = vector.shape_cast %21 : vector<1x32x32xbf16> to vector<32x32xbf16>
    %23 = vector.shape_cast %20 : vector<32x32xbf16> to vector<1x32x32xbf16>
    tpu.vector_store %arg7[%c0_15, %c0_16, %c0_17], %23 {strides = array<i32>} : memref<1x32x32xbf16, #tpu.memory_space<vmem>>, vector<1x32x32xbf16>,
    return
  }
  func.func @transform_0(%arg0: i32, %arg1: i32) -> (i32, i32, i32, i32) {
    %c0_i32 = arith.constant 0 : i32
    %c0_i32_0 = arith.constant 0 : i32
    %c0_i32_1 = arith.constant 0 : i32
    return %arg0, %c0_i32, %arg1, %c0_i32_0 : i32, i32, i32, i32
  }
  func.func @transform_1(%arg0: i32, %arg1: i32) -> (i32, i32) {
    %c0_i32 = arith.constant 0 : i32
    %c0_i32_0 = arith.constant 0 : i32
    %c0_i32_1 = arith.constant 0 : i32
    return %c0_i32, %c0_i32_0 : i32, i32
  }
  func.func @transform_2(%arg0: i32, %arg1: i32) -> (i32, i32) {
    %c0_i32 = arith.constant 0 : i32
    %c0_i32_0 = arith.constant 0 : i32
    %c0_i32_1 = arith.constant 0 : i32
    return %c0_i32, %c0_i32_0 : i32, i32
  }
  func.func @transform_3(%arg0: i32, %arg1: i32) -> (i32, i32) {
    %c0_i32 = arith.constant 0 : i32
    %c0_i32_0 = arith.constant 0 : i32
    %c0_i32_1 = arith.constant 0 : i32
    return %c0_i32, %c0_i32_0 : i32, i32
  }
  func.func @transform_4(%arg0: i32, %arg1: i32) -> (i32, i32) {
    %c0_i32 = arith.constant 0 : i32
    %c0_i32_0 = arith.constant 0 : i32
    %c0_i32_1 = arith.constant 0 : i32
    return %c0_i32, %c0_i32_0 : i32, i32
  }
  func.func @transform_5(%arg0: i32, %arg1: i32) -> (i32, i32, i32) {
    %c0_i32 = arith.constant 0 : i32
    %c0_i32_0 = arith.constant 0 : i32
    return %arg0, %arg1, %c0_i32 : i32, i32, i32
  }
}

module attributes {stable_mosaic.version = 11 : i64} {
  func.func @_grouped_kernel(%arg0: i32, %arg1: i32, %arg2: memref<1x8x16x35xbf16, #tpu.memory_space<vmem>>, %arg3: memref<35x32xbf16, #tpu.memory_space<vmem>>, %arg4: memref<1x32xf32, #tpu.memory_space<vmem>>, %arg5: memref<32x64xbf16, #tpu.memory_space<vmem>>, %arg6: memref<1x64xf32, #tpu.memory_space<vmem>>, %arg7: memref<1x16x64xbf16, #tpu.memory_space<vmem>>) attributes {dimension_semantics = [#tpu.dimension_semantics<parallel>, #tpu.dimension_semantics<parallel>], iteration_bounds = array<i64: 2, 1>, scalar_prefetch = 0 : i64, scratch_operands = 0 : i64, tpu.core_type = #tpu.core_type<tc>, window_params = [{transform_indices = @transform_0, window_bounds = array<i64: 1, 8, 16, 35>}, {pipeline_mode = #tpu.pipeline_mode<synchronous>, transform_indices = @transform_1, window_bounds = array<i64: 35, 32>}, {pipeline_mode = #tpu.pipeline_mode<synchronous>, transform_indices = @transform_2, window_bounds = array<i64: 1, 32>}, {pipeline_mode = #tpu.pipeline_mode<synchronous>, transform_indices = @transform_3, window_bounds = array<i64: 32, 64>}, {pipeline_mode = #tpu.pipeline_mode<synchronous>, transform_indices = @transform_4, window_bounds = array<i64: 1, 64>}, {transform_indices = @transform_5, window_bounds = array<i64: 1, 16, 64>}]} {
    %c0 = arith.constant 0 : index
    %c0_0 = arith.constant 0 : index
    %c0_1 = arith.constant 0 : index
    %c0_2 = arith.constant 0 : index
    %0 = vector.load %arg2[%c0, %c0_0, %c0_1, %c0_2] : memref<1x8x16x35xbf16, #tpu.memory_space<vmem>>, vector<1x8x16x35xbf16>
    %1 = vector.shape_cast %0 : vector<1x8x16x35xbf16> to vector<8x16x35xbf16>
    %2 = vector.shape_cast %1 : vector<8x16x35xbf16> to vector<128x35xbf16>
    %c0_3 = arith.constant 0 : index
    %c0_4 = arith.constant 0 : index
    %3 = vector.load %arg3[%c0_3, %c0_4] : memref<35x32xbf16, #tpu.memory_space<vmem>>, vector<35x32xbf16>
    %cst = arith.constant dense<0.000000e+00> : vector<128x32xf32>
    %4 = tpu.matmul %2, %3, %cst {dimension_numbers = #tpu.dot_dimension_numbers<[1], [0], [0], [1], [0, 0, 1, 1], [], []>} : vector<128x35xbf16>, vector<35x32xbf16>, vector<128x32xf32> -> vector<128x32xf32>
    %c0_5 = arith.constant 0 : index
    %c0_6 = arith.constant 0 : index
    %5 = vector.load %arg4[%c0_5, %c0_6] : memref<1x32xf32, #tpu.memory_space<vmem>>, vector<1x32xf32>
    %6 = vector.broadcast %5 : vector<1x32xf32> to vector<128x32xf32>
    %7 = arith.addf %4, %6 : vector<128x32xf32>
    %cst_7 = arith.constant 0.000000e+00 : f32
    %8 = vector.broadcast %cst_7 : f32 to vector<128x32xf32>
    %9 = arith.maximumf %7, %8 : vector<128x32xf32>
    %10 = arith.truncf %9 : vector<128x32xf32> to vector<128x32xbf16>
    %c0_8 = arith.constant 0 : index
    %c0_9 = arith.constant 0 : index
    %11 = vector.load %arg5[%c0_8, %c0_9] : memref<32x64xbf16, #tpu.memory_space<vmem>>, vector<32x64xbf16>
    %cst_10 = arith.constant dense<0.000000e+00> : vector<128x64xf32>
    %12 = tpu.matmul %10, %11, %cst_10 {dimension_numbers = #tpu.dot_dimension_numbers<[1], [0], [0], [1], [0, 0, 1, 1], [], []>} : vector<128x32xbf16>, vector<32x64xbf16>, vector<128x64xf32> -> vector<128x64xf32>
    %c0_11 = arith.constant 0 : index
    %c0_12 = arith.constant 0 : index
    %13 = vector.load %arg6[%c0_11, %c0_12] : memref<1x64xf32, #tpu.memory_space<vmem>>, vector<1x64xf32>
    %14 = vector.broadcast %13 : vector<1x64xf32> to vector<128x64xf32>
    %15 = arith.addf %12, %14 : vector<128x64xf32>
    %cst_13 = arith.constant 0.000000e+00 : f32
    %16 = vector.broadcast %cst_13 : f32 to vector<128x64xf32>
    %17 = arith.maximumf %15, %16 : vector<128x64xf32>
    %18 = vector.shape_cast %17 : vector<128x64xf32> to vector<8x16x64xf32>
    %cst_14 = arith.constant dense<0xFF800000> : vector<16x64xf32>
    %19 = vector.multi_reduction <maximumf>, %18, %cst_14 [0] : vector<8x16x64xf32> to vector<16x64xf32>
    %20 = arith.truncf %19 : vector<16x64xf32> to vector<16x64xbf16>
    %c0_15 = arith.constant 0 : index
    %c0_16 = arith.constant 0 : index
    %c0_17 = arith.constant 0 : index
    %21 = vector.load %arg7[%c0_15, %c0_16, %c0_17] : memref<1x16x64xbf16, #tpu.memory_space<vmem>>, vector<1x16x64xbf16>
    %22 = vector.shape_cast %21 : vector<1x16x64xbf16> to vector<16x64xbf16>
    %23 = vector.shape_cast %20 : vector<16x64xbf16> to vector<1x16x64xbf16>
    tpu.vector_store %arg7[%c0_15, %c0_16, %c0_17], %23 {strides = array<i32>} : memref<1x16x64xbf16, #tpu.memory_space<vmem>>, vector<1x16x64xbf16>,
    return
  }
  func.func @transform_0(%arg0: i32, %arg1: i32) -> (i32, i32, i32, i32) {
    %c0_i32 = arith.constant 0 : i32
    %c0_i32_0 = arith.constant 0 : i32
    %c0_i32_1 = arith.constant 0 : i32
    return %arg0, %c0_i32, %arg1, %c0_i32_0 : i32, i32, i32, i32
  }
  func.func @transform_1(%arg0: i32, %arg1: i32) -> (i32, i32) {
    %c0_i32 = arith.constant 0 : i32
    %c0_i32_0 = arith.constant 0 : i32
    %c0_i32_1 = arith.constant 0 : i32
    return %c0_i32, %c0_i32_0 : i32, i32
  }
  func.func @transform_2(%arg0: i32, %arg1: i32) -> (i32, i32) {
    %c0_i32 = arith.constant 0 : i32
    %c0_i32_0 = arith.constant 0 : i32
    %c0_i32_1 = arith.constant 0 : i32
    return %c0_i32, %c0_i32_0 : i32, i32
  }
  func.func @transform_3(%arg0: i32, %arg1: i32) -> (i32, i32) {
    %c0_i32 = arith.constant 0 : i32
    %c0_i32_0 = arith.constant 0 : i32
    %c0_i32_1 = arith.constant 0 : i32
    return %c0_i32, %c0_i32_0 : i32, i32
  }
  func.func @transform_4(%arg0: i32, %arg1: i32) -> (i32, i32) {
    %c0_i32 = arith.constant 0 : i32
    %c0_i32_0 = arith.constant 0 : i32
    %c0_i32_1 = arith.constant 0 : i32
    return %c0_i32, %c0_i32_0 : i32, i32
  }
  func.func @transform_5(%arg0: i32, %arg1: i32) -> (i32, i32, i32) {
    %c0_i32 = arith.constant 0 : i32
    %c0_i32_0 = arith.constant 0 : i32
    return %arg0, %arg1, %c0_i32 : i32, i32, i32
  }
}

module attributes {stable_mosaic.version = 11 : i64} {
  func.func @_grouped_kernel(%arg0: i32, %arg1: i32, %arg2: memref<1x8x8x67xbf16, #tpu.memory_space<vmem>>, %arg3: memref<67x64xbf16, #tpu.memory_space<vmem>>, %arg4: memref<1x64xf32, #tpu.memory_space<vmem>>, %arg5: memref<64x128xbf16, #tpu.memory_space<vmem>>, %arg6: memref<1x128xf32, #tpu.memory_space<vmem>>, %arg7: memref<1x8x128xbf16, #tpu.memory_space<vmem>>) attributes {dimension_semantics = [#tpu.dimension_semantics<parallel>, #tpu.dimension_semantics<parallel>], iteration_bounds = array<i64: 2, 1>, scalar_prefetch = 0 : i64, scratch_operands = 0 : i64, tpu.core_type = #tpu.core_type<tc>, window_params = [{transform_indices = @transform_0, window_bounds = array<i64: 1, 8, 8, 67>}, {pipeline_mode = #tpu.pipeline_mode<synchronous>, transform_indices = @transform_1, window_bounds = array<i64: 67, 64>}, {pipeline_mode = #tpu.pipeline_mode<synchronous>, transform_indices = @transform_2, window_bounds = array<i64: 1, 64>}, {pipeline_mode = #tpu.pipeline_mode<synchronous>, transform_indices = @transform_3, window_bounds = array<i64: 64, 128>}, {pipeline_mode = #tpu.pipeline_mode<synchronous>, transform_indices = @transform_4, window_bounds = array<i64: 1, 128>}, {transform_indices = @transform_5, window_bounds = array<i64: 1, 8, 128>}]} {
    %c0 = arith.constant 0 : index
    %c0_0 = arith.constant 0 : index
    %c0_1 = arith.constant 0 : index
    %c0_2 = arith.constant 0 : index
    %0 = vector.load %arg2[%c0, %c0_0, %c0_1, %c0_2] : memref<1x8x8x67xbf16, #tpu.memory_space<vmem>>, vector<1x8x8x67xbf16>
    %1 = vector.shape_cast %0 : vector<1x8x8x67xbf16> to vector<8x8x67xbf16>
    %2 = vector.shape_cast %1 : vector<8x8x67xbf16> to vector<64x67xbf16>
    %c0_3 = arith.constant 0 : index
    %c0_4 = arith.constant 0 : index
    %3 = vector.load %arg3[%c0_3, %c0_4] : memref<67x64xbf16, #tpu.memory_space<vmem>>, vector<67x64xbf16>
    %cst = arith.constant dense<0.000000e+00> : vector<64x64xf32>
    %4 = tpu.matmul %2, %3, %cst {dimension_numbers = #tpu.dot_dimension_numbers<[1], [0], [0], [1], [0, 0, 1, 1], [], []>} : vector<64x67xbf16>, vector<67x64xbf16>, vector<64x64xf32> -> vector<64x64xf32>
    %c0_5 = arith.constant 0 : index
    %c0_6 = arith.constant 0 : index
    %5 = vector.load %arg4[%c0_5, %c0_6] : memref<1x64xf32, #tpu.memory_space<vmem>>, vector<1x64xf32>
    %6 = vector.broadcast %5 : vector<1x64xf32> to vector<64x64xf32>
    %7 = arith.addf %4, %6 : vector<64x64xf32>
    %cst_7 = arith.constant 0.000000e+00 : f32
    %8 = vector.broadcast %cst_7 : f32 to vector<64x64xf32>
    %9 = arith.maximumf %7, %8 : vector<64x64xf32>
    %10 = arith.truncf %9 : vector<64x64xf32> to vector<64x64xbf16>
    %c0_8 = arith.constant 0 : index
    %c0_9 = arith.constant 0 : index
    %11 = vector.load %arg5[%c0_8, %c0_9] : memref<64x128xbf16, #tpu.memory_space<vmem>>, vector<64x128xbf16>
    %cst_10 = arith.constant dense<0.000000e+00> : vector<64x128xf32>
    %12 = tpu.matmul %10, %11, %cst_10 {dimension_numbers = #tpu.dot_dimension_numbers<[1], [0], [0], [1], [0, 0, 1, 1], [], []>} : vector<64x64xbf16>, vector<64x128xbf16>, vector<64x128xf32> -> vector<64x128xf32>
    %c0_11 = arith.constant 0 : index
    %c0_12 = arith.constant 0 : index
    %13 = vector.load %arg6[%c0_11, %c0_12] : memref<1x128xf32, #tpu.memory_space<vmem>>, vector<1x128xf32>
    %14 = vector.broadcast %13 : vector<1x128xf32> to vector<64x128xf32>
    %15 = arith.addf %12, %14 : vector<64x128xf32>
    %cst_13 = arith.constant 0.000000e+00 : f32
    %16 = vector.broadcast %cst_13 : f32 to vector<64x128xf32>
    %17 = arith.maximumf %15, %16 : vector<64x128xf32>
    %18 = vector.shape_cast %17 : vector<64x128xf32> to vector<8x8x128xf32>
    %cst_14 = arith.constant dense<0xFF800000> : vector<8x128xf32>
    %19 = vector.multi_reduction <maximumf>, %18, %cst_14 [0] : vector<8x8x128xf32> to vector<8x128xf32>
    %20 = arith.truncf %19 : vector<8x128xf32> to vector<8x128xbf16>
    %c0_15 = arith.constant 0 : index
    %c0_16 = arith.constant 0 : index
    %c0_17 = arith.constant 0 : index
    %21 = vector.load %arg7[%c0_15, %c0_16, %c0_17] : memref<1x8x128xbf16, #tpu.memory_space<vmem>>, vector<1x8x128xbf16>
    %22 = vector.shape_cast %21 : vector<1x8x128xbf16> to vector<8x128xbf16>
    %23 = vector.shape_cast %20 : vector<8x128xbf16> to vector<1x8x128xbf16>
    tpu.vector_store %arg7[%c0_15, %c0_16, %c0_17], %23 {strides = array<i32>} : memref<1x8x128xbf16, #tpu.memory_space<vmem>>, vector<1x8x128xbf16>,
    return
  }
  func.func @transform_0(%arg0: i32, %arg1: i32) -> (i32, i32, i32, i32) {
    %c0_i32 = arith.constant 0 : i32
    %c0_i32_0 = arith.constant 0 : i32
    %c0_i32_1 = arith.constant 0 : i32
    return %arg0, %c0_i32, %arg1, %c0_i32_0 : i32, i32, i32, i32
  }
  func.func @transform_1(%arg0: i32, %arg1: i32) -> (i32, i32) {
    %c0_i32 = arith.constant 0 : i32
    %c0_i32_0 = arith.constant 0 : i32
    %c0_i32_1 = arith.constant 0 : i32
    return %c0_i32, %c0_i32_0 : i32, i32
  }
  func.func @transform_2(%arg0: i32, %arg1: i32) -> (i32, i32) {
    %c0_i32 = arith.constant 0 : i32
    %c0_i32_0 = arith.constant 0 : i32
    %c0_i32_1 = arith.constant 0 : i32
    return %c0_i32, %c0_i32_0 : i32, i32
  }
  func.func @transform_3(%arg0: i32, %arg1: i32) -> (i32, i32) {
    %c0_i32 = arith.constant 0 : i32
    %c0_i32_0 = arith.constant 0 : i32
    %c0_i32_1 = arith.constant 0 : i32
    return %c0_i32, %c0_i32_0 : i32, i32
  }
  func.func @transform_4(%arg0: i32, %arg1: i32) -> (i32, i32) {
    %c0_i32 = arith.constant 0 : i32
    %c0_i32_0 = arith.constant 0 : i32
    %c0_i32_1 = arith.constant 0 : i32
    return %c0_i32, %c0_i32_0 : i32, i32
  }
  func.func @transform_5(%arg0: i32, %arg1: i32) -> (i32, i32, i32) {
    %c0_i32 = arith.constant 0 : i32
    %c0_i32_0 = arith.constant 0 : i32
    return %arg0, %arg1, %c0_i32 : i32, i32, i32
  }
}

module attributes {stable_mosaic.version = 11 : i64} {
  func.func @_grouped_kernel(%arg0: i32, %arg1: i32, %arg2: memref<1x8x8x131xbf16, #tpu.memory_space<vmem>>, %arg3: memref<131x128xbf16, #tpu.memory_space<vmem>>, %arg4: memref<1x128xf32, #tpu.memory_space<vmem>>, %arg5: memref<128x256xbf16, #tpu.memory_space<vmem>>, %arg6: memref<1x256xf32, #tpu.memory_space<vmem>>, %arg7: memref<1x8x256xbf16, #tpu.memory_space<vmem>>) attributes {dimension_semantics = [#tpu.dimension_semantics<parallel>, #tpu.dimension_semantics<parallel>], iteration_bounds = array<i64: 2, 1>, scalar_prefetch = 0 : i64, scratch_operands = 0 : i64, tpu.core_type = #tpu.core_type<tc>, window_params = [{transform_indices = @transform_0, window_bounds = array<i64: 1, 8, 8, 131>}, {pipeline_mode = #tpu.pipeline_mode<synchronous>, transform_indices = @transform_1, window_bounds = array<i64: 131, 128>}, {pipeline_mode = #tpu.pipeline_mode<synchronous>, transform_indices = @transform_2, window_bounds = array<i64: 1, 128>}, {pipeline_mode = #tpu.pipeline_mode<synchronous>, transform_indices = @transform_3, window_bounds = array<i64: 128, 256>}, {pipeline_mode = #tpu.pipeline_mode<synchronous>, transform_indices = @transform_4, window_bounds = array<i64: 1, 256>}, {transform_indices = @transform_5, window_bounds = array<i64: 1, 8, 256>}]} {
    %c0 = arith.constant 0 : index
    %c0_0 = arith.constant 0 : index
    %c0_1 = arith.constant 0 : index
    %c0_2 = arith.constant 0 : index
    %0 = vector.load %arg2[%c0, %c0_0, %c0_1, %c0_2] : memref<1x8x8x131xbf16, #tpu.memory_space<vmem>>, vector<1x8x8x131xbf16>
    %1 = vector.shape_cast %0 : vector<1x8x8x131xbf16> to vector<8x8x131xbf16>
    %2 = vector.shape_cast %1 : vector<8x8x131xbf16> to vector<64x131xbf16>
    %c0_3 = arith.constant 0 : index
    %c0_4 = arith.constant 0 : index
    %3 = vector.load %arg3[%c0_3, %c0_4] : memref<131x128xbf16, #tpu.memory_space<vmem>>, vector<131x128xbf16>
    %cst = arith.constant dense<0.000000e+00> : vector<64x128xf32>
    %4 = tpu.matmul %2, %3, %cst {dimension_numbers = #tpu.dot_dimension_numbers<[1], [0], [0], [1], [0, 0, 1, 1], [], []>} : vector<64x131xbf16>, vector<131x128xbf16>, vector<64x128xf32> -> vector<64x128xf32>
    %c0_5 = arith.constant 0 : index
    %c0_6 = arith.constant 0 : index
    %5 = vector.load %arg4[%c0_5, %c0_6] : memref<1x128xf32, #tpu.memory_space<vmem>>, vector<1x128xf32>
    %6 = vector.broadcast %5 : vector<1x128xf32> to vector<64x128xf32>
    %7 = arith.addf %4, %6 : vector<64x128xf32>
    %cst_7 = arith.constant 0.000000e+00 : f32
    %8 = vector.broadcast %cst_7 : f32 to vector<64x128xf32>
    %9 = arith.maximumf %7, %8 : vector<64x128xf32>
    %10 = arith.truncf %9 : vector<64x128xf32> to vector<64x128xbf16>
    %c0_8 = arith.constant 0 : index
    %c0_9 = arith.constant 0 : index
    %11 = vector.load %arg5[%c0_8, %c0_9] : memref<128x256xbf16, #tpu.memory_space<vmem>>, vector<128x256xbf16>
    %cst_10 = arith.constant dense<0.000000e+00> : vector<64x256xf32>
    %12 = tpu.matmul %10, %11, %cst_10 {dimension_numbers = #tpu.dot_dimension_numbers<[1], [0], [0], [1], [0, 0, 1, 1], [], []>} : vector<64x128xbf16>, vector<128x256xbf16>, vector<64x256xf32> -> vector<64x256xf32>
    %c0_11 = arith.constant 0 : index
    %c0_12 = arith.constant 0 : index
    %13 = vector.load %arg6[%c0_11, %c0_12] : memref<1x256xf32, #tpu.memory_space<vmem>>, vector<1x256xf32>
    %14 = vector.broadcast %13 : vector<1x256xf32> to vector<64x256xf32>
    %15 = arith.addf %12, %14 : vector<64x256xf32>
    %cst_13 = arith.constant 0.000000e+00 : f32
    %16 = vector.broadcast %cst_13 : f32 to vector<64x256xf32>
    %17 = arith.maximumf %15, %16 : vector<64x256xf32>
    %18 = vector.shape_cast %17 : vector<64x256xf32> to vector<8x8x256xf32>
    %cst_14 = arith.constant dense<0xFF800000> : vector<8x256xf32>
    %19 = vector.multi_reduction <maximumf>, %18, %cst_14 [0] : vector<8x8x256xf32> to vector<8x256xf32>
    %20 = arith.truncf %19 : vector<8x256xf32> to vector<8x256xbf16>
    %c0_15 = arith.constant 0 : index
    %c0_16 = arith.constant 0 : index
    %c0_17 = arith.constant 0 : index
    %21 = vector.load %arg7[%c0_15, %c0_16, %c0_17] : memref<1x8x256xbf16, #tpu.memory_space<vmem>>, vector<1x8x256xbf16>
    %22 = vector.shape_cast %21 : vector<1x8x256xbf16> to vector<8x256xbf16>
    %23 = vector.shape_cast %20 : vector<8x256xbf16> to vector<1x8x256xbf16>
    tpu.vector_store %arg7[%c0_15, %c0_16, %c0_17], %23 {strides = array<i32>} : memref<1x8x256xbf16, #tpu.memory_space<vmem>>, vector<1x8x256xbf16>,
    return
  }
  func.func @transform_0(%arg0: i32, %arg1: i32) -> (i32, i32, i32, i32) {
    %c0_i32 = arith.constant 0 : i32
    %c0_i32_0 = arith.constant 0 : i32
    %c0_i32_1 = arith.constant 0 : i32
    return %arg0, %c0_i32, %arg1, %c0_i32_0 : i32, i32, i32, i32
  }
  func.func @transform_1(%arg0: i32, %arg1: i32) -> (i32, i32) {
    %c0_i32 = arith.constant 0 : i32
    %c0_i32_0 = arith.constant 0 : i32
    %c0_i32_1 = arith.constant 0 : i32
    return %c0_i32, %c0_i32_0 : i32, i32
  }
  func.func @transform_2(%arg0: i32, %arg1: i32) -> (i32, i32) {
    %c0_i32 = arith.constant 0 : i32
    %c0_i32_0 = arith.constant 0 : i32
    %c0_i32_1 = arith.constant 0 : i32
    return %c0_i32, %c0_i32_0 : i32, i32
  }
  func.func @transform_3(%arg0: i32, %arg1: i32) -> (i32, i32) {
    %c0_i32 = arith.constant 0 : i32
    %c0_i32_0 = arith.constant 0 : i32
    %c0_i32_1 = arith.constant 0 : i32
    return %c0_i32, %c0_i32_0 : i32, i32
  }
  func.func @transform_4(%arg0: i32, %arg1: i32) -> (i32, i32) {
    %c0_i32 = arith.constant 0 : i32
    %c0_i32_0 = arith.constant 0 : i32
    %c0_i32_1 = arith.constant 0 : i32
    return %c0_i32, %c0_i32_0 : i32, i32
  }
  func.func @transform_5(%arg0: i32, %arg1: i32) -> (i32, i32, i32) {
    %c0_i32 = arith.constant 0 : i32
    %c0_i32_0 = arith.constant 0 : i32
    return %arg0, %arg1, %c0_i32 : i32, i32, i32
  }
}

module attributes {stable_mosaic.version = 11 : i64} {
  func.func @kernel(%arg0: i32, %arg1: memref<16x256xbf16, #tpu.memory_space<vmem>>, %arg2: memref<16x128xbf16, #tpu.memory_space<vmem>>, %arg3: memref<256x256xbf16, #tpu.memory_space<vmem>>, %arg4: memref<128x256xbf16, #tpu.memory_space<vmem>>, %arg5: memref<1x256xf32, #tpu.memory_space<vmem>>, %arg6: memref<16x256xbf16, #tpu.memory_space<vmem>>) attributes {dimension_semantics = [#tpu.dimension_semantics<parallel>], iteration_bounds = array<i64: 1>, scalar_prefetch = 0 : i64, scratch_operands = 0 : i64, tpu.core_type = #tpu.core_type<tc>, window_params = [{transform_indices = @transform_0, window_bounds = array<i64: 16, 256>}, {transform_indices = @transform_1, window_bounds = array<i64: 16, 128>}, {pipeline_mode = #tpu.pipeline_mode<synchronous>, transform_indices = @transform_2, window_bounds = array<i64: 256, 256>}, {pipeline_mode = #tpu.pipeline_mode<synchronous>, transform_indices = @transform_3, window_bounds = array<i64: 128, 256>}, {pipeline_mode = #tpu.pipeline_mode<synchronous>, transform_indices = @transform_4, window_bounds = array<i64: 1, 256>}, {transform_indices = @transform_5, window_bounds = array<i64: 16, 256>}]} {
    %c0 = arith.constant 0 : index
    %c0_0 = arith.constant 0 : index
    %0 = vector.load %arg5[%c0, %c0_0] : memref<1x256xf32, #tpu.memory_space<vmem>>, vector<1x256xf32>
    %c0_1 = arith.constant 0 : index
    %c0_2 = arith.constant 0 : index
    %1 = vector.load %arg1[%c0_1, %c0_2] : memref<16x256xbf16, #tpu.memory_space<vmem>>, vector<16x256xbf16>
    %c0_3 = arith.constant 0 : index
    %c0_4 = arith.constant 0 : index
    %2 = vector.load %arg3[%c0_3, %c0_4] : memref<256x256xbf16, #tpu.memory_space<vmem>>, vector<256x256xbf16>
    %cst = arith.constant dense<0.000000e+00> : vector<16x256xf32>
    %3 = tpu.matmul %1, %2, %cst {dimension_numbers = #tpu.dot_dimension_numbers<[1], [0], [0], [1], [0, 0, 1, 1], [], []>} : vector<16x256xbf16>, vector<256x256xbf16>, vector<16x256xf32> -> vector<16x256xf32>
    %4 = vector.broadcast %0 : vector<1x256xf32> to vector<16x256xf32>
    %5 = arith.addf %4, %3 : vector<16x256xf32>
    %c0_5 = arith.constant 0 : index
    %c0_6 = arith.constant 0 : index
    %6 = vector.load %arg2[%c0_5, %c0_6] : memref<16x128xbf16, #tpu.memory_space<vmem>>, vector<16x128xbf16>
    %c0_7 = arith.constant 0 : index
    %c0_8 = arith.constant 0 : index
    %7 = vector.load %arg4[%c0_7, %c0_8] : memref<128x256xbf16, #tpu.memory_space<vmem>>, vector<128x256xbf16>
    %cst_9 = arith.constant dense<0.000000e+00> : vector<16x256xf32>
    %8 = tpu.matmul %6, %7, %cst_9 {dimension_numbers = #tpu.dot_dimension_numbers<[1], [0], [0], [1], [0, 0, 1, 1], [], []>} : vector<16x128xbf16>, vector<128x256xbf16>, vector<16x256xf32> -> vector<16x256xf32>
    %9 = arith.addf %5, %8 : vector<16x256xf32>
    %cst_10 = arith.constant 0.000000e+00 : f32
    %10 = vector.broadcast %cst_10 : f32 to vector<16x256xf32>
    %11 = arith.maximumf %9, %10 : vector<16x256xf32>
    %12 = arith.truncf %11 : vector<16x256xf32> to vector<16x256xbf16>
    %c0_11 = arith.constant 0 : index
    %c0_12 = arith.constant 0 : index
    %13 = vector.load %arg6[%c0_11, %c0_12] : memref<16x256xbf16, #tpu.memory_space<vmem>>, vector<16x256xbf16>
    tpu.vector_store %arg6[%c0_11, %c0_12], %12 {strides = array<i32>} : memref<16x256xbf16, #tpu.memory_space<vmem>>, vector<16x256xbf16>,
    return
  }
  func.func @transform_0(%arg0: i32) -> (i32, i32) {
    %c0_i32 = arith.constant 0 : i32
    %c0_i32_0 = arith.constant 0 : i32
    return %arg0, %c0_i32 : i32, i32
  }
  func.func @transform_1(%arg0: i32) -> (i32, i32) {
    %c0_i32 = arith.constant 0 : i32
    %c0_i32_0 = arith.constant 0 : i32
    return %arg0, %c0_i32 : i32, i32
  }
  func.func @transform_2(%arg0: i32) -> (i32, i32) {
    %c0_i32 = arith.constant 0 : i32
    %c0_i32_0 = arith.constant 0 : i32
    %c0_i32_1 = arith.constant 0 : i32
    return %c0_i32, %c0_i32_0 : i32, i32
  }
  func.func @transform_3(%arg0: i32) -> (i32, i32) {
    %c0_i32 = arith.constant 0 : i32
    %c0_i32_0 = arith.constant 0 : i32
    %c0_i32_1 = arith.constant 0 : i32
    return %c0_i32, %c0_i32_0 : i32, i32
  }
  func.func @transform_4(%arg0: i32) -> (i32, i32) {
    %c0_i32 = arith.constant 0 : i32
    %c0_i32_0 = arith.constant 0 : i32
    %c0_i32_1 = arith.constant 0 : i32
    return %c0_i32, %c0_i32_0 : i32, i32
  }
  func.func @transform_5(%arg0: i32) -> (i32, i32) {
    %c0_i32 = arith.constant 0 : i32
    %c0_i32_0 = arith.constant 0 : i32
    return %arg0, %c0_i32 : i32, i32
  }
}

module attributes {stable_mosaic.version = 11 : i64} {
  func.func @kernel(%arg0: i32, %arg1: memref<32x256xbf16, #tpu.memory_space<vmem>>, %arg2: memref<32x64xbf16, #tpu.memory_space<vmem>>, %arg3: memref<256x256xbf16, #tpu.memory_space<vmem>>, %arg4: memref<64x256xbf16, #tpu.memory_space<vmem>>, %arg5: memref<1x256xf32, #tpu.memory_space<vmem>>, %arg6: memref<32x256xbf16, #tpu.memory_space<vmem>>) attributes {dimension_semantics = [#tpu.dimension_semantics<parallel>], iteration_bounds = array<i64: 1>, scalar_prefetch = 0 : i64, scratch_operands = 0 : i64, tpu.core_type = #tpu.core_type<tc>, window_params = [{transform_indices = @transform_0, window_bounds = array<i64: 32, 256>}, {transform_indices = @transform_1, window_bounds = array<i64: 32, 64>}, {pipeline_mode = #tpu.pipeline_mode<synchronous>, transform_indices = @transform_2, window_bounds = array<i64: 256, 256>}, {pipeline_mode = #tpu.pipeline_mode<synchronous>, transform_indices = @transform_3, window_bounds = array<i64: 64, 256>}, {pipeline_mode = #tpu.pipeline_mode<synchronous>, transform_indices = @transform_4, window_bounds = array<i64: 1, 256>}, {transform_indices = @transform_5, window_bounds = array<i64: 32, 256>}]} {
    %c0 = arith.constant 0 : index
    %c0_0 = arith.constant 0 : index
    %0 = vector.load %arg5[%c0, %c0_0] : memref<1x256xf32, #tpu.memory_space<vmem>>, vector<1x256xf32>
    %c0_1 = arith.constant 0 : index
    %c0_2 = arith.constant 0 : index
    %1 = vector.load %arg1[%c0_1, %c0_2] : memref<32x256xbf16, #tpu.memory_space<vmem>>, vector<32x256xbf16>
    %c0_3 = arith.constant 0 : index
    %c0_4 = arith.constant 0 : index
    %2 = vector.load %arg3[%c0_3, %c0_4] : memref<256x256xbf16, #tpu.memory_space<vmem>>, vector<256x256xbf16>
    %cst = arith.constant dense<0.000000e+00> : vector<32x256xf32>
    %3 = tpu.matmul %1, %2, %cst {dimension_numbers = #tpu.dot_dimension_numbers<[1], [0], [0], [1], [0, 0, 1, 1], [], []>} : vector<32x256xbf16>, vector<256x256xbf16>, vector<32x256xf32> -> vector<32x256xf32>
    %4 = vector.broadcast %0 : vector<1x256xf32> to vector<32x256xf32>
    %5 = arith.addf %4, %3 : vector<32x256xf32>
    %c0_5 = arith.constant 0 : index
    %c0_6 = arith.constant 0 : index
    %6 = vector.load %arg2[%c0_5, %c0_6] : memref<32x64xbf16, #tpu.memory_space<vmem>>, vector<32x64xbf16>
    %c0_7 = arith.constant 0 : index
    %c0_8 = arith.constant 0 : index
    %7 = vector.load %arg4[%c0_7, %c0_8] : memref<64x256xbf16, #tpu.memory_space<vmem>>, vector<64x256xbf16>
    %cst_9 = arith.constant dense<0.000000e+00> : vector<32x256xf32>
    %8 = tpu.matmul %6, %7, %cst_9 {dimension_numbers = #tpu.dot_dimension_numbers<[1], [0], [0], [1], [0, 0, 1, 1], [], []>} : vector<32x64xbf16>, vector<64x256xbf16>, vector<32x256xf32> -> vector<32x256xf32>
    %9 = arith.addf %5, %8 : vector<32x256xf32>
    %cst_10 = arith.constant 0.000000e+00 : f32
    %10 = vector.broadcast %cst_10 : f32 to vector<32x256xf32>
    %11 = arith.maximumf %9, %10 : vector<32x256xf32>
    %12 = arith.truncf %11 : vector<32x256xf32> to vector<32x256xbf16>
    %c0_11 = arith.constant 0 : index
    %c0_12 = arith.constant 0 : index
    %13 = vector.load %arg6[%c0_11, %c0_12] : memref<32x256xbf16, #tpu.memory_space<vmem>>, vector<32x256xbf16>
    tpu.vector_store %arg6[%c0_11, %c0_12], %12 {strides = array<i32>} : memref<32x256xbf16, #tpu.memory_space<vmem>>, vector<32x256xbf16>,
    return
  }
  func.func @transform_0(%arg0: i32) -> (i32, i32) {
    %c0_i32 = arith.constant 0 : i32
    %c0_i32_0 = arith.constant 0 : i32
    return %arg0, %c0_i32 : i32, i32
  }
  func.func @transform_1(%arg0: i32) -> (i32, i32) {
    %c0_i32 = arith.constant 0 : i32
    %c0_i32_0 = arith.constant 0 : i32
    return %arg0, %c0_i32 : i32, i32
  }
  func.func @transform_2(%arg0: i32) -> (i32, i32) {
    %c0_i32 = arith.constant 0 : i32
    %c0_i32_0 = arith.constant 0 : i32
    %c0_i32_1 = arith.constant 0 : i32
    return %c0_i32, %c0_i32_0 : i32, i32
  }
  func.func @transform_3(%arg0: i32) -> (i32, i32) {
    %c0_i32 = arith.constant 0 : i32
    %c0_i32_0 = arith.constant 0 : i32
    %c0_i32_1 = arith.constant 0 : i32
    return %c0_i32, %c0_i32_0 : i32, i32
  }
  func.func @transform_4(%arg0: i32) -> (i32, i32) {
    %c0_i32 = arith.constant 0 : i32
    %c0_i32_0 = arith.constant 0 : i32
    %c0_i32_1 = arith.constant 0 : i32
    return %c0_i32, %c0_i32_0 : i32, i32
  }
  func.func @transform_5(%arg0: i32) -> (i32, i32) {
    %c0_i32 = arith.constant 0 : i32
    %c0_i32_0 = arith.constant 0 : i32
    return %arg0, %c0_i32 : i32, i32
  }
}

module attributes {stable_mosaic.version = 11 : i64} {
  func.func @kernel(%arg0: i32, %arg1: memref<64x256xbf16, #tpu.memory_space<vmem>>, %arg2: memref<64x32xbf16, #tpu.memory_space<vmem>>, %arg3: memref<256x256xbf16, #tpu.memory_space<vmem>>, %arg4: memref<32x256xbf16, #tpu.memory_space<vmem>>, %arg5: memref<1x256xf32, #tpu.memory_space<vmem>>, %arg6: memref<64x256xbf16, #tpu.memory_space<vmem>>) attributes {dimension_semantics = [#tpu.dimension_semantics<parallel>], iteration_bounds = array<i64: 1>, scalar_prefetch = 0 : i64, scratch_operands = 0 : i64, tpu.core_type = #tpu.core_type<tc>, window_params = [{transform_indices = @transform_0, window_bounds = array<i64: 64, 256>}, {transform_indices = @transform_1, window_bounds = array<i64: 64, 32>}, {pipeline_mode = #tpu.pipeline_mode<synchronous>, transform_indices = @transform_2, window_bounds = array<i64: 256, 256>}, {pipeline_mode = #tpu.pipeline_mode<synchronous>, transform_indices = @transform_3, window_bounds = array<i64: 32, 256>}, {pipeline_mode = #tpu.pipeline_mode<synchronous>, transform_indices = @transform_4, window_bounds = array<i64: 1, 256>}, {transform_indices = @transform_5, window_bounds = array<i64: 64, 256>}]} {
    %c0 = arith.constant 0 : index
    %c0_0 = arith.constant 0 : index
    %0 = vector.load %arg5[%c0, %c0_0] : memref<1x256xf32, #tpu.memory_space<vmem>>, vector<1x256xf32>
    %c0_1 = arith.constant 0 : index
    %c0_2 = arith.constant 0 : index
    %1 = vector.load %arg1[%c0_1, %c0_2] : memref<64x256xbf16, #tpu.memory_space<vmem>>, vector<64x256xbf16>
    %c0_3 = arith.constant 0 : index
    %c0_4 = arith.constant 0 : index
    %2 = vector.load %arg3[%c0_3, %c0_4] : memref<256x256xbf16, #tpu.memory_space<vmem>>, vector<256x256xbf16>
    %cst = arith.constant dense<0.000000e+00> : vector<64x256xf32>
    %3 = tpu.matmul %1, %2, %cst {dimension_numbers = #tpu.dot_dimension_numbers<[1], [0], [0], [1], [0, 0, 1, 1], [], []>} : vector<64x256xbf16>, vector<256x256xbf16>, vector<64x256xf32> -> vector<64x256xf32>
    %4 = vector.broadcast %0 : vector<1x256xf32> to vector<64x256xf32>
    %5 = arith.addf %4, %3 : vector<64x256xf32>
    %c0_5 = arith.constant 0 : index
    %c0_6 = arith.constant 0 : index
    %6 = vector.load %arg2[%c0_5, %c0_6] : memref<64x32xbf16, #tpu.memory_space<vmem>>, vector<64x32xbf16>
    %c0_7 = arith.constant 0 : index
    %c0_8 = arith.constant 0 : index
    %7 = vector.load %arg4[%c0_7, %c0_8] : memref<32x256xbf16, #tpu.memory_space<vmem>>, vector<32x256xbf16>
    %cst_9 = arith.constant dense<0.000000e+00> : vector<64x256xf32>
    %8 = tpu.matmul %6, %7, %cst_9 {dimension_numbers = #tpu.dot_dimension_numbers<[1], [0], [0], [1], [0, 0, 1, 1], [], []>} : vector<64x32xbf16>, vector<32x256xbf16>, vector<64x256xf32> -> vector<64x256xf32>
    %9 = arith.addf %5, %8 : vector<64x256xf32>
    %cst_10 = arith.constant 0.000000e+00 : f32
    %10 = vector.broadcast %cst_10 : f32 to vector<64x256xf32>
    %11 = arith.maximumf %9, %10 : vector<64x256xf32>
    %12 = arith.truncf %11 : vector<64x256xf32> to vector<64x256xbf16>
    %c0_11 = arith.constant 0 : index
    %c0_12 = arith.constant 0 : index
    %13 = vector.load %arg6[%c0_11, %c0_12] : memref<64x256xbf16, #tpu.memory_space<vmem>>, vector<64x256xbf16>
    tpu.vector_store %arg6[%c0_11, %c0_12], %12 {strides = array<i32>} : memref<64x256xbf16, #tpu.memory_space<vmem>>, vector<64x256xbf16>,
    return
  }
  func.func @transform_0(%arg0: i32) -> (i32, i32) {
    %c0_i32 = arith.constant 0 : i32
    %c0_i32_0 = arith.constant 0 : i32
    return %arg0, %c0_i32 : i32, i32
  }
  func.func @transform_1(%arg0: i32) -> (i32, i32) {
    %c0_i32 = arith.constant 0 : i32
    %c0_i32_0 = arith.constant 0 : i32
    return %arg0, %c0_i32 : i32, i32
  }
  func.func @transform_2(%arg0: i32) -> (i32, i32) {
    %c0_i32 = arith.constant 0 : i32
    %c0_i32_0 = arith.constant 0 : i32
    %c0_i32_1 = arith.constant 0 : i32
    return %c0_i32, %c0_i32_0 : i32, i32
  }
  func.func @transform_3(%arg0: i32) -> (i32, i32) {
    %c0_i32 = arith.constant 0 : i32
    %c0_i32_0 = arith.constant 0 : i32
    %c0_i32_1 = arith.constant 0 : i32
    return %c0_i32, %c0_i32_0 : i32, i32
  }
  func.func @transform_4(%arg0: i32) -> (i32, i32) {
    %c0_i32 = arith.constant 0 : i32
    %c0_i32_0 = arith.constant 0 : i32
    %c0_i32_1 = arith.constant 0 : i32
    return %c0_i32, %c0_i32_0 : i32, i32
  }
  func.func @transform_5(%arg0: i32) -> (i32, i32) {
    %c0_i32 = arith.constant 0 : i32
    %c0_i32_0 = arith.constant 0 : i32
    return %arg0, %c0_i32 : i32, i32
  }
}

module attributes {stable_mosaic.version = 11 : i64} {
  func.func @kernel(%arg0: i32, %arg1: memref<128x256xbf16, #tpu.memory_space<vmem>>, %arg2: memref<128x17xbf16, #tpu.memory_space<vmem>>, %arg3: memref<256x256xbf16, #tpu.memory_space<vmem>>, %arg4: memref<17x256xbf16, #tpu.memory_space<vmem>>, %arg5: memref<1x256xf32, #tpu.memory_space<vmem>>, %arg6: memref<256x256xbf16, #tpu.memory_space<vmem>>, %arg7: memref<1x256xf32, #tpu.memory_space<vmem>>, %arg8: memref<128x256xf32, #tpu.memory_space<vmem>>) attributes {dimension_semantics = [#tpu.dimension_semantics<parallel>], iteration_bounds = array<i64: 1>, scalar_prefetch = 0 : i64, scratch_operands = 0 : i64, tpu.core_type = #tpu.core_type<tc>, window_params = [{transform_indices = @transform_0, window_bounds = array<i64: 128, 256>}, {transform_indices = @transform_1, window_bounds = array<i64: 128, 17>}, {pipeline_mode = #tpu.pipeline_mode<synchronous>, transform_indices = @transform_2, window_bounds = array<i64: 256, 256>}, {pipeline_mode = #tpu.pipeline_mode<synchronous>, transform_indices = @transform_3, window_bounds = array<i64: 17, 256>}, {pipeline_mode = #tpu.pipeline_mode<synchronous>, transform_indices = @transform_4, window_bounds = array<i64: 1, 256>}, {pipeline_mode = #tpu.pipeline_mode<synchronous>, transform_indices = @transform_5, window_bounds = array<i64: 256, 256>}, {pipeline_mode = #tpu.pipeline_mode<synchronous>, transform_indices = @transform_6, window_bounds = array<i64: 1, 256>}, {transform_indices = @transform_7, window_bounds = array<i64: 128, 256>}]} {
    %c0 = arith.constant 0 : index
    %c0_0 = arith.constant 0 : index
    %0 = vector.load %arg5[%c0, %c0_0] : memref<1x256xf32, #tpu.memory_space<vmem>>, vector<1x256xf32>
    %c0_1 = arith.constant 0 : index
    %c0_2 = arith.constant 0 : index
    %1 = vector.load %arg1[%c0_1, %c0_2] : memref<128x256xbf16, #tpu.memory_space<vmem>>, vector<128x256xbf16>
    %c0_3 = arith.constant 0 : index
    %c0_4 = arith.constant 0 : index
    %2 = vector.load %arg3[%c0_3, %c0_4] : memref<256x256xbf16, #tpu.memory_space<vmem>>, vector<256x256xbf16>
    %cst = arith.constant dense<0.000000e+00> : vector<128x256xf32>
    %3 = tpu.matmul %1, %2, %cst {dimension_numbers = #tpu.dot_dimension_numbers<[1], [0], [0], [1], [0, 0, 1, 1], [], []>} : vector<128x256xbf16>, vector<256x256xbf16>, vector<128x256xf32> -> vector<128x256xf32>
    %4 = vector.broadcast %0 : vector<1x256xf32> to vector<128x256xf32>
    %5 = arith.addf %4, %3 : vector<128x256xf32>
    %c0_5 = arith.constant 0 : index
    %c0_6 = arith.constant 0 : index
    %6 = vector.load %arg2[%c0_5, %c0_6] : memref<128x17xbf16, #tpu.memory_space<vmem>>, vector<128x17xbf16>
    %c0_7 = arith.constant 0 : index
    %c0_8 = arith.constant 0 : index
    %7 = vector.load %arg4[%c0_7, %c0_8] : memref<17x256xbf16, #tpu.memory_space<vmem>>, vector<17x256xbf16>
    %cst_9 = arith.constant dense<0.000000e+00> : vector<128x256xf32>
    %8 = tpu.matmul %6, %7, %cst_9 {dimension_numbers = #tpu.dot_dimension_numbers<[1], [0], [0], [1], [0, 0, 1, 1], [], []>} : vector<128x17xbf16>, vector<17x256xbf16>, vector<128x256xf32> -> vector<128x256xf32>
    %9 = arith.addf %5, %8 : vector<128x256xf32>
    %cst_10 = arith.constant 0.000000e+00 : f32
    %10 = vector.broadcast %cst_10 : f32 to vector<128x256xf32>
    %11 = arith.maximumf %9, %10 : vector<128x256xf32>
    %12 = arith.truncf %11 : vector<128x256xf32> to vector<128x256xbf16>
    %c0_11 = arith.constant 0 : index
    %c0_12 = arith.constant 0 : index
    %13 = vector.load %arg6[%c0_11, %c0_12] : memref<256x256xbf16, #tpu.memory_space<vmem>>, vector<256x256xbf16>
    %cst_13 = arith.constant dense<0.000000e+00> : vector<128x256xf32>
    %14 = tpu.matmul %12, %13, %cst_13 {dimension_numbers = #tpu.dot_dimension_numbers<[1], [0], [0], [1], [0, 0, 1, 1], [], []>} : vector<128x256xbf16>, vector<256x256xbf16>, vector<128x256xf32> -> vector<128x256xf32>
    %c0_14 = arith.constant 0 : index
    %c0_15 = arith.constant 0 : index
    %15 = vector.load %arg7[%c0_14, %c0_15] : memref<1x256xf32, #tpu.memory_space<vmem>>, vector<1x256xf32>
    %16 = vector.broadcast %15 : vector<1x256xf32> to vector<128x256xf32>
    %17 = arith.addf %14, %16 : vector<128x256xf32>
    %cst_16 = arith.constant 0.000000e+00 : f32
    %18 = vector.broadcast %cst_16 : f32 to vector<128x256xf32>
    %19 = arith.maximumf %17, %18 : vector<128x256xf32>
    %c0_17 = arith.constant 0 : index
    %c0_18 = arith.constant 0 : index
    %20 = vector.load %arg8[%c0_17, %c0_18] : memref<128x256xf32, #tpu.memory_space<vmem>>, vector<128x256xf32>
    tpu.vector_store %arg8[%c0_17, %c0_18], %19 {strides = array<i32>} : memref<128x256xf32, #tpu.memory_space<vmem>>, vector<128x256xf32>,
    return
  }
  func.func @transform_0(%arg0: i32) -> (i32, i32) {
    %c0_i32 = arith.constant 0 : i32
    %c0_i32_0 = arith.constant 0 : i32
    return %arg0, %c0_i32 : i32, i32
  }
  func.func @transform_1(%arg0: i32) -> (i32, i32) {
    %c0_i32 = arith.constant 0 : i32
    %c0_i32_0 = arith.constant 0 : i32
    return %arg0, %c0_i32 : i32, i32
  }
  func.func @transform_2(%arg0: i32) -> (i32, i32) {
    %c0_i32 = arith.constant 0 : i32
    %c0_i32_0 = arith.constant 0 : i32
    %c0_i32_1 = arith.constant 0 : i32
    return %c0_i32, %c0_i32_0 : i32, i32
  }
  func.func @transform_3(%arg0: i32) -> (i32, i32) {
    %c0_i32 = arith.constant 0 : i32
    %c0_i32_0 = arith.constant 0 : i32
    %c0_i32_1 = arith.constant 0 : i32
    return %c0_i32, %c0_i32_0 : i32, i32
  }
  func.func @transform_4(%arg0: i32) -> (i32, i32) {
    %c0_i32 = arith.constant 0 : i32
    %c0_i32_0 = arith.constant 0 : i32
    %c0_i32_1 = arith.constant 0 : i32
    return %c0_i32, %c0_i32_0 : i32, i32
  }
  func.func @transform_5(%arg0: i32) -> (i32, i32) {
    %c0_i32 = arith.constant 0 : i32
    %c0_i32_0 = arith.constant 0 : i32
    %c0_i32_1 = arith.constant 0 : i32
    return %c0_i32, %c0_i32_0 : i32, i32
  }
  func.func @transform_6(%arg0: i32) -> (i32, i32) {
    %c0_i32 = arith.constant 0 : i32
    %c0_i32_0 = arith.constant 0 : i32
    %c0_i32_1 = arith.constant 0 : i32
    return %c0_i32, %c0_i32_0 : i32, i32
  }
  func.func @transform_7(%arg0: i32) -> (i32, i32) {
    %c0_i32 = arith.constant 0 : i32
    %c0_i32_0 = arith.constant 0 : i32
    return %arg0, %c0_i32 : i32, i32
  }
}

</mosaic_0001>

<bundles_post_ra>
// kernel: neg.13
= control target key start
LH: loop header
LB: loop body
LE: loop exit
PB: predicated region body
PF: predicated region fallthrough
CT: control target
= control target key end

     0   :  { %s264_s0 = inlined_call_operand.vmem [shape: f32[2,64,64], index: 0, kind: input, shape index: {}]   ;;  %s265_s1 = inlined_call_operand.vmem [shape: f32[2,64,64], index: 1, kind: output, shape index: {}]  }
   0x1   :  { %v2_v0 = vld [vmem:[%s264_s0] sm:$0xff]  ;;  %v130_v2 = vld [vmem:[%s264_s0 + $0x8] sm:$0xff]  ;;  %v134_v7 = vld [vmem:[%s264_s0 + $0x10] sm:$0xff] }
   0x2   :  { %v128_v1 = vld [vmem:[%s264_s0 + $0x40] sm:$0xff]  ;;  %v5_v3 = vxor.u32 2147483648, %v2_v0  ;;  %v20_v5 = vxor.u32 2147483648, %v130_v2  ;;  %v132_v6 = vld [vmem:[%s264_s0 + $0x48] sm:$0xff]  ;;  %v136_v8 = vld [vmem:[%s264_s0 + $0x50] sm:$0xff]  ;;  %v36_v10 = vxor.u32 2147483648, %v134_v7 }
   0x3   :  { %v12_v4 = vxor.u32 2147483648, %v128_v1  ;;  %v28_v9 = vxor.u32 2147483648, %v132_v6  ;;  %v44_v11 = vxor.u32 2147483648, %v136_v8  ;;  %v138_v12 = vld [vmem:[%s264_s0 + $0x18] sm:$0xff]  ;;  %v142_v14 = vld [vmem:[%s264_s0 + $0x20] sm:$0xff]  ;;  %v146_v19 = vld [vmem:[%s264_s0 + $0x28] sm:$0xff] }
   0x4   :  { %v140_v13 = vld [vmem:[%s264_s0 + $0x58] sm:$0xff]  ;;  %7 = vst [vmem:[%s265_s1] sm:$0xff] %v5_v3  ;;  %131 = vst [vmem:[%s265_s1 + $0x8] sm:$0xff] %v20_v5  ;;  %v52_v15 = vxor.u32 2147483648, %v138_v12  ;;  %v68_v17 = vxor.u32 2147483648, %v142_v14  ;;  %v144_v18 = vld [vmem:[%s264_s0 + $0x60] sm:$0xff]  ;;  %v84_v22 = vxor.u32 2147483648, %v146_v19 }
   0x5   :  { %129 = vst [vmem:[%s265_s1 + $0x40] sm:$0xff] %v12_v4  ;;  %v60_v16 = vxor.u32 2147483648, %v140_v13  ;;  %v148_v20 = vld [vmem:[%s264_s0 + $0x68] sm:$0xff]  ;;  %133 = vst [vmem:[%s265_s1 + $0x48] sm:$0xff] %v28_v9  ;;  %v76_v21 = vxor.u32 2147483648, %v144_v18  ;;  %v150_v24 = vld [vmem:[%s264_s0 + $0x30] sm:$0xff] }
   0x6   :  { %135 = vst [vmem:[%s265_s1 + $0x10] sm:$0xff] %v36_v10  ;;  %137 = vst [vmem:[%s265_s1 + $0x50] sm:$0xff] %v44_v11  ;;  %v92_v23 = vxor.u32 2147483648, %v148_v20  ;;  %v152_v25 = vld [vmem:[%s264_s0 + $0x70] sm:$0xff]  ;;  %v154_v26 = vld [vmem:[%s264_s0 + $0x38] sm:$0xff]  ;;  %v100_v27 = vxor.u32 2147483648, %v150_v24 }
   0x7   :  { %139 = vst [vmem:[%s265_s1 + $0x18] sm:$0xff] %v52_v15  ;;  %141 = vst [vmem:[%s265_s1 + $0x58] sm:$0xff] %v60_v16  ;;  %v108_v28 = vxor.u32 2147483648, %v152_v25  ;;  %v116_v29 = vxor.u32 2147483648, %v154_v26  ;;  %v156_v30 = vld [vmem:[%s264_s0 + $0x78] sm:$0xff] }
   0x8   :  { %143 = vst [vmem:[%s265_s1 + $0x20] sm:$0xff] %v68_v17  ;;  %145 = vst [vmem:[%s265_s1 + $0x60] sm:$0xff] %v76_v21  ;;  %v124_v31 = vxor.u32 2147483648, %v156_v30 }
   0x9   :  { %147 = vst [vmem:[%s265_s1 + $0x28] sm:$0xff] %v84_v22  ;;  %149 = vst [vmem:[%s265_s1 + $0x68] sm:$0xff] %v92_v23 }
   0xa   :  { %151 = vst [vmem:[%s265_s1 + $0x30] sm:$0xff] %v100_v27  ;;  %153 = vst [vmem:[%s265_s1 + $0x70] sm:$0xff] %v108_v28 }
   0xb   :  { %155 = vst [vmem:[%s265_s1 + $0x38] sm:$0xff] %v116_v29  ;;  %157 = vst [vmem:[%s265_s1 + $0x78] sm:$0xff] %v124_v31 }

// kernel: custom-call.50
= control target key start
LH: loop header
LB: loop body
LE: loop exit
PB: predicated region body
PF: predicated region fallthrough
CT: control target
= control target key end

     0   :  { %s6_s0 = inlined_call_operand.vmem [shape: f32[2,64], index: 0, kind: output, shape index: {}]  }

// kernel: neg.0
= control target key start
LH: loop header
LB: loop body
LE: loop exit
PB: predicated region body
PF: predicated region fallthrough
CT: control target
= control target key end

     0   :  { %s136_s0 = inlined_call_operand.vmem [shape: f32[64,64], index: 0, kind: input, shape index: {}]   ;;  %s137_s1 = inlined_call_operand.vmem [shape: f32[64,64], index: 1, kind: output, shape index: {}]  }
   0x1   :  { %v2_v0 = vld [vmem:[%s136_s0] sm:$0xff]  ;;  %v64_v1 = vld [vmem:[%s136_s0 + $0x8] sm:$0xff]  ;;  %v66_v2 = vld [vmem:[%s136_s0 + $0x10] sm:$0xff] }
   0x2   :  { %v5_v3 = vxor.u32 2147483648, %v2_v0  ;;  %v12_v4 = vxor.u32 2147483648, %v64_v1  ;;  %v20_v5 = vxor.u32 2147483648, %v66_v2  ;;  %v68_v6 = vld [vmem:[%s136_s0 + $0x18] sm:$0xff]  ;;  %v70_v7 = vld [vmem:[%s136_s0 + $0x20] sm:$0xff]  ;;  %v72_v8 = vld [vmem:[%s136_s0 + $0x28] sm:$0xff] }
   0x3   :  { %v28_v9 = vxor.u32 2147483648, %v68_v6  ;;  %v36_v10 = vxor.u32 2147483648, %v70_v7  ;;  %v44_v11 = vxor.u32 2147483648, %v72_v8  ;;  %v74_v12 = vld [vmem:[%s136_s0 + $0x30] sm:$0xff]  ;;  %v76_v13 = vld [vmem:[%s136_s0 + $0x38] sm:$0xff] }
   0x4   :  { %7 = vst [vmem:[%s137_s1] sm:$0xff] %v5_v3  ;;  %65 = vst [vmem:[%s137_s1 + $0x8] sm:$0xff] %v12_v4  ;;  %v52_v14 = vxor.u32 2147483648, %v74_v12  ;;  %v60_v15 = vxor.u32 2147483648, %v76_v13 }
   0x5   :  { %67 = vst [vmem:[%s137_s1 + $0x10] sm:$0xff] %v20_v5  ;;  %69 = vst [vmem:[%s137_s1 + $0x18] sm:$0xff] %v28_v9 }
   0x6   :  { %71 = vst [vmem:[%s137_s1 + $0x20] sm:$0xff] %v36_v10  ;;  %73 = vst [vmem:[%s137_s1 + $0x28] sm:$0xff] %v44_v11 }
   0x7   :  { %75 = vst [vmem:[%s137_s1 + $0x30] sm:$0xff] %v52_v14  ;;  %77 = vst [vmem:[%s137_s1 + $0x38] sm:$0xff] %v60_v15 }

// kernel: backbone_msnet_forward.9
= control target key start
LH: loop header
LB: loop body
LE: loop exit
PB: predicated region body
PF: predicated region fallthrough
CT: control target
= control target key end

     0   :  { %s3680_s18 = smov 0   ;;  %s3682_s19 = smov 0   ;;  %s4528_s0 = inlined_call_operand.vmem [shape: bf16[2,16,64,10], index: 0, kind: input, shape index: {}]   ;;  %s4529_s1 = inlined_call_operand.vmem [shape: bf16[10,16], index: 1, kind: input, shape index: {}]   ;;  %s4530_s2 = inlined_call_operand.vmem [shape: f32[1,16], index: 2, kind: input, shape index: {}]   ;;  %s4531_s3 = inlined_call_operand.vmem [shape: bf16[16,16], index: 3, kind: input, shape index: {}]   ;;  %s4532_s4 = inlined_call_operand.vmem [shape: f32[1,16], index: 4, kind: input, shape index: {}]   ;;  %s4533_s5 = inlined_call_operand.vmem [shape: bf16[2,64,16], index: 5, kind: output, shape index: {}]  }
   0x1   :  { %s3684_s20 = smov 0  }
   0x2 LB: > { %s27_s21 = sadd.s32 1, %s3644_s19  ;;  %p2922_p0 = scmp.ge.s32.totalorder %s3648_s20, 1  ;;  %s3648_s20 = sphi %s3684_s20, %s15_s20   ;;  %s3644_s19 = sphi %s3682_s19, %s4535_s19   ;;  %s3640_s18 = sphi %s3680_s18, %s4534_s18  }
   0x3   : > { %p29_p1 = scmp.ge.s32.totalorder %s27_s21, 2  ;;  %p208_p2 = scmp.lt.s32.totalorder %s3648_s20, 3 }
   0x5   : > { %s4537_s21 = smov (%p29_p1, %s27_s21), 0  ;;  %p209_p3 = pnand %p2922_p0, %p208_p2 }
   0x6   : > { %v3558_v0 = vld [vmem:[%s4529_s1] sm:$0x1f] (!%p209_p3)   ;;  %vm920_vm0 = vcmask (!%p209_p3), 1044480   ;;  %p245_p4 = scmp.lt.s32.totalorder (!%p209_p3), %s3640_s18, 1  ;;  %vm727_vm1 = vcmask (!%p209_p3), 80896   ;;  %vm1676_vm2 = vcmask (!%p209_p3), 130048  }
   0x7   : > { %212 = sbr.rel (%p209_p3) target bundleno = 714 (0x2ca), region = 40  ;;  %3533 = vmatprep.subr.msk.bf16.mxu0 (!%p209_p3), %vm920_vm0, %v3558_v0  ;;  %v922_v1 = vsel (!%p209_p3), %vm920_vm0, %v3558_v0, 0  ;;  %v3615_v27 = vld [vmem:[%s4531_s3] sm:$0xff] (!%p209_p3)   ;;  %vm2822_vm3 = vcmask (!%p209_p3), 125952  }
   0x8   : > { %3274 = vmatpush3.bf16.msra.mxu0 (!%p209_p3), %v922_v1  ;;  %3403 = vmatprep.subr.bf16.mxu1 (!%p209_p3), %v3615_v27  ;;  %v3824_v58 = vld [vmem:[%s4530_s2] ss:$0 sm:$0xff] (!%p209_p3) }
   0x9   : > { %3404 = vmatpush3.bf16.msra.mxu1 (!%p209_p3), %v3615_v27 }
   0xe   : > { %s4539_s18 = smov (!%p245_p4, %s3640_s18), 1 }
   0xf   : > { %s3133_s24 = sshll.u32 %s4539_s18, 9  ;;  %s3134_s13 = sshll.u32 %s4539_s18, 5 }
  0x10   : > { %s3707_s27 = scalar_lea.vmem %s4528_s0, %s3133_s24  ;;  %s4491_s16 = scalar_lea.vmem %s4533_s5, %s3134_s13 }
  0x11   : > { %v3559_v2 = vld [vmem:[%s3707_s27] sm:$0xff]   ;;  %v3560_v3 = vld [vmem:[%s3707_s27 + $0x8] sm:$0xff]   ;;  %v3561_v4 = vld [vmem:[%s3707_s27 + $0x10] sm:$0xff]  }
  0x12   : > { %3275 = vmatprep.mubr.msk.bf16.mxu0 %vm727_vm1, %v3559_v2  ;;  %v3562_v5 = vld [vmem:[%s3707_s27 + $0x18] sm:$0xff]   ;;  %v3563_v6 = vld [vmem:[%s3707_s27 + $0x20] sm:$0xff]   ;;  %v3564_v7 = vld [vmem:[%s3707_s27 + $0x28] sm:$0xff]  }
  0x13   : > { %3276 = vmatmul.mubr.msk.bf16.vlgmr.msra.gmra.mrb[0].mxu0 %vm727_vm1, %v3560_v3  ;;  %v3565_v8 = vld [vmem:[%s3707_s27 + $0x30] sm:$0xff]   ;;  %v3566_v9 = vld [vmem:[%s3707_s27 + $0x38] sm:$0xff]   ;;  %v3567_v10 = vld [vmem:[%s3707_s27 + $0x40] sm:$0xff]  }
  0x14   : > { %3279 = vmatprep.mubr.msk.bf16.mxu0 %vm727_vm1, %v3561_v4  ;;  %v3568_v11 = vld [vmem:[%s3707_s27 + $0x48] sm:$0xff]   ;;  %v3569_v12 = vld [vmem:[%s3707_s27 + $0x50] sm:$0xff]   ;;  %v3570_v13 = vld [vmem:[%s3707_s27 + $0x58] sm:$0xff]  }
  0x15   : > { %v3571_v14 = vld [vmem:[%s3707_s27 + $0x60] sm:$0xff]   ;;  %v3572_v15 = vld [vmem:[%s3707_s27 + $0x68] sm:$0xff]   ;;  %v3573_v16 = vld [vmem:[%s3707_s27 + $0x70] sm:$0xff]  }
  0x16   : > { %v3574_v17 = vld [vmem:[%s3707_s27 + $0x78] sm:$0xff]   ;;  %v3575_v18 = vld [vmem:[%s3707_s27 + $0x80] sm:$0xff]   ;;  %v3576_v19 = vld [vmem:[%s3707_s27 + $0x88] sm:$0xff]  }
  0x17   : > { %v3577_v20 = vld [vmem:[%s3707_s27 + $0x90] sm:$0xff]   ;;  %v3578_v21 = vld [vmem:[%s3707_s27 + $0x98] sm:$0xff]   ;;  %v3579_v22 = vld [vmem:[%s3707_s27 + $0xa0] sm:$0xff]  }
  0x18   : > { %v3580_v23 = vld [vmem:[%s3707_s27 + $0xa8] sm:$0xff]   ;;  %v3581_v24 = vld [vmem:[%s3707_s27 + $0xb0] sm:$0xff]   ;;  %v3582_v25 = vld [vmem:[%s3707_s27 + $0xb8] sm:$0xff]  }
  0x19   : > { %v3583_v26 = vld [vmem:[%s3707_s27 + $0xc0] sm:$0xff]   ;;  %v3584_v28 = vld [vmem:[%s3707_s27 + $0xc8] sm:$0xff]   ;;  %v3585_v29 = vld [vmem:[%s3707_s27 + $0xd0] sm:$0xff]  }
  0x1a   : > { %v3586_v30 = vld [vmem:[%s3707_s27 + $0xd8] sm:$0xff]   ;;  %v3587_v31 = vld [vmem:[%s3707_s27 + $0xe0] sm:$0xff]   ;;  %v3588_v32 = vld [vmem:[%s3707_s27 + $0xe8] sm:$0xff]  }
  0x1b   : > { %3280 = vmatmul.mubr.msk.bf16.gmra.mrb[4].mxu0 %vm727_vm1, %v3562_v5  ;;  %v3589_v33 = vld [vmem:[%s3707_s27 + $0xf0] sm:$0xff]   ;;  %v3590_v34 = vld [vmem:[%s3707_s27 + $0xf8] sm:$0xff]   ;;  %v3591_v35 = vld [vmem:[%s3707_s27 + $0x100] sm:$0xff]  }
  0x1c   : > { %3283 = vmatprep.mubr.msk.bf16.mxu0 %vm727_vm1, %v3563_v6  ;;  %v3592_v36 = vld [vmem:[%s3707_s27 + $0x108] sm:$0xff]   ;;  %v3593_v37 = vld [vmem:[%s3707_s27 + $0x110] sm:$0xff]   ;;  %v3594_v38 = vld [vmem:[%s3707_s27 + $0x118] sm:$0xff]  }
  0x1d   : > { %v3595_v39 = vld [vmem:[%s3707_s27 + $0x120] sm:$0xff]   ;;  %v3596_v40 = vld [vmem:[%s3707_s27 + $0x128] sm:$0xff]   ;;  %v3597_v41 = vld [vmem:[%s3707_s27 + $0x130] sm:$0xff]  }
  0x1e   : > { %v3598_v42 = vld [vmem:[%s3707_s27 + $0x138] sm:$0xff]   ;;  %v3599_v43 = vld [vmem:[%s3707_s27 + $0x140] sm:$0xff]   ;;  %v3600_v44 = vld [vmem:[%s3707_s27 + $0x148] sm:$0xff]  }
  0x1f   : > { %v3601_v45 = vld [vmem:[%s3707_s27 + $0x150] sm:$0xff]   ;;  %v3602_v46 = vld [vmem:[%s3707_s27 + $0x158] sm:$0xff]   ;;  %v3603_v47 = vld [vmem:[%s3707_s27 + $0x160] sm:$0xff]  }
  0x20   : > { %v3604_v48 = vld [vmem:[%s3707_s27 + $0x168] sm:$0xff]   ;;  %v3605_v49 = vld [vmem:[%s3707_s27 + $0x170] sm:$0xff]   ;;  %v3606_v50 = vld [vmem:[%s3707_s27 + $0x178] sm:$0xff]  }
  0x21   : > { %v3607_v51 = vld [vmem:[%s3707_s27 + $0x180] sm:$0xff]   ;;  %v3608_v52 = vld [vmem:[%s3707_s27 + $0x188] sm:$0xff]   ;;  %v3609_v53 = vld [vmem:[%s3707_s27 + $0x190] sm:$0xff]  }
  0x22   : > { %v3610_v54 = vld [vmem:[%s3707_s27 + $0x198] sm:$0xff]   ;;  %v3611_v55 = vld [vmem:[%s3707_s27 + $0x1a0] sm:$0xff]   ;;  %v3612_v56 = vld [vmem:[%s3707_s27 + $0x1a8] sm:$0xff]  }
  0x23   : > { %3284 = vmatmul.mubr.msk.bf16.gmra.mrb[8].mxu0 %vm727_vm1, %v3564_v7  ;;  %v3613_v57 = vld [vmem:[%s3707_s27 + $0x1b0] sm:$0xff]   ;;  %v3614_v62 = vld [vmem:[%s3707_s27 + $0x1b8] sm:$0xff]   ;;  %v3616_v1 = vld [vmem:[%s3707_s27 + $0x1c0] sm:$0xff]  }
  0x24   : > { %3287 = vmatprep.mubr.msk.bf16.mxu0 %vm727_vm1, %v3565_v8 }
  0x2b   : > { %3288 = vmatmul.mubr.msk.bf16.gmra.mrb[12].mxu0 %vm727_vm1, %v3566_v9 }
  0x2c   : > { %3291 = vmatprep.mubr.msk.bf16.mxu0 %vm727_vm1, %v3567_v10 }
  0x33   : > { %3292 = vmatmul.mubr.msk.bf16.gmra.mrb[16].mxu0 %vm727_vm1, %v3568_v11 }
  0x34   : > { %3295 = vmatprep.mubr.msk.bf16.mxu0 %vm727_vm1, %v3569_v12 }
  0x3b   : > { %3296 = vmatmul.mubr.msk.bf16.gmra.mrb[20].mxu0 %vm727_vm1, %v3570_v13 }
  0x3c   : > { %3299 = vmatprep.mubr.msk.bf16.mxu0 %vm727_vm1, %v3571_v14  ;;  %v3617_v14 = vld [vmem:[%s3707_s27 + $0x1c8] sm:$0xff]  }
  0x43   : > { %3300 = vmatmul.mubr.msk.bf16.gmra.mrb[24].mxu0 %vm727_vm1, %v3572_v15 }
  0x44   : > { %3303 = vmatprep.mubr.msk.bf16.mxu0 %vm727_vm1, %v3573_v16 }
  0x4b   : > { %3304 = vmatmul.mubr.msk.bf16.gmra.mrb[28].mxu0 %vm727_vm1, %v3574_v17  ;;  %v3618_v17 = vld [vmem:[%s3707_s27 + $0x1d0] sm:$0xff]  }
  0x4c   : > { %3307 = vmatprep.mubr.msk.bf16.mxu0 %vm727_vm1, %v3575_v18 }
  0x53   : > { %3308 = vmatmul.mubr.msk.bf16.gmra.mrb[32].mxu0 %vm727_vm1, %v3576_v19 }
  0x54   : > { %3311 = vmatprep.mubr.msk.bf16.mxu0 %vm727_vm1, %v3577_v20 }
  0x5b   : > { %3312 = vmatmul.mubr.msk.bf16.gmra.mrb[36].mxu0 %vm727_vm1, %v3578_v21 }
  0x5c   : > { %3315 = vmatprep.mubr.msk.bf16.mxu0 %vm727_vm1, %v3579_v22 }
  0x63   : > { %3316 = vmatmul.mubr.msk.bf16.gmra.mrb[40].mxu0 %vm727_vm1, %v3580_v23 }
  0x64   : > { %3319 = vmatprep.mubr.msk.bf16.mxu0 %vm727_vm1, %v3581_v24 }
  0x6b   : > { %3320 = vmatmul.mubr.msk.bf16.gmra.mrb[44].mxu0 %vm727_vm1, %v3582_v25 }
  0x6c   : > { %3323 = vmatprep.mubr.msk.bf16.mxu0 %vm727_vm1, %v3583_v26 }
  0x73   : > { %3324 = vmatmul.mubr.msk.bf16.gmra.mrb[48].mxu0 %vm727_vm1, %v3584_v28 }
  0x74   : > { %3327 = vmatprep.mubr.msk.bf16.mxu0 %vm727_vm1, %v3585_v29 }
  0x7b   : > { %3328 = vmatmul.mubr.msk.bf16.gmra.mrb[52].mxu0 %vm727_vm1, %v3586_v30  ;;  %v3619_v30 = vld [vmem:[%s3707_s27 + $0x1d8] sm:$0xff]  }
  0x7c   : > { %3331 = vmatprep.mubr.msk.bf16.mxu0 %vm727_vm1, %v3587_v31 }
  0x83   : > { %3332 = vmatmul.mubr.msk.bf16.gmra.mrb[56].mxu0 %vm727_vm1, %v3588_v32 }
  0x84   : > { %3335 = vmatprep.mubr.msk.bf16.mxu0 %vm727_vm1, %v3589_v33  ;;  %v3620_v33 = vld [vmem:[%s3707_s27 + $0x1e0] sm:$0xff]  }
  0x8b   : > { %3336 = vmatmul.mubr.msk.bf16.gmra.mrb[60].mxu0 %vm727_vm1, %v3590_v34 }
  0x8c   : > { %3339 = vmatprep.mubr.msk.bf16.mxu0 %vm727_vm1, %v3591_v35 }
  0x93   : > { %3340 = vmatmul.mubr.msk.bf16.gmra.mrb[64].mxu0 %vm727_vm1, %v3592_v36 }
  0x94   : > { %3343 = vmatprep.mubr.msk.bf16.mxu0 %vm727_vm1, %v3593_v37 }
  0x9b   : > { %3344 = vmatmul.mubr.msk.bf16.gmra.mrb[68].mxu0 %vm727_vm1, %v3594_v38 }
  0x9c   : > { %3347 = vmatprep.mubr.msk.bf16.mxu0 %vm727_vm1, %v3595_v39 }
  0xa3   : > { %3348 = vmatmul.mubr.msk.bf16.gmra.mrb[72].mxu0 %vm727_vm1, %v3596_v40 }
  0xa4   : > { %3351 = vmatprep.mubr.msk.bf16.mxu0 %vm727_vm1, %v3597_v41 }
  0xab   : > { %3352 = vmatmul.mubr.msk.bf16.gmra.mrb[76].mxu0 %vm727_vm1, %v3598_v42 }
  0xac   : > { %3355 = vmatprep.mubr.msk.bf16.mxu0 %vm727_vm1, %v3599_v43 }
  0xb3   : > { %3356 = vmatmul.mubr.msk.bf16.gmra.mrb[80].mxu0 %vm727_vm1, %v3600_v44 }
  0xb4   : > { %3359 = vmatprep.mubr.msk.bf16.mxu0 %vm727_vm1, %v3601_v45 }
  0xbb   : > { %3360 = vmatmul.mubr.msk.bf16.gmra.mrb[84].mxu0 %vm727_vm1, %v3602_v46  ;;  %v3621_v46 = vld [vmem:[%s3707_s27 + $0x1e8] sm:$0xff]  }
  0xbc   : > { %3363 = vmatprep.mubr.msk.bf16.mxu0 %vm727_vm1, %v3603_v47 }
  0xc3   : > { %3364 = vmatmul.mubr.msk.bf16.gmra.mrb[88].mxu0 %vm727_vm1, %v3604_v48 }
  0xc4   : > { %3367 = vmatprep.mubr.msk.bf16.mxu0 %vm727_vm1, %v3605_v49  ;;  %v3622_v49 = vld [vmem:[%s3707_s27 + $0x1f0] sm:$0xff]  }
  0xcb   : > { %3368 = vmatmul.mubr.msk.bf16.gmra.mrb[92].mxu0 %vm727_vm1, %v3606_v50 }
  0xcc   : > { %3371 = vmatprep.mubr.msk.bf16.mxu0 %vm727_vm1, %v3607_v51 }
  0xd3   : > { %3372 = vmatmul.mubr.msk.bf16.gmra.mrb[96].mxu0 %vm727_vm1, %v3608_v52 }
  0xd4   : > { %3375 = vmatprep.mubr.msk.bf16.mxu0 %vm727_vm1, %v3609_v53 }
  0xdb   : > { %3376 = vmatmul.mubr.msk.bf16.gmra.mrb[100].mxu0 %vm727_vm1, %v3610_v54 }
  0xdc   : > { %3379 = vmatprep.mubr.msk.bf16.mxu0 %vm727_vm1, %v3611_v55 }
  0xe3   : > { %3380 = vmatmul.mubr.msk.bf16.gmra.mrb[104].mxu0 %vm727_vm1, %v3612_v56 }
  0xe4   : > { %3383 = vmatprep.mubr.msk.bf16.mxu0 %vm727_vm1, %v3613_v57 }
  0xe6   : > { %v3277_v59 = vpop.f32.mrb[0].mxu0 }
  0xe7   : > { %v967_v60 = vadd.f32 %v3277_v59, %v3824_v58  ;;  %v958_v61 = vpop.f32.mrb[1].mxu0 }
  0xe8   : > { %v959_v63 = vadd.f32 %v3824_v58, %v958_v61  ;;  %v3278_v0 = vpop.f32.mrb[2].mxu0 }
  0xe9   : > { %v970_v2 = vadd.f32 %v3278_v0, %v3824_v58  ;;  %v961_v3 = vpop.f32.mrb[3].mxu0  ;;  %v1471_v5 = vmax.f32 %v967_v60, 0.0 }
  0xea   : > { %v962_v4 = vadd.f32 %v3824_v58, %v961_v3  ;;  %v1469_v7 = vmax.f32 %v959_v63, 0.0  ;;  %v3623_v63 = vld [vmem:[%s3707_s27 + $0x1f8] sm:$0xff]  }
  0xeb   : > { %v1472_v6 = vmax.f32 %v970_v2, 0.0  ;;  %3384 = vmatmul.mubr.msk.bf16.gmra.mrb[108].mxu0 %vm727_vm1, %v3614_v62 }
  0xec   : > { %v1470_v8 = vmax.f32 %v962_v4, 0.0  ;;  %3387 = vmatprep.mubr.msk.bf16.mxu0 %vm727_vm1, %v3616_v1 }
  0xed   : > { %v1598_v9 = vpack.c.bf16 %v1472_v6, %v1471_v5 }
  0xee   : > { %v3281_v10 = vpop.f32.mrb[4].mxu0  ;;  %v1597_v11 = vpack.c.bf16 %v1470_v8, %v1469_v7 }
  0xef   : > { %v983_v12 = vadd.f32 %v3281_v10, %v3824_v58  ;;  %v974_v13 = vpop.f32.mrb[5].mxu0 }
  0xf0   : > { %v975_v15 = vadd.f32 %v3824_v58, %v974_v13  ;;  %v3282_v16 = vpop.f32.mrb[6].mxu0  ;;  %3405 = vmatprep.mubr.msk.bf16.mxu1 %vm1676_vm2, %v1597_v11 }
  0xf1   : > { %v986_v18 = vadd.f32 %v3282_v16, %v3824_v58  ;;  %v977_v19 = vpop.f32.mrb[7].mxu0  ;;  %3406 = vmatmul.mubr.msk.bf16.vlgmr.msra.gmra.mrb[0].mxu1 %vm1676_vm2, %v1598_v9  ;;  %v1475_v21 = vmax.f32 %v983_v12, 0.0 }
  0xf2   : > { %v978_v20 = vadd.f32 %v3824_v58, %v977_v19  ;;  %v1473_v23 = vmax.f32 %v975_v15, 0.0 }
  0xf3   : > { %v1476_v22 = vmax.f32 %v986_v18, 0.0  ;;  %3388 = vmatmul.mubr.msk.bf16.gmra.mrb[112].mxu0 %vm727_vm1, %v3617_v14 }
  0xf4   : > { %v1474_v24 = vmax.f32 %v978_v20, 0.0  ;;  %3391 = vmatprep.mubr.msk.bf16.mxu0 %vm727_vm1, %v3618_v17 }
  0xf5   : > { %v1600_v25 = vpack.c.bf16 %v1476_v22, %v1475_v21 }
  0xf6   : > { %v1599_v26 = vpack.c.bf16 %v1474_v24, %v1473_v23  ;;  %v3285_v27 = vpop.f32.mrb[8].mxu0 }
  0xf7   : > { %v999_v28 = vadd.f32 %v3285_v27, %v3824_v58  ;;  %v990_v29 = vpop.f32.mrb[9].mxu0 }
  0xf8   : > { %v991_v31 = vadd.f32 %v3824_v58, %v990_v29  ;;  %v3286_v32 = vpop.f32.mrb[10].mxu0  ;;  %3409 = vmatprep.mubr.msk.bf16.mxu1 %vm1676_vm2, %v1599_v26 }
  0xf9   : > { %v1002_v34 = vadd.f32 %v3286_v32, %v3824_v58  ;;  %v993_v35 = vpop.f32.mrb[11].mxu0  ;;  %3410 = vmatmul.mubr.msk.bf16.gmra.mrb[4].mxu1 %vm1676_vm2, %v1600_v25  ;;  %v1479_v37 = vmax.f32 %v999_v28, 0.0 }
  0xfa   : > { %v994_v36 = vadd.f32 %v3824_v58, %v993_v35  ;;  %v1477_v39 = vmax.f32 %v991_v31, 0.0 }
  0xfb   : > { %v1480_v38 = vmax.f32 %v1002_v34, 0.0  ;;  %3392 = vmatmul.mubr.msk.bf16.gmra.mrb[116].mxu0 %vm727_vm1, %v3619_v30 }
  0xfc   : > { %v1478_v40 = vmax.f32 %v994_v36, 0.0  ;;  %3395 = vmatprep.mubr.msk.bf16.mxu0 %vm727_vm1, %v3620_v33 }
  0xfd   : > { %v1602_v41 = vpack.c.bf16 %v1480_v38, %v1479_v37 }
  0xfe   : > { %v1601_v42 = vpack.c.bf16 %v1478_v40, %v1477_v39  ;;  %v3289_v43 = vpop.f32.mrb[12].mxu0 }
  0xff   : > { %v1015_v44 = vadd.f32 %v3289_v43, %v3824_v58  ;;  %v1006_v45 = vpop.f32.mrb[13].mxu0 }
 0x100   : > { %v1007_v47 = vadd.f32 %v3824_v58, %v1006_v45  ;;  %v3290_v48 = vpop.f32.mrb[14].mxu0  ;;  %3413 = vmatprep.mubr.msk.bf16.mxu1 %vm1676_vm2, %v1601_v42 }
 0x101   : > { %v1018_v50 = vadd.f32 %v3290_v48, %v3824_v58  ;;  %v1009_v51 = vpop.f32.mrb[15].mxu0  ;;  %3414 = vmatmul.mubr.msk.bf16.gmra.mrb[8].mxu1 %vm1676_vm2, %v1602_v41  ;;  %v1483_v53 = vmax.f32 %v1015_v44, 0.0 }
 0x102   : > { %v1010_v52 = vadd.f32 %v3824_v58, %v1009_v51  ;;  %v1481_v55 = vmax.f32 %v1007_v47, 0.0 }
 0x103   : > { %v1484_v54 = vmax.f32 %v1018_v50, 0.0  ;;  %3396 = vmatmul.mubr.msk.bf16.gmra.mrb[120].mxu0 %vm727_vm1, %v3621_v46 }
 0x104   : > { %v1482_v56 = vmax.f32 %v1010_v52, 0.0  ;;  %3399 = vmatprep.mubr.msk.bf16.mxu0 %vm727_vm1, %v3622_v49 }
 0x105   : > { %v1604_v57 = vpack.c.bf16 %v1484_v54, %v1483_v53 }
 0x106   : > { %v1603_v59 = vpack.c.bf16 %v1482_v56, %v1481_v55  ;;  %v3293_v60 = vpop.f32.mrb[16].mxu0 }
 0x107   : > { %v1031_v61 = vadd.f32 %v3293_v60, %v3824_v58  ;;  %v1022_v62 = vpop.f32.mrb[17].mxu0 }
 0x108   : > { %v1023_v0 = vadd.f32 %v3824_v58, %v1022_v62  ;;  %v3294_v1 = vpop.f32.mrb[18].mxu0  ;;  %3417 = vmatprep.mubr.msk.bf16.mxu1 %vm1676_vm2, %v1603_v59 }
 0x109   : > { %v1034_v2 = vadd.f32 %v3294_v1, %v3824_v58  ;;  %v1025_v3 = vpop.f32.mrb[19].mxu0  ;;  %3418 = vmatmul.mubr.msk.bf16.gmra.mrb[12].mxu1 %vm1676_vm2, %v1604_v57  ;;  %v1487_v5 = vmax.f32 %v1031_v61, 0.0 }
 0x10a   : > { %v1026_v4 = vadd.f32 %v3824_v58, %v1025_v3  ;;  %v1485_v7 = vmax.f32 %v1023_v0, 0.0 }
 0x10b   : > { %v1488_v6 = vmax.f32 %v1034_v2, 0.0  ;;  %3400 = vmatmul.mubr.msk.bf16.gmra.mrb[124].mxu0 %vm727_vm1, %v3623_v63 }
 0x10c   : > { %v1486_v8 = vmax.f32 %v1026_v4, 0.0 }
 0x10d   : > { %v1606_v9 = vpack.c.bf16 %v1488_v6, %v1487_v5 }
 0x10e   : > { %v1605_v10 = vpack.c.bf16 %v1486_v8, %v1485_v7  ;;  %v3297_v11 = vpop.f32.mrb[20].mxu0 }
 0x10f   : > { %v1047_v12 = vadd.f32 %v3297_v11, %v3824_v58  ;;  %v1038_v13 = vpop.f32.mrb[21].mxu0 }
 0x110   : > { %v1039_v14 = vadd.f32 %v3824_v58, %v1038_v13  ;;  %v3298_v15 = vpop.f32.mrb[22].mxu0  ;;  %3421 = vmatprep.mubr.msk.bf16.mxu1 %vm1676_vm2, %v1605_v10 }
 0x111   : > { %v1050_v16 = vadd.f32 %v3298_v15, %v3824_v58  ;;  %v1041_v17 = vpop.f32.mrb[23].mxu0  ;;  %3422 = vmatmul.mubr.msk.bf16.gmra.mrb[16].mxu1 %vm1676_vm2, %v1606_v9  ;;  %v1491_v19 = vmax.f32 %v1047_v12, 0.0 }
 0x112   : > { %v1042_v18 = vadd.f32 %v3824_v58, %v1041_v17  ;;  %v1489_v21 = vmax.f32 %v1039_v14, 0.0 }
 0x113   : > { %v1492_v20 = vmax.f32 %v1050_v16, 0.0 }
 0x114   : > { %v1490_v22 = vmax.f32 %v1042_v18, 0.0 }
 0x115   : > { %v1608_v23 = vpack.c.bf16 %v1492_v20, %v1491_v19 }
 0x116   : > { %v1607_v24 = vpack.c.bf16 %v1490_v22, %v1489_v21  ;;  %v3301_v25 = vpop.f32.mrb[24].mxu0 }
 0x117   : > { %v1063_v26 = vadd.f32 %v3301_v25, %v3824_v58  ;;  %v1054_v27 = vpop.f32.mrb[25].mxu0 }
 0x118   : > { %v1055_v28 = vadd.f32 %v3824_v58, %v1054_v27  ;;  %v3302_v29 = vpop.f32.mrb[26].mxu0  ;;  %3425 = vmatprep.mubr.msk.bf16.mxu1 %vm1676_vm2, %v1607_v24 }
 0x119   : > { %v1066_v30 = vadd.f32 %v3302_v29, %v3824_v58  ;;  %v1057_v31 = vpop.f32.mrb[27].mxu0  ;;  %3426 = vmatmul.mubr.msk.bf16.gmra.mrb[20].mxu1 %vm1676_vm2, %v1608_v23  ;;  %v1495_v33 = vmax.f32 %v1063_v26, 0.0 }
 0x11a   : > { %v1058_v32 = vadd.f32 %v3824_v58, %v1057_v31  ;;  %v1493_v35 = vmax.f32 %v1055_v28, 0.0 }
 0x11b   : > { %v1496_v34 = vmax.f32 %v1066_v30, 0.0 }
 0x11c   : > { %v1494_v36 = vmax.f32 %v1058_v32, 0.0 }
 0x11d   : > { %v1610_v37 = vpack.c.bf16 %v1496_v34, %v1495_v33 }
 0x11e   : > { %v1609_v38 = vpack.c.bf16 %v1494_v36, %v1493_v35  ;;  %v3305_v39 = vpop.f32.mrb[28].mxu0 }
 0x11f   : > { %v1079_v40 = vadd.f32 %v3305_v39, %v3824_v58  ;;  %v1070_v41 = vpop.f32.mrb[29].mxu0 }
 0x120   : > { %v1071_v42 = vadd.f32 %v3824_v58, %v1070_v41  ;;  %v3306_v43 = vpop.f32.mrb[30].mxu0  ;;  %3429 = vmatprep.mubr.msk.bf16.mxu1 %vm1676_vm2, %v1609_v38 }
 0x121   : > { %v1082_v44 = vadd.f32 %v3306_v43, %v3824_v58  ;;  %v1073_v45 = vpop.f32.mrb[31].mxu0  ;;  %3430 = vmatmul.mubr.msk.bf16.gmra.mrb[24].mxu1 %vm1676_vm2, %v1610_v37  ;;  %v1499_v47 = vmax.f32 %v1079_v40, 0.0 }
 0x122   : > { %v1074_v46 = vadd.f32 %v3824_v58, %v1073_v45  ;;  %v1497_v49 = vmax.f32 %v1071_v42, 0.0 }
 0x123   : > { %v1500_v48 = vmax.f32 %v1082_v44, 0.0 }
 0x124   : > { %v1498_v50 = vmax.f32 %v1074_v46, 0.0 }
 0x125   : > { %v1612_v51 = vpack.c.bf16 %v1500_v48, %v1499_v47 }
 0x126   : > { %v1611_v52 = vpack.c.bf16 %v1498_v50, %v1497_v49  ;;  %v3309_v53 = vpop.f32.mrb[32].mxu0 }
 0x127   : > { %v1095_v54 = vadd.f32 %v3309_v53, %v3824_v58  ;;  %v1086_v55 = vpop.f32.mrb[33].mxu0 }
 0x128   : > { %v1087_v56 = vadd.f32 %v3824_v58, %v1086_v55  ;;  %v3310_v57 = vpop.f32.mrb[34].mxu0  ;;  %3433 = vmatprep.mubr.msk.bf16.mxu1 %vm1676_vm2, %v1611_v52 }
 0x129   : > { %v1098_v59 = vadd.f32 %v3310_v57, %v3824_v58  ;;  %v1089_v60 = vpop.f32.mrb[35].mxu0  ;;  %3434 = vmatmul.mubr.msk.bf16.gmra.mrb[28].mxu1 %vm1676_vm2, %v1612_v51  ;;  %v1503_v62 = vmax.f32 %v1095_v54, 0.0 }
 0x12a   : > { %v1090_v61 = vadd.f32 %v3824_v58, %v1089_v60  ;;  %v1501_v0 = vmax.f32 %v1087_v56, 0.0 }
 0x12b   : > { %v1504_v63 = vmax.f32 %v1098_v59, 0.0 }
 0x12c   : > { %v1502_v1 = vmax.f32 %v1090_v61, 0.0 }
 0x12d   : > { %v1614_v2 = vpack.c.bf16 %v1504_v63, %v1503_v62 }
 0x12e   : > { %v1613_v3 = vpack.c.bf16 %v1502_v1, %v1501_v0  ;;  %v3313_v4 = vpop.f32.mrb[36].mxu0 }
 0x12f   : > { %v1111_v5 = vadd.f32 %v3313_v4, %v3824_v58  ;;  %v1102_v6 = vpop.f32.mrb[37].mxu0 }
 0x130   : > { %v1103_v7 = vadd.f32 %v3824_v58, %v1102_v6  ;;  %v3314_v8 = vpop.f32.mrb[38].mxu0  ;;  %3437 = vmatprep.mubr.msk.bf16.mxu1 %vm1676_vm2, %v1613_v3 }
 0x131   : > { %v1114_v9 = vadd.f32 %v3314_v8, %v3824_v58  ;;  %v1105_v10 = vpop.f32.mrb[39].mxu0  ;;  %3438 = vmatmul.mubr.msk.bf16.gmra.mrb[32].mxu1 %vm1676_vm2, %v1614_v2  ;;  %v1507_v12 = vmax.f32 %v1111_v5, 0.0 }
 0x132   : > { %v1106_v11 = vadd.f32 %v3824_v58, %v1105_v10  ;;  %v1505_v14 = vmax.f32 %v1103_v7, 0.0 }
 0x133   : > { %v1508_v13 = vmax.f32 %v1114_v9, 0.0 }
 0x134   : > { %v1506_v15 = vmax.f32 %v1106_v11, 0.0 }
 0x135   : > { %v1616_v16 = vpack.c.bf16 %v1508_v13, %v1507_v12 }
 0x136   : > { %v1615_v17 = vpack.c.bf16 %v1506_v15, %v1505_v14  ;;  %v3317_v18 = vpop.f32.mrb[40].mxu0 }
 0x137   : > { %v1127_v19 = vadd.f32 %v3317_v18, %v3824_v58  ;;  %v1118_v20 = vpop.f32.mrb[41].mxu0 }
 0x138   : > { %v1119_v21 = vadd.f32 %v3824_v58, %v1118_v20  ;;  %v3318_v22 = vpop.f32.mrb[42].mxu0  ;;  %3441 = vmatprep.mubr.msk.bf16.mxu1 %vm1676_vm2, %v1615_v17 }
 0x139   : > { %v1130_v23 = vadd.f32 %v3318_v22, %v3824_v58  ;;  %v1121_v24 = vpop.f32.mrb[43].mxu0  ;;  %3442 = vmatmul.mubr.msk.bf16.gmra.mrb[36].mxu1 %vm1676_vm2, %v1616_v16  ;;  %v1511_v26 = vmax.f32 %v1127_v19, 0.0 }
 0x13a   : > { %v1122_v25 = vadd.f32 %v3824_v58, %v1121_v24  ;;  %v1509_v28 = vmax.f32 %v1119_v21, 0.0 }
 0x13b   : > { %v1512_v27 = vmax.f32 %v1130_v23, 0.0 }
 0x13c   : > { %v1510_v29 = vmax.f32 %v1122_v25, 0.0 }
 0x13d   : > { %v1618_v30 = vpack.c.bf16 %v1512_v27, %v1511_v26 }
 0x13e   : > { %v1617_v31 = vpack.c.bf16 %v1510_v29, %v1509_v28  ;;  %v3321_v32 = vpop.f32.mrb[44].mxu0 }
 0x13f   : > { %v1143_v33 = vadd.f32 %v3321_v32, %v3824_v58  ;;  %v1134_v34 = vpop.f32.mrb[45].mxu0 }
 0x140   : > { %v1135_v35 = vadd.f32 %v3824_v58, %v1134_v34  ;;  %v3322_v36 = vpop.f32.mrb[46].mxu0  ;;  %3445 = vmatprep.mubr.msk.bf16.mxu1 %vm1676_vm2, %v1617_v31 }
 0x141   : > { %v1146_v37 = vadd.f32 %v3322_v36, %v3824_v58  ;;  %v1137_v38 = vpop.f32.mrb[47].mxu0  ;;  %3446 = vmatmul.mubr.msk.bf16.gmra.mrb[40].mxu1 %vm1676_vm2, %v1618_v30  ;;  %v1515_v40 = vmax.f32 %v1143_v33, 0.0 }
 0x142   : > { %v1138_v39 = vadd.f32 %v3824_v58, %v1137_v38  ;;  %v1513_v42 = vmax.f32 %v1135_v35, 0.0 }
 0x143   : > { %v1516_v41 = vmax.f32 %v1146_v37, 0.0 }
 0x144   : > { %v1514_v43 = vmax.f32 %v1138_v39, 0.0 }
 0x145   : > { %v1620_v44 = vpack.c.bf16 %v1516_v41, %v1515_v40 }
 0x146   : > { %v1619_v45 = vpack.c.bf16 %v1514_v43, %v1513_v42  ;;  %v3325_v46 = vpop.f32.mrb[48].mxu0 }
 0x147   : > { %v1159_v47 = vadd.f32 %v3325_v46, %v3824_v58  ;;  %v1150_v48 = vpop.f32.mrb[49].mxu0 }
 0x148   : > { %v1151_v49 = vadd.f32 %v3824_v58, %v1150_v48  ;;  %v3326_v50 = vpop.f32.mrb[50].mxu0  ;;  %3449 = vmatprep.mubr.msk.bf16.mxu1 %vm1676_vm2, %v1619_v45 }
 0x149   : > { %v1162_v51 = vadd.f32 %v3326_v50, %v3824_v58  ;;  %v1153_v52 = vpop.f32.mrb[51].mxu0  ;;  %3450 = vmatmul.mubr.msk.bf16.gmra.mrb[44].mxu1 %vm1676_vm2, %v1620_v44  ;;  %v1519_v54 = vmax.f32 %v1159_v47, 0.0 }
 0x14a   : > { %v1154_v53 = vadd.f32 %v3824_v58, %v1153_v52  ;;  %v1517_v56 = vmax.f32 %v1151_v49, 0.0 }
 0x14b   : > { %v1520_v55 = vmax.f32 %v1162_v51, 0.0 }
 0x14c   : > { %v1518_v57 = vmax.f32 %v1154_v53, 0.0 }
 0x14d   : > { %v1622_v59 = vpack.c.bf16 %v1520_v55, %v1519_v54 }
 0x14e   : > { %v1621_v60 = vpack.c.bf16 %v1518_v57, %v1517_v56  ;;  %v3329_v61 = vpop.f32.mrb[52].mxu0 }
 0x14f   : > { %v1175_v62 = vadd.f32 %v3329_v61, %v3824_v58  ;;  %v1166_v63 = vpop.f32.mrb[53].mxu0 }
 0x150   : > { %v1167_v0 = vadd.f32 %v3824_v58, %v1166_v63  ;;  %v3330_v1 = vpop.f32.mrb[54].mxu0  ;;  %3453 = vmatprep.mubr.msk.bf16.mxu1 %vm1676_vm2, %v1621_v60 }
 0x151   : > { %v1178_v2 = vadd.f32 %v3330_v1, %v3824_v58  ;;  %v1169_v3 = vpop.f32.mrb[55].mxu0  ;;  %3454 = vmatmul.mubr.msk.bf16.gmra.mrb[48].mxu1 %vm1676_vm2, %v1622_v59  ;;  %v1523_v5 = vmax.f32 %v1175_v62, 0.0 }
 0x152   : > { %v1170_v4 = vadd.f32 %v3824_v58, %v1169_v3  ;;  %v1521_v7 = vmax.f32 %v1167_v0, 0.0 }
 0x153   : > { %v1524_v6 = vmax.f32 %v1178_v2, 0.0 }
 0x154   : > { %v1522_v8 = vmax.f32 %v1170_v4, 0.0 }
 0x155   : > { %v1624_v9 = vpack.c.bf16 %v1524_v6, %v1523_v5 }
 0x156   : > { %v1623_v10 = vpack.c.bf16 %v1522_v8, %v1521_v7  ;;  %v3333_v11 = vpop.f32.mrb[56].mxu0 }
 0x157   : > { %v1191_v12 = vadd.f32 %v3333_v11, %v3824_v58  ;;  %v1182_v13 = vpop.f32.mrb[57].mxu0 }
 0x158   : > { %v1183_v14 = vadd.f32 %v3824_v58, %v1182_v13  ;;  %v3334_v15 = vpop.f32.mrb[58].mxu0  ;;  %3457 = vmatprep.mubr.msk.bf16.mxu1 %vm1676_vm2, %v1623_v10 }
 0x159   : > { %v1194_v16 = vadd.f32 %v3334_v15, %v3824_v58  ;;  %v1185_v17 = vpop.f32.mrb[59].mxu0  ;;  %3458 = vmatmul.mubr.msk.bf16.gmra.mrb[52].mxu1 %vm1676_vm2, %v1624_v9  ;;  %v1527_v19 = vmax.f32 %v1191_v12, 0.0 }
 0x15a   : > { %v1186_v18 = vadd.f32 %v3824_v58, %v1185_v17  ;;  %v1525_v21 = vmax.f32 %v1183_v14, 0.0 }
 0x15b   : > { %v1528_v20 = vmax.f32 %v1194_v16, 0.0 }
 0x15c   : > { %v1526_v22 = vmax.f32 %v1186_v18, 0.0 }
 0x15d   : > { %v1626_v23 = vpack.c.bf16 %v1528_v20, %v1527_v19 }
 0x15e   : > { %v1625_v24 = vpack.c.bf16 %v1526_v22, %v1525_v21  ;;  %v3337_v25 = vpop.f32.mrb[60].mxu0 }
 0x15f   : > { %v1207_v26 = vadd.f32 %v3337_v25, %v3824_v58  ;;  %v1198_v27 = vpop.f32.mrb[61].mxu0 }
 0x160   : > { %v1199_v28 = vadd.f32 %v3824_v58, %v1198_v27  ;;  %v3338_v29 = vpop.f32.mrb[62].mxu0  ;;  %3461 = vmatprep.mubr.msk.bf16.mxu1 %vm1676_vm2, %v1625_v24 }
 0x161   : > { %v1210_v30 = vadd.f32 %v3338_v29, %v3824_v58  ;;  %v1201_v31 = vpop.f32.mrb[63].mxu0  ;;  %3462 = vmatmul.mubr.msk.bf16.gmra.mrb[56].mxu1 %vm1676_vm2, %v1626_v23  ;;  %v1531_v33 = vmax.f32 %v1207_v26, 0.0 }
 0x162   : > { %v1202_v32 = vadd.f32 %v3824_v58, %v1201_v31  ;;  %v1529_v35 = vmax.f32 %v1199_v28, 0.0 }
 0x163   : > { %v1532_v34 = vmax.f32 %v1210_v30, 0.0 }
 0x164   : > { %v1530_v36 = vmax.f32 %v1202_v32, 0.0 }
 0x165   : > { %v1628_v37 = vpack.c.bf16 %v1532_v34, %v1531_v33 }
 0x166   : > { %v1627_v38 = vpack.c.bf16 %v1530_v36, %v1529_v35  ;;  %v3341_v39 = vpop.f32.mrb[64].mxu0 }
 0x167   : > { %v1223_v40 = vadd.f32 %v3341_v39, %v3824_v58  ;;  %v1214_v41 = vpop.f32.mrb[65].mxu0 }
 0x168   : > { %v1215_v42 = vadd.f32 %v3824_v58, %v1214_v41  ;;  %v3342_v43 = vpop.f32.mrb[66].mxu0  ;;  %3465 = vmatprep.mubr.msk.bf16.mxu1 %vm1676_vm2, %v1627_v38 }
 0x169   : > { %v1226_v44 = vadd.f32 %v3342_v43, %v3824_v58  ;;  %v1217_v45 = vpop.f32.mrb[67].mxu0  ;;  %3466 = vmatmul.mubr.msk.bf16.gmra.mrb[60].mxu1 %vm1676_vm2, %v1628_v37  ;;  %v1535_v47 = vmax.f32 %v1223_v40, 0.0 }
 0x16a   : > { %v1218_v46 = vadd.f32 %v3824_v58, %v1217_v45  ;;  %v1533_v49 = vmax.f32 %v1215_v42, 0.0 }
 0x16b   : > { %v1536_v48 = vmax.f32 %v1226_v44, 0.0 }
 0x16c   : > { %v1534_v50 = vmax.f32 %v1218_v46, 0.0 }
 0x16d   : > { %v1630_v51 = vpack.c.bf16 %v1536_v48, %v1535_v47 }
 0x16e   : > { %v1629_v52 = vpack.c.bf16 %v1534_v50, %v1533_v49  ;;  %v3345_v53 = vpop.f32.mrb[68].mxu0 }
 0x16f   : > { %v1239_v54 = vadd.f32 %v3345_v53, %v3824_v58  ;;  %v1230_v55 = vpop.f32.mrb[69].mxu0 }
 0x170   : > { %v1231_v56 = vadd.f32 %v3824_v58, %v1230_v55  ;;  %v3346_v57 = vpop.f32.mrb[70].mxu0  ;;  %3469 = vmatprep.mubr.msk.bf16.mxu1 %vm1676_vm2, %v1629_v52 }
 0x171   : > { %v1242_v59 = vadd.f32 %v3346_v57, %v3824_v58  ;;  %v1233_v60 = vpop.f32.mrb[71].mxu0  ;;  %3470 = vmatmul.mubr.msk.bf16.gmra.mrb[64].mxu1 %vm1676_vm2, %v1630_v51  ;;  %v1539_v62 = vmax.f32 %v1239_v54, 0.0 }
 0x172   : > { %v1234_v61 = vadd.f32 %v3824_v58, %v1233_v60  ;;  %v1537_v0 = vmax.f32 %v1231_v56, 0.0 }
 0x173   : > { %v1540_v63 = vmax.f32 %v1242_v59, 0.0 }
 0x174   : > { %v1538_v1 = vmax.f32 %v1234_v61, 0.0 }
 0x175   : > { %v1632_v2 = vpack.c.bf16 %v1540_v63, %v1539_v62 }
 0x176   : > { %v1631_v3 = vpack.c.bf16 %v1538_v1, %v1537_v0  ;;  %v3349_v4 = vpop.f32.mrb[72].mxu0 }
 0x177   : > { %v1255_v5 = vadd.f32 %v3349_v4, %v3824_v58  ;;  %v1246_v6 = vpop.f32.mrb[73].mxu0 }
 0x178   : > { %v1247_v7 = vadd.f32 %v3824_v58, %v1246_v6  ;;  %v3350_v8 = vpop.f32.mrb[74].mxu0  ;;  %3473 = vmatprep.mubr.msk.bf16.mxu1 %vm1676_vm2, %v1631_v3 }
 0x179   : > { %v1258_v9 = vadd.f32 %v3350_v8, %v3824_v58  ;;  %v1249_v10 = vpop.f32.mrb[75].mxu0  ;;  %3474 = vmatmul.mubr.msk.bf16.gmra.mrb[68].mxu1 %vm1676_vm2, %v1632_v2  ;;  %v1543_v12 = vmax.f32 %v1255_v5, 0.0 }
 0x17a   : > { %v1250_v11 = vadd.f32 %v3824_v58, %v1249_v10  ;;  %v1541_v14 = vmax.f32 %v1247_v7, 0.0 }
 0x17b   : > { %v1544_v13 = vmax.f32 %v1258_v9, 0.0 }
 0x17c   : > { %v1542_v15 = vmax.f32 %v1250_v11, 0.0 }
 0x17d   : > { %v1634_v16 = vpack.c.bf16 %v1544_v13, %v1543_v12 }
 0x17e   : > { %v1633_v17 = vpack.c.bf16 %v1542_v15, %v1541_v14  ;;  %v3353_v18 = vpop.f32.mrb[76].mxu0 }
 0x17f   : > { %v1271_v19 = vadd.f32 %v3353_v18, %v3824_v58  ;;  %v1262_v20 = vpop.f32.mrb[77].mxu0 }
 0x180   : > { %v1263_v21 = vadd.f32 %v3824_v58, %v1262_v20  ;;  %v3354_v22 = vpop.f32.mrb[78].mxu0  ;;  %3477 = vmatprep.mubr.msk.bf16.mxu1 %vm1676_vm2, %v1633_v17 }
 0x181   : > { %v1274_v23 = vadd.f32 %v3354_v22, %v3824_v58  ;;  %v1265_v24 = vpop.f32.mrb[79].mxu0  ;;  %3478 = vmatmul.mubr.msk.bf16.gmra.mrb[72].mxu1 %vm1676_vm2, %v1634_v16  ;;  %v1547_v26 = vmax.f32 %v1271_v19, 0.0 }
 0x182   : > { %v1266_v25 = vadd.f32 %v3824_v58, %v1265_v24  ;;  %v1545_v28 = vmax.f32 %v1263_v21, 0.0 }
 0x183   : > { %v1548_v27 = vmax.f32 %v1274_v23, 0.0 }
 0x184   : > { %v1546_v29 = vmax.f32 %v1266_v25, 0.0 }
 0x185   : > { %v1636_v30 = vpack.c.bf16 %v1548_v27, %v1547_v26 }
 0x186   : > { %v1635_v31 = vpack.c.bf16 %v1546_v29, %v1545_v28  ;;  %v3357_v32 = vpop.f32.mrb[80].mxu0 }
 0x187   : > { %v1287_v33 = vadd.f32 %v3357_v32, %v3824_v58  ;;  %v1278_v34 = vpop.f32.mrb[81].mxu0 }
 0x188   : > { %v1279_v35 = vadd.f32 %v3824_v58, %v1278_v34  ;;  %v3358_v36 = vpop.f32.mrb[82].mxu0  ;;  %3481 = vmatprep.mubr.msk.bf16.mxu1 %vm1676_vm2, %v1635_v31 }
 0x189   : > { %v1290_v37 = vadd.f32 %v3358_v36, %v3824_v58  ;;  %v1281_v38 = vpop.f32.mrb[83].mxu0  ;;  %3482 = vmatmul.mubr.msk.bf16.gmra.mrb[76].mxu1 %vm1676_vm2, %v1636_v30  ;;  %v1551_v40 = vmax.f32 %v1287_v33, 0.0 }
 0x18a   : > { %v1282_v39 = vadd.f32 %v3824_v58, %v1281_v38  ;;  %v1549_v42 = vmax.f32 %v1279_v35, 0.0 }
 0x18b   : > { %v1552_v41 = vmax.f32 %v1290_v37, 0.0 }
 0x18c   : > { %v1550_v43 = vmax.f32 %v1282_v39, 0.0 }
 0x18d   : > { %v1638_v44 = vpack.c.bf16 %v1552_v41, %v1551_v40 }
 0x18e   : > { %v1637_v45 = vpack.c.bf16 %v1550_v43, %v1549_v42  ;;  %v3361_v46 = vpop.f32.mrb[84].mxu0 }
 0x18f   : > { %v1303_v47 = vadd.f32 %v3361_v46, %v3824_v58  ;;  %v1294_v48 = vpop.f32.mrb[85].mxu0 }
 0x190   : > { %v1295_v49 = vadd.f32 %v3824_v58, %v1294_v48  ;;  %v3362_v50 = vpop.f32.mrb[86].mxu0  ;;  %3485 = vmatprep.mubr.msk.bf16.mxu1 %vm1676_vm2, %v1637_v45 }
 0x191   : > { %v1306_v51 = vadd.f32 %v3362_v50, %v3824_v58  ;;  %v1297_v52 = vpop.f32.mrb[87].mxu0  ;;  %3486 = vmatmul.mubr.msk.bf16.gmra.mrb[80].mxu1 %vm1676_vm2, %v1638_v44  ;;  %v1555_v54 = vmax.f32 %v1303_v47, 0.0 }
 0x192   : > { %v1298_v53 = vadd.f32 %v3824_v58, %v1297_v52  ;;  %v1553_v56 = vmax.f32 %v1295_v49, 0.0 }
 0x193   : > { %v1556_v55 = vmax.f32 %v1306_v51, 0.0 }
 0x194   : > { %v1554_v57 = vmax.f32 %v1298_v53, 0.0 }
 0x195   : > { %v1640_v59 = vpack.c.bf16 %v1556_v55, %v1555_v54 }
 0x196   : > { %v1639_v60 = vpack.c.bf16 %v1554_v57, %v1553_v56  ;;  %v3365_v61 = vpop.f32.mrb[88].mxu0 }
 0x197   : > { %v1319_v62 = vadd.f32 %v3365_v61, %v3824_v58  ;;  %v1310_v63 = vpop.f32.mrb[89].mxu0 }
 0x198   : > { %v1311_v0 = vadd.f32 %v3824_v58, %v1310_v63  ;;  %v3366_v1 = vpop.f32.mrb[90].mxu0  ;;  %3489 = vmatprep.mubr.msk.bf16.mxu1 %vm1676_vm2, %v1639_v60 }
 0x199   : > { %v1322_v2 = vadd.f32 %v3366_v1, %v3824_v58  ;;  %v1313_v3 = vpop.f32.mrb[91].mxu0  ;;  %3490 = vmatmul.mubr.msk.bf16.gmra.mrb[84].mxu1 %vm1676_vm2, %v1640_v59  ;;  %v1559_v5 = vmax.f32 %v1319_v62, 0.0 }
 0x19a   : > { %v1314_v4 = vadd.f32 %v3824_v58, %v1313_v3  ;;  %v1557_v7 = vmax.f32 %v1311_v0, 0.0 }
 0x19b   : > { %v1560_v6 = vmax.f32 %v1322_v2, 0.0 }
 0x19c   : > { %v1558_v8 = vmax.f32 %v1314_v4, 0.0 }
 0x19d   : > { %v1642_v9 = vpack.c.bf16 %v1560_v6, %v1559_v5 }
 0x19e   : > { %v1641_v10 = vpack.c.bf16 %v1558_v8, %v1557_v7  ;;  %v3369_v11 = vpop.f32.mrb[92].mxu0 }
 0x19f   : > { %v1335_v12 = vadd.f32 %v3369_v11, %v3824_v58  ;;  %v1326_v13 = vpop.f32.mrb[93].mxu0 }
 0x1a0   : > { %v1327_v14 = vadd.f32 %v3824_v58, %v1326_v13  ;;  %v3370_v15 = vpop.f32.mrb[94].mxu0  ;;  %3493 = vmatprep.mubr.msk.bf16.mxu1 %vm1676_vm2, %v1641_v10 }
 0x1a1   : > { %v1338_v16 = vadd.f32 %v3370_v15, %v3824_v58  ;;  %v1329_v17 = vpop.f32.mrb[95].mxu0  ;;  %3494 = vmatmul.mubr.msk.bf16.gmra.mrb[88].mxu1 %vm1676_vm2, %v1642_v9  ;;  %v1563_v19 = vmax.f32 %v1335_v12, 0.0 }
 0x1a2   : > { %v1330_v18 = vadd.f32 %v3824_v58, %v1329_v17  ;;  %v1561_v21 = vmax.f32 %v1327_v14, 0.0 }
 0x1a3   : > { %v1564_v20 = vmax.f32 %v1338_v16, 0.0 }
 0x1a4   : > { %v1562_v22 = vmax.f32 %v1330_v18, 0.0 }
 0x1a5   : > { %v1644_v23 = vpack.c.bf16 %v1564_v20, %v1563_v19 }
 0x1a6   : > { %v1643_v24 = vpack.c.bf16 %v1562_v22, %v1561_v21  ;;  %v3373_v25 = vpop.f32.mrb[96].mxu0 }
 0x1a7   : > { %v1351_v26 = vadd.f32 %v3373_v25, %v3824_v58  ;;  %v1342_v27 = vpop.f32.mrb[97].mxu0 }
 0x1a8   : > { %v1343_v28 = vadd.f32 %v3824_v58, %v1342_v27  ;;  %v3374_v29 = vpop.f32.mrb[98].mxu0  ;;  %3497 = vmatprep.mubr.msk.bf16.mxu1 %vm1676_vm2, %v1643_v24  ;;  %v4017_v27 = vld [vmem:[%s4532_s4] ss:$0 sm:$0xff] }
 0x1a9   : > { %v1354_v30 = vadd.f32 %v3374_v29, %v3824_v58  ;;  %v1345_v31 = vpop.f32.mrb[99].mxu0  ;;  %3498 = vmatmul.mubr.msk.bf16.gmra.mrb[92].mxu1 %vm1676_vm2, %v1644_v23  ;;  %v1567_v33 = vmax.f32 %v1351_v26, 0.0 }
 0x1aa   : > { %v1346_v32 = vadd.f32 %v3824_v58, %v1345_v31  ;;  %v1565_v35 = vmax.f32 %v1343_v28, 0.0 }
 0x1ab   : > { %v1568_v34 = vmax.f32 %v1354_v30, 0.0 }
 0x1ac   : > { %v1566_v36 = vmax.f32 %v1346_v32, 0.0 }
 0x1ad   : > { %v1646_v37 = vpack.c.bf16 %v1568_v34, %v1567_v33 }
 0x1ae   : > { %v1645_v38 = vpack.c.bf16 %v1566_v36, %v1565_v35  ;;  %v3377_v39 = vpop.f32.mrb[100].mxu0 }
 0x1af   : > { %v1367_v40 = vadd.f32 %v3377_v39, %v3824_v58  ;;  %v1358_v41 = vpop.f32.mrb[101].mxu0 }
 0x1b0   : > { %v1359_v42 = vadd.f32 %v3824_v58, %v1358_v41  ;;  %v3378_v43 = vpop.f32.mrb[102].mxu0  ;;  %3501 = vmatprep.mubr.msk.bf16.mxu1 %vm1676_vm2, %v1645_v38 }
 0x1b1   : > { %v1370_v44 = vadd.f32 %v3378_v43, %v3824_v58  ;;  %v1361_v45 = vpop.f32.mrb[103].mxu0  ;;  %3502 = vmatmul.mubr.msk.bf16.gmra.mrb[96].mxu1 %vm1676_vm2, %v1646_v37  ;;  %v1571_v47 = vmax.f32 %v1367_v40, 0.0 }
 0x1b2   : > { %v1362_v46 = vadd.f32 %v3824_v58, %v1361_v45  ;;  %v1569_v49 = vmax.f32 %v1359_v42, 0.0 }
 0x1b3   : > { %v1572_v48 = vmax.f32 %v1370_v44, 0.0 }
 0x1b4   : > { %v1570_v50 = vmax.f32 %v1362_v46, 0.0 }
 0x1b5   : > { %v1648_v51 = vpack.c.bf16 %v1572_v48, %v1571_v47 }
 0x1b6   : > { %v1647_v52 = vpack.c.bf16 %v1570_v50, %v1569_v49  ;;  %v3381_v53 = vpop.f32.mrb[104].mxu0 }
 0x1b7   : > { %v1383_v54 = vadd.f32 %v3381_v53, %v3824_v58  ;;  %v1374_v55 = vpop.f32.mrb[105].mxu0 }
 0x1b8   : > { %v1375_v56 = vadd.f32 %v3824_v58, %v1374_v55  ;;  %v3382_v57 = vpop.f32.mrb[106].mxu0  ;;  %3505 = vmatprep.mubr.msk.bf16.mxu1 %vm1676_vm2, %v1647_v52 }
 0x1b9   : > { %v1386_v59 = vadd.f32 %v3382_v57, %v3824_v58  ;;  %v1377_v60 = vpop.f32.mrb[107].mxu0  ;;  %3506 = vmatmul.mubr.msk.bf16.gmra.mrb[100].mxu1 %vm1676_vm2, %v1648_v51  ;;  %v1575_v62 = vmax.f32 %v1383_v54, 0.0 }
 0x1ba   : > { %v1378_v61 = vadd.f32 %v3824_v58, %v1377_v60  ;;  %v1573_v0 = vmax.f32 %v1375_v56, 0.0 }
 0x1bb   : > { %v1576_v63 = vmax.f32 %v1386_v59, 0.0 }
 0x1bc   : > { %v1574_v1 = vmax.f32 %v1378_v61, 0.0 }
 0x1bd   : > { %v1650_v2 = vpack.c.bf16 %v1576_v63, %v1575_v62 }
 0x1be   : > { %v1649_v3 = vpack.c.bf16 %v1574_v1, %v1573_v0  ;;  %v3385_v4 = vpop.f32.mrb[108].mxu0 }
 0x1bf   : > { %v1399_v5 = vadd.f32 %v3385_v4, %v3824_v58  ;;  %v1390_v6 = vpop.f32.mrb[109].mxu0 }
 0x1c0   : > { %v1391_v7 = vadd.f32 %v3824_v58, %v1390_v6  ;;  %v3386_v8 = vpop.f32.mrb[110].mxu0  ;;  %3509 = vmatprep.mubr.msk.bf16.mxu1 %vm1676_vm2, %v1649_v3 }
 0x1c1   : > { %v1402_v9 = vadd.f32 %v3386_v8, %v3824_v58  ;;  %v1393_v10 = vpop.f32.mrb[111].mxu0  ;;  %3510 = vmatmul.mubr.msk.bf16.gmra.mrb[104].mxu1 %vm1676_vm2, %v1650_v2  ;;  %v1579_v12 = vmax.f32 %v1399_v5, 0.0 }
 0x1c2   : > { %v1394_v11 = vadd.f32 %v3824_v58, %v1393_v10  ;;  %v1577_v14 = vmax.f32 %v1391_v7, 0.0 }
 0x1c3   : > { %v1580_v13 = vmax.f32 %v1402_v9, 0.0 }
 0x1c4   : > { %v1578_v15 = vmax.f32 %v1394_v11, 0.0  ;;  %v3407_v16 = vpop.f32.mrb[0].mxu1 }
 0x1c5   : > { %v1652_v17 = vpack.c.bf16 %v1580_v13, %v1579_v12  ;;  %v1903_v18 = vpop.f32.mrb[1].mxu1  ;;  %v1912_v33 = vadd.f32 %v3407_v16, %v4017_v27 }
 0x1c6   : > { %v1651_v19 = vpack.c.bf16 %v1578_v15, %v1577_v14  ;;  %v3389_v20 = vpop.f32.mrb[112].mxu0  ;;  %v3408_v21 = vpop.f32.mrb[2].mxu1  ;;  %v1904_v37 = vadd.f32 %v4017_v27, %v1903_v18  ;;  %v4052_v14 = vld [vmem:[%s4530_s2] ss:$0 sm:$0xff] }
 0x1c7   : > { %v1415_v22 = vadd.f32 %v3389_v20, %v3824_v58  ;;  %v1406_v23 = vpop.f32.mrb[113].mxu0  ;;  %v1906_v24 = vpop.f32.mrb[3].mxu1  ;;  %v1915_v38 = vadd.f32 %v3408_v21, %v4017_v27  ;;  %v2416_v48 = vmax.f32 %v1912_v33, 0.0 }
 0x1c8   : > { %v1407_v25 = vadd.f32 %v3824_v58, %v1406_v23  ;;  %v3390_v26 = vpop.f32.mrb[114].mxu0  ;;  %3513 = vmatprep.mubr.msk.bf16.mxu1 %vm1676_vm2, %v1651_v19  ;;  %v1907_v41 = vadd.f32 %v4017_v27, %v1906_v24  ;;  %v2414_v51 = vmax.f32 %v1904_v37, 0.0 }
 0x1c9   : > { %v1418_v28 = vadd.f32 %v3390_v26, %v3824_v58  ;;  %v1409_v29 = vpop.f32.mrb[115].mxu0  ;;  %3514 = vmatmul.mubr.msk.bf16.gmra.mrb[108].mxu1 %vm1676_vm2, %v1652_v17  ;;  %v1583_v31 = vmax.f32 %v1415_v22, 0.0  ;;  %v2417_v52 = vmax.f32 %v1915_v38, 0.0  ;;  %v4034_v61 = vsel %vm1676_vm2, %v2416_v48, -inf }
 0x1ca   : > { %v1410_v30 = vadd.f32 %v3824_v58, %v1409_v29  ;;  %v1581_v34 = vmax.f32 %v1407_v25, 0.0  ;;  %v2415_v55 = vmax.f32 %v1907_v41, 0.0  ;;  %v4038_v2 = vsel %vm1676_vm2, %v2414_v51, -inf }
 0x1cb   : > { %v1584_v32 = vmax.f32 %v1418_v28, 0.0  ;;  %v4041_v3 = vsel %vm1676_vm2, %v2417_v52, -inf }
 0x1cc   : > { %v1582_v35 = vmax.f32 %v1410_v30, 0.0  ;;  %v3411_v36 = vpop.f32.mrb[4].mxu1  ;;  %v4045_v6 = vsel %vm1676_vm2, %v2415_v55, -inf }
 0x1cd   : > { %v1654_v39 = vpack.c.bf16 %v1584_v32, %v1583_v31  ;;  %v1919_v40 = vpop.f32.mrb[5].mxu1  ;;  %v1928_v56 = vadd.f32 %v3411_v36, %v4017_v27 }
 0x1ce   : > { %v1653_v42 = vpack.c.bf16 %v1582_v35, %v1581_v34  ;;  %v3393_v43 = vpop.f32.mrb[116].mxu0  ;;  %v3412_v44 = vpop.f32.mrb[6].mxu1  ;;  %v1920_v62 = vadd.f32 %v4017_v27, %v1919_v40 }
 0x1cf   : > { %v1431_v45 = vadd.f32 %v3393_v43, %v3824_v58  ;;  %v1422_v46 = vpop.f32.mrb[117].mxu0  ;;  %v1922_v47 = vpop.f32.mrb[7].mxu1  ;;  %v2420_v7 = vmax.f32 %v1928_v56, 0.0  ;;  %v1931_v12 = vadd.f32 %v3412_v44, %v4017_v27 }
 0x1d0   : > { %v1423_v49 = vadd.f32 %v3824_v58, %v1422_v46  ;;  %v3394_v50 = vpop.f32.mrb[118].mxu0  ;;  %3517 = vmatprep.mubr.msk.bf16.mxu1 %vm1676_vm2, %v1653_v42  ;;  %v2418_v19 = vmax.f32 %v1920_v62, 0.0  ;;  %v1923_v24 = vadd.f32 %v4017_v27, %v1922_v47 }
 0x1d1   : > { %v1434_v53 = vadd.f32 %v3394_v50, %v3824_v58  ;;  %v1425_v54 = vpop.f32.mrb[119].mxu0  ;;  %3518 = vmatmul.mubr.msk.bf16.gmra.mrb[112].mxu1 %vm1676_vm2, %v1654_v39  ;;  %v1587_v59 = vmax.f32 %v1431_v45, 0.0  ;;  %v2421_v38 = vmax.f32 %v1931_v12, 0.0  ;;  %v4085_v48 = vsel %vm1676_vm2, %v2420_v7, -inf }
 0x1d2   : > { %v1426_v57 = vadd.f32 %v3824_v58, %v1425_v54  ;;  %v1585_v63 = vmax.f32 %v1423_v49, 0.0  ;;  %v4088_v49 = vsel %vm1676_vm2, %v2418_v19, -inf }
 0x1d3   : > { %v1588_v60 = vmax.f32 %v1434_v53, 0.0 }
 0x1d4   : > { %v1586_v0 = vmax.f32 %v1426_v57, 0.0  ;;  %v3415_v1 = vpop.f32.mrb[8].mxu1 }
 0x1d5   : > { %v1656_v4 = vpack.c.bf16 %v1588_v60, %v1587_v59  ;;  %v1944_v5 = vadd.f32 %v3415_v1, %v4017_v27  ;;  %v1935_v58 = vpop.f32.mrb[9].mxu1  ;;  %v2419_v60 = vmax.f32 %v1923_v24, 0.0 }
 0x1d6   : > { %v1655_v8 = vpack.c.bf16 %v1586_v0, %v1585_v63  ;;  %v1936_v9 = vadd.f32 %v4017_v27, %v1935_v58  ;;  %v3397_v10 = vpop.f32.mrb[120].mxu0  ;;  %v3416_v11 = vpop.f32.mrb[10].mxu1 }
 0x1d7   : > { %v2424_v13 = vmax.f32 %v1944_v5, 0.0  ;;  %v1447_v15 = vadd.f32 %v4052_v14, %v3397_v10  ;;  %v1947_v16 = vadd.f32 %v3416_v11, %v4017_v27  ;;  %v1438_v17 = vpop.f32.mrb[121].mxu0  ;;  %v1938_v18 = vpop.f32.mrb[11].mxu1 }
 0x1d8   : > { %v2422_v20 = vmax.f32 %v1936_v9, 0.0  ;;  %v1439_v21 = vadd.f32 %v4052_v14, %v1438_v17  ;;  %v1939_v22 = vadd.f32 %v4017_v27, %v1938_v18  ;;  %v3398_v23 = vpop.f32.mrb[122].mxu0  ;;  %3521 = vmatprep.mubr.msk.bf16.mxu1 %vm1676_vm2, %v1655_v8  ;;  %v2697_v18 = vsel %vm1676_vm2, %v2419_v60, -inf }
 0x1d9   : > { %v4061_v25 = vsel %vm1676_vm2, %v2424_v13, -inf  ;;  %v2425_v26 = vmax.f32 %v1947_v16, 0.0  ;;  %v1450_v28 = vadd.f32 %v4052_v14, %v3398_v23  ;;  %v1441_v29 = vpop.f32.mrb[123].mxu0  ;;  %3522 = vmatmul.mubr.msk.bf16.gmra.mrb[116].mxu1 %vm1676_vm2, %v1656_v4  ;;  %v1591_v32 = vmax.f32 %v1447_v15, 0.0 }
 0x1da   : > { %v2606_v30 = vmax.f32 %v4034_v61, %v4061_v25  ;;  %v4068_v31 = vsel %vm1676_vm2, %v2422_v20, -inf  ;;  %v2423_v33 = vmax.f32 %v1939_v22, 0.0  ;;  %v1442_v37 = vadd.f32 %v4052_v14, %v1441_v29 }
 0x1db   : > { %v2544_v34 = vmax.f32 %v4038_v2, %v4068_v31  ;;  %v4073_v35 = vsel %vm1676_vm2, %v2425_v26, -inf  ;;  %v1592_v36 = vmax.f32 %v1450_v28, 0.0  ;;  %v1589_v40 = vmax.f32 %v1439_v21, 0.0 }
 0x1dc   : > { %v2637_v39 = vmax.f32 %v4041_v3, %v4073_v35  ;;  %v4079_v41 = vsel %vm1676_vm2, %v2423_v33, -inf  ;;  %v3419_v42 = vpop.f32.mrb[12].mxu1  ;;  %v1590_v45 = vmax.f32 %v1442_v37, 0.0  ;;  %v4096_v4 = vsel %vm1676_vm2, %v2421_v38, -inf }
 0x1dd   : > { %v2575_v43 = vmax.f32 %v4045_v6, %v4079_v41  ;;  %v1658_v44 = vpack.c.bf16 %v1592_v36, %v1591_v32  ;;  %v1960_v46 = vadd.f32 %v3419_v42, %v4017_v27  ;;  %v1951_v47 = vpop.f32.mrb[13].mxu1 }
 0x1de   : > { %v1952_v50 = vadd.f32 %v4017_v27, %v1951_v47  ;;  %v3401_v51 = vpop.f32.mrb[124].mxu0  ;;  %v3420_v52 = vpop.f32.mrb[14].mxu1  ;;  %v1657_v53 = vpack.c.bf16 %v1590_v45, %v1589_v40 }
 0x1df   : > { %v2428_v54 = vmax.f32 %v1960_v46, 0.0  ;;  %v1463_v55 = vadd.f32 %v4052_v14, %v3401_v51  ;;  %v1963_v56 = vadd.f32 %v3420_v52, %v4017_v27  ;;  %v1454_v57 = vpop.f32.mrb[125].mxu0  ;;  %v1954_v59 = vpop.f32.mrb[15].mxu1 }
 0x1e0   : > { %v2426_v62 = vmax.f32 %v1952_v50, 0.0  ;;  %v1455_v63 = vadd.f32 %v4052_v14, %v1454_v57  ;;  %v1955_v0 = vadd.f32 %v4017_v27, %v1954_v59  ;;  %v3402_v1 = vpop.f32.mrb[126].mxu0  ;;  %3525 = vmatprep.mubr.msk.bf16.mxu1 %vm1676_vm2, %v1657_v53 }
 0x1e1   : > { %v2729_v5 = vsel %vm1676_vm2, %v2428_v54, -inf  ;;  %v2429_v58 = vmax.f32 %v1963_v56, 0.0  ;;  %v1466_v7 = vadd.f32 %v4052_v14, %v3402_v1  ;;  %v1457_v8 = vpop.f32.mrb[127].mxu0  ;;  %v1595_v11 = vmax.f32 %v1463_v55, 0.0  ;;  %3526 = vmatmul.mubr.msk.bf16.gmra.mrb[120].mxu1 %vm1676_vm2, %v1658_v44 }
 0x1e2   : > { %v2730_v9 = vmax.f32 %v4085_v48, %v2729_v5  ;;  %v2667_v10 = vsel %vm1676_vm2, %v2426_v62, -inf  ;;  %v2427_v12 = vmax.f32 %v1955_v0, 0.0  ;;  %v1458_v17 = vadd.f32 %v4052_v14, %v1457_v8 }
 0x1e3   : > { %v2668_v13 = vmax.f32 %v4088_v49, %v2667_v10  ;;  %v2760_v15 = vsel %vm1676_vm2, %v2429_v58, -inf  ;;  %v1596_v16 = vmax.f32 %v1466_v7, 0.0  ;;  %v1593_v20 = vmax.f32 %v1455_v63, 0.0 }
 0x1e4   : > { %v2761_v19 = vmax.f32 %v4096_v4, %v2760_v15  ;;  %v2698_v21 = vsel %vm1676_vm2, %v2427_v12, -inf  ;;  %v3423_v22 = vpop.f32.mrb[16].mxu1  ;;  %v1594_v26 = vmax.f32 %v1458_v17, 0.0 }
 0x1e5   : > { %v2699_v23 = vmax.f32 %v2697_v18, %v2698_v21  ;;  %v1660_v24 = vpack.c.bf16 %v1596_v16, %v1595_v11  ;;  %v1976_v28 = vadd.f32 %v3423_v22, %v4017_v27  ;;  %v1967_v29 = vpop.f32.mrb[17].mxu1 }
 0x1e6   : > { %v1968_v32 = vadd.f32 %v4017_v27, %v1967_v29  ;;  %v3424_v33 = vpop.f32.mrb[18].mxu1  ;;  %v1659_v36 = vpack.c.bf16 %v1594_v26, %v1593_v20 }
 0x1e7   : > { %v2432_v37 = vmax.f32 %v1976_v28, 0.0  ;;  %v1979_v14 = vadd.f32 %v3424_v33, %v4017_v27  ;;  %v1970_v38 = vpop.f32.mrb[19].mxu1 }
 0x1e8   : > { %v2430_v40 = vmax.f32 %v1968_v32, 0.0  ;;  %v1971_v42 = vadd.f32 %v4017_v27, %v1970_v38  ;;  %3529 = vmatprep.mubr.msk.bf16.mxu1 %vm1676_vm2, %v1659_v36 }
 0x1e9   : > { %v2607_v44 = vsel %vm1676_vm2, %v2432_v37, -inf  ;;  %v2433_v45 = vmax.f32 %v1979_v14, 0.0  ;;  %3530 = vmatmul.mubr.msk.bf16.gmra.mrb[124].mxu1 %vm1676_vm2, %v1660_v24 }
 0x1ea   : > { %v4119_v46 = vmax.f32 %v2606_v30, %v2607_v44  ;;  %v2545_v47 = vsel %vm1676_vm2, %v2430_v40, -inf  ;;  %v2431_v48 = vmax.f32 %v1971_v42, 0.0 }
 0x1eb   : > { %v4126_v49 = vmax.f32 %v2544_v34, %v2545_v47  ;;  %v2638_v50 = vsel %vm1676_vm2, %v2433_v45, -inf }
 0x1ec   : > { %v4132_v51 = vmax.f32 %v2637_v39, %v2638_v50  ;;  %v2576_v61 = vsel %vm1676_vm2, %v2431_v48, -inf  ;;  %v3427_v25 = vpop.f32.mrb[20].mxu1 }
 0x1ed   : > { %v4138_v30 = vmax.f32 %v2575_v43, %v2576_v61  ;;  %v1992_v52 = vadd.f32 %v3427_v25, %v4017_v27  ;;  %v1983_v2 = vpop.f32.mrb[21].mxu1 }
 0x1ee   : > { %v1984_v31 = vadd.f32 %v4017_v27, %v1983_v2  ;;  %v3428_v34 = vpop.f32.mrb[22].mxu1 }
 0x1ef   : > { %v2436_v53 = vmax.f32 %v1992_v52, 0.0  ;;  %v1995_v54 = vadd.f32 %v3428_v34, %v4017_v27  ;;  %v1986_v3 = vpop.f32.mrb[23].mxu1 }
 0x1f0   : > { %v2434_v35 = vmax.f32 %v1984_v31, 0.0  ;;  %v1987_v39 = vadd.f32 %v4017_v27, %v1986_v3 }
 0x1f1   : > { %v2731_v55 = vsel %vm1676_vm2, %v2436_v53, -inf  ;;  %v2437_v56 = vmax.f32 %v1995_v54, 0.0 }
 0x1f2   : > { %v4145_v57 = vmax.f32 %v2730_v9, %v2731_v55  ;;  %v2669_v6 = vsel %vm1676_vm2, %v2434_v35, -inf  ;;  %v2435_v41 = vmax.f32 %v1987_v39, 0.0 }
 0x1f3   : > { %v4148_v43 = vmax.f32 %v2668_v13, %v2669_v6  ;;  %v2762_v59 = vsel %vm1676_vm2, %v2437_v56, -inf }
 0x1f4   : > { %v4151_v60 = vmax.f32 %v2761_v19, %v2762_v59  ;;  %v2700_v62 = vsel %vm1676_vm2, %v2435_v41, -inf  ;;  %v3431_v63 = vpop.f32.mrb[24].mxu1 }
 0x1f5   : > { %v4154_v0 = vmax.f32 %v2699_v23, %v2700_v62  ;;  %v2008_v1 = vadd.f32 %v3431_v63, %v4017_v27  ;;  %v1999_v4 = vpop.f32.mrb[25].mxu1 }
 0x1f6   : > { %v2000_v5 = vadd.f32 %v4017_v27, %v1999_v4  ;;  %v3432_v58 = vpop.f32.mrb[26].mxu1 }
 0x1f7   : > { %v2440_v7 = vmax.f32 %v2008_v1, 0.0  ;;  %v2011_v8 = vadd.f32 %v3432_v58, %v4017_v27  ;;  %v2002_v9 = vpop.f32.mrb[27].mxu1 }
 0x1f8   : > { %v2438_v10 = vmax.f32 %v2000_v5, 0.0  ;;  %v2003_v11 = vadd.f32 %v4017_v27, %v2002_v9 }
 0x1f9   : > { %v2609_v12 = vsel %vm1676_vm2, %v2440_v7, -inf  ;;  %v2441_v13 = vmax.f32 %v2011_v8, 0.0 }
 0x1fa   : > { %v2610_v15 = vmax.f32 %v4119_v46, %v2609_v12  ;;  %v2547_v16 = vsel %vm1676_vm2, %v2438_v10, -inf  ;;  %v2439_v17 = vmax.f32 %v2003_v11, 0.0 }
 0x1fb   : > { %v2548_v18 = vmax.f32 %v4126_v49, %v2547_v16  ;;  %v2640_v19 = vsel %vm1676_vm2, %v2441_v13, -inf }
 0x1fc   : > { %v2641_v20 = vmax.f32 %v4132_v51, %v2640_v19  ;;  %v2578_v21 = vsel %vm1676_vm2, %v2439_v17, -inf  ;;  %v3435_v22 = vpop.f32.mrb[28].mxu1 }
 0x1fd   : > { %v2579_v23 = vmax.f32 %v4138_v30, %v2578_v21  ;;  %v2024_v24 = vadd.f32 %v3435_v22, %v4017_v27  ;;  %v2015_v26 = vpop.f32.mrb[29].mxu1 }
 0x1fe   : > { %v2016_v28 = vadd.f32 %v4017_v27, %v2015_v26  ;;  %v3436_v29 = vpop.f32.mrb[30].mxu1 }
 0x1ff   : > { %v2444_v32 = vmax.f32 %v2024_v24, 0.0  ;;  %v2027_v33 = vadd.f32 %v3436_v29, %v4017_v27  ;;  %v2018_v36 = vpop.f32.mrb[31].mxu1 }
 0x200   : > { %v2442_v37 = vmax.f32 %v2016_v28, 0.0  ;;  %v2019_v14 = vadd.f32 %v4017_v27, %v2018_v36 }
 0x201   : > { %v2733_v38 = vsel %vm1676_vm2, %v2444_v32, -inf  ;;  %v2445_v40 = vmax.f32 %v2027_v33, 0.0 }
 0x202   : > { %v2734_v42 = vmax.f32 %v4145_v57, %v2733_v38  ;;  %v2671_v44 = vsel %vm1676_vm2, %v2442_v37, -inf  ;;  %v2443_v45 = vmax.f32 %v2019_v14, 0.0 }
 0x203   : > { %v2672_v46 = vmax.f32 %v4148_v43, %v2671_v44  ;;  %v2764_v47 = vsel %vm1676_vm2, %v2445_v40, -inf }
 0x204   : > { %v2765_v48 = vmax.f32 %v4151_v60, %v2764_v47  ;;  %v2702_v49 = vsel %vm1676_vm2, %v2443_v45, -inf  ;;  %v3439_v50 = vpop.f32.mrb[32].mxu1 }
 0x205   : > { %v2703_v51 = vmax.f32 %v4154_v0, %v2702_v49  ;;  %v2040_v61 = vadd.f32 %v3439_v50, %v4017_v27  ;;  %v2031_v25 = vpop.f32.mrb[33].mxu1 }
 0x206   : > { %v2032_v30 = vadd.f32 %v4017_v27, %v2031_v25  ;;  %v3440_v52 = vpop.f32.mrb[34].mxu1 }
 0x207   : > { %v2448_v2 = vmax.f32 %v2040_v61, 0.0  ;;  %v2043_v31 = vadd.f32 %v3440_v52, %v4017_v27  ;;  %v2034_v34 = vpop.f32.mrb[35].mxu1 }
 0x208   : > { %v2446_v53 = vmax.f32 %v2032_v30, 0.0  ;;  %v2035_v54 = vadd.f32 %v4017_v27, %v2034_v34 }
 0x209   : > { %v2611_v3 = vsel %vm1676_vm2, %v2448_v2, -inf  ;;  %v2449_v35 = vmax.f32 %v2043_v31, 0.0 }
 0x20a   : > { %v4185_v39 = vmax.f32 %v2610_v15, %v2611_v3  ;;  %v2549_v55 = vsel %vm1676_vm2, %v2446_v53, -inf  ;;  %v2447_v56 = vmax.f32 %v2035_v54, 0.0 }
 0x20b   : > { %v4188_v57 = vmax.f32 %v2548_v18, %v2549_v55  ;;  %v2642_v6 = vsel %vm1676_vm2, %v2449_v35, -inf }
 0x20c   : > { %v4191_v41 = vmax.f32 %v2641_v20, %v2642_v6  ;;  %v2580_v43 = vsel %vm1676_vm2, %v2447_v56, -inf  ;;  %v3443_v59 = vpop.f32.mrb[36].mxu1 }
 0x20d   : > { %v4194_v60 = vmax.f32 %v2579_v23, %v2580_v43  ;;  %v2056_v62 = vadd.f32 %v3443_v59, %v4017_v27  ;;  %v2047_v63 = vpop.f32.mrb[37].mxu1 }
 0x20e   : > { %v2048_v0 = vadd.f32 %v4017_v27, %v2047_v63  ;;  %v3444_v1 = vpop.f32.mrb[38].mxu1 }
 0x20f   : > { %v2452_v4 = vmax.f32 %v2056_v62, 0.0  ;;  %v2059_v5 = vadd.f32 %v3444_v1, %v4017_v27  ;;  %v2050_v58 = vpop.f32.mrb[39].mxu1 }
 0x210   : > { %v2450_v7 = vmax.f32 %v2048_v0, 0.0  ;;  %v2051_v8 = vadd.f32 %v4017_v27, %v2050_v58 }
 0x211   : > { %v2735_v9 = vsel %vm1676_vm2, %v2452_v4, -inf  ;;  %v2453_v10 = vmax.f32 %v2059_v5, 0.0 }
 0x212   : > { %v4201_v11 = vmax.f32 %v2734_v42, %v2735_v9  ;;  %v2673_v12 = vsel %vm1676_vm2, %v2450_v7, -inf  ;;  %v2451_v13 = vmax.f32 %v2051_v8, 0.0 }
 0x213   : > { %v4204_v15 = vmax.f32 %v2672_v46, %v2673_v12  ;;  %v2766_v16 = vsel %vm1676_vm2, %v2453_v10, -inf }
 0x214   : > { %v4207_v17 = vmax.f32 %v2765_v48, %v2766_v16  ;;  %v2704_v18 = vsel %vm1676_vm2, %v2451_v13, -inf  ;;  %v3447_v19 = vpop.f32.mrb[40].mxu1 }
 0x215   : > { %v4210_v20 = vmax.f32 %v2703_v51, %v2704_v18  ;;  %v2072_v21 = vadd.f32 %v3447_v19, %v4017_v27  ;;  %v2063_v22 = vpop.f32.mrb[41].mxu1 }
 0x216   : > { %v2064_v23 = vadd.f32 %v4017_v27, %v2063_v22  ;;  %v3448_v24 = vpop.f32.mrb[42].mxu1 }
 0x217   : > { %v2456_v26 = vmax.f32 %v2072_v21, 0.0  ;;  %v2075_v28 = vadd.f32 %v3448_v24, %v4017_v27  ;;  %v2066_v29 = vpop.f32.mrb[43].mxu1 }
 0x218   : > { %v2454_v32 = vmax.f32 %v2064_v23, 0.0  ;;  %v2067_v33 = vadd.f32 %v4017_v27, %v2066_v29 }
 0x219   : > { %v2613_v36 = vsel %vm1676_vm2, %v2456_v26, -inf  ;;  %v2457_v37 = vmax.f32 %v2075_v28, 0.0 }
 0x21a   : > { %v2614_v14 = vmax.f32 %v4185_v39, %v2613_v36  ;;  %v2551_v38 = vsel %vm1676_vm2, %v2454_v32, -inf  ;;  %v2455_v40 = vmax.f32 %v2067_v33, 0.0 }
 0x21b   : > { %v2552_v42 = vmax.f32 %v4188_v57, %v2551_v38  ;;  %v2644_v44 = vsel %vm1676_vm2, %v2457_v37, -inf }
 0x21c   : > { %v2645_v45 = vmax.f32 %v4191_v41, %v2644_v44  ;;  %v2582_v46 = vsel %vm1676_vm2, %v2455_v40, -inf  ;;  %v3451_v47 = vpop.f32.mrb[44].mxu1 }
 0x21d   : > { %v2583_v48 = vmax.f32 %v4194_v60, %v2582_v46  ;;  %v2088_v49 = vadd.f32 %v3451_v47, %v4017_v27  ;;  %v2079_v50 = vpop.f32.mrb[45].mxu1 }
 0x21e   : > { %v2080_v51 = vadd.f32 %v4017_v27, %v2079_v50  ;;  %v3452_v61 = vpop.f32.mrb[46].mxu1 }
 0x21f   : > { %v2460_v25 = vmax.f32 %v2088_v49, 0.0  ;;  %v2091_v30 = vadd.f32 %v3452_v61, %v4017_v27  ;;  %v2082_v52 = vpop.f32.mrb[47].mxu1 }
 0x220   : > { %v2458_v2 = vmax.f32 %v2080_v51, 0.0  ;;  %v2083_v31 = vadd.f32 %v4017_v27, %v2082_v52 }
 0x221   : > { %v2737_v34 = vsel %vm1676_vm2, %v2460_v25, -inf  ;;  %v2461_v53 = vmax.f32 %v2091_v30, 0.0 }
 0x222   : > { %v2738_v54 = vmax.f32 %v4201_v11, %v2737_v34  ;;  %v2675_v3 = vsel %vm1676_vm2, %v2458_v2, -inf  ;;  %v2459_v35 = vmax.f32 %v2083_v31, 0.0 }
 0x223   : > { %v2676_v39 = vmax.f32 %v4204_v15, %v2675_v3  ;;  %v2768_v55 = vsel %vm1676_vm2, %v2461_v53, -inf }
 0x224   : > { %v2769_v56 = vmax.f32 %v4207_v17, %v2768_v55  ;;  %v2706_v57 = vsel %vm1676_vm2, %v2459_v35, -inf  ;;  %v3455_v6 = vpop.f32.mrb[48].mxu1 }
 0x225   : > { %v2707_v41 = vmax.f32 %v4210_v20, %v2706_v57  ;;  %v2104_v43 = vadd.f32 %v3455_v6, %v4017_v27  ;;  %v2095_v59 = vpop.f32.mrb[49].mxu1 }
 0x226   : > { %v2096_v60 = vadd.f32 %v4017_v27, %v2095_v59  ;;  %v3456_v62 = vpop.f32.mrb[50].mxu1 }
 0x227   : > { %v2464_v63 = vmax.f32 %v2104_v43, 0.0  ;;  %v2107_v0 = vadd.f32 %v3456_v62, %v4017_v27  ;;  %v2098_v1 = vpop.f32.mrb[51].mxu1 }
 0x228   : > { %v2462_v4 = vmax.f32 %v2096_v60, 0.0  ;;  %v2099_v5 = vadd.f32 %v4017_v27, %v2098_v1 }
 0x229   : > { %v2615_v58 = vsel %vm1676_vm2, %v2464_v63, -inf  ;;  %v2465_v7 = vmax.f32 %v2107_v0, 0.0 }
 0x22a   : > { %v4241_v8 = vmax.f32 %v2614_v14, %v2615_v58  ;;  %v2553_v9 = vsel %vm1676_vm2, %v2462_v4, -inf  ;;  %v2463_v10 = vmax.f32 %v2099_v5, 0.0 }
 0x22b   : > { %v4244_v11 = vmax.f32 %v2552_v42, %v2553_v9  ;;  %v2646_v12 = vsel %vm1676_vm2, %v2465_v7, -inf }
 0x22c   : > { %v4247_v13 = vmax.f32 %v2645_v45, %v2646_v12  ;;  %v2584_v15 = vsel %vm1676_vm2, %v2463_v10, -inf  ;;  %v3459_v16 = vpop.f32.mrb[52].mxu1 }
 0x22d   : > { %v4250_v17 = vmax.f32 %v2583_v48, %v2584_v15  ;;  %v2120_v18 = vadd.f32 %v3459_v16, %v4017_v27  ;;  %v2111_v19 = vpop.f32.mrb[53].mxu1 }
 0x22e   : > { %v2112_v20 = vadd.f32 %v4017_v27, %v2111_v19  ;;  %v3460_v21 = vpop.f32.mrb[54].mxu1 }
 0x22f   : > { %v2468_v22 = vmax.f32 %v2120_v18, 0.0  ;;  %v2123_v23 = vadd.f32 %v3460_v21, %v4017_v27  ;;  %v2114_v24 = vpop.f32.mrb[55].mxu1 }
 0x230   : > { %v2466_v26 = vmax.f32 %v2112_v20, 0.0  ;;  %v2115_v28 = vadd.f32 %v4017_v27, %v2114_v24 }
 0x231   : > { %v2739_v29 = vsel %vm1676_vm2, %v2468_v22, -inf  ;;  %v2469_v32 = vmax.f32 %v2123_v23, 0.0 }
 0x232   : > { %v4257_v33 = vmax.f32 %v2738_v54, %v2739_v29  ;;  %v2677_v36 = vsel %vm1676_vm2, %v2466_v26, -inf  ;;  %v2467_v37 = vmax.f32 %v2115_v28, 0.0 }
 0x233   : > { %v4260_v14 = vmax.f32 %v2676_v39, %v2677_v36  ;;  %v2770_v38 = vsel %vm1676_vm2, %v2469_v32, -inf }
 0x234   : > { %v4263_v40 = vmax.f32 %v2769_v56, %v2770_v38  ;;  %v2708_v42 = vsel %vm1676_vm2, %v2467_v37, -inf  ;;  %v3463_v44 = vpop.f32.mrb[56].mxu1 }
 0x235   : > { %v4266_v45 = vmax.f32 %v2707_v41, %v2708_v42  ;;  %v2136_v46 = vadd.f32 %v3463_v44, %v4017_v27  ;;  %v2127_v47 = vpop.f32.mrb[57].mxu1 }
 0x236   : > { %v2128_v48 = vadd.f32 %v4017_v27, %v2127_v47  ;;  %v3464_v49 = vpop.f32.mrb[58].mxu1 }
 0x237   : > { %v2472_v50 = vmax.f32 %v2136_v46, 0.0  ;;  %v2139_v51 = vadd.f32 %v3464_v49, %v4017_v27  ;;  %v2130_v61 = vpop.f32.mrb[59].mxu1 }
 0x238   : > { %v2470_v25 = vmax.f32 %v2128_v48, 0.0  ;;  %v2131_v30 = vadd.f32 %v4017_v27, %v2130_v61 }
 0x239   : > { %v2617_v52 = vsel %vm1676_vm2, %v2472_v50, -inf  ;;  %v2473_v2 = vmax.f32 %v2139_v51, 0.0 }
 0x23a   : > { %v2618_v31 = vmax.f32 %v4241_v8, %v2617_v52  ;;  %v2555_v34 = vsel %vm1676_vm2, %v2470_v25, -inf  ;;  %v2471_v53 = vmax.f32 %v2131_v30, 0.0 }
 0x23b   : > { %v2556_v54 = vmax.f32 %v4244_v11, %v2555_v34  ;;  %v2648_v3 = vsel %vm1676_vm2, %v2473_v2, -inf }
 0x23c   : > { %v2649_v35 = vmax.f32 %v4247_v13, %v2648_v3  ;;  %v2586_v39 = vsel %vm1676_vm2, %v2471_v53, -inf  ;;  %v3467_v55 = vpop.f32.mrb[60].mxu1 }
 0x23d   : > { %v2587_v56 = vmax.f32 %v4250_v17, %v2586_v39  ;;  %v2152_v57 = vadd.f32 %v3467_v55, %v4017_v27  ;;  %v2143_v6 = vpop.f32.mrb[61].mxu1 }
 0x23e   : > { %v2144_v41 = vadd.f32 %v4017_v27, %v2143_v6  ;;  %v3468_v43 = vpop.f32.mrb[62].mxu1 }
 0x23f   : > { %v2476_v59 = vmax.f32 %v2152_v57, 0.0  ;;  %v2155_v60 = vadd.f32 %v3468_v43, %v4017_v27  ;;  %v2146_v62 = vpop.f32.mrb[63].mxu1 }
 0x240   : > { %v2474_v63 = vmax.f32 %v2144_v41, 0.0  ;;  %v2147_v0 = vadd.f32 %v4017_v27, %v2146_v62 }
 0x241   : > { %v2741_v1 = vsel %vm1676_vm2, %v2476_v59, -inf  ;;  %v2477_v4 = vmax.f32 %v2155_v60, 0.0 }
 0x242   : > { %v2742_v5 = vmax.f32 %v4257_v33, %v2741_v1  ;;  %v2679_v58 = vsel %vm1676_vm2, %v2474_v63, -inf  ;;  %v2475_v7 = vmax.f32 %v2147_v0, 0.0 }
 0x243   : > { %v2680_v8 = vmax.f32 %v4260_v14, %v2679_v58  ;;  %v2772_v9 = vsel %vm1676_vm2, %v2477_v4, -inf }
 0x244   : > { %v2773_v10 = vmax.f32 %v4263_v40, %v2772_v9  ;;  %v2710_v11 = vsel %vm1676_vm2, %v2475_v7, -inf  ;;  %v3471_v12 = vpop.f32.mrb[64].mxu1 }
 0x245   : > { %v2711_v13 = vmax.f32 %v4266_v45, %v2710_v11  ;;  %v2168_v15 = vadd.f32 %v3471_v12, %v4017_v27  ;;  %v2159_v16 = vpop.f32.mrb[65].mxu1 }
 0x246   : > { %v2160_v17 = vadd.f32 %v4017_v27, %v2159_v16  ;;  %v3472_v18 = vpop.f32.mrb[66].mxu1 }
 0x247   : > { %v2480_v19 = vmax.f32 %v2168_v15, 0.0  ;;  %v2171_v20 = vadd.f32 %v3472_v18, %v4017_v27  ;;  %v2162_v21 = vpop.f32.mrb[67].mxu1 }
 0x248   : > { %v2478_v22 = vmax.f32 %v2160_v17, 0.0  ;;  %v2163_v23 = vadd.f32 %v4017_v27, %v2162_v21 }
 0x249   : > { %v2619_v24 = vsel %vm1676_vm2, %v2480_v19, -inf  ;;  %v2481_v26 = vmax.f32 %v2171_v20, 0.0 }
 0x24a   : > { %v4297_v28 = vmax.f32 %v2618_v31, %v2619_v24  ;;  %v2557_v29 = vsel %vm1676_vm2, %v2478_v22, -inf  ;;  %v2479_v32 = vmax.f32 %v2163_v23, 0.0 }
 0x24b   : > { %v4300_v33 = vmax.f32 %v2556_v54, %v2557_v29  ;;  %v2650_v36 = vsel %vm1676_vm2, %v2481_v26, -inf }
 0x24c   : > { %v4303_v37 = vmax.f32 %v2649_v35, %v2650_v36  ;;  %v2588_v14 = vsel %vm1676_vm2, %v2479_v32, -inf  ;;  %v3475_v38 = vpop.f32.mrb[68].mxu1 }
 0x24d   : > { %v4306_v40 = vmax.f32 %v2587_v56, %v2588_v14  ;;  %v2184_v42 = vadd.f32 %v3475_v38, %v4017_v27  ;;  %v2175_v44 = vpop.f32.mrb[69].mxu1 }
 0x24e   : > { %v2176_v45 = vadd.f32 %v4017_v27, %v2175_v44  ;;  %v3476_v46 = vpop.f32.mrb[70].mxu1 }
 0x24f   : > { %v2484_v47 = vmax.f32 %v2184_v42, 0.0  ;;  %v2187_v48 = vadd.f32 %v3476_v46, %v4017_v27  ;;  %v2178_v49 = vpop.f32.mrb[71].mxu1 }
 0x250   : > { %v2482_v50 = vmax.f32 %v2176_v45, 0.0  ;;  %v2179_v51 = vadd.f32 %v4017_v27, %v2178_v49 }
 0x251   : > { %v2743_v61 = vsel %vm1676_vm2, %v2484_v47, -inf  ;;  %v2485_v25 = vmax.f32 %v2187_v48, 0.0 }
 0x252   : > { %v4313_v30 = vmax.f32 %v2742_v5, %v2743_v61  ;;  %v2681_v52 = vsel %vm1676_vm2, %v2482_v50, -inf  ;;  %v2483_v2 = vmax.f32 %v2179_v51, 0.0 }
 0x253   : > { %v4316_v31 = vmax.f32 %v2680_v8, %v2681_v52  ;;  %v2774_v34 = vsel %vm1676_vm2, %v2485_v25, -inf }
 0x254   : > { %v4319_v53 = vmax.f32 %v2773_v10, %v2774_v34  ;;  %v2712_v54 = vsel %vm1676_vm2, %v2483_v2, -inf  ;;  %v3479_v3 = vpop.f32.mrb[72].mxu1 }
 0x255   : > { %v4322_v35 = vmax.f32 %v2711_v13, %v2712_v54  ;;  %v2200_v39 = vadd.f32 %v3479_v3, %v4017_v27  ;;  %v2191_v55 = vpop.f32.mrb[73].mxu1 }
 0x256   : > { %v2192_v56 = vadd.f32 %v4017_v27, %v2191_v55  ;;  %v3480_v57 = vpop.f32.mrb[74].mxu1 }
 0x257   : > { %v2488_v6 = vmax.f32 %v2200_v39, 0.0  ;;  %v2203_v41 = vadd.f32 %v3480_v57, %v4017_v27  ;;  %v2194_v43 = vpop.f32.mrb[75].mxu1 }
 0x258   : > { %v2486_v59 = vmax.f32 %v2192_v56, 0.0  ;;  %v2195_v60 = vadd.f32 %v4017_v27, %v2194_v43 }
 0x259   : > { %v2621_v62 = vsel %vm1676_vm2, %v2488_v6, -inf  ;;  %v2489_v63 = vmax.f32 %v2203_v41, 0.0 }
 0x25a   : > { %v2622_v0 = vmax.f32 %v4297_v28, %v2621_v62  ;;  %v2559_v1 = vsel %vm1676_vm2, %v2486_v59, -inf  ;;  %v2487_v4 = vmax.f32 %v2195_v60, 0.0 }
 0x25b   : > { %v2560_v5 = vmax.f32 %v4300_v33, %v2559_v1  ;;  %v2652_v58 = vsel %vm1676_vm2, %v2489_v63, -inf }
 0x25c   : > { %v2653_v7 = vmax.f32 %v4303_v37, %v2652_v58  ;;  %v2590_v8 = vsel %vm1676_vm2, %v2487_v4, -inf  ;;  %v3483_v9 = vpop.f32.mrb[76].mxu1 }
 0x25d   : > { %v2591_v10 = vmax.f32 %v4306_v40, %v2590_v8  ;;  %v2216_v11 = vadd.f32 %v3483_v9, %v4017_v27  ;;  %v2207_v12 = vpop.f32.mrb[77].mxu1 }
 0x25e   : > { %v2208_v13 = vadd.f32 %v4017_v27, %v2207_v12  ;;  %v3484_v15 = vpop.f32.mrb[78].mxu1 }
 0x25f   : > { %v2492_v16 = vmax.f32 %v2216_v11, 0.0  ;;  %v2219_v17 = vadd.f32 %v3484_v15, %v4017_v27  ;;  %v2210_v18 = vpop.f32.mrb[79].mxu1 }
 0x260   : > { %v2490_v19 = vmax.f32 %v2208_v13, 0.0  ;;  %v2211_v20 = vadd.f32 %v4017_v27, %v2210_v18 }
 0x261   : > { %v2745_v21 = vsel %vm1676_vm2, %v2492_v16, -inf  ;;  %v2493_v22 = vmax.f32 %v2219_v17, 0.0 }
 0x262   : > { %v2746_v23 = vmax.f32 %v4313_v30, %v2745_v21  ;;  %v2683_v24 = vsel %vm1676_vm2, %v2490_v19, -inf  ;;  %v2491_v26 = vmax.f32 %v2211_v20, 0.0 }
 0x263   : > { %v2684_v28 = vmax.f32 %v4316_v31, %v2683_v24  ;;  %v2776_v29 = vsel %vm1676_vm2, %v2493_v22, -inf }
 0x264   : > { %v2777_v32 = vmax.f32 %v4319_v53, %v2776_v29  ;;  %v2714_v33 = vsel %vm1676_vm2, %v2491_v26, -inf  ;;  %v3487_v36 = vpop.f32.mrb[80].mxu1 }
 0x265   : > { %v2715_v37 = vmax.f32 %v4322_v35, %v2714_v33  ;;  %v2232_v14 = vadd.f32 %v3487_v36, %v4017_v27  ;;  %v2223_v38 = vpop.f32.mrb[81].mxu1 }
 0x266   : > { %v2224_v40 = vadd.f32 %v4017_v27, %v2223_v38  ;;  %v3488_v42 = vpop.f32.mrb[82].mxu1 }
 0x267   : > { %v2496_v44 = vmax.f32 %v2232_v14, 0.0  ;;  %v2235_v45 = vadd.f32 %v3488_v42, %v4017_v27  ;;  %v2226_v46 = vpop.f32.mrb[83].mxu1 }
 0x268   : > { %v2494_v47 = vmax.f32 %v2224_v40, 0.0  ;;  %v2227_v48 = vadd.f32 %v4017_v27, %v2226_v46 }
 0x269   : > { %v2623_v49 = vsel %vm1676_vm2, %v2496_v44, -inf  ;;  %v2497_v50 = vmax.f32 %v2235_v45, 0.0 }
 0x26a   : > { %v4353_v51 = vmax.f32 %v2622_v0, %v2623_v49  ;;  %v2561_v61 = vsel %vm1676_vm2, %v2494_v47, -inf  ;;  %v2495_v25 = vmax.f32 %v2227_v48, 0.0 }
 0x26b   : > { %v4356_v30 = vmax.f32 %v2560_v5, %v2561_v61  ;;  %v2654_v52 = vsel %vm1676_vm2, %v2497_v50, -inf }
 0x26c   : > { %v4359_v2 = vmax.f32 %v2653_v7, %v2654_v52  ;;  %v2592_v31 = vsel %vm1676_vm2, %v2495_v25, -inf  ;;  %v3491_v34 = vpop.f32.mrb[84].mxu1 }
 0x26d   : > { %v4362_v53 = vmax.f32 %v2591_v10, %v2592_v31  ;;  %v2248_v54 = vadd.f32 %v3491_v34, %v4017_v27  ;;  %v2239_v3 = vpop.f32.mrb[85].mxu1 }
 0x26e   : > { %v2240_v35 = vadd.f32 %v4017_v27, %v2239_v3  ;;  %v3492_v39 = vpop.f32.mrb[86].mxu1 }
 0x26f   : > { %v2500_v55 = vmax.f32 %v2248_v54, 0.0  ;;  %v2251_v56 = vadd.f32 %v3492_v39, %v4017_v27  ;;  %v2242_v57 = vpop.f32.mrb[87].mxu1 }
 0x270   : > { %v2498_v6 = vmax.f32 %v2240_v35, 0.0  ;;  %v2243_v41 = vadd.f32 %v4017_v27, %v2242_v57 }
 0x271   : > { %v2747_v43 = vsel %vm1676_vm2, %v2500_v55, -inf  ;;  %v2501_v59 = vmax.f32 %v2251_v56, 0.0 }
 0x272   : > { %v4369_v60 = vmax.f32 %v2746_v23, %v2747_v43  ;;  %v2685_v62 = vsel %vm1676_vm2, %v2498_v6, -inf  ;;  %v2499_v63 = vmax.f32 %v2243_v41, 0.0 }
 0x273   : > { %v4372_v0 = vmax.f32 %v2684_v28, %v2685_v62  ;;  %v2778_v1 = vsel %vm1676_vm2, %v2501_v59, -inf }
 0x274   : > { %v4375_v4 = vmax.f32 %v2777_v32, %v2778_v1  ;;  %v2716_v5 = vsel %vm1676_vm2, %v2499_v63, -inf  ;;  %v3495_v58 = vpop.f32.mrb[88].mxu1 }
 0x275   : > { %v4378_v7 = vmax.f32 %v2715_v37, %v2716_v5  ;;  %v2264_v8 = vadd.f32 %v3495_v58, %v4017_v27  ;;  %v2255_v9 = vpop.f32.mrb[89].mxu1  ;;  %v4396_v37 = vld [vmem:[%s4532_s4] ss:$0 sm:$0xff] }
 0x276   : > { %v2256_v10 = vadd.f32 %v4017_v27, %v2255_v9  ;;  %v3496_v11 = vpop.f32.mrb[90].mxu1 }
 0x277   : > { %v2504_v12 = vmax.f32 %v2264_v8, 0.0  ;;  %v2267_v13 = vadd.f32 %v3496_v11, %v4017_v27  ;;  %v2258_v15 = vpop.f32.mrb[91].mxu1 }
 0x278   : > { %v2502_v16 = vmax.f32 %v2256_v10, 0.0  ;;  %v2259_v17 = vadd.f32 %v4017_v27, %v2258_v15 }
 0x279   : > { %v2625_v18 = vsel %vm1676_vm2, %v2504_v12, -inf  ;;  %v2505_v19 = vmax.f32 %v2267_v13, 0.0 }
 0x27a   : > { %v2626_v20 = vmax.f32 %v4353_v51, %v2625_v18  ;;  %v2563_v21 = vsel %vm1676_vm2, %v2502_v16, -inf  ;;  %v2503_v22 = vmax.f32 %v2259_v17, 0.0 }
 0x27b   : > { %v2564_v23 = vmax.f32 %v4356_v30, %v2563_v21  ;;  %v2656_v24 = vsel %vm1676_vm2, %v2505_v19, -inf }
 0x27c   : > { %v2657_v26 = vmax.f32 %v4359_v2, %v2656_v24  ;;  %v2594_v28 = vsel %vm1676_vm2, %v2503_v22, -inf  ;;  %v3499_v29 = vpop.f32.mrb[92].mxu1 }
 0x27d   : > { %v2595_v32 = vmax.f32 %v4362_v53, %v2594_v28  ;;  %v2280_v33 = vadd.f32 %v3499_v29, %v4017_v27  ;;  %v2271_v36 = vpop.f32.mrb[93].mxu1 }
 0x27e   : > { %v2272_v14 = vadd.f32 %v4396_v37, %v2271_v36  ;;  %v3500_v38 = vpop.f32.mrb[94].mxu1 }
 0x27f   : > { %v2508_v40 = vmax.f32 %v2280_v33, 0.0  ;;  %v2283_v42 = vadd.f32 %v4396_v37, %v3500_v38  ;;  %v2274_v44 = vpop.f32.mrb[95].mxu1 }
 0x280   : > { %v2506_v45 = vmax.f32 %v2272_v14, 0.0  ;;  %v2275_v46 = vadd.f32 %v4396_v37, %v2274_v44 }
 0x281   : > { %v2749_v47 = vsel %vm1676_vm2, %v2508_v40, -inf  ;;  %v2509_v48 = vmax.f32 %v2283_v42, 0.0 }
 0x282   : > { %v2750_v27 = vmax.f32 %v4369_v60, %v2749_v47  ;;  %v2687_v49 = vsel %vm1676_vm2, %v2506_v45, -inf  ;;  %v2507_v50 = vmax.f32 %v2275_v46, 0.0 }
 0x283   : > { %v2688_v51 = vmax.f32 %v4372_v0, %v2687_v49  ;;  %v2780_v61 = vsel %vm1676_vm2, %v2509_v48, -inf }
 0x284   : > { %v2781_v25 = vmax.f32 %v4375_v4, %v2780_v61  ;;  %v2718_v30 = vsel %vm1676_vm2, %v2507_v50, -inf  ;;  %v3503_v52 = vpop.f32.mrb[96].mxu1 }
 0x285   : > { %v2719_v2 = vmax.f32 %v4378_v7, %v2718_v30  ;;  %v2296_v31 = vadd.f32 %v4396_v37, %v3503_v52  ;;  %v2287_v34 = vpop.f32.mrb[97].mxu1 }
 0x286   : > { %v2288_v53 = vadd.f32 %v4396_v37, %v2287_v34  ;;  %v3504_v54 = vpop.f32.mrb[98].mxu1 }
 0x287   : > { %v2512_v3 = vmax.f32 %v2296_v31, 0.0  ;;  %v2299_v35 = vadd.f32 %v4396_v37, %v3504_v54  ;;  %v2290_v39 = vpop.f32.mrb[99].mxu1 }
 0x288   : > { %v2510_v55 = vmax.f32 %v2288_v53, 0.0  ;;  %v2291_v56 = vadd.f32 %v4396_v37, %v2290_v39 }
 0x289   : > { %v2627_v57 = vsel %vm1676_vm2, %v2512_v3, -inf  ;;  %v2513_v6 = vmax.f32 %v2299_v35, 0.0 }
 0x28a   : > { %v4414_v41 = vmax.f32 %v2626_v20, %v2627_v57  ;;  %v2565_v43 = vsel %vm1676_vm2, %v2510_v55, -inf  ;;  %v2511_v59 = vmax.f32 %v2291_v56, 0.0 }
 0x28b   : > { %v4417_v60 = vmax.f32 %v2564_v23, %v2565_v43  ;;  %v2658_v62 = vsel %vm1676_vm2, %v2513_v6, -inf }
 0x28c   : > { %v4420_v63 = vmax.f32 %v2657_v26, %v2658_v62  ;;  %v2596_v0 = vsel %vm1676_vm2, %v2511_v59, -inf  ;;  %v3507_v1 = vpop.f32.mrb[100].mxu1 }
 0x28d   : > { %v4423_v4 = vmax.f32 %v2595_v32, %v2596_v0  ;;  %v2312_v5 = vadd.f32 %v4396_v37, %v3507_v1  ;;  %v2303_v58 = vpop.f32.mrb[101].mxu1 }
 0x28e   : > { %v2304_v7 = vadd.f32 %v4396_v37, %v2303_v58  ;;  %v3508_v8 = vpop.f32.mrb[102].mxu1 }
 0x28f   : > { %v2516_v9 = vmax.f32 %v2312_v5, 0.0  ;;  %v2315_v10 = vadd.f32 %v4396_v37, %v3508_v8  ;;  %v2306_v11 = vpop.f32.mrb[103].mxu1 }
 0x290   : > { %v2514_v12 = vmax.f32 %v2304_v7, 0.0  ;;  %v2307_v13 = vadd.f32 %v4396_v37, %v2306_v11 }
 0x291   : > { %v2751_v15 = vsel %vm1676_vm2, %v2516_v9, -inf  ;;  %v2517_v16 = vmax.f32 %v2315_v10, 0.0 }
 0x292   : > { %v4430_v17 = vmax.f32 %v2750_v27, %v2751_v15  ;;  %v2689_v18 = vsel %vm1676_vm2, %v2514_v12, -inf  ;;  %v2515_v19 = vmax.f32 %v2307_v13, 0.0 }
 0x293   : > { %v4433_v20 = vmax.f32 %v2688_v51, %v2689_v18  ;;  %v2782_v21 = vsel %vm1676_vm2, %v2517_v16, -inf }
 0x294   : > { %v4436_v22 = vmax.f32 %v2781_v25, %v2782_v21  ;;  %v2720_v23 = vsel %vm1676_vm2, %v2515_v19, -inf  ;;  %v3511_v24 = vpop.f32.mrb[104].mxu1 }
 0x295   : > { %v4439_v26 = vmax.f32 %v2719_v2, %v2720_v23  ;;  %v2328_v28 = vadd.f32 %v4396_v37, %v3511_v24  ;;  %v2319_v29 = vpop.f32.mrb[105].mxu1 }
 0x296   : > { %v2320_v32 = vadd.f32 %v4396_v37, %v2319_v29  ;;  %v3512_v33 = vpop.f32.mrb[106].mxu1 }
 0x297   : > { %v2520_v36 = vmax.f32 %v2328_v28, 0.0  ;;  %v2331_v14 = vadd.f32 %v4396_v37, %v3512_v33  ;;  %v2322_v38 = vpop.f32.mrb[107].mxu1 }
 0x298   : > { %v2518_v40 = vmax.f32 %v2320_v32, 0.0  ;;  %v2323_v42 = vadd.f32 %v4396_v37, %v2322_v38 }
 0x299   : > { %v2629_v44 = vsel %vm1676_vm2, %v2520_v36, -inf  ;;  %v2521_v45 = vmax.f32 %v2331_v14, 0.0 }
 0x29a   : > { %v2630_v46 = vmax.f32 %v4414_v41, %v2629_v44  ;;  %v2567_v47 = vsel %vm1676_vm2, %v2518_v40, -inf  ;;  %v2519_v48 = vmax.f32 %v2323_v42, 0.0 }
 0x29b   : > { %v2568_v27 = vmax.f32 %v4417_v60, %v2567_v47  ;;  %v2660_v49 = vsel %vm1676_vm2, %v2521_v45, -inf }
 0x29c   : > { %v2661_v50 = vmax.f32 %v4420_v63, %v2660_v49  ;;  %v2598_v51 = vsel %vm1676_vm2, %v2519_v48, -inf  ;;  %v3515_v61 = vpop.f32.mrb[108].mxu1 }
 0x29d   : > { %v2599_v25 = vmax.f32 %v4423_v4, %v2598_v51  ;;  %v2344_v30 = vadd.f32 %v4396_v37, %v3515_v61  ;;  %v2335_v52 = vpop.f32.mrb[109].mxu1 }
 0x29e   : > { %v2336_v2 = vadd.f32 %v4396_v37, %v2335_v52  ;;  %v3516_v31 = vpop.f32.mrb[110].mxu1 }
 0x29f   : > { %v2524_v34 = vmax.f32 %v2344_v30, 0.0  ;;  %v2347_v53 = vadd.f32 %v4396_v37, %v3516_v31  ;;  %v2338_v54 = vpop.f32.mrb[111].mxu1 }
 0x2a0   : > { %v2522_v3 = vmax.f32 %v2336_v2, 0.0  ;;  %v2339_v35 = vadd.f32 %v4396_v37, %v2338_v54 }
 0x2a1   : > { %v2753_v39 = vsel %vm1676_vm2, %v2524_v34, -inf  ;;  %v2525_v55 = vmax.f32 %v2347_v53, 0.0 }
 0x2a2   : > { %v2754_v56 = vmax.f32 %v4430_v17, %v2753_v39  ;;  %v2691_v57 = vsel %vm1676_vm2, %v2522_v3, -inf  ;;  %v2523_v6 = vmax.f32 %v2339_v35, 0.0 }
 0x2a3   : > { %v2692_v41 = vmax.f32 %v4433_v20, %v2691_v57  ;;  %v2784_v43 = vsel %vm1676_vm2, %v2525_v55, -inf }
 0x2a4   : > { %v2785_v59 = vmax.f32 %v4436_v22, %v2784_v43  ;;  %v2722_v60 = vsel %vm1676_vm2, %v2523_v6, -inf  ;;  %v3519_v62 = vpop.f32.mrb[112].mxu1 }
 0x2a5   : > { %v2723_v63 = vmax.f32 %v4439_v26, %v2722_v60  ;;  %v2360_v0 = vadd.f32 %v4396_v37, %v3519_v62  ;;  %v2351_v1 = vpop.f32.mrb[113].mxu1 }
 0x2a6   : > { %v2352_v4 = vadd.f32 %v4396_v37, %v2351_v1  ;;  %v3520_v5 = vpop.f32.mrb[114].mxu1 }
 0x2a7   : > { %v2528_v58 = vmax.f32 %v2360_v0, 0.0  ;;  %v2363_v7 = vadd.f32 %v4396_v37, %v3520_v5  ;;  %v2354_v8 = vpop.f32.mrb[115].mxu1 }
 0x2a8   : > { %v2526_v9 = vmax.f32 %v2352_v4, 0.0  ;;  %v2355_v10 = vadd.f32 %v4396_v37, %v2354_v8 }
 0x2a9   : > { %v2631_v11 = vsel %vm1676_vm2, %v2528_v58, -inf  ;;  %v2529_v12 = vmax.f32 %v2363_v7, 0.0 }
 0x2aa   : > { %v2632_v13 = vmax.f32 %v2630_v46, %v2631_v11  ;;  %v2569_v15 = vsel %vm1676_vm2, %v2526_v9, -inf  ;;  %v2527_v16 = vmax.f32 %v2355_v10, 0.0 }
 0x2ab   : > { %v2570_v17 = vmax.f32 %v2568_v27, %v2569_v15  ;;  %v2662_v18 = vsel %vm1676_vm2, %v2529_v12, -inf }
 0x2ac   : > { %v2663_v19 = vmax.f32 %v2661_v50, %v2662_v18  ;;  %v2600_v20 = vsel %vm1676_vm2, %v2527_v16, -inf  ;;  %v3523_v21 = vpop.f32.mrb[116].mxu1 }
 0x2ad   : > { %v2601_v22 = vmax.f32 %v2599_v25, %v2600_v20  ;;  %v2376_v23 = vadd.f32 %v4396_v37, %v3523_v21  ;;  %v2367_v24 = vpop.f32.mrb[117].mxu1 }
 0x2ae   : > { %v2368_v26 = vadd.f32 %v4396_v37, %v2367_v24  ;;  %v3524_v28 = vpop.f32.mrb[118].mxu1 }
 0x2af   : > { %v2532_v29 = vmax.f32 %v2376_v23, 0.0  ;;  %v2379_v32 = vadd.f32 %v4396_v37, %v3524_v28  ;;  %v2370_v33 = vpop.f32.mrb[119].mxu1 }
 0x2b0   : > { %v2530_v36 = vmax.f32 %v2368_v26, 0.0  ;;  %v2371_v14 = vadd.f32 %v4396_v37, %v2370_v33 }
 0x2b1   : > { %v2755_v38 = vsel %vm1676_vm2, %v2532_v29, -inf  ;;  %v2533_v40 = vmax.f32 %v2379_v32, 0.0 }
 0x2b2   : > { %v2756_v42 = vmax.f32 %v2754_v56, %v2755_v38  ;;  %v2693_v44 = vsel %vm1676_vm2, %v2530_v36, -inf  ;;  %v2531_v45 = vmax.f32 %v2371_v14, 0.0 }
 0x2b3   : > { %v2694_v46 = vmax.f32 %v2692_v41, %v2693_v44  ;;  %v2786_v47 = vsel %vm1676_vm2, %v2533_v40, -inf }
 0x2b4   : > { %v2787_v48 = vmax.f32 %v2785_v59, %v2786_v47  ;;  %v2724_v27 = vsel %vm1676_vm2, %v2531_v45, -inf  ;;  %v3527_v50 = vpop.f32.mrb[120].mxu1 }
 0x2b5   : > { %v2725_v49 = vmax.f32 %v2723_v63, %v2724_v27  ;;  %v2392_v51 = vadd.f32 %v4396_v37, %v3527_v50  ;;  %v2383_v61 = vpop.f32.mrb[121].mxu1 }
 0x2b6   : > { %v2384_v25 = vadd.f32 %v4396_v37, %v2383_v61  ;;  %v3528_v30 = vpop.f32.mrb[122].mxu1 }
 0x2b7   : > { %v2536_v52 = vmax.f32 %v2392_v51, 0.0  ;;  %v2395_v2 = vadd.f32 %v4396_v37, %v3528_v30  ;;  %v2386_v31 = vpop.f32.mrb[123].mxu1 }
 0x2b8   : > { %v2534_v34 = vmax.f32 %v2384_v25, 0.0  ;;  %v2387_v53 = vadd.f32 %v4396_v37, %v2386_v31 }
 0x2b9   : > { %v2633_v54 = vsel %vm1676_vm2, %v2536_v52, -inf  ;;  %v2537_v3 = vmax.f32 %v2395_v2, 0.0 }
 0x2ba   : > { %v2634_v35 = vmax.f32 %v2632_v13, %v2633_v54  ;;  %v2571_v39 = vsel %vm1676_vm2, %v2534_v34, -inf  ;;  %v2535_v55 = vmax.f32 %v2387_v53, 0.0 }
 0x2bb   : > { %v2572_v56 = vmax.f32 %v2570_v17, %v2571_v39  ;;  %v2664_v57 = vsel %vm1676_vm2, %v2537_v3, -inf }
 0x2bc   : > { %v3137_v6 = vpack.c.bf16 %v2634_v35, %v2634_v35  ;;  %v2665_v41 = vmax.f32 %v2663_v19, %v2664_v57  ;;  %v2602_v43 = vsel %vm1676_vm2, %v2535_v55, -inf  ;;  %v3531_v59 = vpop.f32.mrb[124].mxu1 }
 0x2bd   : > { %v3135_v60 = vpack.c.bf16 %v2572_v56, %v2572_v56  ;;  %v2603_v62 = vmax.f32 %v2601_v22, %v2602_v43  ;;  %v2408_v63 = vadd.f32 %v4396_v37, %v3531_v59  ;;  %v2399_v0 = vpop.f32.mrb[125].mxu1 }
 0x2be   : > { %2825 = vst.msk [vmem:[%s4491_s16 + $0x8] sm:$0xf] %vm2822_vm3, %v3137_v6  ;;  %v3138_v1 = vpack.c.bf16 %v2665_v41, %v2665_v41  ;;  %v2400_v4 = vadd.f32 %v4396_v37, %v2399_v0  ;;  %v3532_v5 = vpop.f32.mrb[126].mxu1 }
 0x2bf   : > { %2823 = vst.msk [vmem:[%s4491_s16] sm:$0xf] %vm2822_vm3, %v3135_v60  ;;  %v3136_v58 = vpack.c.bf16 %v2603_v62, %v2603_v62  ;;  %v2540_v7 = vmax.f32 %v2408_v63, 0.0  ;;  %v2411_v8 = vadd.f32 %v4396_v37, %v3532_v5  ;;  %v2402_v9 = vpop.f32.mrb[127].mxu1 }
 0x2c0   : > { %2826 = vst.msk [vmem:[%s4491_s16 + $0xc] sm:$0xf] %vm2822_vm3, %v3138_v1  ;;  %v2538_v10 = vmax.f32 %v2400_v4, 0.0  ;;  %v2403_v11 = vadd.f32 %v4396_v37, %v2402_v9 }
 0x2c1   : > { %2824 = vst.msk [vmem:[%s4491_s16 + $0x4] sm:$0xf] %vm2822_vm3, %v3136_v58  ;;  %v2757_v12 = vsel %vm1676_vm2, %v2540_v7, -inf  ;;  %v2541_v13 = vmax.f32 %v2411_v8, 0.0 }
 0x2c2   : > { %v2758_v15 = vmax.f32 %v2756_v42, %v2757_v12  ;;  %v2695_v16 = vsel %vm1676_vm2, %v2538_v10, -inf  ;;  %v2539_v17 = vmax.f32 %v2403_v11, 0.0 }
 0x2c3   : > { %v2696_v18 = vmax.f32 %v2694_v46, %v2695_v16  ;;  %v2788_v19 = vsel %vm1676_vm2, %v2541_v13, -inf }
 0x2c4   : > { %v3141_v20 = vpack.c.bf16 %v2758_v15, %v2758_v15  ;;  %v2789_v21 = vmax.f32 %v2787_v48, %v2788_v19  ;;  %v2726_v22 = vsel %vm1676_vm2, %v2539_v17, -inf }
 0x2c5   : > { %v3139_v37 = vpack.c.bf16 %v2696_v18, %v2696_v18  ;;  %v2727_v23 = vmax.f32 %v2725_v49, %v2726_v22 }
 0x2c6   : > { %2829 = vst.msk [vmem:[%s4491_s16 + $0x18] sm:$0xf] %vm2822_vm3, %v3141_v20  ;;  %v3142_v24 = vpack.c.bf16 %v2789_v21, %v2789_v21 }
 0x2c7   : > { %2827 = vst.msk [vmem:[%s4491_s16 + $0x10] sm:$0xf] %vm2822_vm3, %v3139_v37  ;;  %v3140_v26 = vpack.c.bf16 %v2727_v23, %v2727_v23 }
 0x2c8   : > { %2830 = vst.msk [vmem:[%s4491_s16 + $0x1c] sm:$0xf] %vm2822_vm3, %v3142_v24 }
 0x2c9   : > { %2828 = vst.msk [vmem:[%s4491_s16 + $0x14] sm:$0xf] %vm2822_vm3, %v3140_v26 }
 0x2ca PF: > { %s15_s20 = sadd.s32 1, %s3648_s20   ;;  %s4534_s18 = smov %s3644_s19 }
 0x2cb   : > { %p12_p5 = scmp.ge.s32.totalorder %s15_s20, 4   ;;  %s4535_s19 = smov %s4537_s21 }
 0x2cd   :  { %14 = sbr.rel (!%p12_p5) target bundleno = 2 (0x2), region = 70 }

// kernel: custom-call.51
= control target key start
LH: loop header
LB: loop body
LE: loop exit
PB: predicated region body
PF: predicated region fallthrough
CT: control target
= control target key end

     0   :  { %s6_s0 = inlined_call_operand.vmem [shape: f32[2,32], index: 0, kind: output, shape index: {}]  }

// kernel: backbone_msnet_forward.10
= control target key start
LH: loop header
LB: loop body
LE: loop exit
PB: predicated region body
PF: predicated region fallthrough
CT: control target
= control target key end

     0   :  { %s1373_s18 = smov 0   ;;  %s1375_s19 = smov 0   ;;  %s1578_s0 = inlined_call_operand.vmem [shape: bf16[2,8,32,20], index: 0, kind: input, shape index: {}]   ;;  %s1579_s1 = inlined_call_operand.vmem [shape: bf16[20,32], index: 1, kind: input, shape index: {}]   ;;  %s1580_s2 = inlined_call_operand.vmem [shape: f32[1,32], index: 2, kind: input, shape index: {}]   ;;  %s1581_s3 = inlined_call_operand.vmem [shape: bf16[32,32], index: 3, kind: input, shape index: {}]   ;;  %s1582_s4 = inlined_call_operand.vmem [shape: f32[1,32], index: 4, kind: input, shape index: {}]   ;;  %s1583_s5 = inlined_call_operand.vmem [shape: bf16[2,32,32], index: 5, kind: output, shape index: {}]  }
   0x1   :  { %s1377_s20 = smov 0  }
   0x2 LB: > { %s27_s21 = sadd.s32 1, %s1337_s19  ;;  %p1095_p0 = scmp.ge.s32.totalorder %s1341_s20, 1  ;;  %s1341_s20 = sphi %s1377_s20, %s15_s20   ;;  %s1337_s19 = sphi %s1375_s19, %s1585_s19   ;;  %s1333_s18 = sphi %s1373_s18, %s1584_s18  }
   0x3   : > { %p29_p1 = scmp.ge.s32.totalorder %s27_s21, 2  ;;  %p208_p2 = scmp.lt.s32.totalorder %s1341_s20, 3 }
   0x5   : > { %s1587_s21 = smov (%p29_p1, %s27_s21), 0  ;;  %p209_p3 = pnand %p1095_p0, %p208_p2 }
   0x6   : > { %v1299_v0 = vld [vmem:[%s1579_s1] sm:$0xff] (!%p209_p3)   ;;  %vm445_vm0 = vcmask (!%p209_p3), 1041408   ;;  %v1300_v1 = vld [vmem:[%s1579_s1 + $0x8] ss:$0 sps:$4 sm:$0x33] (!%p209_p3)   ;;  %p245_p4 = scmp.lt.s32.totalorder (!%p209_p3), %s1333_s18, 1 }
   0x7   : > { %212 = sbr.rel (%p209_p3) target bundleno = 522 (0x20a), region = 40  ;;  %1202 = vmatprep.subr.bf16.mxu0 (!%p209_p3), %v1299_v0  ;;  %v447_v2 = vsel (!%p209_p3), %vm445_vm0, %v1300_v1, 0  ;;  %vm396_vm1 = vcmask (!%p209_p3), 162816   ;;  %v1317_v19 = vld [vmem:[%s1581_s3] sm:$0xff] (!%p209_p3)   ;;  %v1318_v20 = vld [vmem:[%s1581_s3 + $0x8] sm:$0xff] (!%p209_p3)   ;;  %vm681_vm2 = vcmask (!%p209_p3), 261120  }
   0x8   : > { %1203 = vmatpush3.bf16.msra.mxu0 (!%p209_p3), %v1299_v0  ;;  %1238 = vmatprep.subr.bf16.mxu1 (!%p209_p3), %v1317_v19  ;;  %v1446_v21 = vld [vmem:[%s1580_s2] ss:$0 sm:$0xff] (!%p209_p3)  ;;  %vm999_vm3 = vcmask (!%p209_p3), 257024  }
   0x9   : > { %1274 = vmatprep.subr.msk.bf16.mxu0 (!%p209_p3), %vm445_vm0, %v1300_v1  ;;  %1239 = vmatpush3.bf16.msra.mxu1 (!%p209_p3), %v1317_v19 }
   0xa   : > { %1240 = vmatprep.subr.bf16.mxu1 (!%p209_p3), %v1318_v20 }
   0xc   : > { %1205 = vmatpush3.bf16.msra.mxu0 (!%p209_p3), %v447_v2 }
   0xd   : > { %1241 = vmatpush3.bf16.msra.mxu1 (!%p209_p3), %v1318_v20 }
   0xe   : > { %s1589_s18 = smov (!%p245_p4, %s1333_s18), 1 }
   0xf   : > { %s1160_s26 = sshll.u32 %s1589_s18, 7  ;;  %s1161_s13 = sshll.u32 %s1589_s18, 4 }
  0x10   : > { %s1403_s29 = scalar_lea.vmem %s1578_s0, %s1160_s26  ;;  %s262_s16 = scalar_lea.vmem %s1583_s5, %s1161_s13 }
  0x11   : > { %v1301_v3 = vld [vmem:[%s1403_s29] sm:$0xff]   ;;  %v1302_v4 = vld [vmem:[%s1403_s29 + $0x8] sm:$0xff]   ;;  %v1303_v5 = vld [vmem:[%s1403_s29 + $0x10] sm:$0xff]  }
  0x12   : > { %1206 = vmatprep.mubr.msk.bf16.mxu0 %vm396_vm1, %v1301_v3  ;;  %v1304_v6 = vld [vmem:[%s1403_s29 + $0x18] sm:$0xff]   ;;  %v1305_v7 = vld [vmem:[%s1403_s29 + $0x20] sm:$0xff]   ;;  %v1306_v8 = vld [vmem:[%s1403_s29 + $0x28] sm:$0xff]  }
  0x13   : > { %1207 = vmatmul.mubr.msk.bf16.vlgmr.msra.gmra.mrb[0].mxu0 %vm396_vm1, %v1302_v4  ;;  %v1307_v9 = vld [vmem:[%s1403_s29 + $0x30] sm:$0xff]   ;;  %v1308_v10 = vld [vmem:[%s1403_s29 + $0x38] sm:$0xff]   ;;  %v1309_v11 = vld [vmem:[%s1403_s29 + $0x40] sm:$0xff]  }
  0x14   : > { %1210 = vmatprep.mubr.msk.bf16.mxu0 %vm396_vm1, %v1303_v5  ;;  %v1310_v12 = vld [vmem:[%s1403_s29 + $0x48] sm:$0xff]   ;;  %v1311_v13 = vld [vmem:[%s1403_s29 + $0x50] sm:$0xff]   ;;  %v1312_v14 = vld [vmem:[%s1403_s29 + $0x58] sm:$0xff]  }
  0x15   : > { %v1313_v15 = vld [vmem:[%s1403_s29 + $0x60] sm:$0xff]   ;;  %v1314_v16 = vld [vmem:[%s1403_s29 + $0x68] sm:$0xff]   ;;  %v1315_v17 = vld [vmem:[%s1403_s29 + $0x70] sm:$0xff]  }
  0x16   : > { %v1316_v18 = vld [vmem:[%s1403_s29 + $0x78] sm:$0xff]  }
  0x1b   : > { %1211 = vmatmul.mubr.msk.bf16.gmra.mrb[4].mxu0 %vm396_vm1, %v1304_v6 }
  0x1c   : > { %1214 = vmatprep.mubr.msk.bf16.mxu0 %vm396_vm1, %v1305_v7 }
  0x23   : > { %1215 = vmatmul.mubr.msk.bf16.gmra.mrb[8].mxu0 %vm396_vm1, %v1306_v8 }
  0x24   : > { %1218 = vmatprep.mubr.msk.bf16.mxu0 %vm396_vm1, %v1307_v9 }
  0x2b   : > { %1219 = vmatmul.mubr.msk.bf16.gmra.mrb[12].mxu0 %vm396_vm1, %v1308_v10 }
  0x2c   : > { %1222 = vmatprep.mubr.msk.bf16.mxu0 %vm396_vm1, %v1309_v11 }
  0x33   : > { %1223 = vmatmul.mubr.msk.bf16.gmra.mrb[16].mxu0 %vm396_vm1, %v1310_v12 }
  0x34   : > { %1226 = vmatprep.mubr.msk.bf16.mxu0 %vm396_vm1, %v1311_v13 }
  0x3b   : > { %1227 = vmatmul.mubr.msk.bf16.gmra.mrb[20].mxu0 %vm396_vm1, %v1312_v14 }
  0x3c   : > { %1230 = vmatprep.mubr.msk.bf16.mxu0 %vm396_vm1, %v1313_v15 }
  0x43   : > { %1231 = vmatmul.mubr.msk.bf16.gmra.mrb[24].mxu0 %vm396_vm1, %v1314_v16 }
  0x44   : > { %1234 = vmatprep.mubr.msk.bf16.mxu0 %vm396_vm1, %v1315_v17 }
  0x4b   : > { %1235 = vmatmul.mubr.msk.bf16.gmra.mrb[28].mxu0 %vm396_vm1, %v1316_v18 }
  0xe6   : > { %v1208_v22 = vpop.f32.mrb[0].mxu0 }
  0xe7   : > { %v492_v23 = vadd.f32 %v1208_v22, %v1446_v21  ;;  %v483_v24 = vpop.f32.mrb[1].mxu0 }
  0xe8   : > { %v484_v25 = vadd.f32 %v1446_v21, %v483_v24  ;;  %v1209_v26 = vpop.f32.mrb[2].mxu0 }
  0xe9   : > { %v495_v27 = vadd.f32 %v1209_v26, %v1446_v21  ;;  %v486_v28 = vpop.f32.mrb[3].mxu0  ;;  %v612_v30 = vmax.f32 %v492_v23, 0.0 }
  0xea   : > { %v487_v29 = vadd.f32 %v1446_v21, %v486_v28  ;;  %v610_v32 = vmax.f32 %v484_v25, 0.0 }
  0xeb   : > { %v613_v31 = vmax.f32 %v495_v27, 0.0 }
  0xec   : > { %v611_v33 = vmax.f32 %v487_v29, 0.0 }
  0xed   : > { %v643_v34 = vpack.c.bf16 %v613_v31, %v612_v30 }
  0xee   : > { %v1212_v35 = vpop.f32.mrb[4].mxu0  ;;  %v642_v36 = vpack.c.bf16 %v611_v33, %v610_v32 }
  0xef   : > { %v508_v37 = vadd.f32 %v1212_v35, %v1446_v21  ;;  %v499_v38 = vpop.f32.mrb[5].mxu0 }
  0xf0   : > { %v500_v39 = vadd.f32 %v1446_v21, %v499_v38  ;;  %v1213_v40 = vpop.f32.mrb[6].mxu0  ;;  %1242 = vmatprep.mubr.msk.bf16.mxu1 %vm681_vm2, %v642_v36 }
  0xf1   : > { %v511_v41 = vadd.f32 %v1213_v40, %v1446_v21  ;;  %v502_v42 = vpop.f32.mrb[7].mxu0  ;;  %1243 = vmatmul.mubr.msk.bf16.vlgmr.msra.gmra.mrb[0].mxu1 %vm681_vm2, %v643_v34  ;;  %v616_v44 = vmax.f32 %v508_v37, 0.0 }
  0xf2   : > { %v503_v43 = vadd.f32 %v1446_v21, %v502_v42  ;;  %v614_v46 = vmax.f32 %v500_v39, 0.0 }
  0xf3   : > { %v617_v45 = vmax.f32 %v511_v41, 0.0 }
  0xf4   : > { %v615_v47 = vmax.f32 %v503_v43, 0.0 }
  0xf5   : > { %v645_v48 = vpack.c.bf16 %v617_v45, %v616_v44 }
  0xf6   : > { %v644_v49 = vpack.c.bf16 %v615_v47, %v614_v46  ;;  %v1216_v50 = vpop.f32.mrb[8].mxu0 }
  0xf7   : > { %v524_v51 = vadd.f32 %v1216_v50, %v1446_v21  ;;  %v515_v52 = vpop.f32.mrb[9].mxu0 }
  0xf8   : > { %v516_v53 = vadd.f32 %v1446_v21, %v515_v52  ;;  %v1217_v54 = vpop.f32.mrb[10].mxu0  ;;  %1246 = vmatprep.mubr.msk.bf16.mxu1 %vm681_vm2, %v644_v49 }
  0xf9   : > { %v527_v55 = vadd.f32 %v1217_v54, %v1446_v21  ;;  %v518_v56 = vpop.f32.mrb[11].mxu0  ;;  %1247 = vmatmul.mubr.msk.bf16.gmra.mrb[4].mxu1 %vm681_vm2, %v645_v48  ;;  %v620_v58 = vmax.f32 %v524_v51, 0.0 }
  0xfa   : > { %v519_v57 = vadd.f32 %v1446_v21, %v518_v56  ;;  %v618_v60 = vmax.f32 %v516_v53, 0.0 }
  0xfb   : > { %v621_v59 = vmax.f32 %v527_v55, 0.0 }
  0xfc   : > { %v619_v61 = vmax.f32 %v519_v57, 0.0 }
  0xfd   : > { %v647_v62 = vpack.c.bf16 %v621_v59, %v620_v58 }
  0xfe   : > { %v646_v63 = vpack.c.bf16 %v619_v61, %v618_v60  ;;  %v1220_v0 = vpop.f32.mrb[12].mxu0 }
  0xff   : > { %v540_v1 = vadd.f32 %v1220_v0, %v1446_v21  ;;  %v531_v2 = vpop.f32.mrb[13].mxu0 }
 0x100   : > { %v532_v3 = vadd.f32 %v1446_v21, %v531_v2  ;;  %v1221_v4 = vpop.f32.mrb[14].mxu0  ;;  %1250 = vmatprep.mubr.msk.bf16.mxu1 %vm681_vm2, %v646_v63 }
 0x101   : > { %v543_v5 = vadd.f32 %v1221_v4, %v1446_v21  ;;  %v534_v6 = vpop.f32.mrb[15].mxu0  ;;  %1251 = vmatmul.mubr.msk.bf16.gmra.mrb[8].mxu1 %vm681_vm2, %v647_v62  ;;  %v624_v8 = vmax.f32 %v540_v1, 0.0 }
 0x102   : > { %v535_v7 = vadd.f32 %v1446_v21, %v534_v6  ;;  %v622_v10 = vmax.f32 %v532_v3, 0.0 }
 0x103   : > { %v625_v9 = vmax.f32 %v543_v5, 0.0 }
 0x104   : > { %v623_v11 = vmax.f32 %v535_v7, 0.0 }
 0x105   : > { %v649_v12 = vpack.c.bf16 %v625_v9, %v624_v8  ;;  %v1499_v9 = vld [vmem:[%s1582_s4] ss:$0 sm:$0xff] }
 0x106   : > { %v648_v13 = vpack.c.bf16 %v623_v11, %v622_v10  ;;  %v1224_v14 = vpop.f32.mrb[16].mxu0 }
 0x107   : > { %v556_v15 = vadd.f32 %v1224_v14, %v1446_v21  ;;  %v547_v16 = vpop.f32.mrb[17].mxu0 }
 0x108   : > { %v548_v17 = vadd.f32 %v1446_v21, %v547_v16  ;;  %v1225_v18 = vpop.f32.mrb[18].mxu0  ;;  %1254 = vmatprep.mubr.msk.bf16.mxu1 %vm681_vm2, %v648_v13 }
 0x109   : > { %v559_v19 = vadd.f32 %v1225_v18, %v1446_v21  ;;  %v550_v20 = vpop.f32.mrb[19].mxu0  ;;  %1255 = vmatmul.mubr.msk.bf16.gmra.mrb[12].mxu1 %vm681_vm2, %v649_v12  ;;  %v628_v23 = vmax.f32 %v556_v15, 0.0 }
 0x10a   : > { %v551_v22 = vadd.f32 %v1446_v21, %v550_v20  ;;  %v626_v25 = vmax.f32 %v548_v17, 0.0 }
 0x10b   : > { %v629_v24 = vmax.f32 %v559_v19, 0.0 }
 0x10c   : > { %v627_v26 = vmax.f32 %v551_v22, 0.0 }
 0x10d   : > { %v651_v27 = vpack.c.bf16 %v629_v24, %v628_v23 }
 0x10e   : > { %v650_v28 = vpack.c.bf16 %v627_v26, %v626_v25  ;;  %v1228_v29 = vpop.f32.mrb[20].mxu0 }
 0x10f   : > { %v572_v30 = vadd.f32 %v1228_v29, %v1446_v21  ;;  %v563_v31 = vpop.f32.mrb[21].mxu0 }
 0x110   : > { %v564_v32 = vadd.f32 %v1446_v21, %v563_v31  ;;  %v1229_v33 = vpop.f32.mrb[22].mxu0  ;;  %1258 = vmatprep.mubr.msk.bf16.mxu1 %vm681_vm2, %v650_v28 }
 0x111   : > { %v575_v34 = vadd.f32 %v1229_v33, %v1446_v21  ;;  %v566_v35 = vpop.f32.mrb[23].mxu0  ;;  %1259 = vmatmul.mubr.msk.bf16.gmra.mrb[16].mxu1 %vm681_vm2, %v651_v27  ;;  %v632_v37 = vmax.f32 %v572_v30, 0.0 }
 0x112   : > { %v567_v36 = vadd.f32 %v1446_v21, %v566_v35  ;;  %v630_v39 = vmax.f32 %v564_v32, 0.0 }
 0x113   : > { %v633_v38 = vmax.f32 %v575_v34, 0.0 }
 0x114   : > { %v631_v40 = vmax.f32 %v567_v36, 0.0 }
 0x115   : > { %v653_v41 = vpack.c.bf16 %v633_v38, %v632_v37 }
 0x116   : > { %v652_v42 = vpack.c.bf16 %v631_v40, %v630_v39  ;;  %v1232_v43 = vpop.f32.mrb[24].mxu0 }
 0x117   : > { %v588_v44 = vadd.f32 %v1232_v43, %v1446_v21  ;;  %v579_v45 = vpop.f32.mrb[25].mxu0 }
 0x118   : > { %v580_v46 = vadd.f32 %v1446_v21, %v579_v45  ;;  %v1233_v47 = vpop.f32.mrb[26].mxu0  ;;  %1262 = vmatprep.mubr.msk.bf16.mxu1 %vm681_vm2, %v652_v42 }
 0x119   : > { %v591_v48 = vadd.f32 %v1233_v47, %v1446_v21  ;;  %v582_v49 = vpop.f32.mrb[27].mxu0  ;;  %1263 = vmatmul.mubr.msk.bf16.gmra.mrb[20].mxu1 %vm681_vm2, %v653_v41  ;;  %v636_v51 = vmax.f32 %v588_v44, 0.0 }
 0x11a   : > { %v583_v50 = vadd.f32 %v1446_v21, %v582_v49  ;;  %v634_v53 = vmax.f32 %v580_v46, 0.0 }
 0x11b   : > { %v637_v52 = vmax.f32 %v591_v48, 0.0 }
 0x11c   : > { %v635_v54 = vmax.f32 %v583_v50, 0.0 }
 0x11d   : > { %v655_v55 = vpack.c.bf16 %v637_v52, %v636_v51 }
 0x11e   : > { %v654_v56 = vpack.c.bf16 %v635_v54, %v634_v53  ;;  %v1236_v57 = vpop.f32.mrb[28].mxu0 }
 0x11f   : > { %v604_v58 = vadd.f32 %v1236_v57, %v1446_v21  ;;  %v595_v59 = vpop.f32.mrb[29].mxu0 }
 0x120   : > { %v596_v60 = vadd.f32 %v1446_v21, %v595_v59  ;;  %v1237_v61 = vpop.f32.mrb[30].mxu0  ;;  %1266 = vmatprep.mubr.msk.bf16.mxu1 %vm681_vm2, %v654_v56 }
 0x121   : > { %v607_v62 = vadd.f32 %v1237_v61, %v1446_v21  ;;  %v598_v63 = vpop.f32.mrb[31].mxu0  ;;  %1267 = vmatmul.mubr.msk.bf16.gmra.mrb[24].mxu1 %vm681_vm2, %v655_v55  ;;  %v640_v1 = vmax.f32 %v604_v58, 0.0 }
 0x122   : > { %v599_v0 = vadd.f32 %v1446_v21, %v598_v63  ;;  %v638_v3 = vmax.f32 %v596_v60, 0.0 }
 0x123   : > { %v641_v2 = vmax.f32 %v607_v62, 0.0 }
 0x124   : > { %v639_v4 = vmax.f32 %v599_v0, 0.0 }
 0x125   : > { %v657_v5 = vpack.c.bf16 %v641_v2, %v640_v1 }
 0x126   : > { %v656_v6 = vpack.c.bf16 %v639_v4, %v638_v3 }
 0x128   : > { %1270 = vmatprep.mubr.msk.bf16.mxu1 %vm681_vm2, %v656_v6 }
 0x129   : > { %1271 = vmatmul.mubr.msk.bf16.gmra.mrb[28].mxu1 %vm681_vm2, %v657_v5 }
 0x1c4   : > { %v1244_v7 = vpop.f32.mrb[0].mxu1 }
 0x1c5   : > { %v764_v8 = vpop.f32.mrb[1].mxu1  ;;  %v773_v21 = vadd.f32 %v1244_v7, %v1499_v9 }
 0x1c6   : > { %v1245_v10 = vpop.f32.mrb[2].mxu1  ;;  %v765_v12 = vadd.f32 %v1499_v9, %v764_v8 }
 0x1c7   : > { %v767_v11 = vpop.f32.mrb[3].mxu1  ;;  %v776_v13 = vadd.f32 %v1245_v10, %v1499_v9  ;;  %v893_v16 = vmax.f32 %v773_v21, 0.0 }
 0x1c8   : > { %v768_v14 = vadd.f32 %v1499_v9, %v767_v11  ;;  %v891_v19 = vmax.f32 %v765_v12, 0.0 }
 0x1c9   : > { %v894_v23 = vmax.f32 %v776_v13, 0.0  ;;  %v953_v30 = vsel %vm681_vm2, %v893_v16, -inf }
 0x1ca   : > { %v892_v27 = vmax.f32 %v768_v14, 0.0  ;;  %v923_v33 = vsel %vm681_vm2, %v891_v19, -inf }
 0x1cb   : > { %v968_v37 = vsel %vm681_vm2, %v894_v23, -inf }
 0x1cc   : > { %v1248_v15 = vpop.f32.mrb[4].mxu1  ;;  %v938_v40 = vsel %vm681_vm2, %v892_v27, -inf }
 0x1cd   : > { %v789_v17 = vadd.f32 %v1248_v15, %v1499_v9  ;;  %v780_v18 = vpop.f32.mrb[5].mxu1 }
 0x1ce   : > { %v781_v20 = vadd.f32 %v1499_v9, %v780_v18  ;;  %v1249_v22 = vpop.f32.mrb[6].mxu1 }
 0x1cf   : > { %v897_v24 = vmax.f32 %v789_v17, 0.0  ;;  %v792_v25 = vadd.f32 %v1249_v22, %v1499_v9  ;;  %v783_v26 = vpop.f32.mrb[7].mxu1 }
 0x1d0   : > { %v895_v28 = vmax.f32 %v781_v20, 0.0  ;;  %v784_v29 = vadd.f32 %v1499_v9, %v783_v26 }
 0x1d1   : > { %v954_v31 = vsel %vm681_vm2, %v897_v24, -inf  ;;  %v898_v32 = vmax.f32 %v792_v25, 0.0 }
 0x1d2   : > { %v955_v34 = vmax.f32 %v953_v30, %v954_v31  ;;  %v924_v35 = vsel %vm681_vm2, %v895_v28, -inf  ;;  %v896_v36 = vmax.f32 %v784_v29, 0.0 }
 0x1d3   : > { %v925_v38 = vmax.f32 %v923_v33, %v924_v35  ;;  %v969_v39 = vsel %vm681_vm2, %v898_v32, -inf }
 0x1d4   : > { %v970_v41 = vmax.f32 %v968_v37, %v969_v39  ;;  %v939_v42 = vsel %vm681_vm2, %v896_v36, -inf  ;;  %v1252_v43 = vpop.f32.mrb[8].mxu1 }
 0x1d5   : > { %v940_v44 = vmax.f32 %v938_v40, %v939_v42  ;;  %v805_v45 = vadd.f32 %v1252_v43, %v1499_v9  ;;  %v796_v46 = vpop.f32.mrb[9].mxu1 }
 0x1d6   : > { %v797_v47 = vadd.f32 %v1499_v9, %v796_v46  ;;  %v1253_v48 = vpop.f32.mrb[10].mxu1 }
 0x1d7   : > { %v901_v49 = vmax.f32 %v805_v45, 0.0  ;;  %v808_v50 = vadd.f32 %v1253_v48, %v1499_v9  ;;  %v799_v51 = vpop.f32.mrb[11].mxu1 }
 0x1d8   : > { %v899_v52 = vmax.f32 %v797_v47, 0.0  ;;  %v800_v53 = vadd.f32 %v1499_v9, %v799_v51 }
 0x1d9   : > { %v956_v54 = vsel %vm681_vm2, %v901_v49, -inf  ;;  %v902_v55 = vmax.f32 %v808_v50, 0.0 }
 0x1da   : > { %v957_v56 = vmax.f32 %v955_v34, %v956_v54  ;;  %v926_v57 = vsel %vm681_vm2, %v899_v52, -inf  ;;  %v900_v58 = vmax.f32 %v800_v53, 0.0 }
 0x1db   : > { %v927_v59 = vmax.f32 %v925_v38, %v926_v57  ;;  %v971_v60 = vsel %vm681_vm2, %v902_v55, -inf }
 0x1dc   : > { %v972_v61 = vmax.f32 %v970_v41, %v971_v60  ;;  %v941_v62 = vsel %vm681_vm2, %v900_v58, -inf  ;;  %v1256_v63 = vpop.f32.mrb[12].mxu1 }
 0x1dd   : > { %v942_v0 = vmax.f32 %v940_v44, %v941_v62  ;;  %v821_v1 = vadd.f32 %v1256_v63, %v1499_v9  ;;  %v812_v2 = vpop.f32.mrb[13].mxu1 }
 0x1de   : > { %v813_v3 = vadd.f32 %v1499_v9, %v812_v2  ;;  %v1257_v4 = vpop.f32.mrb[14].mxu1 }
 0x1df   : > { %v905_v5 = vmax.f32 %v821_v1, 0.0  ;;  %v824_v6 = vadd.f32 %v1257_v4, %v1499_v9  ;;  %v815_v7 = vpop.f32.mrb[15].mxu1 }
 0x1e0   : > { %v903_v8 = vmax.f32 %v813_v3, 0.0  ;;  %v816_v10 = vadd.f32 %v1499_v9, %v815_v7 }
 0x1e1   : > { %v958_v11 = vsel %vm681_vm2, %v905_v5, -inf  ;;  %v906_v21 = vmax.f32 %v824_v6, 0.0 }
 0x1e2   : > { %v959_v12 = vmax.f32 %v957_v56, %v958_v11  ;;  %v928_v13 = vsel %vm681_vm2, %v903_v8, -inf  ;;  %v904_v14 = vmax.f32 %v816_v10, 0.0 }
 0x1e3   : > { %v929_v15 = vmax.f32 %v927_v59, %v928_v13  ;;  %v973_v16 = vsel %vm681_vm2, %v906_v21, -inf }
 0x1e4   : > { %v974_v17 = vmax.f32 %v972_v61, %v973_v16  ;;  %v943_v18 = vsel %vm681_vm2, %v904_v14, -inf  ;;  %v1260_v19 = vpop.f32.mrb[16].mxu1 }
 0x1e5   : > { %v944_v20 = vmax.f32 %v942_v0, %v943_v18  ;;  %v837_v22 = vadd.f32 %v1260_v19, %v1499_v9  ;;  %v828_v23 = vpop.f32.mrb[17].mxu1 }
 0x1e6   : > { %v829_v24 = vadd.f32 %v1499_v9, %v828_v23  ;;  %v1261_v25 = vpop.f32.mrb[18].mxu1 }
 0x1e7   : > { %v909_v26 = vmax.f32 %v837_v22, 0.0  ;;  %v840_v27 = vadd.f32 %v1261_v25, %v1499_v9  ;;  %v831_v28 = vpop.f32.mrb[19].mxu1 }
 0x1e8   : > { %v907_v29 = vmax.f32 %v829_v24, 0.0  ;;  %v832_v30 = vadd.f32 %v1499_v9, %v831_v28 }
 0x1e9   : > { %v960_v31 = vsel %vm681_vm2, %v909_v26, -inf  ;;  %v910_v32 = vmax.f32 %v840_v27, 0.0 }
 0x1ea   : > { %v961_v33 = vmax.f32 %v959_v12, %v960_v31  ;;  %v930_v34 = vsel %vm681_vm2, %v907_v29, -inf  ;;  %v908_v35 = vmax.f32 %v832_v30, 0.0 }
 0x1eb   : > { %v931_v36 = vmax.f32 %v929_v15, %v930_v34  ;;  %v975_v37 = vsel %vm681_vm2, %v910_v32, -inf }
 0x1ec   : > { %v976_v38 = vmax.f32 %v974_v17, %v975_v37  ;;  %v945_v39 = vsel %vm681_vm2, %v908_v35, -inf  ;;  %v1264_v40 = vpop.f32.mrb[20].mxu1 }
 0x1ed   : > { %v946_v41 = vmax.f32 %v944_v20, %v945_v39  ;;  %v853_v42 = vadd.f32 %v1264_v40, %v1499_v9  ;;  %v844_v43 = vpop.f32.mrb[21].mxu1 }
 0x1ee   : > { %v845_v44 = vadd.f32 %v1499_v9, %v844_v43  ;;  %v1265_v45 = vpop.f32.mrb[22].mxu1 }
 0x1ef   : > { %v913_v46 = vmax.f32 %v853_v42, 0.0  ;;  %v856_v47 = vadd.f32 %v1265_v45, %v1499_v9  ;;  %v847_v48 = vpop.f32.mrb[23].mxu1 }
 0x1f0   : > { %v911_v49 = vmax.f32 %v845_v44, 0.0  ;;  %v848_v50 = vadd.f32 %v1499_v9, %v847_v48 }
 0x1f1   : > { %v962_v51 = vsel %vm681_vm2, %v913_v46, -inf  ;;  %v914_v52 = vmax.f32 %v856_v47, 0.0 }
 0x1f2   : > { %v963_v53 = vmax.f32 %v961_v33, %v962_v51  ;;  %v932_v54 = vsel %vm681_vm2, %v911_v49, -inf  ;;  %v912_v55 = vmax.f32 %v848_v50, 0.0 }
 0x1f3   : > { %v933_v56 = vmax.f32 %v931_v36, %v932_v54  ;;  %v977_v57 = vsel %vm681_vm2, %v914_v52, -inf }
 0x1f4   : > { %v978_v58 = vmax.f32 %v976_v38, %v977_v57  ;;  %v947_v59 = vsel %vm681_vm2, %v912_v55, -inf  ;;  %v1268_v60 = vpop.f32.mrb[24].mxu1 }
 0x1f5   : > { %v948_v61 = vmax.f32 %v946_v41, %v947_v59  ;;  %v869_v62 = vadd.f32 %v1268_v60, %v1499_v9  ;;  %v860_v63 = vpop.f32.mrb[25].mxu1 }
 0x1f6   : > { %v861_v0 = vadd.f32 %v1499_v9, %v860_v63  ;;  %v1269_v1 = vpop.f32.mrb[26].mxu1 }
 0x1f7   : > { %v917_v2 = vmax.f32 %v869_v62, 0.0  ;;  %v872_v3 = vadd.f32 %v1269_v1, %v1499_v9  ;;  %v863_v4 = vpop.f32.mrb[27].mxu1 }
 0x1f8   : > { %v915_v5 = vmax.f32 %v861_v0, 0.0  ;;  %v864_v6 = vadd.f32 %v1499_v9, %v863_v4 }
 0x1f9   : > { %v964_v7 = vsel %vm681_vm2, %v917_v2, -inf  ;;  %v918_v8 = vmax.f32 %v872_v3, 0.0 }
 0x1fa   : > { %v965_v10 = vmax.f32 %v963_v53, %v964_v7  ;;  %v934_v11 = vsel %vm681_vm2, %v915_v5, -inf  ;;  %v916_v21 = vmax.f32 %v864_v6, 0.0 }
 0x1fb   : > { %v935_v12 = vmax.f32 %v933_v56, %v934_v11  ;;  %v979_v13 = vsel %vm681_vm2, %v918_v8, -inf }
 0x1fc   : > { %v980_v14 = vmax.f32 %v978_v58, %v979_v13  ;;  %v949_v15 = vsel %vm681_vm2, %v916_v21, -inf  ;;  %v1272_v16 = vpop.f32.mrb[28].mxu1 }
 0x1fd   : > { %v950_v17 = vmax.f32 %v948_v61, %v949_v15  ;;  %v885_v18 = vadd.f32 %v1272_v16, %v1499_v9  ;;  %v876_v19 = vpop.f32.mrb[29].mxu1 }
 0x1fe   : > { %v877_v20 = vadd.f32 %v1499_v9, %v876_v19  ;;  %v1273_v22 = vpop.f32.mrb[30].mxu1 }
 0x1ff   : > { %v921_v23 = vmax.f32 %v885_v18, 0.0  ;;  %v888_v24 = vadd.f32 %v1273_v22, %v1499_v9  ;;  %v879_v25 = vpop.f32.mrb[31].mxu1 }
 0x200   : > { %v919_v26 = vmax.f32 %v877_v20, 0.0  ;;  %v880_v27 = vadd.f32 %v1499_v9, %v879_v25 }
 0x201   : > { %v966_v28 = vsel %vm681_vm2, %v921_v23, -inf  ;;  %v922_v29 = vmax.f32 %v888_v24, 0.0 }
 0x202   : > { %v967_v30 = vmax.f32 %v965_v10, %v966_v28  ;;  %v936_v31 = vsel %vm681_vm2, %v919_v26, -inf  ;;  %v920_v32 = vmax.f32 %v880_v27, 0.0 }
 0x203   : > { %v937_v33 = vmax.f32 %v935_v12, %v936_v31  ;;  %v981_v34 = vsel %vm681_vm2, %v922_v29, -inf }
 0x204   : > { %v1164_v35 = vpack.c.bf16 %v967_v30, %v967_v30  ;;  %v982_v36 = vmax.f32 %v980_v14, %v981_v34  ;;  %v951_v37 = vsel %vm681_vm2, %v920_v32, -inf }
 0x205   : > { %v1162_v9 = vpack.c.bf16 %v937_v33, %v937_v33  ;;  %v952_v38 = vmax.f32 %v950_v17, %v951_v37 }
 0x206   : > { %1002 = vst.msk [vmem:[%s262_s16 + $0x8] sm:$0xf] %vm999_vm3, %v1164_v35  ;;  %v1165_v39 = vpack.c.bf16 %v982_v36, %v982_v36 }
 0x207   : > { %1000 = vst.msk [vmem:[%s262_s16] sm:$0xf] %vm999_vm3, %v1162_v9  ;;  %v1163_v40 = vpack.c.bf16 %v952_v38, %v952_v38 }
 0x208   : > { %1003 = vst.msk [vmem:[%s262_s16 + $0xc] sm:$0xf] %vm999_vm3, %v1165_v39 }
 0x209   : > { %1001 = vst.msk [vmem:[%s262_s16 + $0x4] sm:$0xf] %vm999_vm3, %v1163_v40 }
 0x20a PF: > { %s15_s20 = sadd.s32 1, %s1341_s20   ;;  %s1584_s18 = smov %s1337_s19 }
 0x20b   : > { %p12_p5 = scmp.ge.s32.totalorder %s15_s20, 4   ;;  %s1585_s19 = smov %s1587_s21 }
 0x20d   :  { %14 = sbr.rel (!%p12_p5) target bundleno = 2 (0x2), region = 70 }

// kernel: neg.1
= control target key start
LH: loop header
LB: loop body
LE: loop exit
PB: predicated region body
PF: predicated region fallthrough
CT: control target
= control target key end

     0   :  { %s72_s0 = inlined_call_operand.vmem [shape: f32[32,32], index: 0, kind: input, shape index: {}]   ;;  %s73_s1 = inlined_call_operand.vmem [shape: f32[32,32], index: 1, kind: output, shape index: {}]  }
   0x1   :  { %v2_v0 = vld [vmem:[%s72_s0] sm:$0xff]  ;;  %v32_v1 = vld [vmem:[%s72_s0 + $0x8] sm:$0xff]  ;;  %v34_v2 = vld [vmem:[%s72_s0 + $0x10] sm:$0xff] }
   0x2   :  { %v5_v3 = vxor.u32 2147483648, %v2_v0  ;;  %v12_v4 = vxor.u32 2147483648, %v32_v1  ;;  %v20_v5 = vxor.u32 2147483648, %v34_v2  ;;  %v36_v6 = vld [vmem:[%s72_s0 + $0x18] sm:$0xff] }
   0x3   :  { %v28_v7 = vxor.u32 2147483648, %v36_v6 }
   0x4   :  { %7 = vst [vmem:[%s73_s1] sm:$0xff] %v5_v3  ;;  %33 = vst [vmem:[%s73_s1 + $0x8] sm:$0xff] %v12_v4 }
   0x5   :  { %35 = vst [vmem:[%s73_s1 + $0x10] sm:$0xff] %v20_v5  ;;  %37 = vst [vmem:[%s73_s1 + $0x18] sm:$0xff] %v28_v7 }

// kernel: backbone_msnet_forward.11
= control target key start
LH: loop header
LB: loop body
LE: loop exit
PB: predicated region body
PF: predicated region fallthrough
CT: control target
= control target key end

     0   :  { %s995_s18 = smov 0   ;;  %s997_s19 = smov 0   ;;  %s1103_s0 = inlined_call_operand.vmem [shape: bf16[2,8,16,35], index: 0, kind: input, shape index: {}]   ;;  %s1104_s1 = inlined_call_operand.vmem [shape: bf16[35,32], index: 1, kind: input, shape index: {}]   ;;  %s1105_s2 = inlined_call_operand.vmem [shape: f32[1,32], index: 2, kind: input, shape index: {}]   ;;  %s1106_s3 = inlined_call_operand.vmem [shape: bf16[32,64], index: 3, kind: input, shape index: {}]   ;;  %s1107_s4 = inlined_call_operand.vmem [shape: f32[1,64], index: 4, kind: input, shape index: {}]   ;;  %s1108_s5 = inlined_call_operand.vmem [shape: bf16[2,16,64], index: 5, kind: output, shape index: {}]  }
   0x1   :  { %s999_s20 = smov 0  }
   0x2 LB: > { %s27_s21 = sadd.s32 1, %s958_s19  ;;  %p795_p0 = scmp.ge.s32.totalorder %s962_s20, 1  ;;  %s962_s20 = sphi %s999_s20, %s15_s20   ;;  %s958_s19 = sphi %s997_s19, %s1110_s19   ;;  %s954_s18 = sphi %s995_s18, %s1109_s18  }
   0x3   : > { %p29_p1 = scmp.ge.s32.totalorder %s27_s21, 2  ;;  %p208_p2 = scmp.lt.s32.totalorder %s962_s20, 3 }
   0x5   : > { %s1112_s21 = smov (%p29_p1, %s27_s21), 0  ;;  %p209_p3 = pnand %p795_p0, %p208_p2 }
   0x6   : > { %v927_v0 = vld [vmem:[%s1104_s1] sm:$0xff] (!%p209_p3)   ;;  %vm373_vm0 = vcmask (!%p209_p3), 1040384   ;;  %v928_v1 = vld [vmem:[%s1104_s1 + $0x8] sm:$0xff] (!%p209_p3)   ;;  %vm374_vm1 = vcmask (!%p209_p3), 1041408   ;;  %v964_v3 = vmov (!%p209_p3), 65535   ;;  %p245_p4 = scmp.lt.s32.totalorder (!%p209_p3), %s954_s18, 1 }
   0x7   : > { %212 = sbr.rel (%p209_p3) target bundleno = 492 (0x1ec), region = 40  ;;  %860 = vmatprep.subr.bf16.mxu0 (!%p209_p3), %v927_v0  ;;  %v929_v2 = vld [vmem:[%s1104_s1 + $0x10] ss:$0 sps:$4 sm:$0x33] (!%p209_p3)   ;;  %v375_v4 = vsel (!%p209_p3), %vm373_vm0, 4294967295, %v964_v3  ;;  %vm348_vm2 = vcmask (!%p209_p3), 285696  }
   0x8   : > { %861 = vmatpush3.bf16.msra.mxu0 (!%p209_p3), %v927_v0  ;;  %v376_v5 = vsel (!%p209_p3), %vm374_vm1, %v375_v4, 0  ;;  %v938_v15 = vld [vmem:[%s1106_s3] sm:$0xff] (!%p209_p3)   ;;  %v939_v16 = vld [vmem:[%s1106_s3 + $0x8] sm:$0xff] (!%p209_p3)   ;;  %vm524_vm3 = vcmask (!%p209_p3), 261120   ;;  %vm662_vm4 = vcmask (!%p209_p3), 523264   ;;  %vm701_vm5 = vcmask (!%p209_p3), 519168  }
   0x9   : > { %862 = vmatprep.subr.bf16.mxu0 (!%p209_p3), %v928_v1  ;;  %v378_v6 = vand.u32 (!%p209_p3), %v929_v2, %v376_v5  ;;  %882 = vmatprep.subr.bf16.mxu1 (!%p209_p3), %v938_v15  ;;  %v800_v17 = vld [vmem:[%s1105_s2] ss:$0 sm:$0xff] (!%p209_p3) }
   0xa   : > { %883 = vmatpush3.bf16.msra.mxu1 (!%p209_p3), %v938_v15 }
   0xb   : > { %884 = vmatprep.subr.bf16.mxu1 (!%p209_p3), %v939_v16 }
   0xc   : > { %863 = vmatpush3.bf16.msra.mxu0 (!%p209_p3), %v928_v1 }
   0xd   : > { %864 = vmatprep.subr.bf16.mxu0 (!%p209_p3), %v378_v6 }
   0xe   : > { %s1114_s18 = smov (!%p245_p4, %s954_s18), 1  ;;  %885 = vmatpush3.bf16.msra.mxu1 %v939_v16 }
   0xf   : > { %s835_s28 = sshll.u32 %s1114_s18, 6  ;;  %s836_s15 = sshll.u32 %s1114_s18, 3 }
  0x10   : > { %s252_s6 = scalar_lea.vmem %s1103_s0, %s835_s28  ;;  %865 = vmatpush3.bf16.msra.mxu0 %v378_v6  ;;  %s262_s22 = scalar_lea.vmem %s1108_s5, %s836_s15 }
  0x11   : > { %v930_v7 = vld [vmem:[%s252_s6] sm:$0xff]   ;;  %v931_v8 = vld [vmem:[%s252_s6 + $0x8] sm:$0xff]   ;;  %v932_v9 = vld [vmem:[%s252_s6 + $0x10] sm:$0xff]  }
  0x12   : > { %866 = vmatprep.mubr.msk.bf16.mxu0 %vm348_vm2, %v930_v7  ;;  %v933_v10 = vld [vmem:[%s252_s6 + $0x18] sm:$0xff]   ;;  %v934_v11 = vld [vmem:[%s252_s6 + $0x20] sm:$0xff]   ;;  %v935_v12 = vld [vmem:[%s252_s6 + $0x28] sm:$0xff]  }
  0x13   : > { %867 = vmatmul.mubr.msk.bf16.vlgmr.msra.gmra.mrb[0].mxu0 %vm348_vm2, %v931_v8  ;;  %v936_v13 = vld [vmem:[%s252_s6 + $0x30] sm:$0xff]   ;;  %v937_v14 = vld [vmem:[%s252_s6 + $0x38] sm:$0xff]  }
  0x14   : > { %870 = vmatprep.mubr.msk.bf16.mxu0 %vm348_vm2, %v932_v9 }
  0x1b   : > { %871 = vmatmul.mubr.msk.bf16.gmra.mrb[4].mxu0 %vm348_vm2, %v933_v10 }
  0x1c   : > { %874 = vmatprep.mubr.msk.bf16.mxu0 %vm348_vm2, %v934_v11 }
  0x23   : > { %875 = vmatmul.mubr.msk.bf16.gmra.mrb[8].mxu0 %vm348_vm2, %v935_v12  ;;  %v1056_v12 = vld [vmem:[%s1107_s4] ss:$0 sm:$0xff] }
  0x24   : > { %878 = vmatprep.mubr.msk.bf16.mxu0 %vm348_vm2, %v936_v13 }
  0x2b   : > { %879 = vmatmul.mubr.msk.bf16.gmra.mrb[12].mxu0 %vm348_vm2, %v937_v14 }
  0xe6   : > { %v868_v18 = vpop.f32.mrb[0].mxu0 }
  0xe7   : > { %v423_v19 = vadd.f32 %v868_v18, %v800_v17  ;;  %v414_v20 = vpop.f32.mrb[1].mxu0 }
  0xe8   : > { %v415_v21 = vadd.f32 %v800_v17, %v414_v20  ;;  %v869_v22 = vpop.f32.mrb[2].mxu0 }
  0xe9   : > { %v426_v23 = vadd.f32 %v869_v22, %v800_v17  ;;  %v417_v24 = vpop.f32.mrb[3].mxu0  ;;  %v479_v26 = vmax.f32 %v423_v19, 0.0 }
  0xea   : > { %v418_v25 = vadd.f32 %v800_v17, %v417_v24  ;;  %v477_v28 = vmax.f32 %v415_v21, 0.0 }
  0xeb   : > { %v480_v27 = vmax.f32 %v426_v23, 0.0 }
  0xec   : > { %v478_v29 = vmax.f32 %v418_v25, 0.0 }
  0xed   : > { %v494_v30 = vpack.c.bf16 %v480_v27, %v479_v26 }
  0xee   : > { %v872_v31 = vpop.f32.mrb[4].mxu0  ;;  %v493_v32 = vpack.c.bf16 %v478_v29, %v477_v28 }
  0xef   : > { %v439_v33 = vadd.f32 %v872_v31, %v800_v17  ;;  %v430_v34 = vpop.f32.mrb[5].mxu0 }
  0xf0   : > { %v431_v35 = vadd.f32 %v800_v17, %v430_v34  ;;  %v873_v36 = vpop.f32.mrb[6].mxu0  ;;  %886 = vmatprep.mubr.msk.bf16.mxu1 %vm524_vm3, %v493_v32 }
  0xf1   : > { %v442_v37 = vadd.f32 %v873_v36, %v800_v17  ;;  %v433_v38 = vpop.f32.mrb[7].mxu0  ;;  %887 = vmatmul.mubr.msk.bf16.vlgmr.msra.gmra.mrb[0].mxu1 %vm524_vm3, %v494_v30  ;;  %v483_v40 = vmax.f32 %v439_v33, 0.0 }
  0xf2   : > { %v434_v39 = vadd.f32 %v800_v17, %v433_v38  ;;  %v481_v42 = vmax.f32 %v431_v35, 0.0 }
  0xf3   : > { %v484_v41 = vmax.f32 %v442_v37, 0.0 }
  0xf4   : > { %v482_v43 = vmax.f32 %v434_v39, 0.0 }
  0xf5   : > { %v496_v44 = vpack.c.bf16 %v484_v41, %v483_v40 }
  0xf6   : > { %v495_v45 = vpack.c.bf16 %v482_v43, %v481_v42  ;;  %v876_v46 = vpop.f32.mrb[8].mxu0 }
  0xf7   : > { %v455_v47 = vadd.f32 %v876_v46, %v800_v17  ;;  %v446_v48 = vpop.f32.mrb[9].mxu0 }
  0xf8   : > { %v447_v49 = vadd.f32 %v800_v17, %v446_v48  ;;  %v877_v50 = vpop.f32.mrb[10].mxu0  ;;  %890 = vmatprep.mubr.msk.bf16.mxu1 %vm524_vm3, %v495_v45 }
  0xf9   : > { %v458_v51 = vadd.f32 %v877_v50, %v800_v17  ;;  %v449_v52 = vpop.f32.mrb[11].mxu0  ;;  %891 = vmatmul.mubr.msk.bf16.gmra.mrb[4].mxu1 %vm524_vm3, %v496_v44  ;;  %v487_v54 = vmax.f32 %v455_v47, 0.0 }
  0xfa   : > { %v450_v53 = vadd.f32 %v800_v17, %v449_v52  ;;  %v485_v56 = vmax.f32 %v447_v49, 0.0 }
  0xfb   : > { %v488_v55 = vmax.f32 %v458_v51, 0.0 }
  0xfc   : > { %v486_v57 = vmax.f32 %v450_v53, 0.0 }
  0xfd   : > { %v498_v58 = vpack.c.bf16 %v488_v55, %v487_v54 }
  0xfe   : > { %v497_v59 = vpack.c.bf16 %v486_v57, %v485_v56  ;;  %v880_v60 = vpop.f32.mrb[12].mxu0 }
  0xff   : > { %v471_v61 = vadd.f32 %v880_v60, %v800_v17  ;;  %v462_v62 = vpop.f32.mrb[13].mxu0 }
 0x100   : > { %v463_v63 = vadd.f32 %v800_v17, %v462_v62  ;;  %v881_v0 = vpop.f32.mrb[14].mxu0  ;;  %894 = vmatprep.mubr.msk.bf16.mxu1 %vm524_vm3, %v497_v59 }
 0x101   : > { %v474_v1 = vadd.f32 %v881_v0, %v800_v17  ;;  %v465_v2 = vpop.f32.mrb[15].mxu0  ;;  %895 = vmatmul.mubr.msk.bf16.gmra.mrb[8].mxu1 %vm524_vm3, %v498_v58  ;;  %v491_v4 = vmax.f32 %v471_v61, 0.0 }
 0x102   : > { %v466_v3 = vadd.f32 %v800_v17, %v465_v2  ;;  %v489_v6 = vmax.f32 %v463_v63, 0.0 }
 0x103   : > { %v492_v5 = vmax.f32 %v474_v1, 0.0 }
 0x104   : > { %v490_v7 = vmax.f32 %v466_v3, 0.0 }
 0x105   : > { %v500_v8 = vpack.c.bf16 %v492_v5, %v491_v4 }
 0x106   : > { %v499_v9 = vpack.c.bf16 %v490_v7, %v489_v6 }
 0x108   : > { %898 = vmatprep.mubr.msk.bf16.mxu1 %vm524_vm3, %v499_v9 }
 0x109   : > { %899 = vmatmul.mubr.msk.bf16.gmra.mrb[12].mxu1 %vm524_vm3, %v500_v8 }
 0x1c4   : > { %v888_v10 = vpop.f32.mrb[0].mxu1 }
 0x1c5   : > { %v583_v11 = vpop.f32.mrb[1].mxu1  ;;  %v592_v15 = vadd.f32 %v888_v10, %v1056_v12 }
 0x1c6   : > { %v889_v13 = vpop.f32.mrb[2].mxu1  ;;  %v584_v16 = vadd.f32 %v1056_v12, %v583_v11 }
 0x1c7   : > { %v586_v14 = vpop.f32.mrb[3].mxu1  ;;  %v595_v17 = vadd.f32 %v889_v13, %v1056_v12  ;;  %v648_v20 = vmax.f32 %v592_v15, 0.0 }
 0x1c8   : > { %v587_v18 = vadd.f32 %v1056_v12, %v586_v14  ;;  %v646_v23 = vmax.f32 %v584_v16, 0.0 }
 0x1c9   : > { %v649_v26 = vmax.f32 %v595_v17, 0.0  ;;  %v664_v33 = vsel %vm662_vm4, %v648_v20, -inf }
 0x1ca   : > { %v647_v30 = vmax.f32 %v587_v18, 0.0  ;;  %v663_v36 = vsel %vm662_vm4, %v646_v23, -inf }
 0x1cb   : > { %v679_v40 = vsel %vm662_vm4, %v649_v26, -inf }
 0x1cc   : > { %v892_v19 = vpop.f32.mrb[4].mxu1  ;;  %v678_v43 = vsel %vm662_vm4, %v647_v30, -inf }
 0x1cd   : > { %v608_v21 = vadd.f32 %v892_v19, %v1056_v12  ;;  %v599_v22 = vpop.f32.mrb[5].mxu1 }
 0x1ce   : > { %v600_v24 = vadd.f32 %v1056_v12, %v599_v22  ;;  %v893_v25 = vpop.f32.mrb[6].mxu1 }
 0x1cf   : > { %v652_v27 = vmax.f32 %v608_v21, 0.0  ;;  %v611_v28 = vadd.f32 %v893_v25, %v1056_v12  ;;  %v602_v29 = vpop.f32.mrb[7].mxu1 }
 0x1d0   : > { %v650_v31 = vmax.f32 %v600_v24, 0.0  ;;  %v603_v32 = vadd.f32 %v1056_v12, %v602_v29 }
 0x1d1   : > { %v667_v34 = vsel %vm662_vm4, %v652_v27, -inf  ;;  %v653_v35 = vmax.f32 %v611_v28, 0.0 }
 0x1d2   : > { %v668_v37 = vmax.f32 %v664_v33, %v667_v34  ;;  %v665_v38 = vsel %vm662_vm4, %v650_v31, -inf  ;;  %v651_v39 = vmax.f32 %v603_v32, 0.0 }
 0x1d3   : > { %v666_v41 = vmax.f32 %v663_v36, %v665_v38  ;;  %v682_v42 = vsel %vm662_vm4, %v653_v35, -inf }
 0x1d4   : > { %v683_v44 = vmax.f32 %v679_v40, %v682_v42  ;;  %v680_v45 = vsel %vm662_vm4, %v651_v39, -inf  ;;  %v896_v46 = vpop.f32.mrb[8].mxu1 }
 0x1d5   : > { %v681_v47 = vmax.f32 %v678_v43, %v680_v45  ;;  %v624_v48 = vadd.f32 %v896_v46, %v1056_v12  ;;  %v615_v49 = vpop.f32.mrb[9].mxu1 }
 0x1d6   : > { %v616_v50 = vadd.f32 %v1056_v12, %v615_v49  ;;  %v897_v51 = vpop.f32.mrb[10].mxu1 }
 0x1d7   : > { %v656_v52 = vmax.f32 %v624_v48, 0.0  ;;  %v627_v53 = vadd.f32 %v897_v51, %v1056_v12  ;;  %v618_v54 = vpop.f32.mrb[11].mxu1 }
 0x1d8   : > { %v654_v55 = vmax.f32 %v616_v50, 0.0  ;;  %v619_v56 = vadd.f32 %v1056_v12, %v618_v54 }
 0x1d9   : > { %v671_v57 = vsel %vm662_vm4, %v656_v52, -inf  ;;  %v657_v58 = vmax.f32 %v627_v53, 0.0 }
 0x1da   : > { %v672_v59 = vmax.f32 %v668_v37, %v671_v57  ;;  %v669_v60 = vsel %vm662_vm4, %v654_v55, -inf  ;;  %v655_v61 = vmax.f32 %v619_v56, 0.0 }
 0x1db   : > { %v670_v62 = vmax.f32 %v666_v41, %v669_v60  ;;  %v686_v63 = vsel %vm662_vm4, %v657_v58, -inf }
 0x1dc   : > { %v687_v0 = vmax.f32 %v683_v44, %v686_v63  ;;  %v684_v1 = vsel %vm662_vm4, %v655_v61, -inf  ;;  %v900_v2 = vpop.f32.mrb[12].mxu1 }
 0x1dd   : > { %v685_v3 = vmax.f32 %v681_v47, %v684_v1  ;;  %v640_v4 = vadd.f32 %v900_v2, %v1056_v12  ;;  %v631_v5 = vpop.f32.mrb[13].mxu1 }
 0x1de   : > { %v632_v6 = vadd.f32 %v1056_v12, %v631_v5  ;;  %v901_v7 = vpop.f32.mrb[14].mxu1 }
 0x1df   : > { %v660_v8 = vmax.f32 %v640_v4, 0.0  ;;  %v643_v9 = vadd.f32 %v901_v7, %v1056_v12  ;;  %v634_v10 = vpop.f32.mrb[15].mxu1 }
 0x1e0   : > { %v658_v11 = vmax.f32 %v632_v6, 0.0  ;;  %v635_v13 = vadd.f32 %v1056_v12, %v634_v10 }
 0x1e1   : > { %v675_v14 = vsel %vm662_vm4, %v660_v8, -inf  ;;  %v661_v15 = vmax.f32 %v643_v9, 0.0 }
 0x1e2   : > { %v676_v16 = vmax.f32 %v672_v59, %v675_v14  ;;  %v673_v17 = vsel %vm662_vm4, %v658_v11, -inf  ;;  %v659_v18 = vmax.f32 %v635_v13, 0.0 }
 0x1e3   : > { %v674_v19 = vmax.f32 %v670_v62, %v673_v17  ;;  %v690_v20 = vsel %vm662_vm4, %v661_v15, -inf }
 0x1e4   : > { %v691_v21 = vmax.f32 %v687_v0, %v690_v20  ;;  %v688_v22 = vsel %vm662_vm4, %v659_v18, -inf }
 0x1e5   : > { %v677_v23 = vmax.f32 %v674_v19, %v676_v16  ;;  %v689_v24 = vmax.f32 %v685_v3, %v688_v22 }
 0x1e7   : > { %v837_v12 = vpack.c.bf16 %v677_v23, %v677_v23  ;;  %v692_v25 = vmax.f32 %v689_v24, %v691_v21 }
 0x1e9   : > { %702 = vst.msk [vmem:[%s262_s22] sm:$0xf] %vm701_vm5, %v837_v12  ;;  %v838_v26 = vpack.c.bf16 %v692_v25, %v692_v25 }
 0x1eb   : > { %703 = vst.msk [vmem:[%s262_s22 + $0x4] sm:$0xf] %vm701_vm5, %v838_v26 }
 0x1ec PF: > { %s15_s20 = sadd.s32 1, %s962_s20   ;;  %s1109_s18 = smov %s958_s19 }
 0x1ed   : > { %p12_p5 = scmp.ge.s32.totalorder %s15_s20, 4   ;;  %s1110_s19 = smov %s1112_s21 }
 0x1ef   :  { %14 = sbr.rel (!%p12_p5) target bundleno = 2 (0x2), region = 70 }

// kernel: custom-call.52
= control target key start
LH: loop header
LB: loop body
LE: loop exit
PB: predicated region body
PF: predicated region fallthrough
CT: control target
= control target key end

     0   :  { %s6_s0 = inlined_call_operand.vmem [shape: f32[2,16], index: 0, kind: output, shape index: {}]  }

// kernel: backbone_msnet_forward.12
= control target key start
LH: loop header
LB: loop body
LE: loop exit
PB: predicated region body
PF: predicated region fallthrough
CT: control target
= control target key end

     0   :  { %s812_s18 = smov 0   ;;  %s814_s19 = smov 0   ;;  %s890_s0 = inlined_call_operand.vmem [shape: bf16[2,8,8,67], index: 0, kind: input, shape index: {}]   ;;  %s891_s1 = inlined_call_operand.vmem [shape: bf16[67,64], index: 1, kind: input, shape index: {}]   ;;  %s892_s2 = inlined_call_operand.vmem [shape: f32[1,64], index: 2, kind: input, shape index: {}]   ;;  %s893_s3 = inlined_call_operand.vmem [shape: bf16[64,128], index: 3, kind: input, shape index: {}]   ;;  %s894_s4 = inlined_call_operand.vmem [shape: f32[1,128], index: 4, kind: input, shape index: {}]   ;;  %s895_s5 = inlined_call_operand.vmem [shape: bf16[2,8,128], index: 5, kind: output, shape index: {}]  }
   0x1   :  { %s816_s20 = smov 0  }
   0x2 LB: > { %s27_s21 = sadd.s32 1, %s775_s19  ;;  %p638_p0 = scmp.ge.s32.totalorder %s779_s20, 1  ;;  %s779_s20 = sphi %s816_s20, %s15_s20   ;;  %s775_s19 = sphi %s814_s19, %s897_s19   ;;  %s771_s18 = sphi %s812_s18, %s896_s18  }
   0x3   : > { %p29_p1 = scmp.ge.s32.totalorder %s27_s21, 2  ;;  %p206_p2 = scmp.lt.s32.totalorder %s779_s20, 3 }
   0x5   : > { %s899_s21 = smov (%p29_p1, %s27_s21), 0  ;;  %p207_p3 = pnand %p638_p0, %p206_p2 }
   0x6   : > { %v744_v0 = vld [vmem:[%s891_s1] sm:$0xff] (!%p207_p3)   ;;  %v745_v1 = vld [vmem:[%s891_s1 + $0x8] sm:$0xff] (!%p207_p3)   ;;  %vm339_vm0 = vcmask (!%p207_p3), 1040384   ;;  %v746_v2 = vld [vmem:[%s891_s1 + $0x10] sm:$0xff] (!%p207_p3)   ;;  %vm340_vm1 = vcmask (!%p207_p3), 1041408   ;;  %p239_p4 = scmp.lt.s32.totalorder (!%p207_p3), %s771_s18, 1 }
   0x7   : > { %210 = sbr.rel (%p207_p3) target bundleno = 485 (0x1e5), region = 40  ;;  %685 = vmatprep.subr.bf16.mxu0 (!%p207_p3), %v744_v0  ;;  %v748_v3 = vld [vmem:[%s891_s1 + $0x20] ss:$0 sps:$4 sm:$0x33] (!%p207_p3)   ;;  %v781_v4 = vmov (!%p207_p3), 65535   ;;  %v754_v7 = vld [vmem:[%s893_s3 + $0x8] sm:$0xff] (!%p207_p3)  }
   0x8   : > { %686 = vmatpush3.bf16.msra.mxu0 (!%p207_p3), %v744_v0  ;;  %v341_v5 = vsel (!%p207_p3), %vm339_vm0, 4294967295, %v781_v4  ;;  %v753_v6 = vld [vmem:[%s893_s3] sm:$0xff] (!%p207_p3)   ;;  %v747_v8 = vld [vmem:[%s891_s1 + $0x18] sm:$0xff] (!%p207_p3)   ;;  %vm326_vm2 = vcmask (!%p207_p3), 547840   ;;  %v755_v15 = vld [vmem:[%s893_s3 + $0x10] sm:$0xff] (!%p207_p3)   ;;  %vm462_vm3 = vcmask (!%p207_p3), 523264  }
   0x9   : > { %687 = vmatprep.subr.bf16.mxu0 (!%p207_p3), %v745_v1  ;;  %703 = vmatprep.subr.bf16.mxu1 (!%p207_p3), %v753_v6  ;;  %v342_v9 = vsel (!%p207_p3), %vm340_vm1, %v341_v5, 0  ;;  %v756_v16 = vld [vmem:[%s893_s3 + $0x18] sm:$0xff] (!%p207_p3)   ;;  %v642_v17 = vld [vmem:[%s892_s2] ss:$0 sm:$0xff] (!%p207_p3) }
   0xa   : > { %704 = vmatpush3.bf16.msra.mxu1 (!%p207_p3), %v753_v6  ;;  %v344_v11 = vand.u32 (!%p207_p3), %v748_v3, %v342_v9  ;;  %v656_v50 = vld [vmem:[%s894_s4] ss:$0 sm:$0xff] (!%p207_p3) }
   0xb   : > { %705 = vmatprep.subr.bf16.mxu1 (!%p207_p3), %v754_v7 }
   0xc   : > { %688 = vmatpush3.bf16.msra.mxu0 (!%p207_p3), %v745_v1 }
   0xd   : > { %689 = vmatprep.subr.bf16.mxu0 (!%p207_p3), %v746_v2 }
   0xe   : > { %s901_s18 = smov (!%p239_p4, %s771_s18), 1  ;;  %706 = vmatpush3.bf16.msra.mxu1 %v754_v7 }
   0xf   : > { %s667_s11 = sshll.u32 %s901_s18, 5  ;;  %707 = vmatprep.subr.bf16.mxu1 %v755_v15  ;;  %s641_s27 = sshll.u32 %s901_s18, 2 }
  0x10   : > { %s246_s14 = scalar_lea.vmem %s890_s0, %s667_s11  ;;  %690 = vmatpush3.bf16.msra.mxu0 %v746_v2  ;;  %s253_s30 = scalar_lea.vmem %s895_s5, %s641_s27 }
  0x11   : > { %v749_v10 = vld [vmem:[%s246_s14] sm:$0xff]   ;;  %691 = vmatprep.subr.bf16.mxu0 %v747_v8  ;;  %v750_v12 = vld [vmem:[%s246_s14 + $0x8] sm:$0xff]   ;;  %v751_v13 = vld [vmem:[%s246_s14 + $0x10] sm:$0xff]  }
  0x12   : > { %695 = vmatprep.mubr.msk.bf16.mxu0 %vm326_vm2, %v749_v10  ;;  %v752_v14 = vld [vmem:[%s246_s14 + $0x18] sm:$0xff]   ;;  %708 = vmatpush3.bf16.msra.mxu1 %v755_v15 }
  0x13   : > { %709 = vmatprep.subr.bf16.mxu1 %v756_v16 }
  0x14   : > { %692 = vmatpush3.bf16.msra.mxu0 %v747_v8 }
  0x15   : > { %693 = vmatprep.subr.bf16.mxu0 %v344_v11 }
  0x16   : > { %710 = vmatpush3.bf16.msra.mxu1 %v756_v16 }
  0x18   : > { %694 = vmatpush3.bf16.msra.mxu0 %v344_v11 }
  0x1b   : > { %696 = vmatmul.mubr.msk.bf16.vlgmr.msra.gmra.mrb[0].mxu0 %vm326_vm2, %v750_v12 }
  0x1c   : > { %699 = vmatprep.mubr.msk.bf16.mxu0 %vm326_vm2, %v751_v13 }
  0x23   : > { %700 = vmatmul.mubr.msk.bf16.gmra.mrb[4].mxu0 %vm326_vm2, %v752_v14 }
  0xee   : > { %v697_v18 = vpop.f32.mrb[0].mxu0 }
  0xef   : > { %v389_v19 = vadd.f32 %v697_v18, %v642_v17  ;;  %v380_v20 = vpop.f32.mrb[1].mxu0 }
  0xf0   : > { %v381_v21 = vadd.f32 %v642_v17, %v380_v20  ;;  %v698_v22 = vpop.f32.mrb[2].mxu0 }
  0xf1   : > { %v392_v23 = vadd.f32 %v698_v22, %v642_v17  ;;  %v383_v24 = vpop.f32.mrb[3].mxu0  ;;  %v413_v26 = vmax.f32 %v389_v19, 0.0 }
  0xf2   : > { %v384_v25 = vadd.f32 %v642_v17, %v383_v24  ;;  %v411_v28 = vmax.f32 %v381_v21, 0.0 }
  0xf3   : > { %v414_v27 = vmax.f32 %v392_v23, 0.0 }
  0xf4   : > { %v412_v29 = vmax.f32 %v384_v25, 0.0 }
  0xf5   : > { %v420_v30 = vpack.c.bf16 %v414_v27, %v413_v26 }
  0xf6   : > { %v701_v31 = vpop.f32.mrb[4].mxu0  ;;  %v419_v32 = vpack.c.bf16 %v412_v29, %v411_v28 }
  0xf7   : > { %v405_v33 = vadd.f32 %v701_v31, %v642_v17  ;;  %v396_v34 = vpop.f32.mrb[5].mxu0 }
  0xf8   : > { %v397_v35 = vadd.f32 %v642_v17, %v396_v34  ;;  %v702_v36 = vpop.f32.mrb[6].mxu0  ;;  %711 = vmatprep.mubr.msk.bf16.mxu1 %vm462_vm3, %v419_v32 }
  0xf9   : > { %v408_v37 = vadd.f32 %v702_v36, %v642_v17  ;;  %v399_v38 = vpop.f32.mrb[7].mxu0  ;;  %712 = vmatmul.mubr.msk.bf16.vlgmr.msra.gmra.mrb[0].mxu1 %vm462_vm3, %v420_v30  ;;  %v417_v40 = vmax.f32 %v405_v33, 0.0 }
  0xfa   : > { %v400_v39 = vadd.f32 %v642_v17, %v399_v38  ;;  %v415_v42 = vmax.f32 %v397_v35, 0.0 }
  0xfb   : > { %v418_v41 = vmax.f32 %v408_v37, 0.0 }
  0xfc   : > { %v416_v43 = vmax.f32 %v400_v39, 0.0 }
  0xfd   : > { %v422_v44 = vpack.c.bf16 %v418_v41, %v417_v40 }
  0xfe   : > { %v421_v45 = vpack.c.bf16 %v416_v43, %v415_v42 }
 0x100   : > { %715 = vmatprep.mubr.msk.bf16.mxu1 %vm462_vm3, %v421_v45 }
 0x101   : > { %716 = vmatmul.mubr.msk.bf16.gmra.mrb[4].mxu1 %vm462_vm3, %v422_v44 }
 0x1cc   : > { %v713_v46 = vpop.f32.mrb[0].mxu1 }
 0x1cd   : > { %v509_v47 = vpop.f32.mrb[1].mxu1  ;;  %v518_v51 = vadd.f32 %v713_v46, %v656_v50 }
 0x1ce   : > { %v714_v48 = vpop.f32.mrb[2].mxu1  ;;  %v510_v52 = vadd.f32 %v656_v50, %v509_v47 }
 0x1cf   : > { %v512_v49 = vpop.f32.mrb[3].mxu1  ;;  %v521_v54 = vadd.f32 %v714_v48, %v656_v50  ;;  %v542_v60 = vmax.f32 %v518_v51, 0.0 }
 0x1d0   : > { %v513_v57 = vadd.f32 %v656_v50, %v512_v49  ;;  %v540_v0 = vmax.f32 %v510_v52, 0.0 }
 0x1d1   : > { %v543_v3 = vmax.f32 %v521_v54, 0.0 }
 0x1d2   : > { %v541_v6 = vmax.f32 %v513_v57, 0.0 }
 0x1d4   : > { %v717_v53 = vpop.f32.mrb[4].mxu1 }
 0x1d5   : > { %v534_v55 = vadd.f32 %v717_v53, %v656_v50  ;;  %v525_v56 = vpop.f32.mrb[5].mxu1 }
 0x1d6   : > { %v526_v58 = vadd.f32 %v656_v50, %v525_v56  ;;  %v718_v59 = vpop.f32.mrb[6].mxu1 }
 0x1d7   : > { %v546_v61 = vmax.f32 %v534_v55, 0.0  ;;  %v537_v62 = vadd.f32 %v718_v59, %v656_v50  ;;  %v528_v63 = vpop.f32.mrb[7].mxu1 }
 0x1d8   : > { %v544_v1 = vmax.f32 %v526_v58, 0.0  ;;  %v529_v2 = vadd.f32 %v656_v50, %v528_v63 }
 0x1d9   : > { %v550_v4 = vmax.f32 %v542_v60, %v546_v61  ;;  %v547_v5 = vmax.f32 %v537_v62, 0.0 }
 0x1da   : > { %v548_v7 = vmax.f32 %v540_v0, %v544_v1  ;;  %v545_v8 = vmax.f32 %v529_v2, 0.0 }
 0x1db   : > { %v551_v9 = vmax.f32 %v543_v3, %v547_v5 }
 0x1dc   : > { %v549_v10 = vmax.f32 %v541_v6, %v545_v8 }
 0x1dd   : > { %v553_v11 = vmax.f32 %v550_v4, %v551_v9 }
 0x1de   : > { %v552_v12 = vmax.f32 %v548_v7, %v549_v10 }
 0x1e0   : > { %v554_v13 = vmax.f32 %v552_v12, %v553_v11 }
 0x1e2   : > { %v555_v14 = vpack.c.bf16 %v554_v13, %v554_v13 }
 0x1e4   : > { %556 = vst [vmem:[%s253_s30] sm:$0xf] %v555_v14 }
 0x1e5 PF: > { %s15_s20 = sadd.s32 1, %s779_s20   ;;  %s896_s18 = smov %s775_s19 }
 0x1e6   : > { %p12_p5 = scmp.ge.s32.totalorder %s15_s20, 4   ;;  %s897_s19 = smov %s899_s21 }
 0x1e8   :  { %14 = sbr.rel (!%p12_p5) target bundleno = 2 (0x2), region = 70 }

// kernel: custom-call.53
= control target key start
LH: loop header
LB: loop body
LE: loop exit
PB: predicated region body
PF: predicated region fallthrough
CT: control target
= control target key end

     0   :  { %s6_s0 = inlined_call_operand.vmem [shape: f32[2,8], index: 0, kind: output, shape index: {}]  }

// kernel: neg.3
= control target key start
LH: loop header
LB: loop body
LE: loop exit
PB: predicated region body
PF: predicated region fallthrough
CT: control target
= control target key end

     0   :  { %s24_s0 = inlined_call_operand.vmem [shape: f32[8,8], index: 0, kind: input, shape index: {}]   ;;  %s25_s1 = inlined_call_operand.vmem [shape: f32[8,8], index: 1, kind: output, shape index: {}]  }
   0x1   :  { %v2_v0 = vld [vmem:[%s24_s0] sm:$0xff] }
   0x2   :  { %v5_v1 = vxor.u32 2147483648, %v2_v0 }
   0x4   :  { %7 = vst [vmem:[%s25_s1] sm:$0xff] %v5_v1 }

// kernel: neg.18
= control target key start
LH: loop header
LB: loop body
LE: loop exit
PB: predicated region body
PF: predicated region fallthrough
CT: control target
= control target key end

     0   :  { %s40_s0 = inlined_call_operand.vmem [shape: f32[2,8,4], index: 0, kind: input, shape index: {}]   ;;  %s41_s1 = inlined_call_operand.vmem [shape: f32[2,8,4], index: 1, kind: output, shape index: {}]  }
   0x1   :  { %v2_v0 = vld [vmem:[%s40_s0] sm:$0xff]  ;;  %v16_v1 = vld [vmem:[%s40_s0 + $0x8] sm:$0xff] }
   0x2   :  { %v5_v2 = vxor.u32 2147483648, %v2_v0  ;;  %v12_v3 = vxor.u32 2147483648, %v16_v1 }
   0x4   :  { %7 = vst [vmem:[%s41_s1] sm:$0xff] %v5_v2  ;;  %17 = vst [vmem:[%s41_s1 + $0x8] sm:$0xff] %v12_v3 }

// kernel: backbone_msnet_forward.13
= control target key start
LH: loop header
LB: loop body
LE: loop exit
PB: predicated region body
PF: predicated region fallthrough
CT: control target
= control target key end

     0   :  { %s970_s18 = smov 0   ;;  %s972_s19 = smov 0   ;;  %s1115_s0 = inlined_call_operand.vmem [shape: bf16[2,8,8,131], index: 0, kind: input, shape index: {}]   ;;  %s1116_s1 = inlined_call_operand.vmem [shape: bf16[131,128], index: 1, kind: input, shape index: {}]   ;;  %s1117_s2 = inlined_call_operand.vmem [shape: f32[1,128], index: 2, kind: input, shape index: {}]   ;;  %s1118_s3 = inlined_call_operand.vmem [shape: bf16[128,256], index: 3, kind: input, shape index: {}]   ;;  %s1119_s4 = inlined_call_operand.vmem [shape: f32[1,256], index: 4, kind: input, shape index: {}]   ;;  %s1120_s5 = inlined_call_operand.vmem [shape: bf16[2,8,256], index: 5, kind: output, shape index: {}]  }
   0x1   :  { %s974_s20 = smov 0  }
   0x2 LB: > { %s27_s21 = sadd.s32 1, %s932_s19  ;;  %p794_p0 = scmp.ge.s32.totalorder %s936_s20, 1  ;;  %s936_s20 = sphi %s974_s20, %s15_s20   ;;  %s932_s19 = sphi %s972_s19, %s1122_s19   ;;  %s928_s18 = sphi %s970_s18, %s1121_s18  }
   0x3   : > { %p29_p1 = scmp.ge.s32.totalorder %s27_s21, 2  ;;  %p207_p2 = scmp.lt.s32.totalorder %s936_s20, 3 }
   0x5   : > { %s1124_s21 = smov (%p29_p1, %s27_s21), 0  ;;  %p208_p3 = pnand %p794_p0, %p207_p2 }
   0x6   : > { %v869_v0 = vld [vmem:[%s1116_s1] sm:$0xff] (!%p208_p3)   ;;  %v938_v1 = vmov (!%p208_p3), 0   ;;  %v870_v2 = vld [vmem:[%s1116_s1 + $0x8] sm:$0xff] (!%p208_p3)   ;;  %v871_v3 = vld [vmem:[%s1116_s1 + $0x10] sm:$0xff] (!%p208_p3)   ;;  %p243_p4 = scmp.lt.s32.totalorder (!%p208_p3), %s928_s18, 1  ;;  %vm381_vm0 = vcmask (!%p208_p3), 23552  }
   0x7   : > { %211 = sbr.rel (%p208_p3) target bundleno = 513 (0x201), region = 40  ;;  %401 = vmatprep.subr.bf16.mxu0 (!%p208_p3), %v938_v1  ;;  %618 = vmatprep.mubr.bf16.mxu1 (!%p208_p3), %v938_v1  ;;  %v872_v4 = vld [vmem:[%s1116_s1 + $0x18] sm:$0xff] (!%p208_p3)   ;;  %v890_v5 = vld [vmem:[%s1118_s3 + $0x4] ss:$8 sps:$4 sm:$0xff] (!%p208_p3)   ;;  %v892_v6 = vld [vmem:[%s1118_s3] ss:$8 sps:$4 sm:$0xff] (!%p208_p3)  }
   0x8   : > { %402 = vmatpush1.bf16.msra.mxu0 (!%p208_p3), %v869_v0  ;;  %586 = vmatprep.subr.bf16.mxu1 (!%p208_p3), %v890_v5  ;;  %v893_v7 = vld [vmem:[%s1118_s3 + $0x14] ss:$8 sps:$4 sm:$0xff] (!%p208_p3)   ;;  %v895_v8 = vld [vmem:[%s1118_s3 + $0x10] ss:$8 sps:$4 sm:$0xff] (!%p208_p3)   ;;  %v873_v10 = vld [vmem:[%s1116_s1 + $0x20] sm:$0xff] (!%p208_p3)   ;;  %vm394_vm1 = vcmask (!%p208_p3), 1040384  }
   0x9   : > { %403 = vmatprep.subr.bf16.mxu0 (!%p208_p3), %v938_v1  ;;  %587 = vmatpush1.bf16.msra.mxu1 (!%p208_p3), %v892_v6  ;;  %v874_v11 = vld [vmem:[%s1116_s1 + $0x28] sm:$0xff] (!%p208_p3)   ;;  %v899_v14 = vld [vmem:[%s1118_s3 + $0x34] ss:$8 sps:$4 sm:$0xff] (!%p208_p3)   ;;  %v901_v15 = vld [vmem:[%s1118_s3 + $0x30] ss:$8 sps:$4 sm:$0xff] (!%p208_p3)   ;;  %vm395_vm2 = vcmask (!%p208_p3), 1041408  }
   0xa   : > { %588 = vmatprep.subr.bf16.mxu1 (!%p208_p3), %v893_v7  ;;  %v896_v12 = vld [vmem:[%s1118_s3 + $0x24] ss:$8 sps:$4 sm:$0xff] (!%p208_p3)   ;;  %v898_v13 = vld [vmem:[%s1118_s3 + $0x20] ss:$8 sps:$4 sm:$0xff] (!%p208_p3)   ;;  %v875_v17 = vld [vmem:[%s1116_s1 + $0x30] sm:$0xff] (!%p208_p3)   ;;  %v939_v18 = vmov (!%p208_p3), 65535  }
   0xb   : > { %v902_v16 = vld [vmem:[%s1118_s3 + $0x44] ss:$8 sps:$4 sm:$0xff] (!%p208_p3)   ;;  %v396_v19 = vsel (!%p208_p3), %vm394_vm1, 4294967295, %v939_v18  ;;  %v904_v20 = vld [vmem:[%s1118_s3 + $0x40] ss:$8 sps:$4 sm:$0xff] (!%p208_p3)   ;;  %v876_v22 = vld [vmem:[%s1116_s1 + $0x38] sm:$0xff] (!%p208_p3)  }
   0xc   : > { %404 = vmatpush1.bf16.msra.mxu0 (!%p208_p3), %v870_v2  ;;  %v905_v21 = vld [vmem:[%s1118_s3 + $0x54] ss:$8 sps:$4 sm:$0xff] (!%p208_p3)   ;;  %v877_v23 = vld [vmem:[%s1116_s1 + $0x40] ss:$0 sps:$4 sm:$0x33] (!%p208_p3)   ;;  %v397_v24 = vsel (!%p208_p3), %vm395_vm2, %v396_v19, 0 }
   0xd   : > { %405 = vmatprep.subr.bf16.mxu0 (!%p208_p3), %v938_v1  ;;  %589 = vmatpush1.bf16.msra.mxu1 (!%p208_p3), %v895_v8  ;;  %v907_v25 = vld [vmem:[%s1118_s3 + $0x50] ss:$8 sps:$4 sm:$0xff] (!%p208_p3)   ;;  %v399_v26 = vand.u32 (!%p208_p3), %v877_v23, %v397_v24  ;;  %v908_v34 = vld [vmem:[%s1118_s3 + $0x64] ss:$8 sps:$4 sm:$0xff] (!%p208_p3)   ;;  %v910_v35 = vld [vmem:[%s1118_s3 + $0x60] ss:$8 sps:$4 sm:$0xff] (!%p208_p3)  }
   0xe   : > { %s1126_s18 = smov (!%p243_p4, %s928_s18), 1  ;;  %590 = vmatprep.subr.bf16.mxu1 %v896_v12  ;;  %v911_v36 = vld [vmem:[%s1118_s3 + $0x74] ss:$8 sps:$4 sm:$0xff]   ;;  %v913_v37 = vld [vmem:[%s1118_s3 + $0x70] ss:$8 sps:$4 sm:$0xff]   ;;  %v496_v12 = vlaneseq }
   0xf   : > { %s840_s7 = sshll.u32 %s1126_s18, 6  ;;  %v799_v38 = vld [vmem:[%s1117_s2] ss:$0 sm:$0xff]  ;;  %s841_s14 = sshll.u32 %s1126_s18, 3 }
  0x10   : > { %406 = vmatpush1.bf16.msra.mxu0 %v871_v3  ;;  %s1017_s12 = scalar_lea.vmem %s1115_s0, %s840_s7  ;;  %s260_s17 = scalar_lea.vmem %s1120_s5, %s841_s14 }
  0x11   : > { %407 = vmatprep.subr.bf16.mxu0 %v938_v1  ;;  %v880_v9 = vld [vmem:[%s1017_s12 + $0x4] ss:$8 sps:$4 sm:$0xff]   ;;  %591 = vmatpush1.bf16.msra.mxu1 %v898_v13  ;;  %v878_v27 = vld [vmem:[%s1017_s12] ss:$8 sps:$4 sm:$0xff]   ;;  %v881_v28 = vld [vmem:[%s1017_s12 + $0x14] ss:$8 sps:$4 sm:$0xff]  }
  0x12   : > { %817 = vmatprep.mubr.msk.bf16.mxu0 %vm381_vm0, %v880_v9  ;;  %592 = vmatprep.subr.bf16.mxu1 %v899_v14  ;;  %v883_v29 = vld [vmem:[%s1017_s12 + $0x10] ss:$8 sps:$4 sm:$0xff]   ;;  %v884_v30 = vld [vmem:[%s1017_s12 + $0x24] ss:$8 sps:$4 sm:$0xff]   ;;  %v886_v31 = vld [vmem:[%s1017_s12 + $0x20] ss:$8 sps:$4 sm:$0xff]  }
  0x13   : > { %v887_v32 = vld [vmem:[%s1017_s12 + $0x34] ss:$8 sps:$4 sm:$0xff]   ;;  %v889_v33 = vld [vmem:[%s1017_s12 + $0x30] ss:$8 sps:$4 sm:$0xff]   ;;  %v497_v13 = vshrl.u32 %v496_v12, 7 }
  0x14   : > { %408 = vmatpush1.bf16.msra.mxu0 %v872_v4 }
  0x15   : > { %409 = vmatprep.subr.bf16.mxu0 %v938_v1  ;;  %593 = vmatpush1.bf16.msra.mxu1 %v901_v15  ;;  %v498_v14 = vsub.s32 0, %v497_v13  ;;  %v494_v15 = vld [vmem:[%s1119_s4] sm:$0x3] }
  0x16   : > { %594 = vmatprep.subr.bf16.mxu1 %v902_v16 }
  0x18   : > { %410 = vmatpush1.bf16.msra.mxu0 %v873_v10 }
  0x19   : > { %411 = vmatprep.subr.bf16.mxu0 %v938_v1  ;;  %595 = vmatpush1.bf16.msra.mxu1 %v904_v20  ;;  %v499_v20 = vrot.slane %v494_v15, %v498_v14 }
  0x1a   : > { %596 = vmatprep.subr.bf16.mxu1 %v905_v21 }
  0x1c   : > { %412 = vmatpush1.bf16.msra.mxu0 %v874_v11 }
  0x1d   : > { %413 = vmatprep.subr.bf16.mxu0 %v938_v1  ;;  %597 = vmatpush1.bf16.msra.mxu1 %v907_v25 }
  0x1e   : > { %598 = vmatprep.subr.bf16.mxu1 %v908_v34 }
  0x20   : > { %414 = vmatpush1.bf16.msra.mxu0 %v875_v17  ;;  %v502_v17 = vsub.s32 1, %v497_v13 }
  0x21   : > { %415 = vmatprep.subr.bf16.mxu0 %v938_v1  ;;  %599 = vmatpush1.bf16.msra.mxu1 %v910_v35 }
  0x22   : > { %600 = vmatprep.subr.bf16.mxu1 %v911_v36 }
  0x24   : > { %416 = vmatpush1.bf16.msra.mxu0 %v876_v22 }
  0x25   : > { %417 = vmatprep.subr.bf16.mxu0 %v938_v1  ;;  %601 = vmatpush1.bf16.msra.mxu1 %v913_v37 }
  0x28   : > { %418 = vmatpush1.bf16.msra.mxu0 %v399_v26 }
  0x2b   : > { %434 = vmatmul.mubr.bf16.vlgmr.msra.gmra.mrb[0].mxu0 %v878_v27 }
  0x2c   : > { %818 = vmatprep.mubr.msk.bf16.mxu0 %vm381_vm0, %v881_v28 }
  0x33   : > { %442 = vmatmul.mubr.bf16.gmra.mrb[4].mxu0 %v883_v29 }
  0x34   : > { %819 = vmatprep.mubr.msk.bf16.mxu0 %vm381_vm0, %v884_v30 }
  0x3b   : > { %450 = vmatmul.mubr.bf16.gmra.mrb[8].mxu0 %v886_v31 }
  0x3c   : > { %820 = vmatprep.mubr.msk.bf16.mxu0 %vm381_vm0, %v887_v32 }
  0x43   : > { %458 = vmatmul.mubr.bf16.gmra.mrb[12].mxu0 %v889_v33 }
  0xfe   : > { %v435_v39 = vpop.f32.mrb[0].mxu0 }
  0xff   : > { %v436_v40 = vadd.f32 %v799_v38, %v435_v39  ;;  %v437_v41 = vpop.f32.mrb[1].mxu0 }
 0x100   : > { %v438_v42 = vpop.f32.mrb[2].mxu0 }
 0x101   : > { %v439_v43 = vadd.f32 %v799_v38, %v438_v42  ;;  %v440_v44 = vpop.f32.mrb[3].mxu0  ;;  %v466_v45 = vmax.f32 %v436_v40, 0.0 }
 0x103   : > { %v467_v46 = vmax.f32 %v439_v43, 0.0 }
 0x105   : > { %v474_v47 = vpack.c.bf16 %v467_v46, %v466_v45 }
 0x106   : > { %v443_v48 = vpop.f32.mrb[4].mxu0 }
 0x107   : > { %v444_v49 = vadd.f32 %v799_v38, %v443_v48  ;;  %v445_v50 = vpop.f32.mrb[5].mxu0  ;;  %619 = vmatmul.mubr.bf16.vlgmr.msra.gmra.mrb[0].mxu1 %v474_v47 }
 0x108   : > { %v446_v51 = vpop.f32.mrb[6].mxu0  ;;  %628 = vmatprep.mubr.bf16.mxu1 %v938_v1 }
 0x109   : > { %v447_v52 = vadd.f32 %v799_v38, %v446_v51  ;;  %v448_v53 = vpop.f32.mrb[7].mxu0  ;;  %v468_v54 = vmax.f32 %v444_v49, 0.0 }
 0x10b   : > { %v469_v55 = vmax.f32 %v447_v52, 0.0 }
 0x10d   : > { %v475_v56 = vpack.c.bf16 %v469_v55, %v468_v54 }
 0x10e   : > { %v451_v57 = vpop.f32.mrb[8].mxu0 }
 0x10f   : > { %v452_v58 = vadd.f32 %v799_v38, %v451_v57  ;;  %v453_v59 = vpop.f32.mrb[9].mxu0  ;;  %629 = vmatmul.mubr.bf16.gmra.mrb[4].mxu1 %v475_v56 }
 0x110   : > { %v454_v60 = vpop.f32.mrb[10].mxu0  ;;  %638 = vmatprep.mubr.bf16.mxu1 %v938_v1 }
 0x111   : > { %v455_v61 = vadd.f32 %v799_v38, %v454_v60  ;;  %v456_v62 = vpop.f32.mrb[11].mxu0  ;;  %v470_v63 = vmax.f32 %v452_v58, 0.0 }
 0x113   : > { %v471_v0 = vmax.f32 %v455_v61, 0.0 }
 0x115   : > { %v476_v2 = vpack.c.bf16 %v471_v0, %v470_v63 }
 0x116   : > { %v459_v3 = vpop.f32.mrb[12].mxu0 }
 0x117   : > { %v460_v4 = vadd.f32 %v799_v38, %v459_v3  ;;  %v461_v5 = vpop.f32.mrb[13].mxu0  ;;  %639 = vmatmul.mubr.bf16.gmra.mrb[8].mxu1 %v476_v2 }
 0x118   : > { %v462_v6 = vpop.f32.mrb[14].mxu0  ;;  %648 = vmatprep.mubr.bf16.mxu1 %v938_v1  ;;  %v503_v1 = vrot.slane %v494_v15, %v502_v17 }
 0x119   : > { %v463_v7 = vadd.f32 %v799_v38, %v462_v6  ;;  %v464_v8 = vpop.f32.mrb[15].mxu0  ;;  %v472_v9 = vmax.f32 %v460_v4, 0.0 }
 0x11b   : > { %v473_v10 = vmax.f32 %v463_v7, 0.0 }
 0x11d   : > { %v477_v11 = vpack.c.bf16 %v473_v10, %v472_v9 }
 0x11f   : > { %649 = vmatmul.mubr.bf16.gmra.mrb[12].mxu1 %v477_v11 }
 0x1da   : > { %v620_v16 = vpop.f32.mrb[0].mxu1 }
 0x1db   : > { %v622_v18 = vpop.f32.mrb[1].mxu1  ;;  %v621_v22 = vadd.f32 %v620_v16, %v499_v20 }
 0x1dc   : > { %v624_v19 = vpop.f32.mrb[2].mxu1  ;;  %v623_v23 = vadd.f32 %v622_v18, %v503_v1 }
 0x1dd   : > { %v626_v21 = vpop.f32.mrb[3].mxu1  ;;  %v625_v25 = vadd.f32 %v624_v19, %v499_v20  ;;  %v659_v31 = vmax.f32 %v621_v22, 0.0 }
 0x1de   : > { %v627_v28 = vadd.f32 %v626_v21, %v503_v1  ;;  %v660_v35 = vmax.f32 %v623_v23, 0.0 }
 0x1df   : > { %v661_v38 = vmax.f32 %v625_v25, 0.0 }
 0x1e0   : > { %v662_v41 = vmax.f32 %v627_v28, 0.0 }
 0x1e2   : > { %v630_v24 = vpop.f32.mrb[4].mxu1 }
 0x1e3   : > { %v631_v26 = vadd.f32 %v630_v24, %v499_v20  ;;  %v632_v27 = vpop.f32.mrb[5].mxu1 }
 0x1e4   : > { %v633_v29 = vadd.f32 %v632_v27, %v503_v1  ;;  %v634_v30 = vpop.f32.mrb[6].mxu1 }
 0x1e5   : > { %v663_v32 = vmax.f32 %v631_v26, 0.0  ;;  %v635_v33 = vadd.f32 %v634_v30, %v499_v20  ;;  %v636_v34 = vpop.f32.mrb[7].mxu1 }
 0x1e6   : > { %v664_v36 = vmax.f32 %v633_v29, 0.0  ;;  %v637_v37 = vadd.f32 %v636_v34, %v503_v1 }
 0x1e7   : > { %v675_v39 = vmax.f32 %v659_v31, %v663_v32  ;;  %v665_v40 = vmax.f32 %v635_v33, 0.0 }
 0x1e8   : > { %v682_v42 = vmax.f32 %v660_v35, %v664_v36  ;;  %v666_v43 = vmax.f32 %v637_v37, 0.0 }
 0x1e9   : > { %v676_v44 = vmax.f32 %v661_v38, %v665_v40 }
 0x1ea   : > { %v683_v45 = vmax.f32 %v662_v41, %v666_v43  ;;  %v640_v46 = vpop.f32.mrb[8].mxu1 }
 0x1eb   : > { %v641_v47 = vadd.f32 %v640_v46, %v499_v20  ;;  %v642_v48 = vpop.f32.mrb[9].mxu1 }
 0x1ec   : > { %v643_v49 = vadd.f32 %v642_v48, %v503_v1  ;;  %v644_v50 = vpop.f32.mrb[10].mxu1 }
 0x1ed   : > { %v667_v51 = vmax.f32 %v641_v47, 0.0  ;;  %v645_v52 = vadd.f32 %v644_v50, %v499_v20  ;;  %v646_v53 = vpop.f32.mrb[11].mxu1 }
 0x1ee   : > { %v668_v54 = vmax.f32 %v643_v49, 0.0  ;;  %v647_v55 = vadd.f32 %v646_v53, %v503_v1 }
 0x1ef   : > { %v677_v56 = vmax.f32 %v675_v39, %v667_v51  ;;  %v669_v57 = vmax.f32 %v645_v52, 0.0 }
 0x1f0   : > { %v684_v58 = vmax.f32 %v682_v42, %v668_v54  ;;  %v670_v59 = vmax.f32 %v647_v55, 0.0 }
 0x1f1   : > { %v678_v60 = vmax.f32 %v676_v44, %v669_v57 }
 0x1f2   : > { %v685_v61 = vmax.f32 %v683_v45, %v670_v59  ;;  %v650_v62 = vpop.f32.mrb[12].mxu1 }
 0x1f3   : > { %v651_v63 = vadd.f32 %v650_v62, %v499_v20  ;;  %v652_v0 = vpop.f32.mrb[13].mxu1 }
 0x1f4   : > { %v653_v2 = vadd.f32 %v652_v0, %v503_v1  ;;  %v654_v3 = vpop.f32.mrb[14].mxu1 }
 0x1f5   : > { %v671_v4 = vmax.f32 %v651_v63, 0.0  ;;  %v655_v5 = vadd.f32 %v654_v3, %v499_v20  ;;  %v656_v6 = vpop.f32.mrb[15].mxu1 }
 0x1f6   : > { %v672_v7 = vmax.f32 %v653_v2, 0.0  ;;  %v657_v8 = vadd.f32 %v656_v6, %v503_v1 }
 0x1f7   : > { %v679_v9 = vmax.f32 %v677_v56, %v671_v4  ;;  %v673_v10 = vmax.f32 %v655_v5, 0.0 }
 0x1f8   : > { %v686_v11 = vmax.f32 %v684_v58, %v672_v7  ;;  %v674_v12 = vmax.f32 %v657_v8, 0.0 }
 0x1f9   : > { %v680_v13 = vmax.f32 %v678_v60, %v673_v10 }
 0x1fa   : > { %v687_v14 = vmax.f32 %v685_v61, %v674_v12 }
 0x1fb   : > { %v681_v15 = vmax.f32 %v679_v9, %v680_v13 }
 0x1fc   : > { %v688_v16 = vmax.f32 %v686_v11, %v687_v14 }
 0x1fe   : > { %v842_v17 = vpack.c.bf16 %v688_v16, %v681_v15 }
 0x200   : > { %697 = vst [vmem:[%s260_s17] sm:$0xff] %v842_v17 }
 0x201 PF: > { %s15_s20 = sadd.s32 1, %s936_s20   ;;  %s1121_s18 = smov %s932_s19 }
 0x202   : > { %p12_p5 = scmp.ge.s32.totalorder %s15_s20, 4   ;;  %s1122_s19 = smov %s1124_s21 }
 0x204   :  { %14 = sbr.rel (!%p12_p5) target bundleno = 2 (0x2), region = 70 }

// kernel: neg.20
= control target key start
LH: loop header
LB: loop body
LE: loop exit
PB: predicated region body
PF: predicated region fallthrough
CT: control target
= control target key end

     0   :  { %s40_s0 = inlined_call_operand.vmem [shape: f32[2,16,8], index: 0, kind: input, shape index: {}]   ;;  %s41_s1 = inlined_call_operand.vmem [shape: f32[2,16,8], index: 1, kind: output, shape index: {}]  }
   0x1   :  { %v2_v0 = vld [vmem:[%s40_s0] sm:$0xff]  ;;  %v16_v1 = vld [vmem:[%s40_s0 + $0x8] sm:$0xff] }
   0x2   :  { %v5_v2 = vxor.u32 2147483648, %v2_v0  ;;  %v12_v3 = vxor.u32 2147483648, %v16_v1 }
   0x4   :  { %7 = vst [vmem:[%s41_s1] sm:$0xff] %v5_v2  ;;  %17 = vst [vmem:[%s41_s1 + $0x8] sm:$0xff] %v12_v3 }

// kernel: backbone_msnet_forward.14
= control target key start
LH: loop header
LB: loop body
LE: loop exit
PB: predicated region body
PF: predicated region fallthrough
CT: control target
= control target key end

     0   :  { %v597_v1 = vmov 0   ;;  %v270_v56 = vlaneseq  ;;  %s790_s2 = inlined_call_operand.vmem [shape: bf16[256,256], index: 2, kind: input, shape index: {}]   ;;  %s791_s3 = inlined_call_operand.vmem [shape: bf16[128,256], index: 3, kind: input, shape index: {}]   ;;  %s792_s0 = inlined_call_operand.vmem [shape: bf16[16,256], index: 0, kind: input, shape index: {}]   ;;  %s793_s1 = inlined_call_operand.vmem [shape: bf16[16,128], index: 1, kind: input, shape index: {}]   ;;  %s794_s4 = inlined_call_operand.vmem [shape: f32[1,256], index: 4, kind: input, shape index: {}]   ;;  %s795_s5 = inlined_call_operand.vmem [shape: bf16[16,256], index: 5, kind: output, shape index: {}]  }
   0x1   :  { %v521_v0 = vld [vmem:[%s790_s2 + $0x4] ss:$8 sps:$4 sm:$0xff]   ;;  %420 = vmatprep.mubr.bf16.mxu0 %v597_v1  ;;  %v523_v2 = vld [vmem:[%s790_s2] ss:$8 sps:$4 sm:$0xff]   ;;  %v524_v3 = vld [vmem:[%s790_s2 + $0x14] ss:$8 sps:$4 sm:$0xff]  }
   0x2   :  { %226 = vmatprep.subr.bf16.mxu1 %v521_v0  ;;  %v526_v4 = vld [vmem:[%s790_s2 + $0x10] ss:$8 sps:$4 sm:$0xff]   ;;  %v527_v5 = vld [vmem:[%s790_s2 + $0x24] ss:$8 sps:$4 sm:$0xff]   ;;  %v529_v6 = vld [vmem:[%s790_s2 + $0x20] ss:$8 sps:$4 sm:$0xff]  }
   0x3   :  { %227 = vmatpush1.bf16.msra.mxu1 %v523_v2  ;;  %v530_v7 = vld [vmem:[%s790_s2 + $0x34] ss:$8 sps:$4 sm:$0xff]   ;;  %v532_v8 = vld [vmem:[%s790_s2 + $0x30] ss:$8 sps:$4 sm:$0xff]   ;;  %v545_v9 = vld [vmem:[%s791_s3 + $0x4] ss:$8 sps:$4 sm:$0xff]  }
   0x4   :  { %228 = vmatprep.subr.bf16.mxu1 %v524_v3  ;;  %v533_v10 = vld [vmem:[%s790_s2 + $0x44] ss:$8 sps:$4 sm:$0xff]   ;;  %v549_v11 = vld [vmem:[%s791_s3] ss:$8 sps:$4 sm:$0xff]   ;;  %388 = vmatprep.subr.bf16.mxu0 %v545_v9  ;;  %v551_v12 = vld [vmem:[%s791_s3 + $0x14] ss:$8 sps:$4 sm:$0xff]  }
   0x5   :  { %389 = vmatpush1.bf16.msra.mxu0 %v549_v11  ;;  %v535_v13 = vld [vmem:[%s790_s2 + $0x40] ss:$8 sps:$4 sm:$0xff]   ;;  %v536_v14 = vld [vmem:[%s790_s2 + $0x54] ss:$8 sps:$4 sm:$0xff]   ;;  %v555_v15 = vld [vmem:[%s791_s3 + $0x10] ss:$8 sps:$4 sm:$0xff]  }
   0x6   :  { %390 = vmatprep.subr.bf16.mxu0 %v551_v12  ;;  %v557_v16 = vld [vmem:[%s791_s3 + $0x24] ss:$8 sps:$4 sm:$0xff]   ;;  %v538_v17 = vld [vmem:[%s790_s2 + $0x50] ss:$8 sps:$4 sm:$0xff]   ;;  %v561_v18 = vld [vmem:[%s791_s3 + $0x20] ss:$8 sps:$4 sm:$0xff]  }
   0x7   :  { %229 = vmatpush1.bf16.msra.mxu1 %v526_v4  ;;  %v563_v19 = vld [vmem:[%s791_s3 + $0x34] ss:$8 sps:$4 sm:$0xff]   ;;  %v539_v20 = vld [vmem:[%s790_s2 + $0x64] ss:$8 sps:$4 sm:$0xff]   ;;  %v567_v21 = vld [vmem:[%s791_s3 + $0x30] ss:$8 sps:$4 sm:$0xff]  }
   0x8   :  { %230 = vmatprep.subr.bf16.mxu1 %v527_v5  ;;  %v541_v22 = vld [vmem:[%s790_s2 + $0x60] ss:$8 sps:$4 sm:$0xff]   ;;  %v569_v23 = vld [vmem:[%s791_s3 + $0x44] ss:$8 sps:$4 sm:$0xff]   ;;  %v542_v24 = vld [vmem:[%s790_s2 + $0x74] ss:$8 sps:$4 sm:$0xff]  }
   0x9   :  { %391 = vmatpush1.bf16.msra.mxu0 %v555_v15  ;;  %v544_v25 = vld [vmem:[%s790_s2 + $0x70] ss:$8 sps:$4 sm:$0xff]   ;;  %v573_v26 = vld [vmem:[%s791_s3 + $0x40] ss:$8 sps:$4 sm:$0xff]   ;;  %v575_v27 = vld [vmem:[%s791_s3 + $0x54] ss:$8 sps:$4 sm:$0xff]  }
   0xa   :  { %392 = vmatprep.subr.bf16.mxu0 %v557_v16  ;;  %v547_v28 = vld [vmem:[%s790_s2 + $0x84] ss:$8 sps:$4 sm:$0xff]   ;;  %v579_v29 = vld [vmem:[%s791_s3 + $0x50] ss:$8 sps:$4 sm:$0xff]   ;;  %v550_v30 = vld [vmem:[%s790_s2 + $0x80] ss:$8 sps:$4 sm:$0xff]  }
   0xb   :  { %231 = vmatpush1.bf16.msra.mxu1 %v529_v6  ;;  %v581_v31 = vld [vmem:[%s791_s3 + $0x64] ss:$8 sps:$4 sm:$0xff]   ;;  %v553_v32 = vld [vmem:[%s790_s2 + $0x94] ss:$8 sps:$4 sm:$0xff]   ;;  %v585_v34 = vld [vmem:[%s791_s3 + $0x60] ss:$8 sps:$4 sm:$0xff]  }
   0xc   :  { %232 = vmatprep.subr.bf16.mxu1 %v530_v7  ;;  %v595_v33 = vld [vmem:[%s792_s0 + $0x4] ss:$8 sps:$4 sm:$0xff]   ;;  %v556_v35 = vld [vmem:[%s790_s2 + $0x90] ss:$8 sps:$4 sm:$0xff]   ;;  %v587_v36 = vld [vmem:[%s791_s3 + $0x74] ss:$8 sps:$4 sm:$0xff]  }
   0xd   :  { %393 = vmatpush1.bf16.msra.mxu0 %v561_v18  ;;  %v559_v37 = vld [vmem:[%s790_s2 + $0xa4] ss:$8 sps:$4 sm:$0xff]   ;;  %258 = vmatprep.mubr.bf16.mxu1 %v595_v33  ;;  %v591_v38 = vld [vmem:[%s791_s3 + $0x70] ss:$8 sps:$4 sm:$0xff]   ;;  %v562_v39 = vld [vmem:[%s790_s2 + $0xa0] ss:$8 sps:$4 sm:$0xff]  }
   0xe   :  { %394 = vmatprep.subr.bf16.mxu0 %v563_v19  ;;  %v565_v40 = vld [vmem:[%s790_s2 + $0xb4] ss:$8 sps:$4 sm:$0xff]   ;;  %v596_v41 = vld [vmem:[%s793_s1] sm:$0xff]   ;;  %v568_v42 = vld [vmem:[%s790_s2 + $0xb0] ss:$8 sps:$4 sm:$0xff]   ;;  %v271_v57 = vshrl.u32 %v270_v56, 7 }
   0xf   :  { %233 = vmatpush1.bf16.msra.mxu1 %v532_v8  ;;  %v571_v43 = vld [vmem:[%s790_s2 + $0xc4] ss:$8 sps:$4 sm:$0xff]   ;;  %v574_v44 = vld [vmem:[%s790_s2 + $0xc0] ss:$8 sps:$4 sm:$0xff]   ;;  %v577_v45 = vld [vmem:[%s790_s2 + $0xd4] ss:$8 sps:$4 sm:$0xff]  }
  0x10   :  { %234 = vmatprep.subr.bf16.mxu1 %v533_v10  ;;  %v580_v46 = vld [vmem:[%s790_s2 + $0xd0] ss:$8 sps:$4 sm:$0xff]   ;;  %v583_v47 = vld [vmem:[%s790_s2 + $0xe4] ss:$8 sps:$4 sm:$0xff]   ;;  %v586_v48 = vld [vmem:[%s790_s2 + $0xe0] ss:$8 sps:$4 sm:$0xff]  }
  0x11   :  { %395 = vmatpush1.bf16.msra.mxu0 %v567_v21  ;;  %v589_v49 = vld [vmem:[%s790_s2 + $0xf4] ss:$8 sps:$4 sm:$0xff]   ;;  %v592_v50 = vld [vmem:[%s790_s2 + $0xf0] ss:$8 sps:$4 sm:$0xff]   ;;  %v593_v51 = vld [vmem:[%s792_s0] ss:$8 sps:$4 sm:$0xff]  }
  0x12   :  { %396 = vmatprep.subr.bf16.mxu0 %v569_v23  ;;  %v272_v58 = vsub.s32 0, %v271_v57  ;;  %v21_v59 = vld [vmem:[%s794_s4] sm:$0x3]  ;;  %v276_v60 = vsub.s32 1, %v271_v57 }
  0x13   :  { %235 = vmatpush1.bf16.msra.mxu1 %v535_v13 }
  0x14   :  { %236 = vmatprep.subr.bf16.mxu1 %v536_v14  ;;  %v273_v61 = vrot.slane %v21_v59, %v272_v58  ;;  %v277_v62 = vrot.slane %v21_v59, %v276_v60 }
  0x15   :  { %397 = vmatpush1.bf16.msra.mxu0 %v573_v26 }
  0x16   :  { %398 = vmatprep.subr.bf16.mxu0 %v575_v27 }
  0x17   :  { %237 = vmatpush1.bf16.msra.mxu1 %v538_v17 }
  0x18   :  { %238 = vmatprep.subr.bf16.mxu1 %v539_v20 }
  0x19   :  { %399 = vmatpush1.bf16.msra.mxu0 %v579_v29 }
  0x1a   :  { %400 = vmatprep.subr.bf16.mxu0 %v581_v31 }
  0x1b   :  { %239 = vmatpush1.bf16.msra.mxu1 %v541_v22 }
  0x1c   :  { %240 = vmatprep.subr.bf16.mxu1 %v542_v24 }
  0x1d   :  { %401 = vmatpush1.bf16.msra.mxu0 %v585_v34 }
  0x1e   :  { %402 = vmatprep.subr.bf16.mxu0 %v587_v36 }
  0x1f   :  { %241 = vmatpush1.bf16.msra.mxu1 %v544_v25 }
  0x20   :  { %242 = vmatprep.subr.bf16.mxu1 %v547_v28 }
  0x21   :  { %403 = vmatpush1.bf16.msra.mxu0 %v591_v38 }
  0x23   :  { %243 = vmatpush1.bf16.msra.mxu1 %v550_v30 }
  0x24   :  { %244 = vmatprep.subr.bf16.mxu1 %v553_v32  ;;  %421 = vmatmul.mubr.bf16.vlgmr.msra.gmra.mrb[0].mxu0 %v596_v41 }
  0x27   :  { %245 = vmatpush1.bf16.msra.mxu1 %v556_v35 }
  0x28   :  { %246 = vmatprep.subr.bf16.mxu1 %v559_v37 }
  0x2b   :  { %247 = vmatpush1.bf16.msra.mxu1 %v562_v39 }
  0x2c   :  { %248 = vmatprep.subr.bf16.mxu1 %v565_v40 }
  0x2f   :  { %249 = vmatpush1.bf16.msra.mxu1 %v568_v42 }
  0x30   :  { %250 = vmatprep.subr.bf16.mxu1 %v571_v43 }
  0x33   :  { %251 = vmatpush1.bf16.msra.mxu1 %v574_v44 }
  0x34   :  { %252 = vmatprep.subr.bf16.mxu1 %v577_v45 }
  0x37   :  { %253 = vmatpush1.bf16.msra.mxu1 %v580_v46 }
  0x38   :  { %254 = vmatprep.subr.bf16.mxu1 %v583_v47 }
  0x3b   :  { %255 = vmatpush1.bf16.msra.mxu1 %v586_v48 }
  0x3c   :  { %256 = vmatprep.subr.bf16.mxu1 %v589_v49 }
  0x3f   :  { %257 = vmatpush1.bf16.msra.mxu1 %v592_v50 }
  0x42   :  { %259 = vmatmul.mubr.bf16.vlgmr.msra.gmra.mrb[0].mxu1 %v593_v51 }
  0xf7   :  { %v422_v52 = vpop.f32.mrb[0].mxu0 }
  0xf8   :  { %v424_v53 = vpop.f32.mrb[1].mxu0 }
  0xf9   :  { %v426_v54 = vpop.f32.mrb[2].mxu0 }
  0xfa   :  { %v428_v55 = vpop.f32.mrb[3].mxu0 }
 0x115   :  { %v260_v63 = vpop.f32.mrb[0].mxu1 }
 0x116   :  { %v280_v0 = vadd.f32 %v273_v61, %v260_v63  ;;  %v262_v1 = vpop.f32.mrb[1].mxu1 }
 0x117   :  { %v281_v2 = vadd.f32 %v277_v62, %v262_v1  ;;  %v264_v3 = vpop.f32.mrb[2].mxu1 }
 0x118   :  { %v431_v4 = vadd.f32 %v422_v52, %v280_v0  ;;  %v282_v5 = vadd.f32 %v273_v61, %v264_v3  ;;  %v266_v6 = vpop.f32.mrb[3].mxu1 }
 0x119   :  { %v432_v7 = vadd.f32 %v424_v53, %v281_v2  ;;  %v283_v8 = vadd.f32 %v277_v62, %v266_v6 }
 0x11a   :  { %v435_v9 = vmax.f32 %v431_v4, 0.0  ;;  %v433_v10 = vadd.f32 %v426_v54, %v282_v5 }
 0x11b   :  { %v436_v11 = vmax.f32 %v432_v7, 0.0  ;;  %v434_v12 = vadd.f32 %v428_v55, %v283_v8 }
 0x11c   :  { %v437_v13 = vmax.f32 %v433_v10, 0.0 }
 0x11d   :  { %v510_v14 = vpack.c.bf16 %v436_v11, %v435_v9  ;;  %v438_v15 = vmax.f32 %v434_v12, 0.0 }
 0x11f   :  { %451 = vst [vmem:[%s795_s5] sm:$0xff] %v510_v14  ;;  %v511_v16 = vpack.c.bf16 %v438_v15, %v437_v13 }
 0x121   :  { %452 = vst [vmem:[%s795_s5 + $0x8] sm:$0xff] %v511_v16 }

// kernel: neg.22
= control target key start
LH: loop header
LB: loop body
LE: loop exit
PB: predicated region body
PF: predicated region fallthrough
CT: control target
= control target key end

     0   :  { %s72_s0 = inlined_call_operand.vmem [shape: f32[2,32,16], index: 0, kind: input, shape index: {}]   ;;  %s73_s1 = inlined_call_operand.vmem [shape: f32[2,32,16], index: 1, kind: output, shape index: {}]  }
   0x1   :  { %v2_v0 = vld [vmem:[%s72_s0] sm:$0xff]  ;;  %v32_v1 = vld [vmem:[%s72_s0 + $0x10] sm:$0xff]  ;;  %v34_v2 = vld [vmem:[%s72_s0 + $0x8] sm:$0xff] }
   0x2   :  { %v5_v3 = vxor.u32 2147483648, %v2_v0  ;;  %v12_v4 = vxor.u32 2147483648, %v32_v1  ;;  %v20_v5 = vxor.u32 2147483648, %v34_v2  ;;  %v36_v6 = vld [vmem:[%s72_s0 + $0x18] sm:$0xff] }
   0x3   :  { %v28_v7 = vxor.u32 2147483648, %v36_v6 }
   0x4   :  { %7 = vst [vmem:[%s73_s1] sm:$0xff] %v5_v3  ;;  %33 = vst [vmem:[%s73_s1 + $0x10] sm:$0xff] %v12_v4 }
   0x5   :  { %35 = vst [vmem:[%s73_s1 + $0x8] sm:$0xff] %v20_v5  ;;  %37 = vst [vmem:[%s73_s1 + $0x18] sm:$0xff] %v28_v7 }

// kernel: backbone_msnet_forward.15
= control target key start
LH: loop header
LB: loop body
LE: loop exit
PB: predicated region body
PF: predicated region fallthrough
CT: control target
= control target key end

     0   :  { %v621_v1 = vmov 0   ;;  %vm372_vm0 = vcmask 523264   ;;  %v292_v55 = vlaneseq  ;;  %s807_s2 = inlined_call_operand.vmem [shape: bf16[256,256], index: 2, kind: input, shape index: {}]   ;;  %s808_s3 = inlined_call_operand.vmem [shape: bf16[64,256], index: 3, kind: input, shape index: {}]   ;;  %s809_s0 = inlined_call_operand.vmem [shape: bf16[32,256], index: 0, kind: input, shape index: {}]   ;;  %s810_s1 = inlined_call_operand.vmem [shape: bf16[32,64], index: 1, kind: input, shape index: {}]   ;;  %s811_s4 = inlined_call_operand.vmem [shape: f32[1,256], index: 4, kind: input, shape index: {}]   ;;  %s812_s5 = inlined_call_operand.vmem [shape: bf16[32,256], index: 5, kind: output, shape index: {}]  }
   0x1   :  { %v553_v0 = vld [vmem:[%s807_s2 + $0x4] ss:$8 sps:$4 sm:$0xff]   ;;  %411 = vmatprep.mubr.bf16.mxu0 %v621_v1  ;;  %v555_v2 = vld [vmem:[%s807_s2] ss:$8 sps:$4 sm:$0xff]   ;;  %v556_v3 = vld [vmem:[%s807_s2 + $0x14] ss:$8 sps:$4 sm:$0xff]  }
   0x2   :  { %238 = vmatprep.subr.bf16.mxu1 %v553_v0  ;;  %v558_v4 = vld [vmem:[%s807_s2 + $0x10] ss:$8 sps:$4 sm:$0xff]   ;;  %v559_v5 = vld [vmem:[%s807_s2 + $0x24] ss:$8 sps:$4 sm:$0xff]   ;;  %v561_v6 = vld [vmem:[%s807_s2 + $0x20] ss:$8 sps:$4 sm:$0xff]  }
   0x3   :  { %239 = vmatpush1.bf16.msra.mxu1 %v555_v2  ;;  %v562_v7 = vld [vmem:[%s807_s2 + $0x34] ss:$8 sps:$4 sm:$0xff]   ;;  %v564_v8 = vld [vmem:[%s807_s2 + $0x30] ss:$8 sps:$4 sm:$0xff]   ;;  %v565_v9 = vld [vmem:[%s807_s2 + $0x44] ss:$8 sps:$4 sm:$0xff]  }
   0x4   :  { %240 = vmatprep.subr.bf16.mxu1 %v556_v3  ;;  %v567_v10 = vld [vmem:[%s807_s2 + $0x40] ss:$8 sps:$4 sm:$0xff]   ;;  %v568_v11 = vld [vmem:[%s807_s2 + $0x54] ss:$8 sps:$4 sm:$0xff]   ;;  %v589_v12 = vld [vmem:[%s808_s3 + $0x4] ss:$8 sps:$4 sm:$0xff]  }
   0x5   :  { %v570_v13 = vld [vmem:[%s807_s2 + $0x50] ss:$8 sps:$4 sm:$0xff]   ;;  %379 = vmatprep.subr.bf16.mxu0 %v589_v12  ;;  %v593_v14 = vld [vmem:[%s808_s3] ss:$8 sps:$4 sm:$0xff]   ;;  %v595_v15 = vld [vmem:[%s808_s3 + $0x14] ss:$8 sps:$4 sm:$0xff]  }
   0x6   :  { %v571_v16 = vld [vmem:[%s807_s2 + $0x64] ss:$8 sps:$4 sm:$0xff]   ;;  %380 = vmatpush1.bf16.msra.mxu0 %v593_v14  ;;  %v599_v17 = vld [vmem:[%s808_s3 + $0x10] ss:$8 sps:$4 sm:$0xff]   ;;  %v573_v19 = vld [vmem:[%s807_s2 + $0x60] ss:$8 sps:$4 sm:$0xff]  }
   0x7   :  { %241 = vmatpush1.bf16.msra.mxu1 %v558_v4  ;;  %381 = vmatprep.subr.bf16.mxu0 %v595_v15  ;;  %v601_v18 = vld [vmem:[%s808_s3 + $0x24] ss:$8 sps:$4 sm:$0xff]   ;;  %v574_v20 = vld [vmem:[%s807_s2 + $0x74] ss:$8 sps:$4 sm:$0xff]   ;;  %v605_v21 = vld [vmem:[%s808_s3 + $0x20] ss:$8 sps:$4 sm:$0xff]  }
   0x8   :  { %242 = vmatprep.subr.bf16.mxu1 %v559_v5  ;;  %v607_v22 = vld [vmem:[%s808_s3 + $0x34] ss:$8 sps:$4 sm:$0xff]   ;;  %v576_v23 = vld [vmem:[%s807_s2 + $0x70] ss:$8 sps:$4 sm:$0xff]   ;;  %v577_v24 = vld [vmem:[%s807_s2 + $0x84] ss:$8 sps:$4 sm:$0xff]  }
   0x9   :  { %v615_v25 = vld [vmem:[%s809_s0 + $0x4] ss:$8 sps:$4 sm:$0xff]   ;;  %v611_v26 = vld [vmem:[%s808_s3 + $0x30] ss:$8 sps:$4 sm:$0xff]   ;;  %v579_v27 = vld [vmem:[%s807_s2 + $0x80] ss:$8 sps:$4 sm:$0xff]  }
   0xa   :  { %382 = vmatpush1.bf16.msra.mxu0 %v599_v17  ;;  %270 = vmatprep.mubr.bf16.mxu1 %v615_v25  ;;  %v616_v28 = vld [vmem:[%s810_s1] sm:$0xff]   ;;  %v580_v29 = vld [vmem:[%s807_s2 + $0x94] ss:$8 sps:$4 sm:$0xff]   ;;  %v582_v30 = vld [vmem:[%s807_s2 + $0x90] ss:$8 sps:$4 sm:$0xff]   ;;  %v293_v56 = vshrl.u32 %v292_v55, 7 }
   0xb   :  { %243 = vmatpush1.bf16.msra.mxu1 %v561_v6  ;;  %383 = vmatprep.subr.bf16.mxu0 %v601_v18  ;;  %v583_v31 = vld [vmem:[%s807_s2 + $0xa4] ss:$8 sps:$4 sm:$0xff]   ;;  %v585_v32 = vld [vmem:[%s807_s2 + $0xa0] ss:$8 sps:$4 sm:$0xff]   ;;  %v586_v34 = vld [vmem:[%s807_s2 + $0xb4] ss:$8 sps:$4 sm:$0xff]  }
   0xc   :  { %244 = vmatprep.subr.bf16.mxu1 %v562_v7  ;;  %v619_v33 = vld [vmem:[%s810_s1 + $0x8] sm:$0xff]   ;;  %v588_v35 = vld [vmem:[%s807_s2 + $0xb0] ss:$8 sps:$4 sm:$0xff]   ;;  %v597_v38 = vld [vmem:[%s807_s2 + $0xd4] ss:$8 sps:$4 sm:$0xff]   ;;  %v294_v57 = vsub.s32 0, %v293_v56 }
   0xd   :  { %v591_v36 = vld [vmem:[%s807_s2 + $0xc4] ss:$8 sps:$4 sm:$0xff]   ;;  %v594_v37 = vld [vmem:[%s807_s2 + $0xc0] ss:$8 sps:$4 sm:$0xff]   ;;  %v600_v39 = vld [vmem:[%s807_s2 + $0xd0] ss:$8 sps:$4 sm:$0xff]  }
   0xe   :  { %384 = vmatpush1.bf16.msra.mxu0 %v605_v21  ;;  %v603_v40 = vld [vmem:[%s807_s2 + $0xe4] ss:$8 sps:$4 sm:$0xff]   ;;  %v606_v41 = vld [vmem:[%s807_s2 + $0xe0] ss:$8 sps:$4 sm:$0xff]   ;;  %v609_v42 = vld [vmem:[%s807_s2 + $0xf4] ss:$8 sps:$4 sm:$0xff]  }
   0xf   :  { %245 = vmatpush1.bf16.msra.mxu1 %v564_v8  ;;  %385 = vmatprep.subr.bf16.mxu0 %v607_v22  ;;  %v612_v43 = vld [vmem:[%s807_s2 + $0xf0] ss:$8 sps:$4 sm:$0xff]   ;;  %v613_v44 = vld [vmem:[%s809_s0] ss:$8 sps:$4 sm:$0xff]   ;;  %v617_v45 = vld [vmem:[%s809_s0 + $0x14] ss:$8 sps:$4 sm:$0xff]  }
  0x10   :  { %246 = vmatprep.subr.bf16.mxu1 %v565_v9  ;;  %v620_v46 = vld [vmem:[%s809_s0 + $0x10] ss:$8 sps:$4 sm:$0xff]   ;;  %v21_v58 = vld [vmem:[%s811_s4] sm:$0x3]  ;;  %v298_v59 = vsub.s32 1, %v293_v56 }
  0x11   :  { %v295_v60 = vrot.slane %v21_v58, %v294_v57 }
  0x12   :  { %386 = vmatpush1.bf16.msra.mxu0 %v611_v26  ;;  %v299_v61 = vrot.slane %v21_v58, %v298_v59 }
  0x13   :  { %247 = vmatpush1.bf16.msra.mxu1 %v567_v10 }
  0x14   :  { %248 = vmatprep.subr.bf16.mxu1 %v568_v11 }
  0x15   :  { %526 = vmatmul.mubr.msk.bf16.vlgmr.msra.gmra.mrb[0].mxu0 %vm372_vm0, %v616_v28 }
  0x16   :  { %421 = vmatprep.mubr.bf16.mxu0 %v621_v1 }
  0x17   :  { %249 = vmatpush1.bf16.msra.mxu1 %v570_v13 }
  0x18   :  { %250 = vmatprep.subr.bf16.mxu1 %v571_v16 }
  0x1b   :  { %251 = vmatpush1.bf16.msra.mxu1 %v573_v19 }
  0x1c   :  { %252 = vmatprep.subr.bf16.mxu1 %v574_v20 }
  0x1d   :  { %527 = vmatmul.mubr.msk.bf16.gmra.mrb[4].mxu0 %vm372_vm0, %v619_v33 }
  0x1f   :  { %253 = vmatpush1.bf16.msra.mxu1 %v576_v23 }
  0x20   :  { %254 = vmatprep.subr.bf16.mxu1 %v577_v24 }
  0x23   :  { %255 = vmatpush1.bf16.msra.mxu1 %v579_v27 }
  0x24   :  { %256 = vmatprep.subr.bf16.mxu1 %v580_v29 }
  0x27   :  { %257 = vmatpush1.bf16.msra.mxu1 %v582_v30 }
  0x28   :  { %258 = vmatprep.subr.bf16.mxu1 %v583_v31 }
  0x2b   :  { %259 = vmatpush1.bf16.msra.mxu1 %v585_v32 }
  0x2c   :  { %260 = vmatprep.subr.bf16.mxu1 %v586_v34 }
  0x2f   :  { %261 = vmatpush1.bf16.msra.mxu1 %v588_v35 }
  0x30   :  { %262 = vmatprep.subr.bf16.mxu1 %v591_v36 }
  0x33   :  { %263 = vmatpush1.bf16.msra.mxu1 %v594_v37 }
  0x34   :  { %264 = vmatprep.subr.bf16.mxu1 %v597_v38 }
  0x37   :  { %265 = vmatpush1.bf16.msra.mxu1 %v600_v39 }
  0x38   :  { %266 = vmatprep.subr.bf16.mxu1 %v603_v40 }
  0x3b   :  { %267 = vmatpush1.bf16.msra.mxu1 %v606_v41 }
  0x3c   :  { %268 = vmatprep.subr.bf16.mxu1 %v609_v42 }
  0x3f   :  { %269 = vmatpush1.bf16.msra.mxu1 %v612_v43 }
  0x42   :  { %271 = vmatmul.mubr.bf16.vlgmr.msra.gmra.mrb[0].mxu1 %v613_v44 }
  0x43   :  { %280 = vmatprep.mubr.bf16.mxu1 %v617_v45 }
  0x4a   :  { %281 = vmatmul.mubr.bf16.gmra.mrb[4].mxu1 %v620_v46 }
  0xe8   :  { %v413_v47 = vpop.f32.mrb[0].mxu0 }
  0xe9   :  { %v415_v48 = vpop.f32.mrb[1].mxu0 }
  0xea   :  { %v417_v49 = vpop.f32.mrb[2].mxu0 }
  0xeb   :  { %v419_v50 = vpop.f32.mrb[3].mxu0 }
  0xf0   :  { %v423_v51 = vpop.f32.mrb[4].mxu0 }
  0xf1   :  { %v425_v52 = vpop.f32.mrb[5].mxu0 }
  0xf2   :  { %v427_v53 = vpop.f32.mrb[6].mxu0 }
  0xf3   :  { %v429_v54 = vpop.f32.mrb[7].mxu0 }
 0x115   :  { %v272_v62 = vpop.f32.mrb[0].mxu1 }
 0x116   :  { %v302_v63 = vadd.f32 %v295_v60, %v272_v62  ;;  %v274_v0 = vpop.f32.mrb[1].mxu1 }
 0x117   :  { %v303_v1 = vadd.f32 %v299_v61, %v274_v0  ;;  %v276_v2 = vpop.f32.mrb[2].mxu1 }
 0x118   :  { %v432_v3 = vadd.f32 %v413_v47, %v302_v63  ;;  %v304_v4 = vadd.f32 %v295_v60, %v276_v2  ;;  %v278_v5 = vpop.f32.mrb[3].mxu1 }
 0x119   :  { %v433_v6 = vadd.f32 %v415_v48, %v303_v1  ;;  %v305_v7 = vadd.f32 %v299_v61, %v278_v5 }
 0x11a   :  { %v440_v8 = vmax.f32 %v432_v3, 0.0  ;;  %v434_v9 = vadd.f32 %v417_v49, %v304_v4 }
 0x11b   :  { %v441_v10 = vmax.f32 %v433_v6, 0.0  ;;  %v435_v11 = vadd.f32 %v419_v50, %v305_v7 }
 0x11c   :  { %v442_v12 = vmax.f32 %v434_v9, 0.0 }
 0x11d   :  { %v532_v13 = vpack.c.bf16 %v441_v10, %v440_v8  ;;  %v443_v14 = vmax.f32 %v435_v11, 0.0  ;;  %v282_v15 = vpop.f32.mrb[4].mxu1 }
 0x11e   :  { %v306_v16 = vadd.f32 %v295_v60, %v282_v15  ;;  %v284_v17 = vpop.f32.mrb[5].mxu1 }
 0x11f   :  { %472 = vst [vmem:[%s812_s5] sm:$0xff] %v532_v13  ;;  %v533_v18 = vpack.c.bf16 %v443_v14, %v442_v12  ;;  %v307_v19 = vadd.f32 %v299_v61, %v284_v17  ;;  %v286_v20 = vpop.f32.mrb[6].mxu1 }
 0x120   :  { %v436_v21 = vadd.f32 %v423_v51, %v306_v16  ;;  %v308_v22 = vadd.f32 %v295_v60, %v286_v20  ;;  %v288_v23 = vpop.f32.mrb[7].mxu1 }
 0x121   :  { %473 = vst [vmem:[%s812_s5 + $0x8] sm:$0xff] %v533_v18  ;;  %v437_v24 = vadd.f32 %v425_v52, %v307_v19  ;;  %v309_v25 = vadd.f32 %v299_v61, %v288_v23 }
 0x122   :  { %v444_v26 = vmax.f32 %v436_v21, 0.0  ;;  %v438_v27 = vadd.f32 %v427_v53, %v308_v22 }
 0x123   :  { %v445_v28 = vmax.f32 %v437_v24, 0.0  ;;  %v439_v29 = vadd.f32 %v429_v54, %v309_v25 }
 0x124   :  { %v446_v30 = vmax.f32 %v438_v27, 0.0 }
 0x125   :  { %v534_v31 = vpack.c.bf16 %v445_v28, %v444_v26  ;;  %v447_v32 = vmax.f32 %v439_v29, 0.0 }
 0x127   :  { %474 = vst [vmem:[%s812_s5 + $0x10] sm:$0xff] %v534_v31  ;;  %v535_v33 = vpack.c.bf16 %v447_v32, %v446_v30 }
 0x129   :  { %475 = vst [vmem:[%s812_s5 + $0x18] sm:$0xff] %v535_v33 }

// kernel: backbone_msnet_forward.16
= control target key start
LH: loop header
LB: loop body
LE: loop exit
PB: predicated region body
PF: predicated region fallthrough
CT: control target
= control target key end

     0   :  { %v763_v1 = vmov 0   ;;  %vm414_vm0 = vcmask 261120   ;;  %v336_v61 = vlaneseq  ;;  %s1014_s2 = inlined_call_operand.vmem [shape: bf16[256,256], index: 2, kind: input, shape index: {}]   ;;  %s1015_s3 = inlined_call_operand.vmem [shape: bf16[32,256], index: 3, kind: input, shape index: {}]   ;;  %s1016_s0 = inlined_call_operand.vmem [shape: bf16[64,256], index: 0, kind: input, shape index: {}]   ;;  %s1017_s1 = inlined_call_operand.vmem [shape: bf16[64,32], index: 1, kind: input, shape index: {}]   ;;  %s1018_s4 = inlined_call_operand.vmem [shape: f32[1,256], index: 4, kind: input, shape index: {}]   ;;  %s1019_s5 = inlined_call_operand.vmem [shape: bf16[64,256], index: 5, kind: output, shape index: {}]  }
   0x1   :  { %v693_v0 = vld [vmem:[%s1014_s2 + $0x4] ss:$8 sps:$4 sm:$0xff]   ;;  %459 = vmatprep.mubr.bf16.mxu0 %v763_v1  ;;  %v695_v2 = vld [vmem:[%s1014_s2] ss:$8 sps:$4 sm:$0xff]   ;;  %v696_v3 = vld [vmem:[%s1014_s2 + $0x14] ss:$8 sps:$4 sm:$0xff]  }
   0x2   :  { %262 = vmatprep.subr.bf16.mxu1 %v693_v0  ;;  %v698_v4 = vld [vmem:[%s1014_s2 + $0x10] ss:$8 sps:$4 sm:$0xff]   ;;  %v699_v5 = vld [vmem:[%s1014_s2 + $0x24] ss:$8 sps:$4 sm:$0xff]   ;;  %v701_v6 = vld [vmem:[%s1014_s2 + $0x20] ss:$8 sps:$4 sm:$0xff]  }
   0x3   :  { %263 = vmatpush1.bf16.msra.mxu1 %v695_v2  ;;  %v702_v7 = vld [vmem:[%s1014_s2 + $0x34] ss:$8 sps:$4 sm:$0xff]   ;;  %v704_v8 = vld [vmem:[%s1014_s2 + $0x30] ss:$8 sps:$4 sm:$0xff]   ;;  %v705_v9 = vld [vmem:[%s1014_s2 + $0x44] ss:$8 sps:$4 sm:$0xff]  }
   0x4   :  { %264 = vmatprep.subr.bf16.mxu1 %v696_v3  ;;  %v707_v10 = vld [vmem:[%s1014_s2 + $0x40] ss:$8 sps:$4 sm:$0xff]   ;;  %v708_v11 = vld [vmem:[%s1014_s2 + $0x54] ss:$8 sps:$4 sm:$0xff]   ;;  %v710_v12 = vld [vmem:[%s1014_s2 + $0x50] ss:$8 sps:$4 sm:$0xff]  }
   0x5   :  { %v735_v13 = vld [vmem:[%s1015_s3 + $0x4] ss:$8 sps:$4 sm:$0xff]   ;;  %v739_v15 = vld [vmem:[%s1015_s3] ss:$8 sps:$4 sm:$0xff]   ;;  %v741_v16 = vld [vmem:[%s1015_s3 + $0x14] ss:$8 sps:$4 sm:$0xff]  }
   0x6   :  { %v711_v14 = vld [vmem:[%s1014_s2 + $0x64] ss:$8 sps:$4 sm:$0xff]   ;;  %427 = vmatprep.subr.bf16.mxu0 %v735_v13  ;;  %v713_v17 = vld [vmem:[%s1014_s2 + $0x60] ss:$8 sps:$4 sm:$0xff]   ;;  %v745_v18 = vld [vmem:[%s1015_s3 + $0x10] ss:$8 sps:$4 sm:$0xff]  }
   0x7   :  { %265 = vmatpush1.bf16.msra.mxu1 %v698_v4  ;;  %428 = vmatpush1.bf16.msra.mxu0 %v739_v15  ;;  %v714_v19 = vld [vmem:[%s1014_s2 + $0x74] ss:$8 sps:$4 sm:$0xff]   ;;  %v749_v20 = vld [vmem:[%s1016_s0 + $0x4] ss:$8 sps:$4 sm:$0xff]   ;;  %v716_v22 = vld [vmem:[%s1014_s2 + $0x70] ss:$8 sps:$4 sm:$0xff]  }
   0x8   :  { %266 = vmatprep.subr.bf16.mxu1 %v699_v5  ;;  %429 = vmatprep.subr.bf16.mxu0 %v741_v16  ;;  %v750_v21 = vld [vmem:[%s1017_s1] sm:$0xff]   ;;  %v720_v25 = vld [vmem:[%s1014_s2 + $0x94] ss:$8 sps:$4 sm:$0xff]   ;;  %v753_v26 = vld [vmem:[%s1017_s1 + $0x8] sm:$0xff]   ;;  %v337_v0 = vshrl.u32 %v336_v61, 7 }
   0x9   :  { %294 = vmatprep.mubr.bf16.mxu1 %v749_v20  ;;  %v717_v23 = vld [vmem:[%s1014_s2 + $0x84] ss:$8 sps:$4 sm:$0xff]   ;;  %v719_v24 = vld [vmem:[%s1014_s2 + $0x80] ss:$8 sps:$4 sm:$0xff]   ;;  %v722_v27 = vld [vmem:[%s1014_s2 + $0x90] ss:$8 sps:$4 sm:$0xff]  }
   0xa   :  { %v723_v28 = vld [vmem:[%s1014_s2 + $0xa4] ss:$8 sps:$4 sm:$0xff]   ;;  %v725_v29 = vld [vmem:[%s1014_s2 + $0xa0] ss:$8 sps:$4 sm:$0xff]   ;;  %v726_v30 = vld [vmem:[%s1014_s2 + $0xb4] ss:$8 sps:$4 sm:$0xff]  }
   0xb   :  { %267 = vmatpush1.bf16.msra.mxu1 %v701_v6  ;;  %430 = vmatpush1.bf16.msra.mxu0 %v745_v18  ;;  %v757_v31 = vld [vmem:[%s1017_s1 + $0x10] sm:$0xff]   ;;  %v729_v33 = vld [vmem:[%s1014_s2 + $0xc4] ss:$8 sps:$4 sm:$0xff]   ;;  %v731_v34 = vld [vmem:[%s1014_s2 + $0xc0] ss:$8 sps:$4 sm:$0xff]   ;;  %v338_v3 = vsub.s32 0, %v337_v0 }
   0xc   :  { %268 = vmatprep.subr.bf16.mxu1 %v702_v7  ;;  %v728_v32 = vld [vmem:[%s1014_s2 + $0xb0] ss:$8 sps:$4 sm:$0xff]   ;;  %v732_v35 = vld [vmem:[%s1014_s2 + $0xd4] ss:$8 sps:$4 sm:$0xff]   ;;  %v737_v38 = vld [vmem:[%s1014_s2 + $0xe4] ss:$8 sps:$4 sm:$0xff]  }
   0xd   :  { %v761_v36 = vld [vmem:[%s1017_s1 + $0x18] sm:$0xff]   ;;  %v740_v39 = vld [vmem:[%s1014_s2 + $0xe0] ss:$8 sps:$4 sm:$0xff]   ;;  %v755_v45 = vld [vmem:[%s1016_s0 + $0x24] ss:$8 sps:$4 sm:$0xff]   ;;  %v342_v5 = vsub.s32 1, %v337_v0 }
   0xe   :  { %640 = vmatmul.mubr.msk.bf16.vlgmr.msra.gmra.mrb[0].mxu0 %vm414_vm0, %v750_v21  ;;  %v734_v37 = vld [vmem:[%s1014_s2 + $0xd0] ss:$8 sps:$4 sm:$0xff]   ;;  %v743_v40 = vld [vmem:[%s1014_s2 + $0xf4] ss:$8 sps:$4 sm:$0xff]   ;;  %v747_v42 = vld [vmem:[%s1016_s0] ss:$8 sps:$4 sm:$0xff]  }
   0xf   :  { %269 = vmatpush1.bf16.msra.mxu1 %v704_v8  ;;  %469 = vmatprep.mubr.bf16.mxu0 %v763_v1  ;;  %v746_v41 = vld [vmem:[%s1014_s2 + $0xf0] ss:$8 sps:$4 sm:$0xff]   ;;  %v751_v43 = vld [vmem:[%s1016_s0 + $0x14] ss:$8 sps:$4 sm:$0xff]   ;;  %v758_v46 = vld [vmem:[%s1016_s0 + $0x20] ss:$8 sps:$4 sm:$0xff]  }
  0x10   :  { %270 = vmatprep.subr.bf16.mxu1 %v705_v9  ;;  %v754_v44 = vld [vmem:[%s1016_s0 + $0x10] ss:$8 sps:$4 sm:$0xff]   ;;  %v759_v47 = vld [vmem:[%s1016_s0 + $0x34] ss:$8 sps:$4 sm:$0xff]   ;;  %v21_v4 = vld [vmem:[%s1018_s4] sm:$0x3] }
  0x11   :  { %v762_v48 = vld [vmem:[%s1016_s0 + $0x30] ss:$8 sps:$4 sm:$0xff]   ;;  %v963_v6 = vrot.slane %v21_v4, %v338_v3  ;;  %v965_v7 = vrot.slane %v21_v4, %v342_v5 }
  0x13   :  { %271 = vmatpush1.bf16.msra.mxu1 %v707_v10 }
  0x14   :  { %272 = vmatprep.subr.bf16.mxu1 %v708_v11 }
  0x16   :  { %641 = vmatmul.mubr.msk.bf16.gmra.mrb[4].mxu0 %vm414_vm0, %v753_v26 }
  0x17   :  { %273 = vmatpush1.bf16.msra.mxu1 %v710_v12  ;;  %479 = vmatprep.mubr.bf16.mxu0 %v763_v1 }
  0x18   :  { %274 = vmatprep.subr.bf16.mxu1 %v711_v14 }
  0x1b   :  { %275 = vmatpush1.bf16.msra.mxu1 %v713_v17 }
  0x1c   :  { %276 = vmatprep.subr.bf16.mxu1 %v714_v19 }
  0x1e   :  { %642 = vmatmul.mubr.msk.bf16.gmra.mrb[8].mxu0 %vm414_vm0, %v757_v31 }
  0x1f   :  { %277 = vmatpush1.bf16.msra.mxu1 %v716_v22  ;;  %489 = vmatprep.mubr.bf16.mxu0 %v763_v1 }
  0x20   :  { %278 = vmatprep.subr.bf16.mxu1 %v717_v23 }
  0x23   :  { %279 = vmatpush1.bf16.msra.mxu1 %v719_v24 }
  0x24   :  { %280 = vmatprep.subr.bf16.mxu1 %v720_v25 }
  0x26   :  { %643 = vmatmul.mubr.msk.bf16.gmra.mrb[12].mxu0 %vm414_vm0, %v761_v36 }
  0x27   :  { %281 = vmatpush1.bf16.msra.mxu1 %v722_v27 }
  0x28   :  { %282 = vmatprep.subr.bf16.mxu1 %v723_v28 }
  0x2b   :  { %283 = vmatpush1.bf16.msra.mxu1 %v725_v29 }
  0x2c   :  { %284 = vmatprep.subr.bf16.mxu1 %v726_v30 }
  0x2f   :  { %285 = vmatpush1.bf16.msra.mxu1 %v728_v32 }
  0x30   :  { %286 = vmatprep.subr.bf16.mxu1 %v729_v33 }
  0x33   :  { %287 = vmatpush1.bf16.msra.mxu1 %v731_v34 }
  0x34   :  { %288 = vmatprep.subr.bf16.mxu1 %v732_v35 }
  0x37   :  { %289 = vmatpush1.bf16.msra.mxu1 %v734_v37 }
  0x38   :  { %290 = vmatprep.subr.bf16.mxu1 %v737_v38 }
  0x3b   :  { %291 = vmatpush1.bf16.msra.mxu1 %v740_v39 }
  0x3c   :  { %292 = vmatprep.subr.bf16.mxu1 %v743_v40 }
  0x3f   :  { %293 = vmatpush1.bf16.msra.mxu1 %v746_v41 }
  0x42   :  { %295 = vmatmul.mubr.bf16.vlgmr.msra.gmra.mrb[0].mxu1 %v747_v42 }
  0x43   :  { %304 = vmatprep.mubr.bf16.mxu1 %v751_v43 }
  0x4a   :  { %305 = vmatmul.mubr.bf16.gmra.mrb[4].mxu1 %v754_v44 }
  0x4b   :  { %314 = vmatprep.mubr.bf16.mxu1 %v755_v45 }
  0x52   :  { %315 = vmatmul.mubr.bf16.gmra.mrb[8].mxu1 %v758_v46 }
  0x53   :  { %324 = vmatprep.mubr.bf16.mxu1 %v759_v47 }
  0x5a   :  { %325 = vmatmul.mubr.bf16.gmra.mrb[12].mxu1 %v762_v48 }
  0xe1   :  { %v461_v49 = vpop.f32.mrb[0].mxu0 }
  0xe2   :  { %v463_v50 = vpop.f32.mrb[1].mxu0 }
  0xe3   :  { %v465_v51 = vpop.f32.mrb[2].mxu0 }
  0xe4   :  { %v467_v52 = vpop.f32.mrb[3].mxu0 }
  0xe9   :  { %v471_v53 = vpop.f32.mrb[4].mxu0 }
  0xea   :  { %v473_v54 = vpop.f32.mrb[5].mxu0 }
  0xeb   :  { %v475_v55 = vpop.f32.mrb[6].mxu0 }
  0xec   :  { %v477_v56 = vpop.f32.mrb[7].mxu0 }
  0xf1   :  { %v481_v57 = vpop.f32.mrb[8].mxu0 }
  0xf2   :  { %v946_v58 = vpop.f32.mrb[9].mxu0 }
  0xf3   :  { %v948_v59 = vpop.f32.mrb[10].mxu0 }
  0xf4   :  { %v950_v60 = vpop.f32.mrb[11].mxu0 }
  0xf9   :  { %v952_v62 = vpop.f32.mrb[12].mxu0 }
  0xfa   :  { %v954_v63 = vpop.f32.mrb[13].mxu0 }
  0xfb   :  { %v956_v1 = vpop.f32.mrb[14].mxu0 }
  0xfc   :  { %v958_v2 = vpop.f32.mrb[15].mxu0 }
 0x115   :  { %v296_v8 = vpop.f32.mrb[0].mxu1 }
 0x116   :  { %v346_v9 = vadd.f32 %v963_v6, %v296_v8  ;;  %v298_v10 = vpop.f32.mrb[1].mxu1 }
 0x117   :  { %v347_v11 = vadd.f32 %v965_v7, %v298_v10  ;;  %v300_v12 = vpop.f32.mrb[2].mxu1 }
 0x118   :  { %v500_v13 = vadd.f32 %v461_v49, %v346_v9  ;;  %v348_v14 = vadd.f32 %v963_v6, %v300_v12  ;;  %v302_v15 = vpop.f32.mrb[3].mxu1 }
 0x119   :  { %v501_v16 = vadd.f32 %v463_v50, %v347_v11  ;;  %v349_v17 = vadd.f32 %v965_v7, %v302_v15 }
 0x11a   :  { %v516_v18 = vmax.f32 %v500_v13, 0.0  ;;  %v502_v19 = vadd.f32 %v465_v51, %v348_v14 }
 0x11b   :  { %v517_v20 = vmax.f32 %v501_v16, 0.0  ;;  %v503_v21 = vadd.f32 %v467_v52, %v349_v17 }
 0x11c   :  { %v518_v22 = vmax.f32 %v502_v19, 0.0 }
 0x11d   :  { %v652_v23 = vpack.c.bf16 %v517_v20, %v516_v18  ;;  %v519_v24 = vmax.f32 %v503_v21, 0.0  ;;  %v306_v25 = vpop.f32.mrb[4].mxu1 }
 0x11e   :  { %v350_v26 = vadd.f32 %v963_v6, %v306_v25  ;;  %v308_v27 = vpop.f32.mrb[5].mxu1 }
 0x11f   :  { %580 = vst [vmem:[%s1019_s5] sm:$0xff] %v652_v23  ;;  %v653_v28 = vpack.c.bf16 %v519_v24, %v518_v22  ;;  %v351_v29 = vadd.f32 %v965_v7, %v308_v27  ;;  %v310_v30 = vpop.f32.mrb[6].mxu1 }
 0x120   :  { %v504_v31 = vadd.f32 %v471_v53, %v350_v26  ;;  %v352_v32 = vadd.f32 %v963_v6, %v310_v30  ;;  %v312_v33 = vpop.f32.mrb[7].mxu1 }
 0x121   :  { %581 = vst [vmem:[%s1019_s5 + $0x8] sm:$0xff] %v653_v28  ;;  %v505_v34 = vadd.f32 %v473_v54, %v351_v29  ;;  %v353_v35 = vadd.f32 %v965_v7, %v312_v33 }
 0x122   :  { %v520_v36 = vmax.f32 %v504_v31, 0.0  ;;  %v506_v37 = vadd.f32 %v475_v55, %v352_v32 }
 0x123   :  { %v521_v38 = vmax.f32 %v505_v34, 0.0  ;;  %v507_v39 = vadd.f32 %v477_v56, %v353_v35 }
 0x124   :  { %v522_v40 = vmax.f32 %v506_v37, 0.0 }
 0x125   :  { %v654_v41 = vpack.c.bf16 %v521_v38, %v520_v36  ;;  %v523_v42 = vmax.f32 %v507_v39, 0.0  ;;  %v316_v43 = vpop.f32.mrb[8].mxu1 }
 0x126   :  { %v354_v44 = vadd.f32 %v963_v6, %v316_v43  ;;  %v318_v45 = vpop.f32.mrb[9].mxu1 }
 0x127   :  { %582 = vst [vmem:[%s1019_s5 + $0x10] sm:$0xff] %v654_v41  ;;  %v655_v46 = vpack.c.bf16 %v523_v42, %v522_v40  ;;  %v355_v47 = vadd.f32 %v965_v7, %v318_v45  ;;  %v320_v48 = vpop.f32.mrb[10].mxu1 }
 0x128   :  { %v508_v49 = vadd.f32 %v481_v57, %v354_v44  ;;  %v356_v50 = vadd.f32 %v963_v6, %v320_v48  ;;  %v322_v51 = vpop.f32.mrb[11].mxu1 }
 0x129   :  { %583 = vst [vmem:[%s1019_s5 + $0x18] sm:$0xff] %v655_v46  ;;  %v509_v52 = vadd.f32 %v946_v58, %v355_v47  ;;  %v357_v53 = vadd.f32 %v965_v7, %v322_v51 }
 0x12a   :  { %v524_v54 = vmax.f32 %v508_v49, 0.0  ;;  %v510_v55 = vadd.f32 %v948_v59, %v356_v50 }
 0x12b   :  { %v525_v56 = vmax.f32 %v509_v52, 0.0  ;;  %v511_v61 = vadd.f32 %v950_v60, %v357_v53 }
 0x12c   :  { %v526_v0 = vmax.f32 %v510_v55, 0.0 }
 0x12d   :  { %v656_v3 = vpack.c.bf16 %v525_v56, %v524_v54  ;;  %v527_v57 = vmax.f32 %v511_v61, 0.0  ;;  %v326_v4 = vpop.f32.mrb[12].mxu1 }
 0x12e   :  { %v358_v5 = vadd.f32 %v963_v6, %v326_v4  ;;  %v328_v8 = vpop.f32.mrb[13].mxu1 }
 0x12f   :  { %584 = vst [vmem:[%s1019_s5 + $0x20] sm:$0xff] %v656_v3  ;;  %v657_v58 = vpack.c.bf16 %v527_v57, %v526_v0  ;;  %v359_v9 = vadd.f32 %v965_v7, %v328_v8  ;;  %v330_v10 = vpop.f32.mrb[14].mxu1 }
 0x130   :  { %v512_v59 = vadd.f32 %v952_v62, %v358_v5  ;;  %v360_v11 = vadd.f32 %v963_v6, %v330_v10  ;;  %v332_v60 = vpop.f32.mrb[15].mxu1 }
 0x131   :  { %585 = vst [vmem:[%s1019_s5 + $0x28] sm:$0xff] %v657_v58  ;;  %v513_v12 = vadd.f32 %v954_v63, %v359_v9  ;;  %v361_v13 = vadd.f32 %v965_v7, %v332_v60 }
 0x132   :  { %v528_v14 = vmax.f32 %v512_v59, 0.0  ;;  %v514_v15 = vadd.f32 %v956_v1, %v360_v11 }
 0x133   :  { %v529_v16 = vmax.f32 %v513_v12, 0.0  ;;  %v515_v17 = vadd.f32 %v958_v2, %v361_v13 }
 0x134   :  { %v530_v18 = vmax.f32 %v514_v15, 0.0 }
 0x135   :  { %v658_v19 = vpack.c.bf16 %v529_v16, %v528_v14  ;;  %v531_v62 = vmax.f32 %v515_v17, 0.0 }
 0x137   :  { %586 = vst [vmem:[%s1019_s5 + $0x30] sm:$0xff] %v658_v19  ;;  %v659_v6 = vpack.c.bf16 %v531_v62, %v530_v18 }
 0x139   :  { %587 = vst [vmem:[%s1019_s5 + $0x38] sm:$0xff] %v659_v6 }

// kernel: neg.24
= control target key start
LH: loop header
LB: loop body
LE: loop exit
PB: predicated region body
PF: predicated region fallthrough
CT: control target
= control target key end

     0   :  { %s136_s0 = inlined_call_operand.vmem [shape: f32[2,64,32], index: 0, kind: input, shape index: {}]   ;;  %s137_s1 = inlined_call_operand.vmem [shape: f32[2,64,32], index: 1, kind: output, shape index: {}]  }
   0x1   :  { %v2_v0 = vld [vmem:[%s136_s0] sm:$0xff]  ;;  %v66_v2 = vld [vmem:[%s136_s0 + $0x8] sm:$0xff]  ;;  %v70_v7 = vld [vmem:[%s136_s0 + $0x10] sm:$0xff] }
   0x2   :  { %v64_v1 = vld [vmem:[%s136_s0 + $0x20] sm:$0xff]  ;;  %v5_v3 = vxor.u32 2147483648, %v2_v0  ;;  %v20_v5 = vxor.u32 2147483648, %v66_v2  ;;  %v68_v6 = vld [vmem:[%s136_s0 + $0x28] sm:$0xff]  ;;  %v72_v8 = vld [vmem:[%s136_s0 + $0x30] sm:$0xff]  ;;  %v36_v10 = vxor.u32 2147483648, %v70_v7 }
   0x3   :  { %v12_v4 = vxor.u32 2147483648, %v64_v1  ;;  %v28_v9 = vxor.u32 2147483648, %v68_v6  ;;  %v44_v11 = vxor.u32 2147483648, %v72_v8  ;;  %v74_v12 = vld [vmem:[%s136_s0 + $0x18] sm:$0xff] }
   0x4   :  { %v76_v13 = vld [vmem:[%s136_s0 + $0x38] sm:$0xff]  ;;  %7 = vst [vmem:[%s137_s1] sm:$0xff] %v5_v3  ;;  %67 = vst [vmem:[%s137_s1 + $0x8] sm:$0xff] %v20_v5  ;;  %v52_v14 = vxor.u32 2147483648, %v74_v12 }
   0x5   :  { %65 = vst [vmem:[%s137_s1 + $0x20] sm:$0xff] %v12_v4  ;;  %v60_v15 = vxor.u32 2147483648, %v76_v13  ;;  %69 = vst [vmem:[%s137_s1 + $0x28] sm:$0xff] %v28_v9 }
   0x6   :  { %71 = vst [vmem:[%s137_s1 + $0x10] sm:$0xff] %v36_v10  ;;  %73 = vst [vmem:[%s137_s1 + $0x30] sm:$0xff] %v44_v11 }
   0x7   :  { %75 = vst [vmem:[%s137_s1 + $0x18] sm:$0xff] %v52_v14  ;;  %77 = vst [vmem:[%s137_s1 + $0x38] sm:$0xff] %v60_v15 }

// kernel: backbone_msnet_forward.17
= control target key start
LH: loop header
LB: loop body
LE: loop exit
PB: predicated region body
PF: predicated region fallthrough
CT: control target
= control target key end

     0   :  { %v1496_v2 = vmov 0   ;;  %vm572_vm0 = vcmask 1040384   ;;  %vm547_vm1 = vcmask 138240   ;;  %s2004_s0 = inlined_call_operand.vmem [shape: bf16[128,256], index: 0, kind: input, shape index: {}]   ;;  %s2005_s1 = inlined_call_operand.vmem [shape: bf16[128,17], index: 1, kind: input, shape index: {}]   ;;  %s2006_s2 = inlined_call_operand.vmem [shape: bf16[256,256], index: 2, kind: input, shape index: {}]   ;;  %s2007_s3 = inlined_call_operand.vmem [shape: bf16[17,256], index: 3, kind: input, shape index: {}]   ;;  %s2008_s4 = inlined_call_operand.vmem [shape: f32[1,256], index: 4, kind: input, shape index: {}]   ;;  %s2009_s5 = inlined_call_operand.vmem [shape: bf16[256,256], index: 5, kind: input, shape index: {}]   ;;  %s2010_s6 = inlined_call_operand.vmem [shape: f32[1,256], index: 6, kind: input, shape index: {}]   ;;  %s2011_s7 = inlined_call_operand.hbm [shape: f32[128,256], index: 7, kind: output, shape index: {}]  }
   0x1   :  { %v1339_v0 = vld [vmem:[%s2006_s2 + $0x4] ss:$8 sps:$4 sm:$0xff]   ;;  %v1341_v1 = vld [vmem:[%s2006_s2] ss:$8 sps:$4 sm:$0xff]   ;;  %613 = vmatprep.mubr.bf16.mxu1 %v1496_v2  ;;  %v1342_v3 = vld [vmem:[%s2006_s2 + $0x14] ss:$8 sps:$4 sm:$0xff]  }
   0x2   :  { %317 = vmatprep.subr.bf16.mxu0 %v1339_v0  ;;  %v1344_v4 = vld [vmem:[%s2006_s2 + $0x10] ss:$8 sps:$4 sm:$0xff]   ;;  %v1345_v5 = vld [vmem:[%s2006_s2 + $0x24] ss:$8 sps:$4 sm:$0xff]   ;;  %v1347_v6 = vld [vmem:[%s2006_s2 + $0x20] ss:$8 sps:$4 sm:$0xff]  }
   0x3   :  { %318 = vmatpush1.bf16.msra.mxu0 %v1341_v1  ;;  %v1348_v7 = vld [vmem:[%s2006_s2 + $0x34] ss:$8 sps:$4 sm:$0xff]   ;;  %v1350_v8 = vld [vmem:[%s2006_s2 + $0x30] ss:$8 sps:$4 sm:$0xff]   ;;  %v1351_v9 = vld [vmem:[%s2006_s2 + $0x44] ss:$8 sps:$4 sm:$0xff]  }
   0x4   :  { %319 = vmatprep.subr.bf16.mxu0 %v1342_v3  ;;  %v1353_v10 = vld [vmem:[%s2006_s2 + $0x40] ss:$8 sps:$4 sm:$0xff]   ;;  %v1354_v11 = vld [vmem:[%s2006_s2 + $0x54] ss:$8 sps:$4 sm:$0xff]   ;;  %v1356_v12 = vld [vmem:[%s2006_s2 + $0x50] ss:$8 sps:$4 sm:$0xff]  }
   0x5   :  { %v1381_v13 = vld [vmem:[%s2007_s3 + $0x4] ss:$8 sps:$4 sm:$0xff]   ;;  %v1385_v15 = vld [vmem:[%s2007_s3] ss:$8 sps:$4 sm:$0xff]   ;;  %v491_v16 = vld [vmem:[%s2007_s3 + $0x10] sm:$0x11] }
   0x6   :  { %v1357_v14 = vld [vmem:[%s2006_s2 + $0x64] ss:$8 sps:$4 sm:$0xff]   ;;  %581 = vmatprep.subr.bf16.mxu1 %v1381_v13  ;;  %v574_v17 = vsel %vm572_vm0, 65535, %v1496_v2  ;;  %v1359_v18 = vld [vmem:[%s2006_s2 + $0x60] ss:$8 sps:$4 sm:$0xff]   ;;  %v1230_v19 = vcombine.high %v491_v16, %v491_v16  ;;  %v1229_v20 = vcombine.low %v491_v16, %v491_v16  ;;  %v1402_v36 = vld [vmem:[%s2005_s1 + $0x10] sm:$0xff]  }
   0x7   :  { %320 = vmatpush1.bf16.msra.mxu0 %v1344_v4  ;;  %582 = vmatpush1.bf16.msra.mxu1 %v1385_v15  ;;  %v1360_v21 = vld [vmem:[%s2006_s2 + $0x74] ss:$8 sps:$4 sm:$0xff]   ;;  %v1394_v24 = vld [vmem:[%s2004_s0 + $0x4] ss:$8 sps:$4 sm:$0xff]   ;;  %v1362_v26 = vld [vmem:[%s2006_s2 + $0x70] ss:$8 sps:$4 sm:$0xff]  }
   0x8   :  { %321 = vmatprep.subr.bf16.mxu0 %v1345_v5  ;;  %v579_v22 = vand.u32 %v1230_v19, %v574_v17  ;;  %v576_v23 = vand.u32 %v1229_v20, %v574_v17  ;;  %349 = vmatprep.mubr.bf16.mxu0 %v1394_v24  ;;  %v1395_v25 = vld [vmem:[%s2005_s1] sm:$0xff]   ;;  %v1366_v29 = vld [vmem:[%s2006_s2 + $0x94] ss:$8 sps:$4 sm:$0xff]   ;;  %v1398_v30 = vld [vmem:[%s2005_s1 + $0x8] sm:$0xff]  }
   0x9   :  { %v1363_v27 = vld [vmem:[%s2006_s2 + $0x84] ss:$8 sps:$4 sm:$0xff]   ;;  %v1365_v28 = vld [vmem:[%s2006_s2 + $0x80] ss:$8 sps:$4 sm:$0xff]   ;;  %v1368_v31 = vld [vmem:[%s2006_s2 + $0x90] ss:$8 sps:$4 sm:$0xff]  }
   0xa   :  { %583 = vmatprep.subr.bf16.mxu1 %v579_v22  ;;  %v1369_v32 = vld [vmem:[%s2006_s2 + $0xa4] ss:$8 sps:$4 sm:$0xff]   ;;  %v1371_v33 = vld [vmem:[%s2006_s2 + $0xa0] ss:$8 sps:$4 sm:$0xff]   ;;  %v1372_v34 = vld [vmem:[%s2006_s2 + $0xb4] ss:$8 sps:$4 sm:$0xff]  }
   0xb   :  { %322 = vmatpush1.bf16.msra.mxu0 %v1347_v6  ;;  %584 = vmatpush1.bf16.msra.mxu1 %v576_v23  ;;  %v1374_v35 = vld [vmem:[%s2006_s2 + $0xb0] ss:$8 sps:$4 sm:$0xff]   ;;  %v1424_v37 = vld [vmem:[%s2009_s5] ss:$8 sps:$4 sm:$0xff]   ;;  %v1426_v38 = vld [vmem:[%s2009_s5 + $0x4] ss:$8 sps:$4 sm:$0xff]  }
   0xc   :  { %323 = vmatprep.subr.bf16.mxu0 %v1348_v7  ;;  %v1375_v39 = vld [vmem:[%s2006_s2 + $0xc4] ss:$8 sps:$4 sm:$0xff]   ;;  %978 = vmatprep.subr.bf16.mxu1 %v1426_v38  ;;  %v1429_v40 = vld [vmem:[%s2009_s5 + $0x14] ss:$8 sps:$4 sm:$0xff]   ;;  %v1427_v41 = vld [vmem:[%s2009_s5 + $0x10] ss:$8 sps:$4 sm:$0xff]  }
   0xd   :  { %v1432_v42 = vld [vmem:[%s2009_s5 + $0x24] ss:$8 sps:$4 sm:$0xff]   ;;  %v1377_v43 = vld [vmem:[%s2006_s2 + $0xc0] ss:$8 sps:$4 sm:$0xff]   ;;  %v1378_v44 = vld [vmem:[%s2006_s2 + $0xd4] ss:$8 sps:$4 sm:$0xff]  }
   0xe   :  { %1231 = vmatmul.mubr.msk.bf16.vlgmr.msra.gmra.mrb[0].mxu1 %vm547_vm1, %v1395_v25  ;;  %v1430_v45 = vld [vmem:[%s2009_s5 + $0x20] ss:$8 sps:$4 sm:$0xff]   ;;  %v1406_v46 = vld [vmem:[%s2005_s1 + $0x18] sm:$0xff]   ;;  %v1383_v49 = vld [vmem:[%s2006_s2 + $0xe4] ss:$8 sps:$4 sm:$0xff]  }
   0xf   :  { %324 = vmatpush1.bf16.msra.mxu0 %v1350_v8  ;;  %623 = vmatprep.mubr.bf16.mxu1 %v1496_v2  ;;  %v1435_v47 = vld [vmem:[%s2009_s5 + $0x34] ss:$8 sps:$4 sm:$0xff]   ;;  %v1380_v48 = vld [vmem:[%s2006_s2 + $0xd0] ss:$8 sps:$4 sm:$0xff]   ;;  %v1438_v51 = vld [vmem:[%s2009_s5 + $0x44] ss:$8 sps:$4 sm:$0xff]  }
  0x10   :  { %325 = vmatprep.subr.bf16.mxu0 %v1351_v9  ;;  %979 = vmatpush1.bf16.msra.mxu1 %v1424_v37  ;;  %v1433_v50 = vld [vmem:[%s2009_s5 + $0x30] ss:$8 sps:$4 sm:$0xff]   ;;  %v1386_v52 = vld [vmem:[%s2006_s2 + $0xe0] ss:$8 sps:$4 sm:$0xff]   ;;  %v1388_v53 = vld [vmem:[%s2006_s2 + $0xf4] ss:$8 sps:$4 sm:$0xff]  }
  0x11   :  { %980 = vmatprep.subr.bf16.mxu1 %v1429_v40  ;;  %v1391_v54 = vld [vmem:[%s2006_s2 + $0xf0] ss:$8 sps:$4 sm:$0xff]   ;;  %v1436_v55 = vld [vmem:[%s2009_s5 + $0x40] ss:$8 sps:$4 sm:$0xff]   ;;  %v1441_v57 = vld [vmem:[%s2009_s5 + $0x54] ss:$8 sps:$4 sm:$0xff]  }
  0x12   :  { %v1410_v56 = vld [vmem:[%s2005_s1 + $0x20] sm:$0xff]   ;;  %v1439_v58 = vld [vmem:[%s2009_s5 + $0x50] ss:$8 sps:$4 sm:$0xff]  }
  0x13   :  { %326 = vmatpush1.bf16.msra.mxu0 %v1353_v10 }
  0x14   :  { %327 = vmatprep.subr.bf16.mxu0 %v1354_v11  ;;  %981 = vmatpush1.bf16.msra.mxu1 %v1427_v41 }
  0x15   :  { %982 = vmatprep.subr.bf16.mxu1 %v1432_v42 }
  0x16   :  { %1232 = vmatmul.mubr.msk.bf16.gmra.mrb[4].mxu1 %vm547_vm1, %v1398_v30 }
  0x17   :  { %328 = vmatpush1.bf16.msra.mxu0 %v1356_v12  ;;  %633 = vmatprep.mubr.bf16.mxu1 %v1496_v2 }
  0x18   :  { %329 = vmatprep.subr.bf16.mxu0 %v1357_v14  ;;  %983 = vmatpush1.bf16.msra.mxu1 %v1430_v45 }
  0x19   :  { %984 = vmatprep.subr.bf16.mxu1 %v1435_v47 }
  0x1b   :  { %330 = vmatpush1.bf16.msra.mxu0 %v1359_v18 }
  0x1c   :  { %331 = vmatprep.subr.bf16.mxu0 %v1360_v21  ;;  %985 = vmatpush1.bf16.msra.mxu1 %v1433_v50 }
  0x1d   :  { %986 = vmatprep.subr.bf16.mxu1 %v1438_v51 }
  0x1e   :  { %1233 = vmatmul.mubr.msk.bf16.gmra.mrb[8].mxu1 %vm547_vm1, %v1402_v36 }
  0x1f   :  { %332 = vmatpush1.bf16.msra.mxu0 %v1362_v26  ;;  %643 = vmatprep.mubr.bf16.mxu1 %v1496_v2 }
  0x20   :  { %333 = vmatprep.subr.bf16.mxu0 %v1363_v27  ;;  %987 = vmatpush1.bf16.msra.mxu1 %v1436_v55 }
  0x23   :  { %334 = vmatpush1.bf16.msra.mxu0 %v1365_v28 }
  0x24   :  { %335 = vmatprep.subr.bf16.mxu0 %v1366_v29 }
  0x26   :  { %1234 = vmatmul.mubr.msk.bf16.gmra.mrb[12].mxu1 %vm547_vm1, %v1406_v46 }
  0x27   :  { %336 = vmatpush1.bf16.msra.mxu0 %v1368_v31  ;;  %653 = vmatprep.mubr.bf16.mxu1 %v1496_v2 }
  0x28   :  { %337 = vmatprep.subr.bf16.mxu0 %v1369_v32 }
  0x2b   :  { %338 = vmatpush1.bf16.msra.mxu0 %v1371_v33 }
  0x2c   :  { %339 = vmatprep.subr.bf16.mxu0 %v1372_v34 }
  0x2f   :  { %340 = vmatpush1.bf16.msra.mxu0 %v1374_v35 }
  0x30   :  { %341 = vmatprep.subr.bf16.mxu0 %v1375_v39 }
  0x33   :  { %342 = vmatpush1.bf16.msra.mxu0 %v1377_v43 }
  0x34   :  { %343 = vmatprep.subr.bf16.mxu0 %v1378_v44 }
  0x37   :  { %344 = vmatpush1.bf16.msra.mxu0 %v1380_v48 }
  0x38   :  { %345 = vmatprep.subr.bf16.mxu0 %v1383_v49 }
  0x3b   :  { %346 = vmatpush1.bf16.msra.mxu0 %v1386_v52 }
  0x3c   :  { %347 = vmatprep.subr.bf16.mxu0 %v1388_v53 }
  0x3d   :  { %12 = vsyncpa [#allocation3], 0  ;;  %v1392_v59 = vld [vmem:[%s2004_s0] ss:$8 sps:$4 sm:$0xff]   ;;  %1235 = vmatmul.mubr.msk.bf16.gmra.mrb[16].mxu1 %vm547_vm1, %v1410_v56  ;;  %988 = vmatprep.subr.bf16.mxu1 %v1441_v57  ;;  %v1444_v60 = vld [vmem:[%s2009_s5 + $0x64] ss:$8 sps:$4 sm:$0xff]   ;;  %v431_v45 = vlaneseq }
  0x3e   :  { %v1396_v61 = vld [vmem:[%s2004_s0 + $0x14] ss:$8 sps:$4 sm:$0xff]   ;;  %663 = vmatprep.mubr.bf16.mxu1 %v1496_v2  ;;  %989 = vmatpush1.bf16.msra.mxu1 %v1439_v58  ;;  %v1442_v62 = vld [vmem:[%s2009_s5 + $0x60] ss:$8 sps:$4 sm:$0xff]   ;;  %v1445_v1 = vld [vmem:[%s2009_s5 + $0x70] ss:$8 sps:$4 sm:$0xff]  }
  0x3f   :  { %348 = vmatpush1.bf16.msra.mxu0 %v1391_v54  ;;  %v1414_v63 = vld [vmem:[%s2005_s1 + $0x28] sm:$0xff]   ;;  %990 = vmatprep.subr.bf16.mxu1 %v1444_v60  ;;  %v1447_v0 = vld [vmem:[%s2009_s5 + $0x74] ss:$8 sps:$4 sm:$0xff]   ;;  %v1399_v3 = vld [vmem:[%s2004_s0 + $0x10] ss:$8 sps:$4 sm:$0xff]   ;;  %v1840_v47 = vshrl.u32 %v431_v45, 7 }
  0x40   :  { %v1450_v4 = vld [vmem:[%s2009_s5 + $0x84] ss:$8 sps:$4 sm:$0xff]   ;;  %v1448_v6 = vld [vmem:[%s2009_s5 + $0x80] ss:$8 sps:$4 sm:$0xff]   ;;  %v1418_v7 = vld [vmem:[%s2005_s1 + $0x30] sm:$0xff]  }
  0x41   :  { %v1400_v5 = vld [vmem:[%s2004_s0 + $0x24] ss:$8 sps:$4 sm:$0xff]   ;;  %v1453_v8 = vld [vmem:[%s2009_s5 + $0x94] ss:$8 sps:$4 sm:$0xff]   ;;  %v1451_v9 = vld [vmem:[%s2009_s5 + $0x90] ss:$8 sps:$4 sm:$0xff]  }
  0x42   :  { %350 = vmatmul.mubr.bf16.vlgmr.msra.gmra.mrb[0].mxu0 %v1392_v59  ;;  %991 = vmatpush1.bf16.msra.mxu1 %v1442_v62  ;;  %v1403_v10 = vld [vmem:[%s2004_s0 + $0x20] ss:$8 sps:$4 sm:$0xff]   ;;  %v1456_v11 = vld [vmem:[%s2009_s5 + $0xa4] ss:$8 sps:$4 sm:$0xff]   ;;  %v1404_v12 = vld [vmem:[%s2004_s0 + $0x34] ss:$8 sps:$4 sm:$0xff]  }
  0x43   :  { %359 = vmatprep.mubr.bf16.mxu0 %v1396_v61  ;;  %992 = vmatprep.subr.bf16.mxu1 %v1447_v0  ;;  %v1454_v13 = vld [vmem:[%s2009_s5 + $0xa0] ss:$8 sps:$4 sm:$0xff]   ;;  %v1422_v14 = vld [vmem:[%s2005_s1 + $0x38] sm:$0xff]   ;;  %v1462_v17 = vld [vmem:[%s2009_s5 + $0xc4] ss:$8 sps:$4 sm:$0xff]   ;;  %v433_v51 = vsub.s32 0, %v1840_v47 }
  0x44   :  { %v1459_v15 = vld [vmem:[%s2009_s5 + $0xb4] ss:$8 sps:$4 sm:$0xff]   ;;  %v1407_v16 = vld [vmem:[%s2004_s0 + $0x30] ss:$8 sps:$4 sm:$0xff]   ;;  %v1408_v18 = vld [vmem:[%s2004_s0 + $0x44] ss:$8 sps:$4 sm:$0xff]  }
  0x45   :  { %1236 = vmatmul.mubr.msk.bf16.gmra.mrb[20].mxu1 %vm547_vm1, %v1414_v63  ;;  %v1460_v19 = vld [vmem:[%s2009_s5 + $0xc0] ss:$8 sps:$4 sm:$0xff]   ;;  %v1412_v21 = vld [vmem:[%s2004_s0 + $0x54] ss:$8 sps:$4 sm:$0xff]   ;;  %v1415_v22 = vld [vmem:[%s2004_s0 + $0x50] ss:$8 sps:$4 sm:$0xff]  }
  0x46   :  { %673 = vmatprep.mubr.bf16.mxu1 %v1496_v2  ;;  %993 = vmatpush1.bf16.msra.mxu1 %v1445_v1  ;;  %v1411_v20 = vld [vmem:[%s2004_s0 + $0x40] ss:$8 sps:$4 sm:$0xff]   ;;  %v1416_v23 = vld [vmem:[%s2004_s0 + $0x64] ss:$8 sps:$4 sm:$0xff]   ;;  %v1420_v25 = vld [vmem:[%s2004_s0 + $0x74] ss:$8 sps:$4 sm:$0xff]  }
  0x47   :  { %994 = vmatprep.subr.bf16.mxu1 %v1450_v4  ;;  %v1419_v24 = vld [vmem:[%s2004_s0 + $0x60] ss:$8 sps:$4 sm:$0xff]   ;;  %v1423_v26 = vld [vmem:[%s2004_s0 + $0x70] ss:$8 sps:$4 sm:$0xff]   ;;  %v1465_v27 = vld [vmem:[%s2009_s5 + $0xd4] ss:$8 sps:$4 sm:$0xff]  }
  0x48   :  { %v1463_v28 = vld [vmem:[%s2009_s5 + $0xd0] ss:$8 sps:$4 sm:$0xff]   ;;  %v1468_v29 = vld [vmem:[%s2009_s5 + $0xe4] ss:$8 sps:$4 sm:$0xff]   ;;  %v1466_v30 = vld [vmem:[%s2009_s5 + $0xe0] ss:$8 sps:$4 sm:$0xff]  }
  0x49   :  { %v1471_v31 = vld [vmem:[%s2009_s5 + $0xf4] ss:$8 sps:$4 sm:$0xff]   ;;  %v1469_v32 = vld [vmem:[%s2009_s5 + $0xf0] ss:$8 sps:$4 sm:$0xff]   ;;  %v28_v52 = vld [vmem:[%s2008_s4] sm:$0x3] }
  0x4a   :  { %360 = vmatmul.mubr.bf16.gmra.mrb[4].mxu0 %v1399_v3  ;;  %995 = vmatpush1.bf16.msra.mxu1 %v1448_v6  ;;  %v437_v53 = vsub.s32 1, %v1840_v47  ;;  %v1857_v55 = vrot.slane %v28_v52, %v433_v51 }
  0x4b   :  { %369 = vmatprep.mubr.bf16.mxu0 %v1400_v5  ;;  %996 = vmatprep.subr.bf16.mxu1 %v1453_v8 }
  0x4c   :  { %v1863_v57 = vrot.slane %v28_v52, %v437_v53 }
  0x4d   :  { %1237 = vmatmul.mubr.msk.bf16.gmra.mrb[24].mxu1 %vm547_vm1, %v1418_v7 }
  0x4e   :  { %683 = vmatprep.mubr.bf16.mxu1 %v1496_v2  ;;  %997 = vmatpush1.bf16.msra.mxu1 %v1451_v9  ;;  %v1457_v2 = vld [vmem:[%s2009_s5 + $0xb0] ss:$8 sps:$4 sm:$0xff]  }
  0x4f   :  { %998 = vmatprep.subr.bf16.mxu1 %v1456_v11 }
  0x52   :  { %370 = vmatmul.mubr.bf16.gmra.mrb[8].mxu0 %v1403_v10  ;;  %999 = vmatpush1.bf16.msra.mxu1 %v1454_v13 }
  0x53   :  { %379 = vmatprep.mubr.bf16.mxu0 %v1404_v12  ;;  %1000 = vmatprep.subr.bf16.mxu1 %v1459_v15 }
  0x55   :  { %1238 = vmatmul.mubr.msk.bf16.gmra.mrb[28].mxu1 %vm547_vm1, %v1422_v14 }
  0x56   :  { %1001 = vmatpush1.bf16.msra.mxu1 %v1457_v2 }
  0x57   :  { %1002 = vmatprep.subr.bf16.mxu1 %v1462_v17 }
  0x5a   :  { %380 = vmatmul.mubr.bf16.gmra.mrb[12].mxu0 %v1407_v16  ;;  %1003 = vmatpush1.bf16.msra.mxu1 %v1460_v19 }
  0x5b   :  { %389 = vmatprep.mubr.bf16.mxu0 %v1408_v18  ;;  %1004 = vmatprep.subr.bf16.mxu1 %v1465_v27 }
  0x5e   :  { %1005 = vmatpush1.bf16.msra.mxu1 %v1463_v28 }
  0x5f   :  { %1006 = vmatprep.subr.bf16.mxu1 %v1468_v29 }
  0x62   :  { %390 = vmatmul.mubr.bf16.gmra.mrb[16].mxu0 %v1411_v20  ;;  %1007 = vmatpush1.bf16.msra.mxu1 %v1466_v30 }
  0x63   :  { %399 = vmatprep.mubr.bf16.mxu0 %v1412_v21  ;;  %1008 = vmatprep.subr.bf16.mxu1 %v1471_v31 }
  0x66   :  { %1009 = vmatpush1.bf16.msra.mxu1 %v1469_v32 }
  0x6a   :  { %400 = vmatmul.mubr.bf16.gmra.mrb[20].mxu0 %v1415_v22 }
  0x6b   :  { %409 = vmatprep.mubr.bf16.mxu0 %v1416_v23 }
  0x72   :  { %410 = vmatmul.mubr.bf16.gmra.mrb[24].mxu0 %v1419_v24 }
  0x73   :  { %419 = vmatprep.mubr.bf16.mxu0 %v1420_v25 }
  0x7a   :  { %420 = vmatmul.mubr.bf16.gmra.mrb[28].mxu0 %v1423_v26 }
  0xe1   :  { %v615_v33 = vpop.f32.mrb[0].mxu1 }
  0xe2   :  { %v617_v34 = vpop.f32.mrb[1].mxu1 }
  0xe3   :  { %v619_v35 = vpop.f32.mrb[2].mxu1 }
  0xe4   :  { %v621_v36 = vpop.f32.mrb[3].mxu1 }
  0xe9   :  { %v625_v37 = vpop.f32.mrb[4].mxu1 }
  0xea   :  { %v627_v38 = vpop.f32.mrb[5].mxu1 }
  0xeb   :  { %v629_v39 = vpop.f32.mrb[6].mxu1 }
  0xec   :  { %v631_v40 = vpop.f32.mrb[7].mxu1 }
  0xf1   :  { %v1830_v41 = vpop.f32.mrb[8].mxu1 }
  0xf2   :  { %v1832_v42 = vpop.f32.mrb[9].mxu1 }
  0xf3   :  { %v1834_v43 = vpop.f32.mrb[10].mxu1 }
  0xf4   :  { %v1836_v44 = vpop.f32.mrb[11].mxu1 }
  0xf9   :  { %v1838_v46 = vpop.f32.mrb[12].mxu1 }
  0xfa   :  { %v1842_v48 = vpop.f32.mrb[13].mxu1 }
  0xfb   :  { %v1844_v49 = vpop.f32.mrb[14].mxu1 }
  0xfc   :  { %v1846_v50 = vpop.f32.mrb[15].mxu1 }
 0x110   :  { %v1853_v54 = vpop.f32.mrb[16].mxu1 }
 0x111   :  { %v1859_v56 = vpop.f32.mrb[17].mxu1 }
 0x112   :  { %v1865_v58 = vpop.f32.mrb[18].mxu1 }
 0x113   :  { %v1867_v59 = vpop.f32.mrb[19].mxu1 }
 0x115   :  { %v351_v60 = vpop.f32.mrb[0].mxu0 }
 0x116   :  { %v441_v61 = vadd.f32 %v1857_v55, %v351_v60  ;;  %v353_v62 = vpop.f32.mrb[1].mxu0 }
 0x117   :  { %v442_v63 = vadd.f32 %v1863_v57, %v353_v62  ;;  %v355_v0 = vpop.f32.mrb[2].mxu0 }
 0x118   :  { %v694_v1 = vadd.f32 %v615_v33, %v441_v61  ;;  %v443_v3 = vadd.f32 %v1857_v55, %v355_v0  ;;  %v357_v4 = vpop.f32.mrb[3].mxu0  ;;  %v1873_v7 = vpop.f32.mrb[20].mxu1 }
 0x119   :  { %v695_v5 = vadd.f32 %v617_v34, %v442_v63  ;;  %v444_v6 = vadd.f32 %v1863_v57, %v357_v4  ;;  %v1875_v9 = vpop.f32.mrb[21].mxu1 }
 0x11a   :  { %v696_v8 = vadd.f32 %v619_v35, %v443_v3  ;;  %v1877_v11 = vpop.f32.mrb[22].mxu1  ;;  %v726_v12 = vmax.f32 %v694_v1, 0.0 }
 0x11b   :  { %v697_v10 = vadd.f32 %v621_v36, %v444_v6  ;;  %v1879_v14 = vpop.f32.mrb[23].mxu1  ;;  %v727_v15 = vmax.f32 %v695_v5, 0.0 }
 0x11c   :  { %v728_v13 = vmax.f32 %v696_v8, 0.0 }
 0x11d   :  { %v729_v2 = vmax.f32 %v697_v10, 0.0  ;;  %v361_v16 = vpop.f32.mrb[4].mxu0 }
 0x11e   :  { %v758_v17 = vpack.c.bf16 %v728_v13, %v726_v12  ;;  %v445_v18 = vadd.f32 %v1857_v55, %v361_v16  ;;  %v363_v19 = vpop.f32.mrb[5].mxu0 }
 0x11f   :  { %v446_v20 = vadd.f32 %v1863_v57, %v363_v19  ;;  %v365_v21 = vpop.f32.mrb[6].mxu0  ;;  %v759_v22 = vpack.c.bf16 %v729_v2, %v727_v15 }
 0x120   :  { %v698_v23 = vadd.f32 %v625_v37, %v445_v18  ;;  %v447_v24 = vadd.f32 %v1857_v55, %v365_v21  ;;  %v367_v25 = vpop.f32.mrb[7].mxu0  ;;  %v1885_v28 = vpop.f32.mrb[24].mxu1 }
 0x121   :  { %v699_v26 = vadd.f32 %v627_v38, %v446_v20  ;;  %v448_v27 = vadd.f32 %v1863_v57, %v367_v25  ;;  %1010 = vmatprep.mubr.bf16.mxu1 %v759_v22  ;;  %v1887_v30 = vpop.f32.mrb[25].mxu1 }
 0x122   :  { %v700_v29 = vadd.f32 %v629_v39, %v447_v24  ;;  %1011 = vmatmul.mubr.bf16.vlgmr.msra.gmra.mrb[32].mxu1 %v758_v17  ;;  %v1889_v32 = vpop.f32.mrb[26].mxu1  ;;  %v730_v33 = vmax.f32 %v698_v23, 0.0 }
 0x123   :  { %v701_v31 = vadd.f32 %v631_v40, %v448_v27  ;;  %v1891_v35 = vpop.f32.mrb[27].mxu1  ;;  %v731_v36 = vmax.f32 %v699_v26, 0.0 }
 0x124   :  { %v732_v34 = vmax.f32 %v700_v29, 0.0 }
 0x125   :  { %v733_v37 = vmax.f32 %v701_v31, 0.0  ;;  %v371_v45 = vpop.f32.mrb[8].mxu0 }
 0x126   :  { %v449_v38 = vadd.f32 %v1857_v55, %v371_v45  ;;  %v373_v52 = vpop.f32.mrb[9].mxu0  ;;  %v760_v60 = vpack.c.bf16 %v732_v34, %v730_v33 }
 0x127   :  { %v450_v61 = vadd.f32 %v1863_v57, %v373_v52  ;;  %v375_v39 = vpop.f32.mrb[10].mxu0  ;;  %v761_v62 = vpack.c.bf16 %v733_v37, %v731_v36 }
 0x128   :  { %v702_v63 = vadd.f32 %v1830_v41, %v449_v38  ;;  %v451_v40 = vadd.f32 %v1857_v55, %v375_v39  ;;  %v377_v0 = vpop.f32.mrb[11].mxu0  ;;  %v1899_v4 = vpop.f32.mrb[28].mxu1 }
 0x129   :  { %v703_v1 = vadd.f32 %v1832_v42, %v450_v61  ;;  %v452_v3 = vadd.f32 %v1863_v57, %v377_v0  ;;  %1020 = vmatprep.mubr.bf16.mxu1 %v761_v62  ;;  %v1902_v6 = vpop.f32.mrb[29].mxu1 }
 0x12a   :  { %v704_v5 = vadd.f32 %v1834_v43, %v451_v40  ;;  %1021 = vmatmul.mubr.bf16.gmra.mrb[36].mxu1 %v760_v60  ;;  %v1905_v10 = vpop.f32.mrb[30].mxu1  ;;  %v734_v41 = vmax.f32 %v702_v63, 0.0 }
 0x12b   :  { %v705_v8 = vadd.f32 %v1836_v44, %v452_v3  ;;  %v1907_v13 = vpop.f32.mrb[31].mxu1  ;;  %v735_v15 = vmax.f32 %v703_v1, 0.0 }
 0x12c   :  { %v736_v12 = vmax.f32 %v704_v5, 0.0 }
 0x12d   :  { %v737_v42 = vmax.f32 %v705_v8, 0.0  ;;  %v381_v2 = vpop.f32.mrb[12].mxu0 }
 0x12e   :  { %v453_v16 = vadd.f32 %v1857_v55, %v381_v2  ;;  %v383_v17 = vpop.f32.mrb[13].mxu0  ;;  %v762_v18 = vpack.c.bf16 %v736_v12, %v734_v41 }
 0x12f   :  { %v454_v43 = vadd.f32 %v1863_v57, %v383_v17  ;;  %v385_v19 = vpop.f32.mrb[14].mxu0  ;;  %v763_v20 = vpack.c.bf16 %v737_v42, %v735_v15 }
 0x130   :  { %v706_v21 = vadd.f32 %v1838_v46, %v453_v16  ;;  %v455_v44 = vadd.f32 %v1857_v55, %v385_v19  ;;  %v387_v22 = vpop.f32.mrb[15].mxu0 }
 0x131   :  { %v707_v23 = vadd.f32 %v1842_v48, %v454_v43  ;;  %v456_v24 = vadd.f32 %v1863_v57, %v387_v22  ;;  %1030 = vmatprep.mubr.bf16.mxu1 %v763_v20 }
 0x132   :  { %v708_v25 = vadd.f32 %v1844_v49, %v455_v44  ;;  %1031 = vmatmul.mubr.bf16.gmra.mrb[40].mxu1 %v762_v18  ;;  %v738_v27 = vmax.f32 %v706_v21, 0.0 }
 0x133   :  { %v709_v26 = vadd.f32 %v1846_v50, %v456_v24  ;;  %v739_v31 = vmax.f32 %v707_v23, 0.0 }
 0x134   :  { %v740_v29 = vmax.f32 %v708_v25, 0.0 }
 0x135   :  { %v741_v33 = vmax.f32 %v709_v26, 0.0  ;;  %v391_v34 = vpop.f32.mrb[16].mxu0 }
 0x136   :  { %v457_v46 = vadd.f32 %v1857_v55, %v391_v34  ;;  %v393_v36 = vpop.f32.mrb[17].mxu0  ;;  %v764_v37 = vpack.c.bf16 %v740_v29, %v738_v27 }
 0x137   :  { %v458_v45 = vadd.f32 %v1863_v57, %v393_v36  ;;  %v395_v48 = vpop.f32.mrb[18].mxu0  ;;  %v765_v38 = vpack.c.bf16 %v741_v33, %v739_v31 }
 0x138   :  { %v710_v52 = vadd.f32 %v1853_v54, %v457_v46  ;;  %v459_v49 = vadd.f32 %v1857_v55, %v395_v48  ;;  %v397_v60 = vpop.f32.mrb[19].mxu0 }
 0x139   :  { %v711_v50 = vadd.f32 %v1859_v56, %v458_v45  ;;  %v460_v61 = vadd.f32 %v1863_v57, %v397_v60  ;;  %1040 = vmatprep.mubr.bf16.mxu1 %v765_v38 }
 0x13a   :  { %v712_v39 = vadd.f32 %v1865_v58, %v459_v49  ;;  %1041 = vmatmul.mubr.bf16.gmra.mrb[44].mxu1 %v764_v37  ;;  %v742_v63 = vmax.f32 %v710_v52, 0.0 }
 0x13b   :  { %v713_v62 = vadd.f32 %v1867_v59, %v460_v61  ;;  %v743_v0 = vmax.f32 %v711_v50, 0.0 }
 0x13c   :  { %v744_v40 = vmax.f32 %v712_v39, 0.0 }
 0x13d   :  { %v745_v1 = vmax.f32 %v713_v62, 0.0  ;;  %v401_v3 = vpop.f32.mrb[20].mxu0 }
 0x13e   :  { %v461_v54 = vadd.f32 %v1857_v55, %v401_v3  ;;  %v403_v5 = vpop.f32.mrb[21].mxu0  ;;  %v766_v8 = vpack.c.bf16 %v744_v40, %v742_v63 }
 0x13f   :  { %v462_v41 = vadd.f32 %v1863_v57, %v403_v5  ;;  %v405_v56 = vpop.f32.mrb[22].mxu0  ;;  %v767_v12 = vpack.c.bf16 %v745_v1, %v743_v0 }
 0x140   :  { %v714_v15 = vadd.f32 %v1873_v7, %v461_v54  ;;  %v463_v58 = vadd.f32 %v1857_v55, %v405_v56  ;;  %v407_v42 = vpop.f32.mrb[23].mxu0 }
 0x141   :  { %v715_v59 = vadd.f32 %v1875_v9, %v462_v41  ;;  %v464_v2 = vadd.f32 %v1863_v57, %v407_v42  ;;  %1050 = vmatprep.mubr.bf16.mxu1 %v767_v12 }
 0x142   :  { %v716_v16 = vadd.f32 %v1877_v11, %v463_v58  ;;  %1051 = vmatmul.mubr.bf16.gmra.mrb[48].mxu1 %v766_v8  ;;  %v746_v18 = vmax.f32 %v714_v15, 0.0 }
 0x143   :  { %v717_v17 = vadd.f32 %v1879_v14, %v464_v2  ;;  %v747_v19 = vmax.f32 %v715_v59, 0.0 }
 0x144   :  { %v748_v43 = vmax.f32 %v716_v16, 0.0 }
 0x145   :  { %v749_v20 = vmax.f32 %v717_v17, 0.0  ;;  %v411_v21 = vpop.f32.mrb[24].mxu0 }
 0x146   :  { %v465_v7 = vadd.f32 %v1857_v55, %v411_v21  ;;  %v413_v44 = vpop.f32.mrb[25].mxu0  ;;  %v768_v22 = vpack.c.bf16 %v748_v43, %v746_v18 }
 0x147   :  { %v466_v23 = vadd.f32 %v1863_v57, %v413_v44  ;;  %v415_v9 = vpop.f32.mrb[26].mxu0  ;;  %v769_v24 = vpack.c.bf16 %v749_v20, %v747_v19 }
 0x148   :  { %v718_v25 = vadd.f32 %v1885_v28, %v465_v7  ;;  %v467_v11 = vadd.f32 %v1857_v55, %v415_v9  ;;  %v417_v26 = vpop.f32.mrb[27].mxu0 }
 0x149   :  { %v719_v14 = vadd.f32 %v1887_v30, %v466_v23  ;;  %v468_v27 = vadd.f32 %v1863_v57, %v417_v26  ;;  %1060 = vmatprep.mubr.bf16.mxu1 %v769_v24 }
 0x14a   :  { %v720_v29 = vadd.f32 %v1889_v32, %v467_v11  ;;  %1061 = vmatmul.mubr.bf16.gmra.mrb[52].mxu1 %v768_v22  ;;  %v750_v33 = vmax.f32 %v718_v25, 0.0 }
 0x14b   :  { %v721_v31 = vadd.f32 %v1891_v35, %v468_v27  ;;  %v751_v46 = vmax.f32 %v719_v14, 0.0 }
 0x14c   :  { %v752_v34 = vmax.f32 %v720_v29, 0.0 }
 0x14d   :  { %v753_v36 = vmax.f32 %v721_v31, 0.0  ;;  %v421_v37 = vpop.f32.mrb[28].mxu0 }
 0x14e   :  { %v469_v28 = vadd.f32 %v1857_v55, %v421_v37  ;;  %v423_v45 = vpop.f32.mrb[29].mxu0  ;;  %v770_v48 = vpack.c.bf16 %v752_v34, %v750_v33 }
 0x14f   :  { %v470_v38 = vadd.f32 %v1863_v57, %v423_v45  ;;  %v425_v30 = vpop.f32.mrb[30].mxu0  ;;  %v771_v52 = vpack.c.bf16 %v753_v36, %v751_v46 }
 0x150   :  { %v722_v49 = vadd.f32 %v1899_v4, %v469_v28  ;;  %v471_v32 = vadd.f32 %v1857_v55, %v425_v30  ;;  %v427_v60 = vpop.f32.mrb[31].mxu0  ;;  %v806_v55 = vld [vmem:[%s2010_s6] sm:$0x3]  ;;  %s1497_s6 = smov [#allocation2]  }
 0x151   :  { %v723_v35 = vadd.f32 %v1902_v6, %v470_v38  ;;  %v472_v50 = vadd.f32 %v1863_v57, %v427_v60  ;;  %1070 = vmatprep.mubr.bf16.mxu1 %v771_v52  ;;  %v1954_v57 = vrot.slane %v806_v55, %v433_v51  ;;  %v1958_v4 = vrot.slane %v806_v55, %v437_v53  ;;  %s1160_s2 = sshll.u32 %s1497_s6, 4  ;;  %s1161_s2 = int_to_ptr.vmem [resolvable:$true] %s1160_s2 }
 0x152   :  { %v724_v61 = vadd.f32 %v1905_v10, %v471_v32  ;;  %1071 = vmatmul.mubr.bf16.gmra.mrb[56].mxu1 %v770_v48  ;;  %v754_v62 = vmax.f32 %v722_v49, 0.0  ;;  %s1472_s12 = scalar_lea.vmem %s1161_s2, 4096  ;;  %p1477_p1 = scmp.lt.s32.totalorder %s1161_s2, %s1161_s2 }
 0x153   :  { %v725_v39 = vadd.f32 %v1907_v13, %v472_v50  ;;  %v755_v40 = vmax.f32 %v723_v35, 0.0  ;;  %p1473_p0 = scmp.ne.s32.totalorder %s1161_s2, %s1472_s12  ;;  %p1478_p2 = scmp.lt.s32.totalorder %s1472_s12, %s1472_s12 }
 0x154   :  { %v756_v63 = vmax.f32 %v724_v61, 0.0 }
 0x155   :  { %v757_v0 = vmax.f32 %v725_v39, 0.0  ;;  %p1479_p3 = por %p1478_p2, %p1477_p1 }
 0x156   :  { %v772_v1 = vpack.c.bf16 %v756_v63, %v754_v62 }
 0x157   :  { %v773_v3 = vpack.c.bf16 %v757_v0, %v755_v40  ;;  %p1480_p4 = pnand %p1479_p3, %p1473_p0 }
 0x159   :  { %1080 = vmatprep.mubr.bf16.mxu1 %v773_v3 }
 0x15a   :  { %1081 = vmatmul.mubr.bf16.gmra.mrb[60].mxu1 %v772_v1 }
 0x1f5   :  { %v1012_v6 = vpop.f32.mrb[32].mxu1 }
 0x1f6   :  { %v1013_v10 = vadd.f32 %v1012_v6, %v1954_v57  ;;  %v1014_v13 = vpop.f32.mrb[33].mxu1 }
 0x1f7   :  { %v1015_v54 = vadd.f32 %v1014_v13, %v1958_v4  ;;  %v1016_v5 = vpop.f32.mrb[34].mxu1 }
 0x1f8   :  { %v1091_v8 = vmax.f32 %v1013_v10, 0.0  ;;  %v1017_v41 = vadd.f32 %v1016_v5, %v1954_v57  ;;  %v1018_v56 = vpop.f32.mrb[35].mxu1 }
 0x1f9   :  { %v1092_v12 = vmax.f32 %v1015_v54, 0.0  ;;  %v1019_v15 = vadd.f32 %v1018_v56, %v1958_v4 }
 0x1fa   :  { %1123 = vst [vmem:[#allocation2] sm:$0xff] %v1091_v8  ;;  %v1093_v51 = vmax.f32 %v1017_v41, 0.0 }
 0x1fb   :  { %1124 = vst [vmem:[#allocation2 + $0x8] sm:$0xff] %v1092_v12  ;;  %v1094_v47 = vmax.f32 %v1019_v15, 0.0 }
 0x1fc   :  { %1125 = vst [vmem:[#allocation2 + $0x10] sm:$0xff] %v1093_v51 }
 0x1fd   :  { %1126 = vst [vmem:[#allocation2 + $0x18] sm:$0xff] %v1094_v47  ;;  %v1022_v53 = vpop.f32.mrb[36].mxu1 }
 0x1fe   :  { %v1023_v58 = vadd.f32 %v1022_v53, %v1954_v57  ;;  %v1024_v42 = vpop.f32.mrb[37].mxu1 }
 0x1ff   :  { %v1025_v59 = vadd.f32 %v1024_v42, %v1958_v4  ;;  %v1026_v2 = vpop.f32.mrb[38].mxu1 }
 0x200   :  { %v1095_v16 = vmax.f32 %v1023_v58, 0.0  ;;  %v1027_v17 = vadd.f32 %v1026_v2, %v1954_v57  ;;  %v1028_v18 = vpop.f32.mrb[39].mxu1 }
 0x201   :  { %v1096_v43 = vmax.f32 %v1025_v59, 0.0  ;;  %v1029_v19 = vadd.f32 %v1028_v18, %v1958_v4 }
 0x202   :  { %1127 = vst [vmem:[#allocation2 + $0x20] sm:$0xff] %v1095_v16  ;;  %v1097_v20 = vmax.f32 %v1027_v17, 0.0 }
 0x203   :  { %1128 = vst [vmem:[#allocation2 + $0x28] sm:$0xff] %v1096_v43  ;;  %v1098_v21 = vmax.f32 %v1029_v19, 0.0 }
 0x204   :  { %1129 = vst [vmem:[#allocation2 + $0x30] sm:$0xff] %v1097_v20 }
 0x205   :  { %1130 = vst [vmem:[#allocation2 + $0x38] sm:$0xff] %v1098_v21  ;;  %v1032_v7 = vpop.f32.mrb[40].mxu1 }
 0x206   :  { %v1033_v44 = vadd.f32 %v1032_v7, %v1954_v57  ;;  %v1034_v22 = vpop.f32.mrb[41].mxu1 }
 0x207   :  { %v1035_v23 = vadd.f32 %v1034_v22, %v1958_v4  ;;  %v1036_v9 = vpop.f32.mrb[42].mxu1 }
 0x208   :  { %v1099_v24 = vmax.f32 %v1033_v44, 0.0  ;;  %v1037_v25 = vadd.f32 %v1036_v9, %v1954_v57  ;;  %v1038_v11 = vpop.f32.mrb[43].mxu1 }
 0x209   :  { %v1100_v26 = vmax.f32 %v1035_v23, 0.0  ;;  %v1039_v14 = vadd.f32 %v1038_v11, %v1958_v4 }
 0x20a   :  { %1131 = vst [vmem:[#allocation2 + $0x40] sm:$0xff] %v1099_v24  ;;  %v1101_v27 = vmax.f32 %v1037_v25, 0.0 }
 0x20b   :  { %1132 = vst [vmem:[#allocation2 + $0x48] sm:$0xff] %v1100_v26  ;;  %v1102_v29 = vmax.f32 %v1039_v14, 0.0 }
 0x20c   :  { %1133 = vst [vmem:[#allocation2 + $0x50] sm:$0xff] %v1101_v27 }
 0x20d   :  { %1134 = vst [vmem:[#allocation2 + $0x58] sm:$0xff] %v1102_v29  ;;  %v1042_v31 = vpop.f32.mrb[44].mxu1 }
 0x20e   :  { %v1043_v33 = vadd.f32 %v1042_v31, %v1954_v57  ;;  %v1044_v34 = vpop.f32.mrb[45].mxu1 }
 0x20f   :  { %v1045_v46 = vadd.f32 %v1044_v34, %v1958_v4  ;;  %v1046_v36 = vpop.f32.mrb[46].mxu1 }
 0x210   :  { %v1103_v37 = vmax.f32 %v1043_v33, 0.0  ;;  %v1047_v28 = vadd.f32 %v1046_v36, %v1954_v57  ;;  %v1048_v45 = vpop.f32.mrb[47].mxu1 }
 0x211   :  { %v1104_v48 = vmax.f32 %v1045_v46, 0.0  ;;  %v1049_v38 = vadd.f32 %v1048_v45, %v1958_v4 }
 0x212   :  { %1135 = vst [vmem:[#allocation2 + $0x60] sm:$0xff] %v1103_v37  ;;  %v1105_v30 = vmax.f32 %v1047_v28, 0.0 }
 0x213   :  { %1136 = vst [vmem:[#allocation2 + $0x68] sm:$0xff] %v1104_v48  ;;  %v1106_v52 = vmax.f32 %v1049_v38, 0.0 }
 0x214   :  { %1137 = vst [vmem:[#allocation2 + $0x70] sm:$0xff] %v1105_v30 }
 0x215   :  { %1138 = vst [vmem:[#allocation2 + $0x78] sm:$0xff] %v1106_v52  ;;  %v1052_v49 = vpop.f32.mrb[48].mxu1 }
 0x216   :  { %v1053_v32 = vadd.f32 %v1052_v49, %v1954_v57  ;;  %v1054_v60 = vpop.f32.mrb[49].mxu1 }
 0x217   :  { %v1055_v35 = vadd.f32 %v1054_v60, %v1958_v4  ;;  %v1056_v50 = vpop.f32.mrb[50].mxu1 }
 0x218   :  { %v1107_v61 = vmax.f32 %v1053_v32, 0.0  ;;  %v1057_v39 = vadd.f32 %v1056_v50, %v1954_v57  ;;  %v1058_v62 = vpop.f32.mrb[51].mxu1 }
 0x219   :  { %v1108_v63 = vmax.f32 %v1055_v35, 0.0  ;;  %v1059_v40 = vadd.f32 %v1058_v62, %v1958_v4 }
 0x21a   :  { %1139 = vst [vmem:[#allocation2 + $0x80] sm:$0xff] %v1107_v61  ;;  %v1109_v0 = vmax.f32 %v1057_v39, 0.0 }
 0x21b   :  { %1140 = vst [vmem:[#allocation2 + $0x88] sm:$0xff] %v1108_v63  ;;  %v1110_v1 = vmax.f32 %v1059_v40, 0.0 }
 0x21c   :  { %1141 = vst [vmem:[#allocation2 + $0x90] sm:$0xff] %v1109_v0 }
 0x21d   :  { %1142 = vst [vmem:[#allocation2 + $0x98] sm:$0xff] %v1110_v1  ;;  %v1062_v3 = vpop.f32.mrb[52].mxu1 }
 0x21e   :  { %v1063_v55 = vadd.f32 %v1062_v3, %v1954_v57  ;;  %v1064_v6 = vpop.f32.mrb[53].mxu1 }
 0x21f   :  { %v1065_v10 = vadd.f32 %v1064_v6, %v1958_v4  ;;  %v1066_v13 = vpop.f32.mrb[54].mxu1 }
 0x220   :  { %v1111_v54 = vmax.f32 %v1063_v55, 0.0  ;;  %v1067_v5 = vadd.f32 %v1066_v13, %v1954_v57  ;;  %v1068_v8 = vpop.f32.mrb[55].mxu1 }
 0x221   :  { %v1112_v41 = vmax.f32 %v1065_v10, 0.0  ;;  %v1069_v56 = vadd.f32 %v1068_v8, %v1958_v4 }
 0x222   :  { %1143 = vst [vmem:[#allocation2 + $0xa0] sm:$0xff] %v1111_v54  ;;  %v1113_v12 = vmax.f32 %v1067_v5, 0.0 }
 0x223   :  { %1144 = vst [vmem:[#allocation2 + $0xa8] sm:$0xff] %v1112_v41  ;;  %v1114_v15 = vmax.f32 %v1069_v56, 0.0 }
 0x224   :  { %1145 = vst [vmem:[#allocation2 + $0xb0] sm:$0xff] %v1113_v12 }
 0x225   :  { %1146 = vst [vmem:[#allocation2 + $0xb8] sm:$0xff] %v1114_v15  ;;  %v1072_v51 = vpop.f32.mrb[56].mxu1 }
 0x226   :  { %v1073_v47 = vadd.f32 %v1072_v51, %v1954_v57  ;;  %v1074_v53 = vpop.f32.mrb[57].mxu1 }
 0x227   :  { %v1075_v58 = vadd.f32 %v1074_v53, %v1958_v4  ;;  %v1076_v42 = vpop.f32.mrb[58].mxu1 }
 0x228   :  { %v1115_v59 = vmax.f32 %v1073_v47, 0.0  ;;  %v1077_v2 = vadd.f32 %v1076_v42, %v1954_v57  ;;  %v1078_v16 = vpop.f32.mrb[59].mxu1 }
 0x229   :  { %v1116_v17 = vmax.f32 %v1075_v58, 0.0  ;;  %v1079_v18 = vadd.f32 %v1078_v16, %v1958_v4 }
 0x22a   :  { %1147 = vst [vmem:[#allocation2 + $0xc0] sm:$0xff] %v1115_v59  ;;  %v1117_v43 = vmax.f32 %v1077_v2, 0.0 }
 0x22b   :  { %1148 = vst [vmem:[#allocation2 + $0xc8] sm:$0xff] %v1116_v17  ;;  %v1118_v19 = vmax.f32 %v1079_v18, 0.0 }
 0x22c   :  { %1149 = vst [vmem:[#allocation2 + $0xd0] sm:$0xff] %v1117_v43 }
 0x22d   :  { %1150 = vst [vmem:[#allocation2 + $0xd8] sm:$0xff] %v1118_v19  ;;  %v1082_v20 = vpop.f32.mrb[60].mxu1 }
 0x22e   :  { %v1083_v21 = vadd.f32 %v1082_v20, %v1954_v57  ;;  %v1084_v7 = vpop.f32.mrb[61].mxu1 }
 0x22f   :  { %v1085_v44 = vadd.f32 %v1084_v7, %v1958_v4  ;;  %v1086_v22 = vpop.f32.mrb[62].mxu1 }
 0x230   :  { %v1119_v23 = vmax.f32 %v1083_v21, 0.0  ;;  %v1087_v9 = vadd.f32 %v1086_v22, %v1954_v57  ;;  %v1088_v24 = vpop.f32.mrb[63].mxu1 }
 0x231   :  { %v1120_v25 = vmax.f32 %v1085_v44, 0.0  ;;  %v1089_v11 = vadd.f32 %v1088_v24, %v1958_v4 }
 0x232   :  { %1151 = vst [vmem:[#allocation2 + $0xe0] sm:$0xff] %v1119_v23  ;;  %v1121_v26 = vmax.f32 %v1087_v9, 0.0 }
 0x233   :  { %1152 = vst [vmem:[#allocation2 + $0xe8] sm:$0xff] %v1120_v25  ;;  %v1122_v14 = vmax.f32 %v1089_v11, 0.0 }
 0x234   :  { %1153 = vst [vmem:[#allocation2 + $0xf0] sm:$0xff] %v1121_v26 }
 0x235   :  { %1154 = vst [vmem:[#allocation2 + $0xf8] sm:$0xff] %v1122_v14 }
 0x236   :  { %1483 = shalt.err (!%p1480_p4)
}
 0x237   :  { %s1484_s15 = scalar_lea.hbm %s2011_s7, 4096 }
 0x238   :  { %p1485_p5 = scmp.ne.s32.totalorder %s2011_s7, %s1484_s15  ;;  %p1488_p6 = scmp.lt.u32.totalorder %s1484_s15, %s2011_s7 }
 0x23a   :  { %p1490_p7 = pnand %p1488_p6, %p1485_p5 }
 0x23c   :  { %1493 = shalt.err (!%p1490_p7)
}
 0x23d   :  { %s1498_s19 = smov 256   ;;  %s1499_s20 = smov 16  }
 0x23e   :  { %1166 = dma.vmem_to_hbm [thread:$0]  %s1161_s2, 4096, %s2011_s7, [#allocation3], %s1498_s19, %s1498_s19, %s1499_s20  }
 0x23f   :  { %1494 = dma.done.wait [#allocation3], 4096  }
 0x240   :  { %1495 = vsyncadd [#allocation3], 4294963200 }
 0x241   :  { %1170 = vsyncpa [#allocation3], 1 }

</bundles_post_ra>
